<compile_context>
chip_gen: v7x
topology: tpu7x:2x2x1
jax: 0.10.0
libtpu: 0.0.40
codegen_flags: <defaults>
</compile_context>

<pallas_src>
import functools

import jax
import jax.numpy as jnp
from jax import lax
from jax.experimental import pallas as pl
from jax.experimental.pallas import tpu as pltpu


W_IMG = 32                    # input spatial width
HW = W_IMG * W_IMG            # rows per image in the flat frame
PAD_ROWS = 320                # frame tail; >= max tap offset (264), mult of 8


# ---------------------------------------------------------------------------
# Fused forward-pass kernel (one grid step = IMB images)
# ---------------------------------------------------------------------------
def _net_kernel(x_ref, w1t_ref, b1_ref, w2t_ref, b2_ref,
                fc1t_ref, fb1_ref, fc2_ref, fb2_ref, fc3_ref, fb3_ref,
                fc4_ref, fb4_ref, out_ref, bufA, bufB, *, imb, chunk):
    f32 = jnp.float32
    W = W_IMG
    M = imb * HW                      # valid frame rows this step
    FR = bufA.shape[0]                # frame rows (M + PAD_ROWS)
    n_chunks = M // chunk

    # Zero the frame tails so shifted tap reads never touch uninitialized VMEM
    # and the zero-padded lanes stay exactly zero layer to layer.
    zt = jnp.zeros((FR - M, 128), f32)
    bufA[M:FR, :] = zt
    bufB[M:FR, :] = zt

    # Hoisted bias loads (JAX does not CSE these inside the loops).
    b1v = b1_ref[...]
    b2v = b2_ref[...]

    # ---- conv1 (5x5, valid) + bias + ReLU  ->  bufA -------------------------
    # output (h, w) lives at frame row h*W + w
    @pl.loop(0, n_chunks)
    def _(c):
        base = pl.multiple_of(c * chunk, chunk)
        acc = jnp.zeros((chunk, 128), f32)
        for ki in range(5):
            for kj in range(5):
                off = ki * W + kj
                lhs = x_ref[pl.ds(base + off, chunk), :]          # (chunk, 8)
                acc = acc + jnp.dot(lhs, w1t_ref[ki * 5 + kj],
                                    preferred_element_type=f32)
        bufA[pl.ds(base, chunk), :] = jnp.maximum(acc + b1v, 0.0)

    # ---- 2x2 max pool, stride 2  ->  bufB ------------------------------------
    # pooled (i, j) lives at frame row 2*i*W + 2*j
    @pl.loop(0, n_chunks)
    def _(c):
        base = pl.multiple_of(c * chunk, chunk)
        m = jnp.maximum(bufA[pl.ds(base, chunk), :],
                        bufA[pl.ds(base + 1, chunk), :])
        m = jnp.maximum(m, bufA[pl.ds(base + W, chunk), :])
        m = jnp.maximum(m, bufA[pl.ds(base + W + 1, chunk), :])
        bufB[pl.ds(base, chunk), :] = m

    # ---- conv2 (5x5, valid on the pooled grid) + bias + ReLU  ->  bufA -------
    # output (i2, j2) lives at frame row 2*i2*W + 2*j2; full 128-lane LHS,
    # w2t input rows 6..127 are exact zeros.
    @pl.loop(0, n_chunks)
    def _(c):
        base = pl.multiple_of(c * chunk, chunk)
        acc = jnp.zeros((chunk, 128), f32)
        for ki in range(5):
            for kj in range(5):
                off = 2 * ki * W + 2 * kj
                lhs = bufB[pl.ds(base + off, chunk), :]           # (chunk, 128)
                acc = acc + jnp.dot(lhs, w2t_ref[ki * 5 + kj],
                                    preferred_element_type=f32)
        bufA[pl.ds(base, chunk), :] = jnp.maximum(acc + b2v, 0.0)

    # ---- 2x2 max pool, stride 2  ->  bufB ------------------------------------
    # pooled (i3, j3) lives at frame row 4*i3*W + 4*j3
    @pl.loop(0, n_chunks)
    def _(c):
        base = pl.multiple_of(c * chunk, chunk)
        m = jnp.maximum(bufA[pl.ds(base, chunk), :],
                        bufA[pl.ds(base + 2, chunk), :])
        m = jnp.maximum(m, bufA[pl.ds(base + 2 * W, chunk), :])
        m = jnp.maximum(m, bufA[pl.ds(base + 2 * W + 2, chunk), :])
        bufB[pl.ds(base, chunk), :] = m

    # ---- fc1 over the flattened (16, 5, 5) features (PyTorch NCHW order) -----
    # 25 spatial taps; each tap gathers one row per image (stride HW) and does
    # a single (imb, 128) @ (128, 128) matmul.  fc1t input rows 16..127 are 0.
    z = jnp.zeros((imb, 128), jnp.float32)
    for s in range(25):
        i3, j3 = divmod(s, 5)
        off = 4 * W * i3 + 4 * j3
        if imb == 1:
            g = bufB[off:off + 1, :]
        else:
            g = bufB[pl.ds(off, imb, stride=HW), :]
        z = z + jnp.dot(g, fc1t_ref[s], preferred_element_type=f32)
    z = jnp.maximum(z + fb1_ref[...], 0.0)

    # ---- fc2 .. fc4 -----------------------------------------------------------
    z = jnp.maximum(jnp.dot(z, fc2_ref[...], preferred_element_type=f32)
                    + fb2_ref[...], 0.0)
    z = jnp.maximum(jnp.dot(z, fc3_ref[...], preferred_element_type=f32)
                    + fb3_ref[...], 0.0)
    z = jnp.dot(z, fc4_ref[...], preferred_element_type=f32) + fb4_ref[...]
    out_ref[0] = z


# ---------------------------------------------------------------------------
# Wrapper: layout / padding prep (tiny) + one batch-gridded pallas_call
# ---------------------------------------------------------------------------
def _net_forward_impl(params, x, *, imb=1, chunk=128):
    B, C, H, W = x.shape
    assert (C, H, W) == (3, 32, 32), "Net expects (B, 3, 32, 32) inputs"
    assert B % imb == 0, "batch must be divisible by images-per-step"
    M = imb * HW
    FR = M + PAD_ROWS
    # Layout invariants (see correctness notes): tail must cover the largest
    # tap offset (conv2: 2*4*W + 2*4 = 264) and chunks must tile the frame.
    assert PAD_ROWS >= 2 * 4 * W_IMG + 2 * 4 and PAD_ROWS % 8 == 0
    assert M % chunk == 0 and chunk % 8 == 0
    nblk = B // imb
    f32 = jnp.float32

    # Flat channels-last rows, channels padded 3 -> 8, per-block zero tail.
    xf = jnp.transpose(x, (0, 2, 3, 1)).reshape(nblk, M, C).astype(f32)
    xf = jnp.pad(xf, ((0, 0), (0, PAD_ROWS), (0, 8 - C))).reshape(nblk * FR, 8)

    # conv taps: (25, K, 128) with K = padded in-channels, 128 = padded OC.
    w1 = params["conv1_w"]                                    # (6, 3, 5, 5)
    w1t = jnp.transpose(w1, (2, 3, 1, 0)).reshape(25, 3, 6)
    w1t = jnp.pad(w1t, ((0, 0), (0, 5), (0, 122)))            # (25, 8, 128)
    b1 = jnp.pad(params["conv1_b"], (0, 122)).reshape(1, 128)

    w2 = params["conv2_w"]                                    # (16, 6, 5, 5)
    w2t = jnp.transpose(w2, (2, 3, 1, 0)).reshape(25, 6, 16)
    w2t = jnp.pad(w2t, ((0, 0), (0, 122), (0, 112)))          # (25, 128, 128)
    b2 = jnp.pad(params["conv2_b"], (0, 112)).reshape(1, 128)

    # fc1 as 25 spatial taps over the 16 channels: rows c*25 + s of fc1_w.
    fc1t = jnp.transpose(params["fc1_w"].reshape(16, 25, 120), (1, 0, 2))
    fc1t = jnp.pad(fc1t, ((0, 0), (0, 112), (0, 8)))          # (25, 128, 128)
    fb1 = jnp.pad(params["fc1_b"], (0, 8)).reshape(1, 128)

    fc2 = jnp.pad(params["fc2_w"], ((0, 8), (0, 44)))         # (128, 128)
    fb2 = jnp.pad(params["fc2_b"], (0, 44)).reshape(1, 128)
    fc3 = jnp.pad(params["fc3_w"], ((0, 44), (0, 86)))        # (128, 128)
    fb3 = jnp.pad(params["fc3_b"], (0, 86)).reshape(1, 128)
    fc4 = jnp.pad(params["fc4_w"], ((0, 86), (0, 118)))       # (128, 128)
    fb4 = jnp.pad(params["fc4_b"], (0, 118)).reshape(1, 128)

    def resident(shape):
        n = len(shape)
        return pl.BlockSpec(shape, lambda i, n=n: (0,) * n)   # VMEM-resident

    kern = functools.partial(_net_kernel, imb=imb, chunk=chunk)
    out = pl.pallas_call(
        kern,
        out_shape=jax.ShapeDtypeStruct((nblk, imb, 128), f32),
        grid=(nblk,),
        in_specs=[pl.BlockSpec((FR, 8), lambda i: (i, 0)),     # streamed input
                  resident(w1t.shape), resident(b1.shape),
                  resident(w2t.shape), resident(b2.shape),
                  resident(fc1t.shape), resident(fb1.shape),
                  resident(fc2.shape), resident(fb2.shape),
                  resident(fc3.shape), resident(fb3.shape),
                  resident(fc4.shape), resident(fb4.shape)],
        out_specs=pl.BlockSpec((1, imb, 128), lambda i: (i, 0, 0)),
        scratch_shapes=[pltpu.VMEM((FR, 128), f32),
                        pltpu.VMEM((FR, 128), f32)],
        compiler_params=pltpu.CompilerParams(
            dimension_semantics=("parallel",)),                # megacore on v7x
    )(xf, w1t, b1, w2t, b2, fc1t, fb1, fc2, fb2, fc3, fb3, fc4, fb4)

    return out.reshape(B, 128)[:, :10]


net_forward = jax.jit(_net_forward_impl)


# ---------------------------------------------------------------------------
# Parameters (deterministic, PyTorch-default-style uniform init)
# ---------------------------------------------------------------------------
def init_params(key):
    def uinit(k, shape, fan_in):
        bound = 1.0 / (fan_in ** 0.5)
        return jax.random.uniform(k, shape, jnp.float32, -bound, bound)

    ks = jax.random.split(key, 12)
    p = {}
    p["conv1_w"] = uinit(ks[0], (6, 3, 5, 5), 3 * 25)
    p["conv1_b"] = uinit(ks[1], (6,), 3 * 25)
    p["conv2_w"] = uinit(ks[2], (16, 6, 5, 5), 6 * 25)
    p["conv2_b"] = uinit(ks[3], (16,), 6 * 25)
    p["fc1_w"] = uinit(ks[4], (400, 120), 400)
    p["fc1_b"] = uinit(ks[5], (120,), 400)
    p["fc2_w"] = uinit(ks[6], (120, 84), 120)
    p["fc2_b"] = uinit(ks[7], (84,), 120)
    p["fc3_w"] = uinit(ks[8], (84, 42), 84)
    p["fc3_b"] = uinit(ks[9], (42,), 84)
    p["fc4_w"] = uinit(ks[10], (42, 10), 42)
    p["fc4_b"] = uinit(ks[11], (10,), 42)
    return p


# Pure-JAX reference for a correctness check.
def net_reference(p, x):
    def conv(x, w, b):
        y = lax.conv_general_dilated(
            x, w, (1, 1), "VALID",
            dimension_numbers=("NCHW", "OIHW", "NCHW"))
        return jnp.maximum(y + b[None, :, None, None], 0.0)

    def pool(x):
        B, C, H, W = x.shape
        return x.reshape(B, C, H // 2, 2, W // 2, 2).max(axis=(3, 5))

    x = pool(conv(x, p["conv1_w"], p["conv1_b"]))
    x = pool(conv(x, p["conv2_w"], p["conv2_b"]))
    x = x.reshape(x.shape[0], -1)
    x = jnp.maximum(x @ p["fc1_w"] + p["fc1_b"], 0.0)
    x = jnp.maximum(x @ p["fc2_w"] + p["fc2_b"], 0.0)
    x = jnp.maximum(x @ p["fc3_w"] + p["fc3_b"], 0.0)
    return x @ p["fc4_w"] + p["fc4_b"]


if __name__ == "__main__":
    key = jax.random.PRNGKey(0)
    k_params, k_x = jax.random.split(key)
    params = init_params(k_params)

    # Input must be (B, 3, 32, 32) so the flatten yields 16*5*5 = 400 features.
    x = jax.random.normal(k_x, (2, 3, 32, 32), dtype=jnp.float32)

    out = jax.block_until_ready(net_forward(params, x))
    ref = jax.block_until_ready(net_reference(params, x))

    assert out.shape == (2, 10), out.shape
    assert jnp.allclose(out, ref, atol=1e-2, rtol=1e-2), "mismatch vs reference"
    print("KERNEL_OK")
</pallas_src>

<mosaic_0001>
module attributes {stable_mosaic.version = 11 : i64} {
  func.func @_net_kernel(%arg0: i32, %arg1: memref<1344x8xf32, #tpu.memory_space<vmem>>, %arg2: memref<25x8x128xf32, #tpu.memory_space<vmem>>, %arg3: memref<1x128xf32, #tpu.memory_space<vmem>>, %arg4: memref<25x128x128xf32, #tpu.memory_space<vmem>>, %arg5: memref<1x128xf32, #tpu.memory_space<vmem>>, %arg6: memref<25x128x128xf32, #tpu.memory_space<vmem>>, %arg7: memref<1x128xf32, #tpu.memory_space<vmem>>, %arg8: memref<128x128xf32, #tpu.memory_space<vmem>>, %arg9: memref<1x128xf32, #tpu.memory_space<vmem>>, %arg10: memref<128x128xf32, #tpu.memory_space<vmem>>, %arg11: memref<1x128xf32, #tpu.memory_space<vmem>>, %arg12: memref<128x128xf32, #tpu.memory_space<vmem>>, %arg13: memref<1x128xf32, #tpu.memory_space<vmem>>, %arg14: memref<1x1x128xf32, #tpu.memory_space<vmem>>, %arg15: memref<1344x128xf32, #tpu.memory_space<vmem>>, %arg16: memref<1344x128xf32, #tpu.memory_space<vmem>>) attributes {dimension_semantics = [#tpu.dimension_semantics<parallel>], iteration_bounds = array<i64: 2>, scalar_prefetch = 0 : i64, scratch_operands = 2 : i64, tpu.core_type = #tpu.core_type<tc>, window_params = [{transform_indices = @transform_0, window_bounds = array<i64: 1344, 8>}, {pipeline_mode = #tpu.pipeline_mode<synchronous>, transform_indices = @transform_1, window_bounds = array<i64: 25, 8, 128>}, {pipeline_mode = #tpu.pipeline_mode<synchronous>, transform_indices = @transform_2, window_bounds = array<i64: 1, 128>}, {pipeline_mode = #tpu.pipeline_mode<synchronous>, transform_indices = @transform_3, window_bounds = array<i64: 25, 128, 128>}, {pipeline_mode = #tpu.pipeline_mode<synchronous>, transform_indices = @transform_4, window_bounds = array<i64: 1, 128>}, {pipeline_mode = #tpu.pipeline_mode<synchronous>, transform_indices = @transform_5, window_bounds = array<i64: 25, 128, 128>}, {pipeline_mode = #tpu.pipeline_mode<synchronous>, transform_indices = @transform_6, window_bounds = array<i64: 1, 128>}, {pipeline_mode = #tpu.pipeline_mode<synchronous>, transform_indices = @transform_7, window_bounds = array<i64: 128, 128>}, {pipeline_mode = #tpu.pipeline_mode<synchronous>, transform_indices = @transform_8, window_bounds = array<i64: 1, 128>}, {pipeline_mode = #tpu.pipeline_mode<synchronous>, transform_indices = @transform_9, window_bounds = array<i64: 128, 128>}, {pipeline_mode = #tpu.pipeline_mode<synchronous>, transform_indices = @transform_10, window_bounds = array<i64: 1, 128>}, {pipeline_mode = #tpu.pipeline_mode<synchronous>, transform_indices = @transform_11, window_bounds = array<i64: 128, 128>}, {pipeline_mode = #tpu.pipeline_mode<synchronous>, transform_indices = @transform_12, window_bounds = array<i64: 1, 128>}, {transform_indices = @transform_13, window_bounds = array<i64: 1, 1, 128>}]} {
    %cst = arith.constant 0.000000e+00 : f32
    %0 = vector.broadcast %cst : f32 to vector<320x128xf32>
    %c1024 = arith.constant 1024 : index
    %c0 = arith.constant 0 : index
    %1 = vector.load %arg15[%c1024, %c0] : memref<1344x128xf32, #tpu.memory_space<vmem>>, vector<320x128xf32>
    tpu.vector_store %arg15[%c1024, %c0], %0 {strides = array<i32>} : memref<1344x128xf32, #tpu.memory_space<vmem>>, vector<320x128xf32>,
    %c1024_0 = arith.constant 1024 : index
    %c0_1 = arith.constant 0 : index
    %2 = vector.load %arg16[%c1024_0, %c0_1] : memref<1344x128xf32, #tpu.memory_space<vmem>>, vector<320x128xf32>
    tpu.vector_store %arg16[%c1024_0, %c0_1], %0 {strides = array<i32>} : memref<1344x128xf32, #tpu.memory_space<vmem>>, vector<320x128xf32>,
    %c0_2 = arith.constant 0 : index
    %c0_3 = arith.constant 0 : index
    %3 = vector.load %arg3[%c0_2, %c0_3] : memref<1x128xf32, #tpu.memory_space<vmem>>, vector<1x128xf32>
    %c0_4 = arith.constant 0 : index
    %c0_5 = arith.constant 0 : index
    %4 = vector.load %arg5[%c0_4, %c0_5] : memref<1x128xf32, #tpu.memory_space<vmem>>, vector<1x128xf32>
    %c0_i32 = arith.constant 0 : i32
    %c8_i32 = arith.constant 8 : i32
    %5 = arith.addi %c0_i32, %c8_i32 : i32
    %c1_i32 = arith.constant 1 : i32
    scf.for %arg17 = %c0_i32 to %5 step %c1_i32  : i32 {
      %c1_i32_149 = arith.constant 1 : i32
      %158 = arith.muli %arg17, %c1_i32_149 : i32
      %c0_i32_150 = arith.constant 0 : i32
      %159 = arith.addi %c0_i32_150, %158 : i32
      %c128_i32 = arith.constant 128 : i32
      %160 = arith.muli %159, %c128_i32 : i32
      %161 = tpu.assume_multiple %160, 128 : i32
      %cst_151 = arith.constant 0.000000e+00 : f32
      %162 = vector.broadcast %cst_151 : f32 to vector<128x128xf32>
      %c0_i32_152 = arith.constant 0 : i32
      %163 = arith.addi %161, %c0_i32_152 : i32
      %164 = arith.index_cast %163 : i32 to index
      %c0_153 = arith.constant 0 : index
      %165 = vector.load %arg1[%164, %c0_153] : memref<1344x8xf32, #tpu.memory_space<vmem>>, vector<128x8xf32>
      %c0_154 = arith.constant 0 : index
      %c0_155 = arith.constant 0 : index
      %c0_156 = arith.constant 0 : index
      %166 = vector.load %arg2[%c0_154, %c0_155, %c0_156] : memref<25x8x128xf32, #tpu.memory_space<vmem>>, vector<1x8x128xf32>
      %167 = vector.shape_cast %166 : vector<1x8x128xf32> to vector<8x128xf32>
      %cst_157 = arith.constant dense<0.000000e+00> : vector<128x128xf32>
      %168 = tpu.matmul %165, %167, %cst_157 {dimension_numbers = #tpu.dot_dimension_numbers<[1], [0], [0], [1], [0, 0, 1, 1], [], []>} : vector<128x8xf32>, vector<8x128xf32>, vector<128x128xf32> -> vector<128x128xf32>
      %169 = arith.addf %162, %168 : vector<128x128xf32>
      %c1_i32_158 = arith.constant 1 : i32
      %170 = arith.addi %161, %c1_i32_158 : i32
      %171 = arith.index_cast %170 : i32 to index
      %c0_159 = arith.constant 0 : index
      %172 = vector.load %arg1[%171, %c0_159] : memref<1344x8xf32, #tpu.memory_space<vmem>>, vector<128x8xf32>
      %c1_160 = arith.constant 1 : index
      %c0_161 = arith.constant 0 : index
      %c0_162 = arith.constant 0 : index
      %173 = vector.load %arg2[%c1_160, %c0_161, %c0_162] : memref<25x8x128xf32, #tpu.memory_space<vmem>>, vector<1x8x128xf32>
      %174 = vector.shape_cast %173 : vector<1x8x128xf32> to vector<8x128xf32>
      %cst_163 = arith.constant dense<0.000000e+00> : vector<128x128xf32>
      %175 = tpu.matmul %172, %174, %cst_163 {dimension_numbers = #tpu.dot_dimension_numbers<[1], [0], [0], [1], [0, 0, 1, 1], [], []>} : vector<128x8xf32>, vector<8x128xf32>, vector<128x128xf32> -> vector<128x128xf32>
      %176 = arith.addf %169, %175 : vector<128x128xf32>
      %c2_i32 = arith.constant 2 : i32
      %177 = arith.addi %161, %c2_i32 : i32
      %178 = arith.index_cast %177 : i32 to index
      %c0_164 = arith.constant 0 : index
      %179 = vector.load %arg1[%178, %c0_164] : memref<1344x8xf32, #tpu.memory_space<vmem>>, vector<128x8xf32>
      %c2_165 = arith.constant 2 : index
      %c0_166 = arith.constant 0 : index
      %c0_167 = arith.constant 0 : index
      %180 = vector.load %arg2[%c2_165, %c0_166, %c0_167] : memref<25x8x128xf32, #tpu.memory_space<vmem>>, vector<1x8x128xf32>
      %181 = vector.shape_cast %180 : vector<1x8x128xf32> to vector<8x128xf32>
      %cst_168 = arith.constant dense<0.000000e+00> : vector<128x128xf32>
      %182 = tpu.matmul %179, %181, %cst_168 {dimension_numbers = #tpu.dot_dimension_numbers<[1], [0], [0], [1], [0, 0, 1, 1], [], []>} : vector<128x8xf32>, vector<8x128xf32>, vector<128x128xf32> -> vector<128x128xf32>
      %183 = arith.addf %176, %182 : vector<128x128xf32>
      %c3_i32 = arith.constant 3 : i32
      %184 = arith.addi %161, %c3_i32 : i32
      %185 = arith.index_cast %184 : i32 to index
      %c0_169 = arith.constant 0 : index
      %186 = vector.load %arg1[%185, %c0_169] : memref<1344x8xf32, #tpu.memory_space<vmem>>, vector<128x8xf32>
      %c3_170 = arith.constant 3 : index
      %c0_171 = arith.constant 0 : index
      %c0_172 = arith.constant 0 : index
      %187 = vector.load %arg2[%c3_170, %c0_171, %c0_172] : memref<25x8x128xf32, #tpu.memory_space<vmem>>, vector<1x8x128xf32>
      %188 = vector.shape_cast %187 : vector<1x8x128xf32> to vector<8x128xf32>
      %cst_173 = arith.constant dense<0.000000e+00> : vector<128x128xf32>
      %189 = tpu.matmul %186, %188, %cst_173 {dimension_numbers = #tpu.dot_dimension_numbers<[1], [0], [0], [1], [0, 0, 1, 1], [], []>} : vector<128x8xf32>, vector<8x128xf32>, vector<128x128xf32> -> vector<128x128xf32>
      %190 = arith.addf %183, %189 : vector<128x128xf32>
      %c4_i32 = arith.constant 4 : i32
      %191 = arith.addi %161, %c4_i32 : i32
      %192 = arith.index_cast %191 : i32 to index
      %c0_174 = arith.constant 0 : index
      %193 = vector.load %arg1[%192, %c0_174] : memref<1344x8xf32, #tpu.memory_space<vmem>>, vector<128x8xf32>
      %c4_175 = arith.constant 4 : index
      %c0_176 = arith.constant 0 : index
      %c0_177 = arith.constant 0 : index
      %194 = vector.load %arg2[%c4_175, %c0_176, %c0_177] : memref<25x8x128xf32, #tpu.memory_space<vmem>>, vector<1x8x128xf32>
      %195 = vector.shape_cast %194 : vector<1x8x128xf32> to vector<8x128xf32>
      %cst_178 = arith.constant dense<0.000000e+00> : vector<128x128xf32>
      %196 = tpu.matmul %193, %195, %cst_178 {dimension_numbers = #tpu.dot_dimension_numbers<[1], [0], [0], [1], [0, 0, 1, 1], [], []>} : vector<128x8xf32>, vector<8x128xf32>, vector<128x128xf32> -> vector<128x128xf32>
      %197 = arith.addf %190, %196 : vector<128x128xf32>
      %c32_i32 = arith.constant 32 : i32
      %198 = arith.addi %161, %c32_i32 : i32
      %199 = arith.index_cast %198 : i32 to index
      %c0_179 = arith.constant 0 : index
      %200 = vector.load %arg1[%199, %c0_179] : memref<1344x8xf32, #tpu.memory_space<vmem>>, vector<128x8xf32>
      %c5_180 = arith.constant 5 : index
      %c0_181 = arith.constant 0 : index
      %c0_182 = arith.constant 0 : index
      %201 = vector.load %arg2[%c5_180, %c0_181, %c0_182] : memref<25x8x128xf32, #tpu.memory_space<vmem>>, vector<1x8x128xf32>
      %202 = vector.shape_cast %201 : vector<1x8x128xf32> to vector<8x128xf32>
      %cst_183 = arith.constant dense<0.000000e+00> : vector<128x128xf32>
      %203 = tpu.matmul %200, %202, %cst_183 {dimension_numbers = #tpu.dot_dimension_numbers<[1], [0], [0], [1], [0, 0, 1, 1], [], []>} : vector<128x8xf32>, vector<8x128xf32>, vector<128x128xf32> -> vector<128x128xf32>
      %204 = arith.addf %197, %203 : vector<128x128xf32>
      %c33_i32 = arith.constant 33 : i32
      %205 = arith.addi %161, %c33_i32 : i32
      %206 = arith.index_cast %205 : i32 to index
      %c0_184 = arith.constant 0 : index
      %207 = vector.load %arg1[%206, %c0_184] : memref<1344x8xf32, #tpu.memory_space<vmem>>, vector<128x8xf32>
      %c6_185 = arith.constant 6 : index
      %c0_186 = arith.constant 0 : index
      %c0_187 = arith.constant 0 : index
      %208 = vector.load %arg2[%c6_185, %c0_186, %c0_187] : memref<25x8x128xf32, #tpu.memory_space<vmem>>, vector<1x8x128xf32>
      %209 = vector.shape_cast %208 : vector<1x8x128xf32> to vector<8x128xf32>
      %cst_188 = arith.constant dense<0.000000e+00> : vector<128x128xf32>
      %210 = tpu.matmul %207, %209, %cst_188 {dimension_numbers = #tpu.dot_dimension_numbers<[1], [0], [0], [1], [0, 0, 1, 1], [], []>} : vector<128x8xf32>, vector<8x128xf32>, vector<128x128xf32> -> vector<128x128xf32>
      %211 = arith.addf %204, %210 : vector<128x128xf32>
      %c34_i32 = arith.constant 34 : i32
      %212 = arith.addi %161, %c34_i32 : i32
      %213 = arith.index_cast %212 : i32 to index
      %c0_189 = arith.constant 0 : index
      %214 = vector.load %arg1[%213, %c0_189] : memref<1344x8xf32, #tpu.memory_space<vmem>>, vector<128x8xf32>
      %c7_190 = arith.constant 7 : index
      %c0_191 = arith.constant 0 : index
      %c0_192 = arith.constant 0 : index
      %215 = vector.load %arg2[%c7_190, %c0_191, %c0_192] : memref<25x8x128xf32, #tpu.memory_space<vmem>>, vector<1x8x128xf32>
      %216 = vector.shape_cast %215 : vector<1x8x128xf32> to vector<8x128xf32>
      %cst_193 = arith.constant dense<0.000000e+00> : vector<128x128xf32>
      %217 = tpu.matmul %214, %216, %cst_193 {dimension_numbers = #tpu.dot_dimension_numbers<[1], [0], [0], [1], [0, 0, 1, 1], [], []>} : vector<128x8xf32>, vector<8x128xf32>, vector<128x128xf32> -> vector<128x128xf32>
      %218 = arith.addf %211, %217 : vector<128x128xf32>
      %c35_i32 = arith.constant 35 : i32
      %219 = arith.addi %161, %c35_i32 : i32
      %220 = arith.index_cast %219 : i32 to index
      %c0_194 = arith.constant 0 : index
      %221 = vector.load %arg1[%220, %c0_194] : memref<1344x8xf32, #tpu.memory_space<vmem>>, vector<128x8xf32>
      %c8_195 = arith.constant 8 : index
      %c0_196 = arith.constant 0 : index
      %c0_197 = arith.constant 0 : index
      %222 = vector.load %arg2[%c8_195, %c0_196, %c0_197] : memref<25x8x128xf32, #tpu.memory_space<vmem>>, vector<1x8x128xf32>
      %223 = vector.shape_cast %222 : vector<1x8x128xf32> to vector<8x128xf32>
      %cst_198 = arith.constant dense<0.000000e+00> : vector<128x128xf32>
      %224 = tpu.matmul %221, %223, %cst_198 {dimension_numbers = #tpu.dot_dimension_numbers<[1], [0], [0], [1], [0, 0, 1, 1], [], []>} : vector<128x8xf32>, vector<8x128xf32>, vector<128x128xf32> -> vector<128x128xf32>
      %225 = arith.addf %218, %224 : vector<128x128xf32>
      %c36_i32 = arith.constant 36 : i32
      %226 = arith.addi %161, %c36_i32 : i32
      %227 = arith.index_cast %226 : i32 to index
      %c0_199 = arith.constant 0 : index
      %228 = vector.load %arg1[%227, %c0_199] : memref<1344x8xf32, #tpu.memory_space<vmem>>, vector<128x8xf32>
      %c9_200 = arith.constant 9 : index
      %c0_201 = arith.constant 0 : index
      %c0_202 = arith.constant 0 : index
      %229 = vector.load %arg2[%c9_200, %c0_201, %c0_202] : memref<25x8x128xf32, #tpu.memory_space<vmem>>, vector<1x8x128xf32>
      %230 = vector.shape_cast %229 : vector<1x8x128xf32> to vector<8x128xf32>
      %cst_203 = arith.constant dense<0.000000e+00> : vector<128x128xf32>
      %231 = tpu.matmul %228, %230, %cst_203 {dimension_numbers = #tpu.dot_dimension_numbers<[1], [0], [0], [1], [0, 0, 1, 1], [], []>} : vector<128x8xf32>, vector<8x128xf32>, vector<128x128xf32> -> vector<128x128xf32>
      %232 = arith.addf %225, %231 : vector<128x128xf32>
      %c64_i32 = arith.constant 64 : i32
      %233 = arith.addi %161, %c64_i32 : i32
      %234 = arith.index_cast %233 : i32 to index
      %c0_204 = arith.constant 0 : index
      %235 = vector.load %arg1[%234, %c0_204] : memref<1344x8xf32, #tpu.memory_space<vmem>>, vector<128x8xf32>
      %c10_205 = arith.constant 10 : index
      %c0_206 = arith.constant 0 : index
      %c0_207 = arith.constant 0 : index
      %236 = vector.load %arg2[%c10_205, %c0_206, %c0_207] : memref<25x8x128xf32, #tpu.memory_space<vmem>>, vector<1x8x128xf32>
      %237 = vector.shape_cast %236 : vector<1x8x128xf32> to vector<8x128xf32>
      %cst_208 = arith.constant dense<0.000000e+00> : vector<128x128xf32>
      %238 = tpu.matmul %235, %237, %cst_208 {dimension_numbers = #tpu.dot_dimension_numbers<[1], [0], [0], [1], [0, 0, 1, 1], [], []>} : vector<128x8xf32>, vector<8x128xf32>, vector<128x128xf32> -> vector<128x128xf32>
      %239 = arith.addf %232, %238 : vector<128x128xf32>
      %c65_i32 = arith.constant 65 : i32
      %240 = arith.addi %161, %c65_i32 : i32
      %241 = arith.index_cast %240 : i32 to index
      %c0_209 = arith.constant 0 : index
      %242 = vector.load %arg1[%241, %c0_209] : memref<1344x8xf32, #tpu.memory_space<vmem>>, vector<128x8xf32>
      %c11_210 = arith.constant 11 : index
      %c0_211 = arith.constant 0 : index
      %c0_212 = arith.constant 0 : index
      %243 = vector.load %arg2[%c11_210, %c0_211, %c0_212] : memref<25x8x128xf32, #tpu.memory_space<vmem>>, vector<1x8x128xf32>
      %244 = vector.shape_cast %243 : vector<1x8x128xf32> to vector<8x128xf32>
      %cst_213 = arith.constant dense<0.000000e+00> : vector<128x128xf32>
      %245 = tpu.matmul %242, %244, %cst_213 {dimension_numbers = #tpu.dot_dimension_numbers<[1], [0], [0], [1], [0, 0, 1, 1], [], []>} : vector<128x8xf32>, vector<8x128xf32>, vector<128x128xf32> -> vector<128x128xf32>
      %246 = arith.addf %239, %245 : vector<128x128xf32>
      %c66_i32 = arith.constant 66 : i32
      %247 = arith.addi %161, %c66_i32 : i32
      %248 = arith.index_cast %247 : i32 to index
      %c0_214 = arith.constant 0 : index
      %249 = vector.load %arg1[%248, %c0_214] : memref<1344x8xf32, #tpu.memory_space<vmem>>, vector<128x8xf32>
      %c12_215 = arith.constant 12 : index
      %c0_216 = arith.constant 0 : index
      %c0_217 = arith.constant 0 : index
      %250 = vector.load %arg2[%c12_215, %c0_216, %c0_217] : memref<25x8x128xf32, #tpu.memory_space<vmem>>, vector<1x8x128xf32>
      %251 = vector.shape_cast %250 : vector<1x8x128xf32> to vector<8x128xf32>
      %cst_218 = arith.constant dense<0.000000e+00> : vector<128x128xf32>
      %252 = tpu.matmul %249, %251, %cst_218 {dimension_numbers = #tpu.dot_dimension_numbers<[1], [0], [0], [1], [0, 0, 1, 1], [], []>} : vector<128x8xf32>, vector<8x128xf32>, vector<128x128xf32> -> vector<128x128xf32>
      %253 = arith.addf %246, %252 : vector<128x128xf32>
      %c67_i32 = arith.constant 67 : i32
      %254 = arith.addi %161, %c67_i32 : i32
      %255 = arith.index_cast %254 : i32 to index
      %c0_219 = arith.constant 0 : index
      %256 = vector.load %arg1[%255, %c0_219] : memref<1344x8xf32, #tpu.memory_space<vmem>>, vector<128x8xf32>
      %c13_220 = arith.constant 13 : index
      %c0_221 = arith.constant 0 : index
      %c0_222 = arith.constant 0 : index
      %257 = vector.load %arg2[%c13_220, %c0_221, %c0_222] : memref<25x8x128xf32, #tpu.memory_space<vmem>>, vector<1x8x128xf32>
      %258 = vector.shape_cast %257 : vector<1x8x128xf32> to vector<8x128xf32>
      %cst_223 = arith.constant dense<0.000000e+00> : vector<128x128xf32>
      %259 = tpu.matmul %256, %258, %cst_223 {dimension_numbers = #tpu.dot_dimension_numbers<[1], [0], [0], [1], [0, 0, 1, 1], [], []>} : vector<128x8xf32>, vector<8x128xf32>, vector<128x128xf32> -> vector<128x128xf32>
      %260 = arith.addf %253, %259 : vector<128x128xf32>
      %c68_i32 = arith.constant 68 : i32
      %261 = arith.addi %161, %c68_i32 : i32
      %262 = arith.index_cast %261 : i32 to index
      %c0_224 = arith.constant 0 : index
      %263 = vector.load %arg1[%262, %c0_224] : memref<1344x8xf32, #tpu.memory_space<vmem>>, vector<128x8xf32>
      %c14_225 = arith.constant 14 : index
      %c0_226 = arith.constant 0 : index
      %c0_227 = arith.constant 0 : index
      %264 = vector.load %arg2[%c14_225, %c0_226, %c0_227] : memref<25x8x128xf32, #tpu.memory_space<vmem>>, vector<1x8x128xf32>
      %265 = vector.shape_cast %264 : vector<1x8x128xf32> to vector<8x128xf32>
      %cst_228 = arith.constant dense<0.000000e+00> : vector<128x128xf32>
      %266 = tpu.matmul %263, %265, %cst_228 {dimension_numbers = #tpu.dot_dimension_numbers<[1], [0], [0], [1], [0, 0, 1, 1], [], []>} : vector<128x8xf32>, vector<8x128xf32>, vector<128x128xf32> -> vector<128x128xf32>
      %267 = arith.addf %260, %266 : vector<128x128xf32>
      %c96_i32 = arith.constant 96 : i32
      %268 = arith.addi %161, %c96_i32 : i32
      %269 = arith.index_cast %268 : i32 to index
      %c0_229 = arith.constant 0 : index
      %270 = vector.load %arg1[%269, %c0_229] : memref<1344x8xf32, #tpu.memory_space<vmem>>, vector<128x8xf32>
      %c15_230 = arith.constant 15 : index
      %c0_231 = arith.constant 0 : index
      %c0_232 = arith.constant 0 : index
      %271 = vector.load %arg2[%c15_230, %c0_231, %c0_232] : memref<25x8x128xf32, #tpu.memory_space<vmem>>, vector<1x8x128xf32>
      %272 = vector.shape_cast %271 : vector<1x8x128xf32> to vector<8x128xf32>
      %cst_233 = arith.constant dense<0.000000e+00> : vector<128x128xf32>
      %273 = tpu.matmul %270, %272, %cst_233 {dimension_numbers = #tpu.dot_dimension_numbers<[1], [0], [0], [1], [0, 0, 1, 1], [], []>} : vector<128x8xf32>, vector<8x128xf32>, vector<128x128xf32> -> vector<128x128xf32>
      %274 = arith.addf %267, %273 : vector<128x128xf32>
      %c97_i32 = arith.constant 97 : i32
      %275 = arith.addi %161, %c97_i32 : i32
      %276 = arith.index_cast %275 : i32 to index
      %c0_234 = arith.constant 0 : index
      %277 = vector.load %arg1[%276, %c0_234] : memref<1344x8xf32, #tpu.memory_space<vmem>>, vector<128x8xf32>
      %c16_235 = arith.constant 16 : index
      %c0_236 = arith.constant 0 : index
      %c0_237 = arith.constant 0 : index
      %278 = vector.load %arg2[%c16_235, %c0_236, %c0_237] : memref<25x8x128xf32, #tpu.memory_space<vmem>>, vector<1x8x128xf32>
      %279 = vector.shape_cast %278 : vector<1x8x128xf32> to vector<8x128xf32>
      %cst_238 = arith.constant dense<0.000000e+00> : vector<128x128xf32>
      %280 = tpu.matmul %277, %279, %cst_238 {dimension_numbers = #tpu.dot_dimension_numbers<[1], [0], [0], [1], [0, 0, 1, 1], [], []>} : vector<128x8xf32>, vector<8x128xf32>, vector<128x128xf32> -> vector<128x128xf32>
      %281 = arith.addf %274, %280 : vector<128x128xf32>
      %c98_i32 = arith.constant 98 : i32
      %282 = arith.addi %161, %c98_i32 : i32
      %283 = arith.index_cast %282 : i32 to index
      %c0_239 = arith.constant 0 : index
      %284 = vector.load %arg1[%283, %c0_239] : memref<1344x8xf32, #tpu.memory_space<vmem>>, vector<128x8xf32>
      %c17_240 = arith.constant 17 : index
      %c0_241 = arith.constant 0 : index
      %c0_242 = arith.constant 0 : index
      %285 = vector.load %arg2[%c17_240, %c0_241, %c0_242] : memref<25x8x128xf32, #tpu.memory_space<vmem>>, vector<1x8x128xf32>
      %286 = vector.shape_cast %285 : vector<1x8x128xf32> to vector<8x128xf32>
      %cst_243 = arith.constant dense<0.000000e+00> : vector<128x128xf32>
      %287 = tpu.matmul %284, %286, %cst_243 {dimension_numbers = #tpu.dot_dimension_numbers<[1], [0], [0], [1], [0, 0, 1, 1], [], []>} : vector<128x8xf32>, vector<8x128xf32>, vector<128x128xf32> -> vector<128x128xf32>
      %288 = arith.addf %281, %287 : vector<128x128xf32>
      %c99_i32 = arith.constant 99 : i32
      %289 = arith.addi %161, %c99_i32 : i32
      %290 = arith.index_cast %289 : i32 to index
      %c0_244 = arith.constant 0 : index
      %291 = vector.load %arg1[%290, %c0_244] : memref<1344x8xf32, #tpu.memory_space<vmem>>, vector<128x8xf32>
      %c18_245 = arith.constant 18 : index
      %c0_246 = arith.constant 0 : index
      %c0_247 = arith.constant 0 : index
      %292 = vector.load %arg2[%c18_245, %c0_246, %c0_247] : memref<25x8x128xf32, #tpu.memory_space<vmem>>, vector<1x8x128xf32>
      %293 = vector.shape_cast %292 : vector<1x8x128xf32> to vector<8x128xf32>
      %cst_248 = arith.constant dense<0.000000e+00> : vector<128x128xf32>
      %294 = tpu.matmul %291, %293, %cst_248 {dimension_numbers = #tpu.dot_dimension_numbers<[1], [0], [0], [1], [0, 0, 1, 1], [], []>} : vector<128x8xf32>, vector<8x128xf32>, vector<128x128xf32> -> vector<128x128xf32>
      %295 = arith.addf %288, %294 : vector<128x128xf32>
      %c100_i32 = arith.constant 100 : i32
      %296 = arith.addi %161, %c100_i32 : i32
      %297 = arith.index_cast %296 : i32 to index
      %c0_249 = arith.constant 0 : index
      %298 = vector.load %arg1[%297, %c0_249] : memref<1344x8xf32, #tpu.memory_space<vmem>>, vector<128x8xf32>
      %c19_250 = arith.constant 19 : index
      %c0_251 = arith.constant 0 : index
      %c0_252 = arith.constant 0 : index
      %299 = vector.load %arg2[%c19_250, %c0_251, %c0_252] : memref<25x8x128xf32, #tpu.memory_space<vmem>>, vector<1x8x128xf32>
      %300 = vector.shape_cast %299 : vector<1x8x128xf32> to vector<8x128xf32>
      %cst_253 = arith.constant dense<0.000000e+00> : vector<128x128xf32>
      %301 = tpu.matmul %298, %300, %cst_253 {dimension_numbers = #tpu.dot_dimension_numbers<[1], [0], [0], [1], [0, 0, 1, 1], [], []>} : vector<128x8xf32>, vector<8x128xf32>, vector<128x128xf32> -> vector<128x128xf32>
      %302 = arith.addf %295, %301 : vector<128x128xf32>
      %c128_i32_254 = arith.constant 128 : i32
      %303 = arith.addi %161, %c128_i32_254 : i32
      %304 = arith.index_cast %303 : i32 to index
      %c0_255 = arith.constant 0 : index
      %305 = vector.load %arg1[%304, %c0_255] : memref<1344x8xf32, #tpu.memory_space<vmem>>, vector<128x8xf32>
      %c20_256 = arith.constant 20 : index
      %c0_257 = arith.constant 0 : index
      %c0_258 = arith.constant 0 : index
      %306 = vector.load %arg2[%c20_256, %c0_257, %c0_258] : memref<25x8x128xf32, #tpu.memory_space<vmem>>, vector<1x8x128xf32>
      %307 = vector.shape_cast %306 : vector<1x8x128xf32> to vector<8x128xf32>
      %cst_259 = arith.constant dense<0.000000e+00> : vector<128x128xf32>
      %308 = tpu.matmul %305, %307, %cst_259 {dimension_numbers = #tpu.dot_dimension_numbers<[1], [0], [0], [1], [0, 0, 1, 1], [], []>} : vector<128x8xf32>, vector<8x128xf32>, vector<128x128xf32> -> vector<128x128xf32>
      %309 = arith.addf %302, %308 : vector<128x128xf32>
      %c129_i32 = arith.constant 129 : i32
      %310 = arith.addi %161, %c129_i32 : i32
      %311 = arith.index_cast %310 : i32 to index
      %c0_260 = arith.constant 0 : index
      %312 = vector.load %arg1[%311, %c0_260] : memref<1344x8xf32, #tpu.memory_space<vmem>>, vector<128x8xf32>
      %c21_261 = arith.constant 21 : index
      %c0_262 = arith.constant 0 : index
      %c0_263 = arith.constant 0 : index
      %313 = vector.load %arg2[%c21_261, %c0_262, %c0_263] : memref<25x8x128xf32, #tpu.memory_space<vmem>>, vector<1x8x128xf32>
      %314 = vector.shape_cast %313 : vector<1x8x128xf32> to vector<8x128xf32>
      %cst_264 = arith.constant dense<0.000000e+00> : vector<128x128xf32>
      %315 = tpu.matmul %312, %314, %cst_264 {dimension_numbers = #tpu.dot_dimension_numbers<[1], [0], [0], [1], [0, 0, 1, 1], [], []>} : vector<128x8xf32>, vector<8x128xf32>, vector<128x128xf32> -> vector<128x128xf32>
      %316 = arith.addf %309, %315 : vector<128x128xf32>
      %c130_i32 = arith.constant 130 : i32
      %317 = arith.addi %161, %c130_i32 : i32
      %318 = arith.index_cast %317 : i32 to index
      %c0_265 = arith.constant 0 : index
      %319 = vector.load %arg1[%318, %c0_265] : memref<1344x8xf32, #tpu.memory_space<vmem>>, vector<128x8xf32>
      %c22_266 = arith.constant 22 : index
      %c0_267 = arith.constant 0 : index
      %c0_268 = arith.constant 0 : index
      %320 = vector.load %arg2[%c22_266, %c0_267, %c0_268] : memref<25x8x128xf32, #tpu.memory_space<vmem>>, vector<1x8x128xf32>
      %321 = vector.shape_cast %320 : vector<1x8x128xf32> to vector<8x128xf32>
      %cst_269 = arith.constant dense<0.000000e+00> : vector<128x128xf32>
      %322 = tpu.matmul %319, %321, %cst_269 {dimension_numbers = #tpu.dot_dimension_numbers<[1], [0], [0], [1], [0, 0, 1, 1], [], []>} : vector<128x8xf32>, vector<8x128xf32>, vector<128x128xf32> -> vector<128x128xf32>
      %323 = arith.addf %316, %322 : vector<128x128xf32>
      %c131_i32 = arith.constant 131 : i32
      %324 = arith.addi %161, %c131_i32 : i32
      %325 = arith.index_cast %324 : i32 to index
      %c0_270 = arith.constant 0 : index
      %326 = vector.load %arg1[%325, %c0_270] : memref<1344x8xf32, #tpu.memory_space<vmem>>, vector<128x8xf32>
      %c23_271 = arith.constant 23 : index
      %c0_272 = arith.constant 0 : index
      %c0_273 = arith.constant 0 : index
      %327 = vector.load %arg2[%c23_271, %c0_272, %c0_273] : memref<25x8x128xf32, #tpu.memory_space<vmem>>, vector<1x8x128xf32>
      %328 = vector.shape_cast %327 : vector<1x8x128xf32> to vector<8x128xf32>
      %cst_274 = arith.constant dense<0.000000e+00> : vector<128x128xf32>
      %329 = tpu.matmul %326, %328, %cst_274 {dimension_numbers = #tpu.dot_dimension_numbers<[1], [0], [0], [1], [0, 0, 1, 1], [], []>} : vector<128x8xf32>, vector<8x128xf32>, vector<128x128xf32> -> vector<128x128xf32>
      %330 = arith.addf %323, %329 : vector<128x128xf32>
      %c132_i32 = arith.constant 132 : i32
      %331 = arith.addi %161, %c132_i32 : i32
      %332 = arith.index_cast %331 : i32 to index
      %c0_275 = arith.constant 0 : index
      %333 = vector.load %arg1[%332, %c0_275] : memref<1344x8xf32, #tpu.memory_space<vmem>>, vector<128x8xf32>
      %c24_276 = arith.constant 24 : index
      %c0_277 = arith.constant 0 : index
      %c0_278 = arith.constant 0 : index
      %334 = vector.load %arg2[%c24_276, %c0_277, %c0_278] : memref<25x8x128xf32, #tpu.memory_space<vmem>>, vector<1x8x128xf32>
      %335 = vector.shape_cast %334 : vector<1x8x128xf32> to vector<8x128xf32>
      %cst_279 = arith.constant dense<0.000000e+00> : vector<128x128xf32>
      %336 = tpu.matmul %333, %335, %cst_279 {dimension_numbers = #tpu.dot_dimension_numbers<[1], [0], [0], [1], [0, 0, 1, 1], [], []>} : vector<128x8xf32>, vector<8x128xf32>, vector<128x128xf32> -> vector<128x128xf32>
      %337 = arith.addf %330, %336 : vector<128x128xf32>
      %338 = vector.broadcast %3 : vector<1x128xf32> to vector<128x128xf32>
      %339 = arith.addf %337, %338 : vector<128x128xf32>
      %cst_280 = arith.constant 0.000000e+00 : f32
      %340 = vector.broadcast %cst_280 : f32 to vector<128x128xf32>
      %341 = arith.maximumf %339, %340 : vector<128x128xf32>
      %342 = arith.index_cast %161 : i32 to index
      %c0_281 = arith.constant 0 : index
      %343 = vector.load %arg15[%342, %c0_281] : memref<1344x128xf32, #tpu.memory_space<vmem>>, vector<128x128xf32>
      tpu.vector_store %arg15[%342, %c0_281], %341 {strides = array<i32>} : memref<1344x128xf32, #tpu.memory_space<vmem>>, vector<128x128xf32>,
    }
    %c8_i32_6 = arith.constant 8 : i32
    %c0_i32_7 = arith.constant 0 : i32
    %c8_i32_8 = arith.constant 8 : i32
    %6 = arith.addi %c0_i32_7, %c8_i32_8 : i32
    %c1_i32_9 = arith.constant 1 : i32
    scf.for %arg17 = %c0_i32_7 to %6 step %c1_i32_9  : i32 {
      %c1_i32_149 = arith.constant 1 : i32
      %158 = arith.muli %arg17, %c1_i32_149 : i32
      %c0_i32_150 = arith.constant 0 : i32
      %159 = arith.addi %c0_i32_150, %158 : i32
      %c128_i32 = arith.constant 128 : i32
      %160 = arith.muli %159, %c128_i32 : i32
      %161 = tpu.assume_multiple %160, 128 : i32
      %162 = arith.index_cast %161 : i32 to index
      %c0_151 = arith.constant 0 : index
      %163 = vector.load %arg15[%162, %c0_151] : memref<1344x128xf32, #tpu.memory_space<vmem>>, vector<128x128xf32>
      %c1_i32_152 = arith.constant 1 : i32
      %164 = arith.addi %161, %c1_i32_152 : i32
      %165 = arith.index_cast %164 : i32 to index
      %c0_153 = arith.constant 0 : index
      %166 = vector.load %arg15[%165, %c0_153] : memref<1344x128xf32, #tpu.memory_space<vmem>>, vector<128x128xf32>
      %167 = arith.maximumf %163, %166 : vector<128x128xf32>
      %c32_i32 = arith.constant 32 : i32
      %168 = arith.addi %161, %c32_i32 : i32
      %169 = arith.index_cast %168 : i32 to index
      %c0_154 = arith.constant 0 : index
      %170 = vector.load %arg15[%169, %c0_154] : memref<1344x128xf32, #tpu.memory_space<vmem>>, vector<128x128xf32>
      %171 = arith.maximumf %167, %170 : vector<128x128xf32>
      %c32_i32_155 = arith.constant 32 : i32
      %172 = arith.addi %161, %c32_i32_155 : i32
      %c1_i32_156 = arith.constant 1 : i32
      %173 = arith.addi %172, %c1_i32_156 : i32
      %174 = arith.index_cast %173 : i32 to index
      %c0_157 = arith.constant 0 : index
      %175 = vector.load %arg15[%174, %c0_157] : memref<1344x128xf32, #tpu.memory_space<vmem>>, vector<128x128xf32>
      %176 = arith.maximumf %171, %175 : vector<128x128xf32>
      %177 = arith.index_cast %161 : i32 to index
      %c0_158 = arith.constant 0 : index
      %178 = vector.load %arg16[%177, %c0_158] : memref<1344x128xf32, #tpu.memory_space<vmem>>, vector<128x128xf32>
      tpu.vector_store %arg16[%177, %c0_158], %176 {strides = array<i32>} : memref<1344x128xf32, #tpu.memory_space<vmem>>, vector<128x128xf32>,
    }
    %c8_i32_10 = arith.constant 8 : i32
    %c0_i32_11 = arith.constant 0 : i32
    %c8_i32_12 = arith.constant 8 : i32
    %7 = arith.addi %c0_i32_11, %c8_i32_12 : i32
    %c1_i32_13 = arith.constant 1 : i32
    scf.for %arg17 = %c0_i32_11 to %7 step %c1_i32_13  : i32 {
      %c1_i32_149 = arith.constant 1 : i32
      %158 = arith.muli %arg17, %c1_i32_149 : i32
      %c0_i32_150 = arith.constant 0 : i32
      %159 = arith.addi %c0_i32_150, %158 : i32
      %c128_i32 = arith.constant 128 : i32
      %160 = arith.muli %159, %c128_i32 : i32
      %161 = tpu.assume_multiple %160, 128 : i32
      %cst_151 = arith.constant 0.000000e+00 : f32
      %162 = vector.broadcast %cst_151 : f32 to vector<128x128xf32>
      %c0_i32_152 = arith.constant 0 : i32
      %163 = arith.addi %161, %c0_i32_152 : i32
      %164 = arith.index_cast %163 : i32 to index
      %c0_153 = arith.constant 0 : index
      %165 = vector.load %arg16[%164, %c0_153] : memref<1344x128xf32, #tpu.memory_space<vmem>>, vector<128x128xf32>
      %c0_154 = arith.constant 0 : index
      %c0_155 = arith.constant 0 : index
      %c0_156 = arith.constant 0 : index
      %166 = vector.load %arg4[%c0_154, %c0_155, %c0_156] : memref<25x128x128xf32, #tpu.memory_space<vmem>>, vector<1x128x128xf32>
      %167 = vector.shape_cast %166 : vector<1x128x128xf32> to vector<128x128xf32>
      %cst_157 = arith.constant dense<0.000000e+00> : vector<128x128xf32>
      %168 = tpu.matmul %165, %167, %cst_157 {dimension_numbers = #tpu.dot_dimension_numbers<[1], [0], [0], [1], [0, 0, 1, 1], [], []>} : vector<128x128xf32>, vector<128x128xf32>, vector<128x128xf32> -> vector<128x128xf32>
      %169 = arith.addf %162, %168 : vector<128x128xf32>
      %c2_i32 = arith.constant 2 : i32
      %170 = arith.addi %161, %c2_i32 : i32
      %171 = arith.index_cast %170 : i32 to index
      %c0_158 = arith.constant 0 : index
      %172 = vector.load %arg16[%171, %c0_158] : memref<1344x128xf32, #tpu.memory_space<vmem>>, vector<128x128xf32>
      %c1_159 = arith.constant 1 : index
      %c0_160 = arith.constant 0 : index
      %c0_161 = arith.constant 0 : index
      %173 = vector.load %arg4[%c1_159, %c0_160, %c0_161] : memref<25x128x128xf32, #tpu.memory_space<vmem>>, vector<1x128x128xf32>
      %174 = vector.shape_cast %173 : vector<1x128x128xf32> to vector<128x128xf32>
      %cst_162 = arith.constant dense<0.000000e+00> : vector<128x128xf32>
      %175 = tpu.matmul %172, %174, %cst_162 {dimension_numbers = #tpu.dot_dimension_numbers<[1], [0], [0], [1], [0, 0, 1, 1], [], []>} : vector<128x128xf32>, vector<128x128xf32>, vector<128x128xf32> -> vector<128x128xf32>
      %176 = arith.addf %169, %175 : vector<128x128xf32>
      %c4_i32 = arith.constant 4 : i32
      %177 = arith.addi %161, %c4_i32 : i32
      %178 = arith.index_cast %177 : i32 to index
      %c0_163 = arith.constant 0 : index
      %179 = vector.load %arg16[%178, %c0_163] : memref<1344x128xf32, #tpu.memory_space<vmem>>, vector<128x128xf32>
      %c2_164 = arith.constant 2 : index
      %c0_165 = arith.constant 0 : index
      %c0_166 = arith.constant 0 : index
      %180 = vector.load %arg4[%c2_164, %c0_165, %c0_166] : memref<25x128x128xf32, #tpu.memory_space<vmem>>, vector<1x128x128xf32>
      %181 = vector.shape_cast %180 : vector<1x128x128xf32> to vector<128x128xf32>
      %cst_167 = arith.constant dense<0.000000e+00> : vector<128x128xf32>
      %182 = tpu.matmul %179, %181, %cst_167 {dimension_numbers = #tpu.dot_dimension_numbers<[1], [0], [0], [1], [0, 0, 1, 1], [], []>} : vector<128x128xf32>, vector<128x128xf32>, vector<128x128xf32> -> vector<128x128xf32>
      %183 = arith.addf %176, %182 : vector<128x128xf32>
      %c6_i32 = arith.constant 6 : i32
      %184 = arith.addi %161, %c6_i32 : i32
      %185 = arith.index_cast %184 : i32 to index
      %c0_168 = arith.constant 0 : index
      %186 = vector.load %arg16[%185, %c0_168] : memref<1344x128xf32, #tpu.memory_space<vmem>>, vector<128x128xf32>
      %c3_169 = arith.constant 3 : index
      %c0_170 = arith.constant 0 : index
      %c0_171 = arith.constant 0 : index
      %187 = vector.load %arg4[%c3_169, %c0_170, %c0_171] : memref<25x128x128xf32, #tpu.memory_space<vmem>>, vector<1x128x128xf32>
      %188 = vector.shape_cast %187 : vector<1x128x128xf32> to vector<128x128xf32>
      %cst_172 = arith.constant dense<0.000000e+00> : vector<128x128xf32>
      %189 = tpu.matmul %186, %188, %cst_172 {dimension_numbers = #tpu.dot_dimension_numbers<[1], [0], [0], [1], [0, 0, 1, 1], [], []>} : vector<128x128xf32>, vector<128x128xf32>, vector<128x128xf32> -> vector<128x128xf32>
      %190 = arith.addf %183, %189 : vector<128x128xf32>
      %c8_i32_173 = arith.constant 8 : i32
      %191 = arith.addi %161, %c8_i32_173 : i32
      %192 = arith.index_cast %191 : i32 to index
      %c0_174 = arith.constant 0 : index
      %193 = vector.load %arg16[%192, %c0_174] : memref<1344x128xf32, #tpu.memory_space<vmem>>, vector<128x128xf32>
      %c4_175 = arith.constant 4 : index
      %c0_176 = arith.constant 0 : index
      %c0_177 = arith.constant 0 : index
      %194 = vector.load %arg4[%c4_175, %c0_176, %c0_177] : memref<25x128x128xf32, #tpu.memory_space<vmem>>, vector<1x128x128xf32>
      %195 = vector.shape_cast %194 : vector<1x128x128xf32> to vector<128x128xf32>
      %cst_178 = arith.constant dense<0.000000e+00> : vector<128x128xf32>
      %196 = tpu.matmul %193, %195, %cst_178 {dimension_numbers = #tpu.dot_dimension_numbers<[1], [0], [0], [1], [0, 0, 1, 1], [], []>} : vector<128x128xf32>, vector<128x128xf32>, vector<128x128xf32> -> vector<128x128xf32>
      %197 = arith.addf %190, %196 : vector<128x128xf32>
      %c64_i32 = arith.constant 64 : i32
      %198 = arith.addi %161, %c64_i32 : i32
      %199 = arith.index_cast %198 : i32 to index
      %c0_179 = arith.constant 0 : index
      %200 = vector.load %arg16[%199, %c0_179] : memref<1344x128xf32, #tpu.memory_space<vmem>>, vector<128x128xf32>
      %c5_180 = arith.constant 5 : index
      %c0_181 = arith.constant 0 : index
      %c0_182 = arith.constant 0 : index
      %201 = vector.load %arg4[%c5_180, %c0_181, %c0_182] : memref<25x128x128xf32, #tpu.memory_space<vmem>>, vector<1x128x128xf32>
      %202 = vector.shape_cast %201 : vector<1x128x128xf32> to vector<128x128xf32>
      %cst_183 = arith.constant dense<0.000000e+00> : vector<128x128xf32>
      %203 = tpu.matmul %200, %202, %cst_183 {dimension_numbers = #tpu.dot_dimension_numbers<[1], [0], [0], [1], [0, 0, 1, 1], [], []>} : vector<128x128xf32>, vector<128x128xf32>, vector<128x128xf32> -> vector<128x128xf32>
      %204 = arith.addf %197, %203 : vector<128x128xf32>
      %c66_i32 = arith.constant 66 : i32
      %205 = arith.addi %161, %c66_i32 : i32
      %206 = arith.index_cast %205 : i32 to index
      %c0_184 = arith.constant 0 : index
      %207 = vector.load %arg16[%206, %c0_184] : memref<1344x128xf32, #tpu.memory_space<vmem>>, vector<128x128xf32>
      %c6_185 = arith.constant 6 : index
      %c0_186 = arith.constant 0 : index
      %c0_187 = arith.constant 0 : index
      %208 = vector.load %arg4[%c6_185, %c0_186, %c0_187] : memref<25x128x128xf32, #tpu.memory_space<vmem>>, vector<1x128x128xf32>
      %209 = vector.shape_cast %208 : vector<1x128x128xf32> to vector<128x128xf32>
      %cst_188 = arith.constant dense<0.000000e+00> : vector<128x128xf32>
      %210 = tpu.matmul %207, %209, %cst_188 {dimension_numbers = #tpu.dot_dimension_numbers<[1], [0], [0], [1], [0, 0, 1, 1], [], []>} : vector<128x128xf32>, vector<128x128xf32>, vector<128x128xf32> -> vector<128x128xf32>
      %211 = arith.addf %204, %210 : vector<128x128xf32>
      %c68_i32 = arith.constant 68 : i32
      %212 = arith.addi %161, %c68_i32 : i32
      %213 = arith.index_cast %212 : i32 to index
      %c0_189 = arith.constant 0 : index
      %214 = vector.load %arg16[%213, %c0_189] : memref<1344x128xf32, #tpu.memory_space<vmem>>, vector<128x128xf32>
      %c7_190 = arith.constant 7 : index
      %c0_191 = arith.constant 0 : index
      %c0_192 = arith.constant 0 : index
      %215 = vector.load %arg4[%c7_190, %c0_191, %c0_192] : memref<25x128x128xf32, #tpu.memory_space<vmem>>, vector<1x128x128xf32>
      %216 = vector.shape_cast %215 : vector<1x128x128xf32> to vector<128x128xf32>
      %cst_193 = arith.constant dense<0.000000e+00> : vector<128x128xf32>
      %217 = tpu.matmul %214, %216, %cst_193 {dimension_numbers = #tpu.dot_dimension_numbers<[1], [0], [0], [1], [0, 0, 1, 1], [], []>} : vector<128x128xf32>, vector<128x128xf32>, vector<128x128xf32> -> vector<128x128xf32>
      %218 = arith.addf %211, %217 : vector<128x128xf32>
      %c70_i32 = arith.constant 70 : i32
      %219 = arith.addi %161, %c70_i32 : i32
      %220 = arith.index_cast %219 : i32 to index
      %c0_194 = arith.constant 0 : index
      %221 = vector.load %arg16[%220, %c0_194] : memref<1344x128xf32, #tpu.memory_space<vmem>>, vector<128x128xf32>
      %c8_195 = arith.constant 8 : index
      %c0_196 = arith.constant 0 : index
      %c0_197 = arith.constant 0 : index
      %222 = vector.load %arg4[%c8_195, %c0_196, %c0_197] : memref<25x128x128xf32, #tpu.memory_space<vmem>>, vector<1x128x128xf32>
      %223 = vector.shape_cast %222 : vector<1x128x128xf32> to vector<128x128xf32>
      %cst_198 = arith.constant dense<0.000000e+00> : vector<128x128xf32>
      %224 = tpu.matmul %221, %223, %cst_198 {dimension_numbers = #tpu.dot_dimension_numbers<[1], [0], [0], [1], [0, 0, 1, 1], [], []>} : vector<128x128xf32>, vector<128x128xf32>, vector<128x128xf32> -> vector<128x128xf32>
      %225 = arith.addf %218, %224 : vector<128x128xf32>
      %c72_i32 = arith.constant 72 : i32
      %226 = arith.addi %161, %c72_i32 : i32
      %227 = arith.index_cast %226 : i32 to index
      %c0_199 = arith.constant 0 : index
      %228 = vector.load %arg16[%227, %c0_199] : memref<1344x128xf32, #tpu.memory_space<vmem>>, vector<128x128xf32>
      %c9_200 = arith.constant 9 : index
      %c0_201 = arith.constant 0 : index
      %c0_202 = arith.constant 0 : index
      %229 = vector.load %arg4[%c9_200, %c0_201, %c0_202] : memref<25x128x128xf32, #tpu.memory_space<vmem>>, vector<1x128x128xf32>
      %230 = vector.shape_cast %229 : vector<1x128x128xf32> to vector<128x128xf32>
      %cst_203 = arith.constant dense<0.000000e+00> : vector<128x128xf32>
      %231 = tpu.matmul %228, %230, %cst_203 {dimension_numbers = #tpu.dot_dimension_numbers<[1], [0], [0], [1], [0, 0, 1, 1], [], []>} : vector<128x128xf32>, vector<128x128xf32>, vector<128x128xf32> -> vector<128x128xf32>
      %232 = arith.addf %225, %231 : vector<128x128xf32>
      %c128_i32_204 = arith.constant 128 : i32
      %233 = arith.addi %161, %c128_i32_204 : i32
      %234 = arith.index_cast %233 : i32 to index
      %c0_205 = arith.constant 0 : index
      %235 = vector.load %arg16[%234, %c0_205] : memref<1344x128xf32, #tpu.memory_space<vmem>>, vector<128x128xf32>
      %c10_206 = arith.constant 10 : index
      %c0_207 = arith.constant 0 : index
      %c0_208 = arith.constant 0 : index
      %236 = vector.load %arg4[%c10_206, %c0_207, %c0_208] : memref<25x128x128xf32, #tpu.memory_space<vmem>>, vector<1x128x128xf32>
      %237 = vector.shape_cast %236 : vector<1x128x128xf32> to vector<128x128xf32>
      %cst_209 = arith.constant dense<0.000000e+00> : vector<128x128xf32>
      %238 = tpu.matmul %235, %237, %cst_209 {dimension_numbers = #tpu.dot_dimension_numbers<[1], [0], [0], [1], [0, 0, 1, 1], [], []>} : vector<128x128xf32>, vector<128x128xf32>, vector<128x128xf32> -> vector<128x128xf32>
      %239 = arith.addf %232, %238 : vector<128x128xf32>
      %c130_i32 = arith.constant 130 : i32
      %240 = arith.addi %161, %c130_i32 : i32
      %241 = arith.index_cast %240 : i32 to index
      %c0_210 = arith.constant 0 : index
      %242 = vector.load %arg16[%241, %c0_210] : memref<1344x128xf32, #tpu.memory_space<vmem>>, vector<128x128xf32>
      %c11_211 = arith.constant 11 : index
      %c0_212 = arith.constant 0 : index
      %c0_213 = arith.constant 0 : index
      %243 = vector.load %arg4[%c11_211, %c0_212, %c0_213] : memref<25x128x128xf32, #tpu.memory_space<vmem>>, vector<1x128x128xf32>
      %244 = vector.shape_cast %243 : vector<1x128x128xf32> to vector<128x128xf32>
      %cst_214 = arith.constant dense<0.000000e+00> : vector<128x128xf32>
      %245 = tpu.matmul %242, %244, %cst_214 {dimension_numbers = #tpu.dot_dimension_numbers<[1], [0], [0], [1], [0, 0, 1, 1], [], []>} : vector<128x128xf32>, vector<128x128xf32>, vector<128x128xf32> -> vector<128x128xf32>
      %246 = arith.addf %239, %245 : vector<128x128xf32>
      %c132_i32 = arith.constant 132 : i32
      %247 = arith.addi %161, %c132_i32 : i32
      %248 = arith.index_cast %247 : i32 to index
      %c0_215 = arith.constant 0 : index
      %249 = vector.load %arg16[%248, %c0_215] : memref<1344x128xf32, #tpu.memory_space<vmem>>, vector<128x128xf32>
      %c12_216 = arith.constant 12 : index
      %c0_217 = arith.constant 0 : index
      %c0_218 = arith.constant 0 : index
      %250 = vector.load %arg4[%c12_216, %c0_217, %c0_218] : memref<25x128x128xf32, #tpu.memory_space<vmem>>, vector<1x128x128xf32>
      %251 = vector.shape_cast %250 : vector<1x128x128xf32> to vector<128x128xf32>
      %cst_219 = arith.constant dense<0.000000e+00> : vector<128x128xf32>
      %252 = tpu.matmul %249, %251, %cst_219 {dimension_numbers = #tpu.dot_dimension_numbers<[1], [0], [0], [1], [0, 0, 1, 1], [], []>} : vector<128x128xf32>, vector<128x128xf32>, vector<128x128xf32> -> vector<128x128xf32>
      %253 = arith.addf %246, %252 : vector<128x128xf32>
      %c134_i32 = arith.constant 134 : i32
      %254 = arith.addi %161, %c134_i32 : i32
      %255 = arith.index_cast %254 : i32 to index
      %c0_220 = arith.constant 0 : index
      %256 = vector.load %arg16[%255, %c0_220] : memref<1344x128xf32, #tpu.memory_space<vmem>>, vector<128x128xf32>
      %c13_221 = arith.constant 13 : index
      %c0_222 = arith.constant 0 : index
      %c0_223 = arith.constant 0 : index
      %257 = vector.load %arg4[%c13_221, %c0_222, %c0_223] : memref<25x128x128xf32, #tpu.memory_space<vmem>>, vector<1x128x128xf32>
      %258 = vector.shape_cast %257 : vector<1x128x128xf32> to vector<128x128xf32>
      %cst_224 = arith.constant dense<0.000000e+00> : vector<128x128xf32>
      %259 = tpu.matmul %256, %258, %cst_224 {dimension_numbers = #tpu.dot_dimension_numbers<[1], [0], [0], [1], [0, 0, 1, 1], [], []>} : vector<128x128xf32>, vector<128x128xf32>, vector<128x128xf32> -> vector<128x128xf32>
      %260 = arith.addf %253, %259 : vector<128x128xf32>
      %c136_i32 = arith.constant 136 : i32
      %261 = arith.addi %161, %c136_i32 : i32
      %262 = arith.index_cast %261 : i32 to index
      %c0_225 = arith.constant 0 : index
      %263 = vector.load %arg16[%262, %c0_225] : memref<1344x128xf32, #tpu.memory_space<vmem>>, vector<128x128xf32>
      %c14_226 = arith.constant 14 : index
      %c0_227 = arith.constant 0 : index
      %c0_228 = arith.constant 0 : index
      %264 = vector.load %arg4[%c14_226, %c0_227, %c0_228] : memref<25x128x128xf32, #tpu.memory_space<vmem>>, vector<1x128x128xf32>
      %265 = vector.shape_cast %264 : vector<1x128x128xf32> to vector<128x128xf32>
      %cst_229 = arith.constant dense<0.000000e+00> : vector<128x128xf32>
      %266 = tpu.matmul %263, %265, %cst_229 {dimension_numbers = #tpu.dot_dimension_numbers<[1], [0], [0], [1], [0, 0, 1, 1], [], []>} : vector<128x128xf32>, vector<128x128xf32>, vector<128x128xf32> -> vector<128x128xf32>
      %267 = arith.addf %260, %266 : vector<128x128xf32>
      %c192_i32 = arith.constant 192 : i32
      %268 = arith.addi %161, %c192_i32 : i32
      %269 = arith.index_cast %268 : i32 to index
      %c0_230 = arith.constant 0 : index
      %270 = vector.load %arg16[%269, %c0_230] : memref<1344x128xf32, #tpu.memory_space<vmem>>, vector<128x128xf32>
      %c15_231 = arith.constant 15 : index
      %c0_232 = arith.constant 0 : index
      %c0_233 = arith.constant 0 : index
      %271 = vector.load %arg4[%c15_231, %c0_232, %c0_233] : memref<25x128x128xf32, #tpu.memory_space<vmem>>, vector<1x128x128xf32>
      %272 = vector.shape_cast %271 : vector<1x128x128xf32> to vector<128x128xf32>
      %cst_234 = arith.constant dense<0.000000e+00> : vector<128x128xf32>
      %273 = tpu.matmul %270, %272, %cst_234 {dimension_numbers = #tpu.dot_dimension_numbers<[1], [0], [0], [1], [0, 0, 1, 1], [], []>} : vector<128x128xf32>, vector<128x128xf32>, vector<128x128xf32> -> vector<128x128xf32>
      %274 = arith.addf %267, %273 : vector<128x128xf32>
      %c194_i32 = arith.constant 194 : i32
      %275 = arith.addi %161, %c194_i32 : i32
      %276 = arith.index_cast %275 : i32 to index
      %c0_235 = arith.constant 0 : index
      %277 = vector.load %arg16[%276, %c0_235] : memref<1344x128xf32, #tpu.memory_space<vmem>>, vector<128x128xf32>
      %c16_236 = arith.constant 16 : index
      %c0_237 = arith.constant 0 : index
      %c0_238 = arith.constant 0 : index
      %278 = vector.load %arg4[%c16_236, %c0_237, %c0_238] : memref<25x128x128xf32, #tpu.memory_space<vmem>>, vector<1x128x128xf32>
      %279 = vector.shape_cast %278 : vector<1x128x128xf32> to vector<128x128xf32>
      %cst_239 = arith.constant dense<0.000000e+00> : vector<128x128xf32>
      %280 = tpu.matmul %277, %279, %cst_239 {dimension_numbers = #tpu.dot_dimension_numbers<[1], [0], [0], [1], [0, 0, 1, 1], [], []>} : vector<128x128xf32>, vector<128x128xf32>, vector<128x128xf32> -> vector<128x128xf32>
      %281 = arith.addf %274, %280 : vector<128x128xf32>
      %c196_i32 = arith.constant 196 : i32
      %282 = arith.addi %161, %c196_i32 : i32
      %283 = arith.index_cast %282 : i32 to index
      %c0_240 = arith.constant 0 : index
      %284 = vector.load %arg16[%283, %c0_240] : memref<1344x128xf32, #tpu.memory_space<vmem>>, vector<128x128xf32>
      %c17_241 = arith.constant 17 : index
      %c0_242 = arith.constant 0 : index
      %c0_243 = arith.constant 0 : index
      %285 = vector.load %arg4[%c17_241, %c0_242, %c0_243] : memref<25x128x128xf32, #tpu.memory_space<vmem>>, vector<1x128x128xf32>
      %286 = vector.shape_cast %285 : vector<1x128x128xf32> to vector<128x128xf32>
      %cst_244 = arith.constant dense<0.000000e+00> : vector<128x128xf32>
      %287 = tpu.matmul %284, %286, %cst_244 {dimension_numbers = #tpu.dot_dimension_numbers<[1], [0], [0], [1], [0, 0, 1, 1], [], []>} : vector<128x128xf32>, vector<128x128xf32>, vector<128x128xf32> -> vector<128x128xf32>
      %288 = arith.addf %281, %287 : vector<128x128xf32>
      %c198_i32 = arith.constant 198 : i32
      %289 = arith.addi %161, %c198_i32 : i32
      %290 = arith.index_cast %289 : i32 to index
      %c0_245 = arith.constant 0 : index
      %291 = vector.load %arg16[%290, %c0_245] : memref<1344x128xf32, #tpu.memory_space<vmem>>, vector<128x128xf32>
      %c18_246 = arith.constant 18 : index
      %c0_247 = arith.constant 0 : index
      %c0_248 = arith.constant 0 : index
      %292 = vector.load %arg4[%c18_246, %c0_247, %c0_248] : memref<25x128x128xf32, #tpu.memory_space<vmem>>, vector<1x128x128xf32>
      %293 = vector.shape_cast %292 : vector<1x128x128xf32> to vector<128x128xf32>
      %cst_249 = arith.constant dense<0.000000e+00> : vector<128x128xf32>
      %294 = tpu.matmul %291, %293, %cst_249 {dimension_numbers = #tpu.dot_dimension_numbers<[1], [0], [0], [1], [0, 0, 1, 1], [], []>} : vector<128x128xf32>, vector<128x128xf32>, vector<128x128xf32> -> vector<128x128xf32>
      %295 = arith.addf %288, %294 : vector<128x128xf32>
      %c200_i32 = arith.constant 200 : i32
      %296 = arith.addi %161, %c200_i32 : i32
      %297 = arith.index_cast %296 : i32 to index
      %c0_250 = arith.constant 0 : index
      %298 = vector.load %arg16[%297, %c0_250] : memref<1344x128xf32, #tpu.memory_space<vmem>>, vector<128x128xf32>
      %c19_251 = arith.constant 19 : index
      %c0_252 = arith.constant 0 : index
      %c0_253 = arith.constant 0 : index
      %299 = vector.load %arg4[%c19_251, %c0_252, %c0_253] : memref<25x128x128xf32, #tpu.memory_space<vmem>>, vector<1x128x128xf32>
      %300 = vector.shape_cast %299 : vector<1x128x128xf32> to vector<128x128xf32>
      %cst_254 = arith.constant dense<0.000000e+00> : vector<128x128xf32>
      %301 = tpu.matmul %298, %300, %cst_254 {dimension_numbers = #tpu.dot_dimension_numbers<[1], [0], [0], [1], [0, 0, 1, 1], [], []>} : vector<128x128xf32>, vector<128x128xf32>, vector<128x128xf32> -> vector<128x128xf32>
      %302 = arith.addf %295, %301 : vector<128x128xf32>
      %c256_i32 = arith.constant 256 : i32
      %303 = arith.addi %161, %c256_i32 : i32
      %304 = arith.index_cast %303 : i32 to index
      %c0_255 = arith.constant 0 : index
      %305 = vector.load %arg16[%304, %c0_255] : memref<1344x128xf32, #tpu.memory_space<vmem>>, vector<128x128xf32>
      %c20_256 = arith.constant 20 : index
      %c0_257 = arith.constant 0 : index
      %c0_258 = arith.constant 0 : index
      %306 = vector.load %arg4[%c20_256, %c0_257, %c0_258] : memref<25x128x128xf32, #tpu.memory_space<vmem>>, vector<1x128x128xf32>
      %307 = vector.shape_cast %306 : vector<1x128x128xf32> to vector<128x128xf32>
      %cst_259 = arith.constant dense<0.000000e+00> : vector<128x128xf32>
      %308 = tpu.matmul %305, %307, %cst_259 {dimension_numbers = #tpu.dot_dimension_numbers<[1], [0], [0], [1], [0, 0, 1, 1], [], []>} : vector<128x128xf32>, vector<128x128xf32>, vector<128x128xf32> -> vector<128x128xf32>
      %309 = arith.addf %302, %308 : vector<128x128xf32>
      %c258_i32 = arith.constant 258 : i32
      %310 = arith.addi %161, %c258_i32 : i32
      %311 = arith.index_cast %310 : i32 to index
      %c0_260 = arith.constant 0 : index
      %312 = vector.load %arg16[%311, %c0_260] : memref<1344x128xf32, #tpu.memory_space<vmem>>, vector<128x128xf32>
      %c21_261 = arith.constant 21 : index
      %c0_262 = arith.constant 0 : index
      %c0_263 = arith.constant 0 : index
      %313 = vector.load %arg4[%c21_261, %c0_262, %c0_263] : memref<25x128x128xf32, #tpu.memory_space<vmem>>, vector<1x128x128xf32>
      %314 = vector.shape_cast %313 : vector<1x128x128xf32> to vector<128x128xf32>
      %cst_264 = arith.constant dense<0.000000e+00> : vector<128x128xf32>
      %315 = tpu.matmul %312, %314, %cst_264 {dimension_numbers = #tpu.dot_dimension_numbers<[1], [0], [0], [1], [0, 0, 1, 1], [], []>} : vector<128x128xf32>, vector<128x128xf32>, vector<128x128xf32> -> vector<128x128xf32>
      %316 = arith.addf %309, %315 : vector<128x128xf32>
      %c260_i32 = arith.constant 260 : i32
      %317 = arith.addi %161, %c260_i32 : i32
      %318 = arith.index_cast %317 : i32 to index
      %c0_265 = arith.constant 0 : index
      %319 = vector.load %arg16[%318, %c0_265] : memref<1344x128xf32, #tpu.memory_space<vmem>>, vector<128x128xf32>
      %c22_266 = arith.constant 22 : index
      %c0_267 = arith.constant 0 : index
      %c0_268 = arith.constant 0 : index
      %320 = vector.load %arg4[%c22_266, %c0_267, %c0_268] : memref<25x128x128xf32, #tpu.memory_space<vmem>>, vector<1x128x128xf32>
      %321 = vector.shape_cast %320 : vector<1x128x128xf32> to vector<128x128xf32>
      %cst_269 = arith.constant dense<0.000000e+00> : vector<128x128xf32>
      %322 = tpu.matmul %319, %321, %cst_269 {dimension_numbers = #tpu.dot_dimension_numbers<[1], [0], [0], [1], [0, 0, 1, 1], [], []>} : vector<128x128xf32>, vector<128x128xf32>, vector<128x128xf32> -> vector<128x128xf32>
      %323 = arith.addf %316, %322 : vector<128x128xf32>
      %c262_i32 = arith.constant 262 : i32
      %324 = arith.addi %161, %c262_i32 : i32
      %325 = arith.index_cast %324 : i32 to index
      %c0_270 = arith.constant 0 : index
      %326 = vector.load %arg16[%325, %c0_270] : memref<1344x128xf32, #tpu.memory_space<vmem>>, vector<128x128xf32>
      %c23_271 = arith.constant 23 : index
      %c0_272 = arith.constant 0 : index
      %c0_273 = arith.constant 0 : index
      %327 = vector.load %arg4[%c23_271, %c0_272, %c0_273] : memref<25x128x128xf32, #tpu.memory_space<vmem>>, vector<1x128x128xf32>
      %328 = vector.shape_cast %327 : vector<1x128x128xf32> to vector<128x128xf32>
      %cst_274 = arith.constant dense<0.000000e+00> : vector<128x128xf32>
      %329 = tpu.matmul %326, %328, %cst_274 {dimension_numbers = #tpu.dot_dimension_numbers<[1], [0], [0], [1], [0, 0, 1, 1], [], []>} : vector<128x128xf32>, vector<128x128xf32>, vector<128x128xf32> -> vector<128x128xf32>
      %330 = arith.addf %323, %329 : vector<128x128xf32>
      %c264_i32 = arith.constant 264 : i32
      %331 = arith.addi %161, %c264_i32 : i32
      %332 = arith.index_cast %331 : i32 to index
      %c0_275 = arith.constant 0 : index
      %333 = vector.load %arg16[%332, %c0_275] : memref<1344x128xf32, #tpu.memory_space<vmem>>, vector<128x128xf32>
      %c24_276 = arith.constant 24 : index
      %c0_277 = arith.constant 0 : index
      %c0_278 = arith.constant 0 : index
      %334 = vector.load %arg4[%c24_276, %c0_277, %c0_278] : memref<25x128x128xf32, #tpu.memory_space<vmem>>, vector<1x128x128xf32>
      %335 = vector.shape_cast %334 : vector<1x128x128xf32> to vector<128x128xf32>
      %cst_279 = arith.constant dense<0.000000e+00> : vector<128x128xf32>
      %336 = tpu.matmul %333, %335, %cst_279 {dimension_numbers = #tpu.dot_dimension_numbers<[1], [0], [0], [1], [0, 0, 1, 1], [], []>} : vector<128x128xf32>, vector<128x128xf32>, vector<128x128xf32> -> vector<128x128xf32>
      %337 = arith.addf %330, %336 : vector<128x128xf32>
      %338 = vector.broadcast %4 : vector<1x128xf32> to vector<128x128xf32>
      %339 = arith.addf %337, %338 : vector<128x128xf32>
      %cst_280 = arith.constant 0.000000e+00 : f32
      %340 = vector.broadcast %cst_280 : f32 to vector<128x128xf32>
      %341 = arith.maximumf %339, %340 : vector<128x128xf32>
      %342 = arith.index_cast %161 : i32 to index
      %c0_281 = arith.constant 0 : index
      %343 = vector.load %arg15[%342, %c0_281] : memref<1344x128xf32, #tpu.memory_space<vmem>>, vector<128x128xf32>
      tpu.vector_store %arg15[%342, %c0_281], %341 {strides = array<i32>} : memref<1344x128xf32, #tpu.memory_space<vmem>>, vector<128x128xf32>,
    }
    %c8_i32_14 = arith.constant 8 : i32
    %c0_i32_15 = arith.constant 0 : i32
    %c8_i32_16 = arith.constant 8 : i32
    %8 = arith.addi %c0_i32_15, %c8_i32_16 : i32
    %c1_i32_17 = arith.constant 1 : i32
    scf.for %arg17 = %c0_i32_15 to %8 step %c1_i32_17  : i32 {
      %c1_i32_149 = arith.constant 1 : i32
      %158 = arith.muli %arg17, %c1_i32_149 : i32
      %c0_i32_150 = arith.constant 0 : i32
      %159 = arith.addi %c0_i32_150, %158 : i32
      %c128_i32 = arith.constant 128 : i32
      %160 = arith.muli %159, %c128_i32 : i32
      %161 = tpu.assume_multiple %160, 128 : i32
      %162 = arith.index_cast %161 : i32 to index
      %c0_151 = arith.constant 0 : index
      %163 = vector.load %arg15[%162, %c0_151] : memref<1344x128xf32, #tpu.memory_space<vmem>>, vector<128x128xf32>
      %c2_i32 = arith.constant 2 : i32
      %164 = arith.addi %161, %c2_i32 : i32
      %165 = arith.index_cast %164 : i32 to index
      %c0_152 = arith.constant 0 : index
      %166 = vector.load %arg15[%165, %c0_152] : memref<1344x128xf32, #tpu.memory_space<vmem>>, vector<128x128xf32>
      %167 = arith.maximumf %163, %166 : vector<128x128xf32>
      %c64_i32 = arith.constant 64 : i32
      %168 = arith.addi %161, %c64_i32 : i32
      %169 = arith.index_cast %168 : i32 to index
      %c0_153 = arith.constant 0 : index
      %170 = vector.load %arg15[%169, %c0_153] : memref<1344x128xf32, #tpu.memory_space<vmem>>, vector<128x128xf32>
      %171 = arith.maximumf %167, %170 : vector<128x128xf32>
      %c64_i32_154 = arith.constant 64 : i32
      %172 = arith.addi %161, %c64_i32_154 : i32
      %c2_i32_155 = arith.constant 2 : i32
      %173 = arith.addi %172, %c2_i32_155 : i32
      %174 = arith.index_cast %173 : i32 to index
      %c0_156 = arith.constant 0 : index
      %175 = vector.load %arg15[%174, %c0_156] : memref<1344x128xf32, #tpu.memory_space<vmem>>, vector<128x128xf32>
      %176 = arith.maximumf %171, %175 : vector<128x128xf32>
      %177 = arith.index_cast %161 : i32 to index
      %c0_157 = arith.constant 0 : index
      %178 = vector.load %arg16[%177, %c0_157] : memref<1344x128xf32, #tpu.memory_space<vmem>>, vector<128x128xf32>
      tpu.vector_store %arg16[%177, %c0_157], %176 {strides = array<i32>} : memref<1344x128xf32, #tpu.memory_space<vmem>>, vector<128x128xf32>,
    }
    %c8_i32_18 = arith.constant 8 : i32
    %cst_19 = arith.constant 0.000000e+00 : f32
    %9 = vector.broadcast %cst_19 : f32 to vector<1x128xf32>
    %c0_20 = arith.constant 0 : index
    %c0_21 = arith.constant 0 : index
    %10 = vector.load %arg16[%c0_20, %c0_21] : memref<1344x128xf32, #tpu.memory_space<vmem>>, vector<1x128xf32>
    %c0_22 = arith.constant 0 : index
    %c0_23 = arith.constant 0 : index
    %c0_24 = arith.constant 0 : index
    %11 = vector.load %arg6[%c0_22, %c0_23, %c0_24] : memref<25x128x128xf32, #tpu.memory_space<vmem>>, vector<1x128x128xf32>
    %12 = vector.shape_cast %11 : vector<1x128x128xf32> to vector<128x128xf32>
    %cst_25 = arith.constant dense<0.000000e+00> : vector<1x128xf32>
    %13 = tpu.matmul %10, %12, %cst_25 {dimension_numbers = #tpu.dot_dimension_numbers<[1], [0], [0], [1], [0, 0, 1, 1], [], []>} : vector<1x128xf32>, vector<128x128xf32>, vector<1x128xf32> -> vector<1x128xf32>
    %14 = arith.addf %9, %13 : vector<1x128xf32>
    %c4 = arith.constant 4 : index
    %c0_26 = arith.constant 0 : index
    %15 = vector.load %arg16[%c4, %c0_26] : memref<1344x128xf32, #tpu.memory_space<vmem>>, vector<1x128xf32>
    %c1 = arith.constant 1 : index
    %c0_27 = arith.constant 0 : index
    %c0_28 = arith.constant 0 : index
    %16 = vector.load %arg6[%c1, %c0_27, %c0_28] : memref<25x128x128xf32, #tpu.memory_space<vmem>>, vector<1x128x128xf32>
    %17 = vector.shape_cast %16 : vector<1x128x128xf32> to vector<128x128xf32>
    %cst_29 = arith.constant dense<0.000000e+00> : vector<1x128xf32>
    %18 = tpu.matmul %15, %17, %cst_29 {dimension_numbers = #tpu.dot_dimension_numbers<[1], [0], [0], [1], [0, 0, 1, 1], [], []>} : vector<1x128xf32>, vector<128x128xf32>, vector<1x128xf32> -> vector<1x128xf32>
    %19 = arith.addf %14, %18 : vector<1x128xf32>
    %c8 = arith.constant 8 : index
    %c0_30 = arith.constant 0 : index
    %20 = vector.load %arg16[%c8, %c0_30] : memref<1344x128xf32, #tpu.memory_space<vmem>>, vector<1x128xf32>
    %c2 = arith.constant 2 : index
    %c0_31 = arith.constant 0 : index
    %c0_32 = arith.constant 0 : index
    %21 = vector.load %arg6[%c2, %c0_31, %c0_32] : memref<25x128x128xf32, #tpu.memory_space<vmem>>, vector<1x128x128xf32>
    %22 = vector.shape_cast %21 : vector<1x128x128xf32> to vector<128x128xf32>
    %cst_33 = arith.constant dense<0.000000e+00> : vector<1x128xf32>
    %23 = tpu.matmul %20, %22, %cst_33 {dimension_numbers = #tpu.dot_dimension_numbers<[1], [0], [0], [1], [0, 0, 1, 1], [], []>} : vector<1x128xf32>, vector<128x128xf32>, vector<1x128xf32> -> vector<1x128xf32>
    %24 = arith.addf %19, %23 : vector<1x128xf32>
    %c12 = arith.constant 12 : index
    %c0_34 = arith.constant 0 : index
    %25 = vector.load %arg16[%c12, %c0_34] : memref<1344x128xf32, #tpu.memory_space<vmem>>, vector<1x128xf32>
    %c3 = arith.constant 3 : index
    %c0_35 = arith.constant 0 : index
    %c0_36 = arith.constant 0 : index
    %26 = vector.load %arg6[%c3, %c0_35, %c0_36] : memref<25x128x128xf32, #tpu.memory_space<vmem>>, vector<1x128x128xf32>
    %27 = vector.shape_cast %26 : vector<1x128x128xf32> to vector<128x128xf32>
    %cst_37 = arith.constant dense<0.000000e+00> : vector<1x128xf32>
    %28 = tpu.matmul %25, %27, %cst_37 {dimension_numbers = #tpu.dot_dimension_numbers<[1], [0], [0], [1], [0, 0, 1, 1], [], []>} : vector<1x128xf32>, vector<128x128xf32>, vector<1x128xf32> -> vector<1x128xf32>
    %29 = arith.addf %24, %28 : vector<1x128xf32>
    %c16 = arith.constant 16 : index
    %c0_38 = arith.constant 0 : index
    %30 = vector.load %arg16[%c16, %c0_38] : memref<1344x128xf32, #tpu.memory_space<vmem>>, vector<1x128xf32>
    %c4_39 = arith.constant 4 : index
    %c0_40 = arith.constant 0 : index
    %c0_41 = arith.constant 0 : index
    %31 = vector.load %arg6[%c4_39, %c0_40, %c0_41] : memref<25x128x128xf32, #tpu.memory_space<vmem>>, vector<1x128x128xf32>
    %32 = vector.shape_cast %31 : vector<1x128x128xf32> to vector<128x128xf32>
    %cst_42 = arith.constant dense<0.000000e+00> : vector<1x128xf32>
    %33 = tpu.matmul %30, %32, %cst_42 {dimension_numbers = #tpu.dot_dimension_numbers<[1], [0], [0], [1], [0, 0, 1, 1], [], []>} : vector<1x128xf32>, vector<128x128xf32>, vector<1x128xf32> -> vector<1x128xf32>
    %34 = arith.addf %29, %33 : vector<1x128xf32>
    %c128 = arith.constant 128 : index
    %c0_43 = arith.constant 0 : index
    %35 = vector.load %arg16[%c128, %c0_43] : memref<1344x128xf32, #tpu.memory_space<vmem>>, vector<1x128xf32>
    %c5 = arith.constant 5 : index
    %c0_44 = arith.constant 0 : index
    %c0_45 = arith.constant 0 : index
    %36 = vector.load %arg6[%c5, %c0_44, %c0_45] : memref<25x128x128xf32, #tpu.memory_space<vmem>>, vector<1x128x128xf32>
    %37 = vector.shape_cast %36 : vector<1x128x128xf32> to vector<128x128xf32>
    %cst_46 = arith.constant dense<0.000000e+00> : vector<1x128xf32>
    %38 = tpu.matmul %35, %37, %cst_46 {dimension_numbers = #tpu.dot_dimension_numbers<[1], [0], [0], [1], [0, 0, 1, 1], [], []>} : vector<1x128xf32>, vector<128x128xf32>, vector<1x128xf32> -> vector<1x128xf32>
    %39 = arith.addf %34, %38 : vector<1x128xf32>
    %c132 = arith.constant 132 : index
    %c0_47 = arith.constant 0 : index
    %40 = vector.load %arg16[%c132, %c0_47] : memref<1344x128xf32, #tpu.memory_space<vmem>>, vector<1x128xf32>
    %c6 = arith.constant 6 : index
    %c0_48 = arith.constant 0 : index
    %c0_49 = arith.constant 0 : index
    %41 = vector.load %arg6[%c6, %c0_48, %c0_49] : memref<25x128x128xf32, #tpu.memory_space<vmem>>, vector<1x128x128xf32>
    %42 = vector.shape_cast %41 : vector<1x128x128xf32> to vector<128x128xf32>
    %cst_50 = arith.constant dense<0.000000e+00> : vector<1x128xf32>
    %43 = tpu.matmul %40, %42, %cst_50 {dimension_numbers = #tpu.dot_dimension_numbers<[1], [0], [0], [1], [0, 0, 1, 1], [], []>} : vector<1x128xf32>, vector<128x128xf32>, vector<1x128xf32> -> vector<1x128xf32>
    %44 = arith.addf %39, %43 : vector<1x128xf32>
    %c136 = arith.constant 136 : index
    %c0_51 = arith.constant 0 : index
    %45 = vector.load %arg16[%c136, %c0_51] : memref<1344x128xf32, #tpu.memory_space<vmem>>, vector<1x128xf32>
    %c7 = arith.constant 7 : index
    %c0_52 = arith.constant 0 : index
    %c0_53 = arith.constant 0 : index
    %46 = vector.load %arg6[%c7, %c0_52, %c0_53] : memref<25x128x128xf32, #tpu.memory_space<vmem>>, vector<1x128x128xf32>
    %47 = vector.shape_cast %46 : vector<1x128x128xf32> to vector<128x128xf32>
    %cst_54 = arith.constant dense<0.000000e+00> : vector<1x128xf32>
    %48 = tpu.matmul %45, %47, %cst_54 {dimension_numbers = #tpu.dot_dimension_numbers<[1], [0], [0], [1], [0, 0, 1, 1], [], []>} : vector<1x128xf32>, vector<128x128xf32>, vector<1x128xf32> -> vector<1x128xf32>
    %49 = arith.addf %44, %48 : vector<1x128xf32>
    %c140 = arith.constant 140 : index
    %c0_55 = arith.constant 0 : index
    %50 = vector.load %arg16[%c140, %c0_55] : memref<1344x128xf32, #tpu.memory_space<vmem>>, vector<1x128xf32>
    %c8_56 = arith.constant 8 : index
    %c0_57 = arith.constant 0 : index
    %c0_58 = arith.constant 0 : index
    %51 = vector.load %arg6[%c8_56, %c0_57, %c0_58] : memref<25x128x128xf32, #tpu.memory_space<vmem>>, vector<1x128x128xf32>
    %52 = vector.shape_cast %51 : vector<1x128x128xf32> to vector<128x128xf32>
    %cst_59 = arith.constant dense<0.000000e+00> : vector<1x128xf32>
    %53 = tpu.matmul %50, %52, %cst_59 {dimension_numbers = #tpu.dot_dimension_numbers<[1], [0], [0], [1], [0, 0, 1, 1], [], []>} : vector<1x128xf32>, vector<128x128xf32>, vector<1x128xf32> -> vector<1x128xf32>
    %54 = arith.addf %49, %53 : vector<1x128xf32>
    %c144 = arith.constant 144 : index
    %c0_60 = arith.constant 0 : index
    %55 = vector.load %arg16[%c144, %c0_60] : memref<1344x128xf32, #tpu.memory_space<vmem>>, vector<1x128xf32>
    %c9 = arith.constant 9 : index
    %c0_61 = arith.constant 0 : index
    %c0_62 = arith.constant 0 : index
    %56 = vector.load %arg6[%c9, %c0_61, %c0_62] : memref<25x128x128xf32, #tpu.memory_space<vmem>>, vector<1x128x128xf32>
    %57 = vector.shape_cast %56 : vector<1x128x128xf32> to vector<128x128xf32>
    %cst_63 = arith.constant dense<0.000000e+00> : vector<1x128xf32>
    %58 = tpu.matmul %55, %57, %cst_63 {dimension_numbers = #tpu.dot_dimension_numbers<[1], [0], [0], [1], [0, 0, 1, 1], [], []>} : vector<1x128xf32>, vector<128x128xf32>, vector<1x128xf32> -> vector<1x128xf32>
    %59 = arith.addf %54, %58 : vector<1x128xf32>
    %c256 = arith.constant 256 : index
    %c0_64 = arith.constant 0 : index
    %60 = vector.load %arg16[%c256, %c0_64] : memref<1344x128xf32, #tpu.memory_space<vmem>>, vector<1x128xf32>
    %c10 = arith.constant 10 : index
    %c0_65 = arith.constant 0 : index
    %c0_66 = arith.constant 0 : index
    %61 = vector.load %arg6[%c10, %c0_65, %c0_66] : memref<25x128x128xf32, #tpu.memory_space<vmem>>, vector<1x128x128xf32>
    %62 = vector.shape_cast %61 : vector<1x128x128xf32> to vector<128x128xf32>
    %cst_67 = arith.constant dense<0.000000e+00> : vector<1x128xf32>
    %63 = tpu.matmul %60, %62, %cst_67 {dimension_numbers = #tpu.dot_dimension_numbers<[1], [0], [0], [1], [0, 0, 1, 1], [], []>} : vector<1x128xf32>, vector<128x128xf32>, vector<1x128xf32> -> vector<1x128xf32>
    %64 = arith.addf %59, %63 : vector<1x128xf32>
    %c260 = arith.constant 260 : index
    %c0_68 = arith.constant 0 : index
    %65 = vector.load %arg16[%c260, %c0_68] : memref<1344x128xf32, #tpu.memory_space<vmem>>, vector<1x128xf32>
    %c11 = arith.constant 11 : index
    %c0_69 = arith.constant 0 : index
    %c0_70 = arith.constant 0 : index
    %66 = vector.load %arg6[%c11, %c0_69, %c0_70] : memref<25x128x128xf32, #tpu.memory_space<vmem>>, vector<1x128x128xf32>
    %67 = vector.shape_cast %66 : vector<1x128x128xf32> to vector<128x128xf32>
    %cst_71 = arith.constant dense<0.000000e+00> : vector<1x128xf32>
    %68 = tpu.matmul %65, %67, %cst_71 {dimension_numbers = #tpu.dot_dimension_numbers<[1], [0], [0], [1], [0, 0, 1, 1], [], []>} : vector<1x128xf32>, vector<128x128xf32>, vector<1x128xf32> -> vector<1x128xf32>
    %69 = arith.addf %64, %68 : vector<1x128xf32>
    %c264 = arith.constant 264 : index
    %c0_72 = arith.constant 0 : index
    %70 = vector.load %arg16[%c264, %c0_72] : memref<1344x128xf32, #tpu.memory_space<vmem>>, vector<1x128xf32>
    %c12_73 = arith.constant 12 : index
    %c0_74 = arith.constant 0 : index
    %c0_75 = arith.constant 0 : index
    %71 = vector.load %arg6[%c12_73, %c0_74, %c0_75] : memref<25x128x128xf32, #tpu.memory_space<vmem>>, vector<1x128x128xf32>
    %72 = vector.shape_cast %71 : vector<1x128x128xf32> to vector<128x128xf32>
    %cst_76 = arith.constant dense<0.000000e+00> : vector<1x128xf32>
    %73 = tpu.matmul %70, %72, %cst_76 {dimension_numbers = #tpu.dot_dimension_numbers<[1], [0], [0], [1], [0, 0, 1, 1], [], []>} : vector<1x128xf32>, vector<128x128xf32>, vector<1x128xf32> -> vector<1x128xf32>
    %74 = arith.addf %69, %73 : vector<1x128xf32>
    %c268 = arith.constant 268 : index
    %c0_77 = arith.constant 0 : index
    %75 = vector.load %arg16[%c268, %c0_77] : memref<1344x128xf32, #tpu.memory_space<vmem>>, vector<1x128xf32>
    %c13 = arith.constant 13 : index
    %c0_78 = arith.constant 0 : index
    %c0_79 = arith.constant 0 : index
    %76 = vector.load %arg6[%c13, %c0_78, %c0_79] : memref<25x128x128xf32, #tpu.memory_space<vmem>>, vector<1x128x128xf32>
    %77 = vector.shape_cast %76 : vector<1x128x128xf32> to vector<128x128xf32>
    %cst_80 = arith.constant dense<0.000000e+00> : vector<1x128xf32>
    %78 = tpu.matmul %75, %77, %cst_80 {dimension_numbers = #tpu.dot_dimension_numbers<[1], [0], [0], [1], [0, 0, 1, 1], [], []>} : vector<1x128xf32>, vector<128x128xf32>, vector<1x128xf32> -> vector<1x128xf32>
    %79 = arith.addf %74, %78 : vector<1x128xf32>
    %c272 = arith.constant 272 : index
    %c0_81 = arith.constant 0 : index
    %80 = vector.load %arg16[%c272, %c0_81] : memref<1344x128xf32, #tpu.memory_space<vmem>>, vector<1x128xf32>
    %c14 = arith.constant 14 : index
    %c0_82 = arith.constant 0 : index
    %c0_83 = arith.constant 0 : index
    %81 = vector.load %arg6[%c14, %c0_82, %c0_83] : memref<25x128x128xf32, #tpu.memory_space<vmem>>, vector<1x128x128xf32>
    %82 = vector.shape_cast %81 : vector<1x128x128xf32> to vector<128x128xf32>
    %cst_84 = arith.constant dense<0.000000e+00> : vector<1x128xf32>
    %83 = tpu.matmul %80, %82, %cst_84 {dimension_numbers = #tpu.dot_dimension_numbers<[1], [0], [0], [1], [0, 0, 1, 1], [], []>} : vector<1x128xf32>, vector<128x128xf32>, vector<1x128xf32> -> vector<1x128xf32>
    %84 = arith.addf %79, %83 : vector<1x128xf32>
    %c384 = arith.constant 384 : index
    %c0_85 = arith.constant 0 : index
    %85 = vector.load %arg16[%c384, %c0_85] : memref<1344x128xf32, #tpu.memory_space<vmem>>, vector<1x128xf32>
    %c15 = arith.constant 15 : index
    %c0_86 = arith.constant 0 : index
    %c0_87 = arith.constant 0 : index
    %86 = vector.load %arg6[%c15, %c0_86, %c0_87] : memref<25x128x128xf32, #tpu.memory_space<vmem>>, vector<1x128x128xf32>
    %87 = vector.shape_cast %86 : vector<1x128x128xf32> to vector<128x128xf32>
    %cst_88 = arith.constant dense<0.000000e+00> : vector<1x128xf32>
    %88 = tpu.matmul %85, %87, %cst_88 {dimension_numbers = #tpu.dot_dimension_numbers<[1], [0], [0], [1], [0, 0, 1, 1], [], []>} : vector<1x128xf32>, vector<128x128xf32>, vector<1x128xf32> -> vector<1x128xf32>
    %89 = arith.addf %84, %88 : vector<1x128xf32>
    %c388 = arith.constant 388 : index
    %c0_89 = arith.constant 0 : index
    %90 = vector.load %arg16[%c388, %c0_89] : memref<1344x128xf32, #tpu.memory_space<vmem>>, vector<1x128xf32>
    %c16_90 = arith.constant 16 : index
    %c0_91 = arith.constant 0 : index
    %c0_92 = arith.constant 0 : index
    %91 = vector.load %arg6[%c16_90, %c0_91, %c0_92] : memref<25x128x128xf32, #tpu.memory_space<vmem>>, vector<1x128x128xf32>
    %92 = vector.shape_cast %91 : vector<1x128x128xf32> to vector<128x128xf32>
    %cst_93 = arith.constant dense<0.000000e+00> : vector<1x128xf32>
    %93 = tpu.matmul %90, %92, %cst_93 {dimension_numbers = #tpu.dot_dimension_numbers<[1], [0], [0], [1], [0, 0, 1, 1], [], []>} : vector<1x128xf32>, vector<128x128xf32>, vector<1x128xf32> -> vector<1x128xf32>
    %94 = arith.addf %89, %93 : vector<1x128xf32>
    %c392 = arith.constant 392 : index
    %c0_94 = arith.constant 0 : index
    %95 = vector.load %arg16[%c392, %c0_94] : memref<1344x128xf32, #tpu.memory_space<vmem>>, vector<1x128xf32>
    %c17 = arith.constant 17 : index
    %c0_95 = arith.constant 0 : index
    %c0_96 = arith.constant 0 : index
    %96 = vector.load %arg6[%c17, %c0_95, %c0_96] : memref<25x128x128xf32, #tpu.memory_space<vmem>>, vector<1x128x128xf32>
    %97 = vector.shape_cast %96 : vector<1x128x128xf32> to vector<128x128xf32>
    %cst_97 = arith.constant dense<0.000000e+00> : vector<1x128xf32>
    %98 = tpu.matmul %95, %97, %cst_97 {dimension_numbers = #tpu.dot_dimension_numbers<[1], [0], [0], [1], [0, 0, 1, 1], [], []>} : vector<1x128xf32>, vector<128x128xf32>, vector<1x128xf32> -> vector<1x128xf32>
    %99 = arith.addf %94, %98 : vector<1x128xf32>
    %c396 = arith.constant 396 : index
    %c0_98 = arith.constant 0 : index
    %100 = vector.load %arg16[%c396, %c0_98] : memref<1344x128xf32, #tpu.memory_space<vmem>>, vector<1x128xf32>
    %c18 = arith.constant 18 : index
    %c0_99 = arith.constant 0 : index
    %c0_100 = arith.constant 0 : index
    %101 = vector.load %arg6[%c18, %c0_99, %c0_100] : memref<25x128x128xf32, #tpu.memory_space<vmem>>, vector<1x128x128xf32>
    %102 = vector.shape_cast %101 : vector<1x128x128xf32> to vector<128x128xf32>
    %cst_101 = arith.constant dense<0.000000e+00> : vector<1x128xf32>
    %103 = tpu.matmul %100, %102, %cst_101 {dimension_numbers = #tpu.dot_dimension_numbers<[1], [0], [0], [1], [0, 0, 1, 1], [], []>} : vector<1x128xf32>, vector<128x128xf32>, vector<1x128xf32> -> vector<1x128xf32>
    %104 = arith.addf %99, %103 : vector<1x128xf32>
    %c400 = arith.constant 400 : index
    %c0_102 = arith.constant 0 : index
    %105 = vector.load %arg16[%c400, %c0_102] : memref<1344x128xf32, #tpu.memory_space<vmem>>, vector<1x128xf32>
    %c19 = arith.constant 19 : index
    %c0_103 = arith.constant 0 : index
    %c0_104 = arith.constant 0 : index
    %106 = vector.load %arg6[%c19, %c0_103, %c0_104] : memref<25x128x128xf32, #tpu.memory_space<vmem>>, vector<1x128x128xf32>
    %107 = vector.shape_cast %106 : vector<1x128x128xf32> to vector<128x128xf32>
    %cst_105 = arith.constant dense<0.000000e+00> : vector<1x128xf32>
    %108 = tpu.matmul %105, %107, %cst_105 {dimension_numbers = #tpu.dot_dimension_numbers<[1], [0], [0], [1], [0, 0, 1, 1], [], []>} : vector<1x128xf32>, vector<128x128xf32>, vector<1x128xf32> -> vector<1x128xf32>
    %109 = arith.addf %104, %108 : vector<1x128xf32>
    %c512 = arith.constant 512 : index
    %c0_106 = arith.constant 0 : index
    %110 = vector.load %arg16[%c512, %c0_106] : memref<1344x128xf32, #tpu.memory_space<vmem>>, vector<1x128xf32>
    %c20 = arith.constant 20 : index
    %c0_107 = arith.constant 0 : index
    %c0_108 = arith.constant 0 : index
    %111 = vector.load %arg6[%c20, %c0_107, %c0_108] : memref<25x128x128xf32, #tpu.memory_space<vmem>>, vector<1x128x128xf32>
    %112 = vector.shape_cast %111 : vector<1x128x128xf32> to vector<128x128xf32>
    %cst_109 = arith.constant dense<0.000000e+00> : vector<1x128xf32>
    %113 = tpu.matmul %110, %112, %cst_109 {dimension_numbers = #tpu.dot_dimension_numbers<[1], [0], [0], [1], [0, 0, 1, 1], [], []>} : vector<1x128xf32>, vector<128x128xf32>, vector<1x128xf32> -> vector<1x128xf32>
    %114 = arith.addf %109, %113 : vector<1x128xf32>
    %c516 = arith.constant 516 : index
    %c0_110 = arith.constant 0 : index
    %115 = vector.load %arg16[%c516, %c0_110] : memref<1344x128xf32, #tpu.memory_space<vmem>>, vector<1x128xf32>
    %c21 = arith.constant 21 : index
    %c0_111 = arith.constant 0 : index
    %c0_112 = arith.constant 0 : index
    %116 = vector.load %arg6[%c21, %c0_111, %c0_112] : memref<25x128x128xf32, #tpu.memory_space<vmem>>, vector<1x128x128xf32>
    %117 = vector.shape_cast %116 : vector<1x128x128xf32> to vector<128x128xf32>
    %cst_113 = arith.constant dense<0.000000e+00> : vector<1x128xf32>
    %118 = tpu.matmul %115, %117, %cst_113 {dimension_numbers = #tpu.dot_dimension_numbers<[1], [0], [0], [1], [0, 0, 1, 1], [], []>} : vector<1x128xf32>, vector<128x128xf32>, vector<1x128xf32> -> vector<1x128xf32>
    %119 = arith.addf %114, %118 : vector<1x128xf32>
    %c520 = arith.constant 520 : index
    %c0_114 = arith.constant 0 : index
    %120 = vector.load %arg16[%c520, %c0_114] : memref<1344x128xf32, #tpu.memory_space<vmem>>, vector<1x128xf32>
    %c22 = arith.constant 22 : index
    %c0_115 = arith.constant 0 : index
    %c0_116 = arith.constant 0 : index
    %121 = vector.load %arg6[%c22, %c0_115, %c0_116] : memref<25x128x128xf32, #tpu.memory_space<vmem>>, vector<1x128x128xf32>
    %122 = vector.shape_cast %121 : vector<1x128x128xf32> to vector<128x128xf32>
    %cst_117 = arith.constant dense<0.000000e+00> : vector<1x128xf32>
    %123 = tpu.matmul %120, %122, %cst_117 {dimension_numbers = #tpu.dot_dimension_numbers<[1], [0], [0], [1], [0, 0, 1, 1], [], []>} : vector<1x128xf32>, vector<128x128xf32>, vector<1x128xf32> -> vector<1x128xf32>
    %124 = arith.addf %119, %123 : vector<1x128xf32>
    %c524 = arith.constant 524 : index
    %c0_118 = arith.constant 0 : index
    %125 = vector.load %arg16[%c524, %c0_118] : memref<1344x128xf32, #tpu.memory_space<vmem>>, vector<1x128xf32>
    %c23 = arith.constant 23 : index
    %c0_119 = arith.constant 0 : index
    %c0_120 = arith.constant 0 : index
    %126 = vector.load %arg6[%c23, %c0_119, %c0_120] : memref<25x128x128xf32, #tpu.memory_space<vmem>>, vector<1x128x128xf32>
    %127 = vector.shape_cast %126 : vector<1x128x128xf32> to vector<128x128xf32>
    %cst_121 = arith.constant dense<0.000000e+00> : vector<1x128xf32>
    %128 = tpu.matmul %125, %127, %cst_121 {dimension_numbers = #tpu.dot_dimension_numbers<[1], [0], [0], [1], [0, 0, 1, 1], [], []>} : vector<1x128xf32>, vector<128x128xf32>, vector<1x128xf32> -> vector<1x128xf32>
    %129 = arith.addf %124, %128 : vector<1x128xf32>
    %c528 = arith.constant 528 : index
    %c0_122 = arith.constant 0 : index
    %130 = vector.load %arg16[%c528, %c0_122] : memref<1344x128xf32, #tpu.memory_space<vmem>>, vector<1x128xf32>
    %c24 = arith.constant 24 : index
    %c0_123 = arith.constant 0 : index
    %c0_124 = arith.constant 0 : index
    %131 = vector.load %arg6[%c24, %c0_123, %c0_124] : memref<25x128x128xf32, #tpu.memory_space<vmem>>, vector<1x128x128xf32>
    %132 = vector.shape_cast %131 : vector<1x128x128xf32> to vector<128x128xf32>
    %cst_125 = arith.constant dense<0.000000e+00> : vector<1x128xf32>
    %133 = tpu.matmul %130, %132, %cst_125 {dimension_numbers = #tpu.dot_dimension_numbers<[1], [0], [0], [1], [0, 0, 1, 1], [], []>} : vector<1x128xf32>, vector<128x128xf32>, vector<1x128xf32> -> vector<1x128xf32>
    %134 = arith.addf %129, %133 : vector<1x128xf32>
    %c0_126 = arith.constant 0 : index
    %c0_127 = arith.constant 0 : index
    %135 = vector.load %arg7[%c0_126, %c0_127] : memref<1x128xf32, #tpu.memory_space<vmem>>, vector<1x128xf32>
    %136 = arith.addf %134, %135 : vector<1x128xf32>
    %cst_128 = arith.constant 0.000000e+00 : f32
    %137 = vector.broadcast %cst_128 : f32 to vector<1x128xf32>
    %138 = arith.maximumf %136, %137 : vector<1x128xf32>
    %c0_129 = arith.constant 0 : index
    %c0_130 = arith.constant 0 : index
    %139 = vector.load %arg8[%c0_129, %c0_130] : memref<128x128xf32, #tpu.memory_space<vmem>>, vector<128x128xf32>
    %cst_131 = arith.constant dense<0.000000e+00> : vector<1x128xf32>
    %140 = tpu.matmul %138, %139, %cst_131 {dimension_numbers = #tpu.dot_dimension_numbers<[1], [0], [0], [1], [0, 0, 1, 1], [], []>} : vector<1x128xf32>, vector<128x128xf32>, vector<1x128xf32> -> vector<1x128xf32>
    %c0_132 = arith.constant 0 : index
    %c0_133 = arith.constant 0 : index
    %141 = vector.load %arg9[%c0_132, %c0_133] : memref<1x128xf32, #tpu.memory_space<vmem>>, vector<1x128xf32>
    %142 = arith.addf %140, %141 : vector<1x128xf32>
    %cst_134 = arith.constant 0.000000e+00 : f32
    %143 = vector.broadcast %cst_134 : f32 to vector<1x128xf32>
    %144 = arith.maximumf %142, %143 : vector<1x128xf32>
    %c0_135 = arith.constant 0 : index
    %c0_136 = arith.constant 0 : index
    %145 = vector.load %arg10[%c0_135, %c0_136] : memref<128x128xf32, #tpu.memory_space<vmem>>, vector<128x128xf32>
    %cst_137 = arith.constant dense<0.000000e+00> : vector<1x128xf32>
    %146 = tpu.matmul %144, %145, %cst_137 {dimension_numbers = #tpu.dot_dimension_numbers<[1], [0], [0], [1], [0, 0, 1, 1], [], []>} : vector<1x128xf32>, vector<128x128xf32>, vector<1x128xf32> -> vector<1x128xf32>
    %c0_138 = arith.constant 0 : index
    %c0_139 = arith.constant 0 : index
    %147 = vector.load %arg11[%c0_138, %c0_139] : memref<1x128xf32, #tpu.memory_space<vmem>>, vector<1x128xf32>
    %148 = arith.addf %146, %147 : vector<1x128xf32>
    %cst_140 = arith.constant 0.000000e+00 : f32
    %149 = vector.broadcast %cst_140 : f32 to vector<1x128xf32>
    %150 = arith.maximumf %148, %149 : vector<1x128xf32>
    %c0_141 = arith.constant 0 : index
    %c0_142 = arith.constant 0 : index
    %151 = vector.load %arg12[%c0_141, %c0_142] : memref<128x128xf32, #tpu.memory_space<vmem>>, vector<128x128xf32>
    %cst_143 = arith.constant dense<0.000000e+00> : vector<1x128xf32>
    %152 = tpu.matmul %150, %151, %cst_143 {dimension_numbers = #tpu.dot_dimension_numbers<[1], [0], [0], [1], [0, 0, 1, 1], [], []>} : vector<1x128xf32>, vector<128x128xf32>, vector<1x128xf32> -> vector<1x128xf32>
    %c0_144 = arith.constant 0 : index
    %c0_145 = arith.constant 0 : index
    %153 = vector.load %arg13[%c0_144, %c0_145] : memref<1x128xf32, #tpu.memory_space<vmem>>, vector<1x128xf32>
    %154 = arith.addf %152, %153 : vector<1x128xf32>
    %c0_146 = arith.constant 0 : index
    %c0_147 = arith.constant 0 : index
    %c0_148 = arith.constant 0 : index
    %155 = vector.load %arg14[%c0_146, %c0_147, %c0_148] : memref<1x1x128xf32, #tpu.memory_space<vmem>>, vector<1x1x128xf32>
    %156 = vector.shape_cast %155 : vector<1x1x128xf32> to vector<1x128xf32>
    %157 = vector.shape_cast %154 : vector<1x128xf32> to vector<1x1x128xf32>
    tpu.vector_store %arg14[%c0_146, %c0_147, %c0_148], %157 {strides = array<i32>} : memref<1x1x128xf32, #tpu.memory_space<vmem>>, vector<1x1x128xf32>,
    return
  }
  func.func @transform_0(%arg0: i32) -> (i32, i32) {
    %c0_i32 = arith.constant 0 : i32
    %c0_i32_0 = arith.constant 0 : i32
    return %arg0, %c0_i32 : i32, i32
  }
  func.func @transform_1(%arg0: i32) -> (i32, i32, i32) {
    %c0_i32 = arith.constant 0 : i32
    %c0_i32_0 = arith.constant 0 : i32
    %c0_i32_1 = arith.constant 0 : i32
    %c0_i32_2 = arith.constant 0 : i32
    return %c0_i32, %c0_i32_0, %c0_i32_1 : i32, i32, i32
  }
  func.func @transform_2(%arg0: i32) -> (i32, i32) {
    %c0_i32 = arith.constant 0 : i32
    %c0_i32_0 = arith.constant 0 : i32
    %c0_i32_1 = arith.constant 0 : i32
    return %c0_i32, %c0_i32_0 : i32, i32
  }
  func.func @transform_3(%arg0: i32) -> (i32, i32, i32) {
    %c0_i32 = arith.constant 0 : i32
    %c0_i32_0 = arith.constant 0 : i32
    %c0_i32_1 = arith.constant 0 : i32
    %c0_i32_2 = arith.constant 0 : i32
    return %c0_i32, %c0_i32_0, %c0_i32_1 : i32, i32, i32
  }
  func.func @transform_4(%arg0: i32) -> (i32, i32) {
    %c0_i32 = arith.constant 0 : i32
    %c0_i32_0 = arith.constant 0 : i32
    %c0_i32_1 = arith.constant 0 : i32
    return %c0_i32, %c0_i32_0 : i32, i32
  }
  func.func @transform_5(%arg0: i32) -> (i32, i32, i32) {
    %c0_i32 = arith.constant 0 : i32
    %c0_i32_0 = arith.constant 0 : i32
    %c0_i32_1 = arith.constant 0 : i32
    %c0_i32_2 = arith.constant 0 : i32
    return %c0_i32, %c0_i32_0, %c0_i32_1 : i32, i32, i32
  }
  func.func @transform_6(%arg0: i32) -> (i32, i32) {
    %c0_i32 = arith.constant 0 : i32
    %c0_i32_0 = arith.constant 0 : i32
    %c0_i32_1 = arith.constant 0 : i32
    return %c0_i32, %c0_i32_0 : i32, i32
  }
  func.func @transform_7(%arg0: i32) -> (i32, i32) {
    %c0_i32 = arith.constant 0 : i32
    %c0_i32_0 = arith.constant 0 : i32
    %c0_i32_1 = arith.constant 0 : i32
    return %c0_i32, %c0_i32_0 : i32, i32
  }
  func.func @transform_8(%arg0: i32) -> (i32, i32) {
    %c0_i32 = arith.constant 0 : i32
    %c0_i32_0 = arith.constant 0 : i32
    %c0_i32_1 = arith.constant 0 : i32
    return %c0_i32, %c0_i32_0 : i32, i32
  }
  func.func @transform_9(%arg0: i32) -> (i32, i32) {
    %c0_i32 = arith.constant 0 : i32
    %c0_i32_0 = arith.constant 0 : i32
    %c0_i32_1 = arith.constant 0 : i32
    return %c0_i32, %c0_i32_0 : i32, i32
  }
  func.func @transform_10(%arg0: i32) -> (i32, i32) {
    %c0_i32 = arith.constant 0 : i32
    %c0_i32_0 = arith.constant 0 : i32
    %c0_i32_1 = arith.constant 0 : i32
    return %c0_i32, %c0_i32_0 : i32, i32
  }
  func.func @transform_11(%arg0: i32) -> (i32, i32) {
    %c0_i32 = arith.constant 0 : i32
    %c0_i32_0 = arith.constant 0 : i32
    %c0_i32_1 = arith.constant 0 : i32
    return %c0_i32, %c0_i32_0 : i32, i32
  }
  func.func @transform_12(%arg0: i32) -> (i32, i32) {
    %c0_i32 = arith.constant 0 : i32
    %c0_i32_0 = arith.constant 0 : i32
    %c0_i32_1 = arith.constant 0 : i32
    return %c0_i32, %c0_i32_0 : i32, i32
  }
  func.func @transform_13(%arg0: i32) -> (i32, i32, i32) {
    %c0_i32 = arith.constant 0 : i32
    %c0_i32_0 = arith.constant 0 : i32
    %c0_i32_1 = arith.constant 0 : i32
    return %arg0, %c0_i32, %c0_i32_0 : i32, i32, i32
  }
}

</mosaic_0001>

<bundles_post_ra>
// kernel: _net_forward_impl.1
= control target key start
LH: loop header
LB: loop body
LE: loop exit
PB: predicated region body
PF: predicated region fallthrough
CT: control target
= control target key end

     0   :  { %s28804_s0 = inlined_call_operand.vmem [shape: f32[2688,8], index: 0, kind: input, shape index: {}]   ;;  %s28805_s1 = inlined_call_operand.vmem [shape: f32[25,8,128], index: 1, kind: input, shape index: {}]   ;;  %s28806_s2 = inlined_call_operand.vmem [shape: f32[1,128], index: 2, kind: input, shape index: {}]   ;;  %s28807_s3 = inlined_call_operand.vmem [shape: f32[25,128,128], index: 3, kind: input, shape index: {}]   ;;  %s28808_s4 = inlined_call_operand.vmem [shape: f32[1,128], index: 4, kind: input, shape index: {}]   ;;  %s28809_s5 = inlined_call_operand.vmem [shape: f32[25,128,128], index: 5, kind: input, shape index: {}]   ;;  %s28810_s6 = inlined_call_operand.vmem [shape: f32[1,128], index: 6, kind: input, shape index: {}]   ;;  %s28811_s7 = inlined_call_operand.vmem [shape: f32[128,128], index: 7, kind: input, shape index: {}]   ;;  %s28812_s8 = inlined_call_operand.vmem [shape: f32[1,128], index: 8, kind: input, shape index: {}]   ;;  %s28813_s9 = inlined_call_operand.vmem [shape: f32[128,128], index: 9, kind: input, shape index: {}]   ;;  %s28814_s10 = inlined_call_operand.vmem [shape: f32[1,128], index: 10, kind: input, shape index: {}]   ;;  %s28815_s11 = inlined_call_operand.vmem [shape: f32[128,128], index: 11, kind: input, shape index: {}]   ;;  %s28816_s12 = inlined_call_operand.vmem [shape: f32[1,128], index: 12, kind: input, shape index: {}]   ;;  %s28817_s13 = inlined_call_operand.hbm [shape: f32[2,1,128], index: 13, kind: output, shape index: {}]  }
   0x1   :  { %28863 = sst [smem:[#allocation49_spill]] %s28804_s0 }
   0x2   :  { %28864 = sst [smem:[#allocation50_spill]] %s28805_s1 }
   0x3   :  { %28865 = sst [smem:[#allocation51_spill]] %s28806_s2 }
   0x4   :  { %18 = vsyncpa [#allocation5], 0 }
   0x5   :  { %20 = vsyncpa [#allocation5 + $0x1], 0  ;;  %s23603_s25 = smov 0   ;;  %s23605_s26 = smov 0  }
   0x6   :  { %s23607_s27 = smov 0   ;;  %s23609_s28 = smov 0  }
   0x7 LB: > { %s23624_s29 = sadd.s32 4294967295, %s23511_s28   ;;  %s14245_s30 = sadd.s32 4294967294, %s23511_s28   ;;  %s23511_s28 = sphi %s23609_s28, %s28960_s28   ;;  %s23507_s27 = sphi %s23607_s27, %s28959_s27   ;;  %s23503_s26 = sphi %s23605_s26, %s28958_s26   ;;  %s23499_s25 = sphi %s23603_s25, %s28957_s25  }
   0x8   : > { %s23628_s14 = sadd.s32 1, %s23511_s28   ;;  %s311_s15 = sadd.s32 1, %s23507_s27 }
   0x9   : > { %s308_s16 = ssub.s32 %s23511_s28, %s23628_s14  ;;  %p321_p0 = scmp.ne.s32.totalorder %s23507_s27, %s23503_s26 }
   0xa   : > { %p309_p1 = scmp.eq.s32.totalorder %s308_s16, 0  ;;  %p322_p2 = scmp.eq.s32.totalorder %s23624_s29, 1 }
   0xb   : > { %p327_p3 = scmp.ne.s32.totalorder %s23503_s26, %s23499_s25  ;;  %p328_p4 = scmp.eq.s32.totalorder %s14245_s30, 1 }
   0xc   : > { %s23639_s17 = scalar_select %p309_p1, %s23507_s27, %s311_s15  }
   0xd   : > { %p23641_p5 = por %p322_p2, %p321_p0  ;;  %p23645_p6 = por %p328_p4, %p327_p3 }
   0xe   : > { %28866 = sst [smem:[#allocation7_spill]] %s23639_s17  ;;  %p14248_p7 = scmp.ge.s32.totalorder %s23511_s28, 1 }
   0xf   : > { %p391_p8 = scmp.lt.s32.totalorder %s23511_s28, 3 }
  0x11   : > { %p392_p9 = pnand %p14248_p7, %p391_p8 }
  0x13   : > { %395 = sbr.rel (%p392_p9) target bundleno = 2691 (0xa83), region = 72 }
  0x1a   : > { %s28818_s20 = sand.u32 1, %s23503_s26   ;;  %s434_s21 = smul.u32 168, %s23624_s29  ;;  %v28819_v1 = vmov 0.0   ;;  %v23741_v2 = vld [vmem:[%s28808_s4] ss:$0 sm:$0xff] }
  0x1b   : > { %s28869_s2 = sld [smem:[#allocation51_spill]]  ;;  %440 = vst [vmem:[#allocation2 + $0x400] sm:$0xff] %v28819_v1  ;;  %441 = vst [vmem:[#allocation2 + $0x408] sm:$0xff] %v28819_v1  ;;  %s28872_s0 = sld [smem:[#allocation49_spill]] }
  0x1c   : > { %442 = vst [vmem:[#allocation2 + $0x410] sm:$0xff] %v28819_v1  ;;  %443 = vst [vmem:[#allocation2 + $0x418] sm:$0xff] %v28819_v1  ;;  %p435_p10 = scmp.lt.s32.totalorder %s434_s21, 335  ;;  %s23756_s17 = smov 0  }
  0x1d   : > { %444 = vst [vmem:[#allocation2 + $0x420] sm:$0xff] %v28819_v1  ;;  %445 = vst [vmem:[#allocation2 + $0x428] sm:$0xff] %v28819_v1 }
  0x1e   : > { %446 = vst [vmem:[#allocation2 + $0x430] sm:$0xff] %v28819_v1  ;;  %447 = vst [vmem:[#allocation2 + $0x438] sm:$0xff] %v28819_v1  ;;  %s28962_s21 = smov (!%p435_p10, %s434_s21), 335 }
  0x1f   : > { %448 = vst [vmem:[#allocation2 + $0x440] sm:$0xff] %v28819_v1  ;;  %449 = vst [vmem:[#allocation2 + $0x448] sm:$0xff] %v28819_v1  ;;  %s14249_s15 = sshll.u32 %s28962_s21, 3 }
  0x20   : > { %450 = vst [vmem:[#allocation2 + $0x450] sm:$0xff] %v28819_v1  ;;  %451 = vst [vmem:[#allocation2 + $0x458] sm:$0xff] %v28819_v1 }
  0x21   : > { %v23656_v0 = vld [vmem:[%s28869_s2] ss:$0 sm:$0xff]  ;;  %452 = vst [vmem:[#allocation2 + $0x460] sm:$0xff] %v28819_v1  ;;  %453 = vst [vmem:[#allocation2 + $0x468] sm:$0xff] %v28819_v1  ;;  %s23750_s23 = scalar_lea.vmem %s28872_s0, %s14249_s15  ;;  %s23754_s2 = scalar_lea.vmem [#allocation4], %s28818_s20 }
  0x22   : > { %28870 = vst [vmem:[#allocation8_spill] sm:$0xff] %v23656_v0  ;;  %454 = vst [vmem:[#allocation2 + $0x470] sm:$0xff] %v28819_v1 }
  0x23   : > { %455 = vst [vmem:[#allocation2 + $0x478] sm:$0xff] %v28819_v1  ;;  %456 = vst [vmem:[#allocation2 + $0x480] sm:$0xff] %v28819_v1 }
  0x24   : > { %457 = vst [vmem:[#allocation2 + $0x488] sm:$0xff] %v28819_v1  ;;  %458 = vst [vmem:[#allocation2 + $0x490] sm:$0xff] %v28819_v1 }
  0x25   : > { %459 = vst [vmem:[#allocation2 + $0x498] sm:$0xff] %v28819_v1  ;;  %460 = vst [vmem:[#allocation2 + $0x4a0] sm:$0xff] %v28819_v1 }
  0x26   : > { %461 = vst [vmem:[#allocation2 + $0x4a8] sm:$0xff] %v28819_v1  ;;  %462 = vst [vmem:[#allocation2 + $0x4b0] sm:$0xff] %v28819_v1 }
  0x27   : > { %463 = vst [vmem:[#allocation2 + $0x4b8] sm:$0xff] %v28819_v1  ;;  %464 = vst [vmem:[#allocation2 + $0x4c0] sm:$0xff] %v28819_v1 }
  0x28   : > { %465 = vst [vmem:[#allocation2 + $0x4c8] sm:$0xff] %v28819_v1  ;;  %466 = vst [vmem:[#allocation2 + $0x4d0] sm:$0xff] %v28819_v1 }
  0x29   : > { %467 = vst [vmem:[#allocation2 + $0x4d8] sm:$0xff] %v28819_v1  ;;  %468 = vst [vmem:[#allocation2 + $0x4e0] sm:$0xff] %v28819_v1 }
  0x2a   : > { %469 = vst [vmem:[#allocation2 + $0x4e8] sm:$0xff] %v28819_v1  ;;  %470 = vst [vmem:[#allocation2 + $0x4f0] sm:$0xff] %v28819_v1 }
  0x2b   : > { %471 = vst [vmem:[#allocation2 + $0x4f8] sm:$0xff] %v28819_v1  ;;  %472 = vst [vmem:[#allocation2 + $0x500] sm:$0xff] %v28819_v1 }
  0x2c   : > { %473 = vst [vmem:[#allocation2 + $0x508] sm:$0xff] %v28819_v1  ;;  %474 = vst [vmem:[#allocation2 + $0x510] sm:$0xff] %v28819_v1 }
  0x2d   : > { %475 = vst [vmem:[#allocation2 + $0x518] sm:$0xff] %v28819_v1  ;;  %476 = vst [vmem:[#allocation2 + $0x520] sm:$0xff] %v28819_v1 }
  0x2e   : > { %477 = vst [vmem:[#allocation2 + $0x528] sm:$0xff] %v28819_v1  ;;  %478 = vst [vmem:[#allocation2 + $0x530] sm:$0xff] %v28819_v1 }
  0x2f   : > { %479 = vst [vmem:[#allocation2 + $0x538] sm:$0xff] %v28819_v1  ;;  %480 = vst [vmem:[#allocation3 + $0x400] sm:$0xff] %v28819_v1 }
  0x30   : > { %481 = vst [vmem:[#allocation3 + $0x408] sm:$0xff] %v28819_v1  ;;  %482 = vst [vmem:[#allocation3 + $0x410] sm:$0xff] %v28819_v1 }
  0x31   : > { %483 = vst [vmem:[#allocation3 + $0x418] sm:$0xff] %v28819_v1  ;;  %484 = vst [vmem:[#allocation3 + $0x420] sm:$0xff] %v28819_v1 }
  0x32   : > { %485 = vst [vmem:[#allocation3 + $0x428] sm:$0xff] %v28819_v1  ;;  %486 = vst [vmem:[#allocation3 + $0x430] sm:$0xff] %v28819_v1 }
  0x33   : > { %487 = vst [vmem:[#allocation3 + $0x438] sm:$0xff] %v28819_v1  ;;  %488 = vst [vmem:[#allocation3 + $0x440] sm:$0xff] %v28819_v1 }
  0x34   : > { %489 = vst [vmem:[#allocation3 + $0x448] sm:$0xff] %v28819_v1  ;;  %490 = vst [vmem:[#allocation3 + $0x450] sm:$0xff] %v28819_v1 }
  0x35   : > { %491 = vst [vmem:[#allocation3 + $0x458] sm:$0xff] %v28819_v1  ;;  %492 = vst [vmem:[#allocation3 + $0x460] sm:$0xff] %v28819_v1 }
  0x36   : > { %493 = vst [vmem:[#allocation3 + $0x468] sm:$0xff] %v28819_v1  ;;  %494 = vst [vmem:[#allocation3 + $0x470] sm:$0xff] %v28819_v1 }
  0x37   : > { %495 = vst [vmem:[#allocation3 + $0x478] sm:$0xff] %v28819_v1  ;;  %496 = vst [vmem:[#allocation3 + $0x480] sm:$0xff] %v28819_v1 }
  0x38   : > { %497 = vst [vmem:[#allocation3 + $0x488] sm:$0xff] %v28819_v1  ;;  %498 = vst [vmem:[#allocation3 + $0x490] sm:$0xff] %v28819_v1 }
  0x39   : > { %499 = vst [vmem:[#allocation3 + $0x498] sm:$0xff] %v28819_v1  ;;  %500 = vst [vmem:[#allocation3 + $0x4a0] sm:$0xff] %v28819_v1 }
  0x3a   : > { %501 = vst [vmem:[#allocation3 + $0x4a8] sm:$0xff] %v28819_v1  ;;  %502 = vst [vmem:[#allocation3 + $0x4b0] sm:$0xff] %v28819_v1 }
  0x3b   : > { %503 = vst [vmem:[#allocation3 + $0x4b8] sm:$0xff] %v28819_v1  ;;  %504 = vst [vmem:[#allocation3 + $0x4c0] sm:$0xff] %v28819_v1 }
  0x3c   : > { %505 = vst [vmem:[#allocation3 + $0x4c8] sm:$0xff] %v28819_v1  ;;  %506 = vst [vmem:[#allocation3 + $0x4d0] sm:$0xff] %v28819_v1 }
  0x3d   : > { %507 = vst [vmem:[#allocation3 + $0x4d8] sm:$0xff] %v28819_v1  ;;  %508 = vst [vmem:[#allocation3 + $0x4e0] sm:$0xff] %v28819_v1 }
  0x3e   : > { %509 = vst [vmem:[#allocation3 + $0x4e8] sm:$0xff] %v28819_v1  ;;  %510 = vst [vmem:[#allocation3 + $0x4f0] sm:$0xff] %v28819_v1 }
  0x3f   : > { %511 = vst [vmem:[#allocation3 + $0x4f8] sm:$0xff] %v28819_v1  ;;  %512 = vst [vmem:[#allocation3 + $0x500] sm:$0xff] %v28819_v1 }
  0x40   : > { %513 = vst [vmem:[#allocation3 + $0x508] sm:$0xff] %v28819_v1  ;;  %514 = vst [vmem:[#allocation3 + $0x510] sm:$0xff] %v28819_v1 }
  0x41   : > { %515 = vst [vmem:[#allocation3 + $0x518] sm:$0xff] %v28819_v1  ;;  %516 = vst [vmem:[#allocation3 + $0x520] sm:$0xff] %v28819_v1 }
  0x42   : > { %517 = vst [vmem:[#allocation3 + $0x528] sm:$0xff] %v28819_v1  ;;  %518 = vst [vmem:[#allocation3 + $0x530] sm:$0xff] %v28819_v1 }
  0x43   : > { %519 = vst [vmem:[#allocation3 + $0x538] sm:$0xff] %v28819_v1  ;;  %28871 = vst [vmem:[#allocation9_spill] sm:$0xff] %v23741_v2 }
  0x44 LB: >> { %s28873_s1 = sld [smem:[#allocation50_spill]]  ;;  %s14250_s24 = sshll.u32 %s23515_s17, 7  ;;  %vm567_vm0 = vcmask 64512   ;;  %s23515_s17 = sphi %s23756_s17, %s527_s17  }
  0x45   : >> { %s23777_s30 = scalar_lea.vmem %s23750_s23, %s14250_s24  ;;  %s527_s17 = sadd.s32 1, %s23515_s17  }
  0x46   : >> { %v14252_v7 = vld [vmem:[%s23777_s30 + $0x1] sm:$0xff]  ;;  %v14253_v9 = vld [vmem:[%s23777_s30 + $0x9] sm:$0xff]  ;;  %v14254_v11 = vld [vmem:[%s23777_s30 + $0x11] sm:$0xff]  ;;  %p524_p11 = scmp.ge.s32.totalorder %s527_s17, 8  }
  0x47   : >> { %v23781_v8 = vld [vmem:[%s23777_s30 + $0x42] sm:$0xff]  ;;  %18072 = vmatprep.mubr.msk.f32.mxu1 %vm567_vm0, %v14252_v7  ;;  %v23788_v10 = vld [vmem:[%s23777_s30 + $0x4a] sm:$0xff]  ;;  %v23792_v12 = vld [vmem:[%s23777_s30 + $0x52] sm:$0xff] }
  0x48   : >> { %28874 = vst [vmem:[#allocation10_spill] sm:$0xff] %v23781_v8  ;;  %18384 = vmatprep.mubr.msk.f32.mxu0 %vm567_vm0, %v23781_v8  ;;  %28875 = vst [vmem:[#allocation11_spill] sm:$0xff] %v23788_v10  ;;  %v14255_v15 = vld [vmem:[%s23777_s30 + $0x19] sm:$0xff]  ;;  %v23813_v17 = vld [vmem:[%s23777_s30 + $0x21] sm:$0xff] }
  0x49   : >> { %28876 = vst [vmem:[#allocation12_spill] sm:$0xff] %v23792_v12  ;;  %v23807_v16 = vld [vmem:[%s23777_s30 + $0x5a] sm:$0xff]  ;;  %v23816_v18 = vld [vmem:[%s23777_s30 + $0x62] sm:$0xff]  ;;  %v23830_v20 = vld [vmem:[%s23777_s30 + $0x6a] sm:$0xff] }
  0x4a   : >> { %v14268_v3 = vld [vmem:[%s28873_s1 + $0x8] sm:$0xff]  ;;  %v14658_v4 = vld [vmem:[%s28873_s1 + $0x60] sm:$0xff]  ;;  %v14726_v13 = vld [vmem:[%s28873_s1 + $0x70] sm:$0xff]  ;;  %28877 = vst [vmem:[#allocation13_spill] sm:$0xff] %v23807_v16 }
  0x4b   : >> { %v546_v5 = vld [vmem:[%s28873_s1] sm:$0xff]  ;;  %18070 = vmatprep.subr.mxu1 %v14268_v3  ;;  %18382 = vmatprep.subr.mxu0 %v14658_v4  ;;  %v14692_v6 = vld [vmem:[%s28873_s1 + $0x68] sm:$0xff]  ;;  %v23803_v14 = vld [vmem:[%s28873_s1 + $0x10] sm:$0xff] }
  0x4c   : >> { %18071 = vmatpush3.msra.mxu1 %v14268_v3  ;;  %18383 = vmatpush3.msra.mxu0 %v14658_v4  ;;  %v23827_v19 = vld [vmem:[%s23777_s30 + $0x29] sm:$0xff]  ;;  %v23833_v21 = vld [vmem:[%s23777_s30 + $0x31] sm:$0xff]  ;;  %v23847_v23 = vld [vmem:[%s23777_s30 + $0x39] sm:$0xff] }
  0x4d   : >> { %18096 = vmatprep.subr.mxu1 %v546_v5  ;;  %18408 = vmatprep.subr.mxu0 %v14692_v6  ;;  %v23836_v22 = vld [vmem:[%s23777_s30 + $0x72] sm:$0xff]  ;;  %v23850_v24 = vld [vmem:[%s23777_s30 + $0x7a] sm:$0xff]  ;;  %v23856_v26 = vld [vmem:[%s23777_s30 + $0x43] sm:$0xff] }
  0x4e   : >> { %18073 = vmatmul.mubr.msk.f32.vlgmr.msra.gmra.mrb[0].mxu1 %vm567_vm0, %v14253_v9  ;;  %18385 = vmatmul.mubr.msk.f32.vlgmr.msra.gmra.mrb[0].mxu0 %vm567_vm0, %v23788_v10  ;;  %v23853_v25 = vld [vmem:[%s23777_s30 + $0x41] sm:$0xff]  ;;  %v23867_v27 = vld [vmem:[%s23777_s30 + $0x49] sm:$0xff]  ;;  %v23873_v29 = vld [vmem:[%s23777_s30 + $0x51] sm:$0xff] }
  0x4f   : >> { %18097 = vmatpush3.msra.mxu1 %v546_v5  ;;  %18409 = vmatpush3.msra.mxu0 %v14692_v6  ;;  %28878 = vst [vmem:[#allocation14_spill] sm:$0xff] %v23867_v27  ;;  %v23870_v28 = vld [vmem:[%s23777_s30 + $0x4b] sm:$0xff]  ;;  %28879 = vst [vmem:[#allocation15_spill] sm:$0xff] %v23873_v29  ;;  %v23876_v30 = vld [vmem:[%s23777_s30 + $0x53] sm:$0xff] }
  0x50   : >> { %18075 = vmatprep.mubr.msk.f32.mxu1 %vm567_vm0, %v14254_v11  ;;  %18387 = vmatprep.mubr.msk.f32.mxu0 %vm567_vm0, %v23792_v12  ;;  %v23881_v31 = vld [vmem:[%s28873_s1 + $0x78] sm:$0xff]  ;;  %v23898_v34 = vld [vmem:[%s23777_s30 + $0x61] sm:$0xff]  ;;  %v23913_v36 = vld [vmem:[%s23777_s30 + $0x69] sm:$0xff] }
  0x51   : >> { %18434 = vmatprep.subr.mxu0 %v14726_v13  ;;  %18122 = vmatprep.subr.mxu1 %v23803_v14  ;;  %v23890_v32 = vld [vmem:[%s23777_s30 + $0x59] sm:$0xff]  ;;  %v23901_v35 = vld [vmem:[%s23777_s30 + $0x63] sm:$0xff]  ;;  %v23916_v37 = vld [vmem:[%s23777_s30 + $0x6b] sm:$0xff] }
  0x52   : >> { %18076 = vmatmul.mubr.msk.f32.gmra.mrb[2].mxu1 %vm567_vm0, %v14255_v15  ;;  %18388 = vmatmul.mubr.msk.f32.gmra.mrb[2].mxu0 %vm567_vm0, %v23807_v16  ;;  %28880 = vst [vmem:[#allocation16_spill] sm:$0xff] %v23890_v32  ;;  %v23893_v33 = vld [vmem:[%s23777_s30 + $0x5b] sm:$0xff]  ;;  %v23919_v38 = vld [vmem:[%s23777_s30 + $0x71] sm:$0xff]  ;;  %v23940_v43 = vld [vmem:[%s23777_s30 + $0x83] sm:$0xff] }
  0x53   : >> { %18078 = vmatprep.mubr.msk.f32.mxu1 %vm567_vm0, %v23813_v17  ;;  %18390 = vmatprep.mubr.msk.f32.mxu0 %vm567_vm0, %v23816_v18  ;;  %v23922_v39 = vld [vmem:[%s23777_s30 + $0x73] sm:$0xff]  ;;  %v23936_v41 = vld [vmem:[%s23777_s30 + $0x7b] sm:$0xff]  ;;  %v531_v44 = vld [vmem:[%s23777_s30 + $0x8] sm:$0xff] }
  0x54   : >> { %v23933_v40 = vld [vmem:[%s23777_s30 + $0x79] sm:$0xff]  ;;  %v23951_v45 = vld [vmem:[%s23777_s30 + $0x8b] sm:$0xff]  ;;  %v23977_v52 = vld [vmem:[%s23777_s30 + $0xa3] sm:$0xff] }
  0x55   : >> { %v530_v42 = vld [vmem:[%s23777_s30] sm:$0xff]  ;;  %v532_v46 = vld [vmem:[%s23777_s30 + $0x10] sm:$0xff]  ;;  %v23960_v48 = vld [vmem:[%s28873_s1 + $0x18] sm:$0xff] }
  0x56   : >> { %18079 = vmatmul.mubr.msk.f32.gmra.mrb[4].mxu1 %vm567_vm0, %v23827_v19  ;;  %18391 = vmatmul.mubr.msk.f32.gmra.mrb[4].mxu0 %vm567_vm0, %v23830_v20  ;;  %v23955_v47 = vld [vmem:[%s23777_s30 + $0x93] sm:$0xff]  ;;  %v23969_v50 = vld [vmem:[%s23777_s30 + $0x9b] sm:$0xff]  ;;  %v23988_v53 = vld [vmem:[%s23777_s30 + $0x28] sm:$0xff] }
  0x57   : >> { %18081 = vmatprep.mubr.msk.f32.mxu1 %vm567_vm0, %v23833_v21  ;;  %18393 = vmatprep.mubr.msk.f32.mxu0 %vm567_vm0, %v23836_v22  ;;  %v533_v49 = vld [vmem:[%s23777_s30 + $0x18] sm:$0xff]  ;;  %v23974_v51 = vld [vmem:[%s23777_s30 + $0x20] sm:$0xff]  ;;  %v23991_v54 = vld [vmem:[%s23777_s30 + $0xab] sm:$0xff] }
  0x58   : >> { %v23994_v55 = vld [vmem:[%s23777_s30 + $0x30] sm:$0xff]  ;;  %v24008_v57 = vld [vmem:[%s23777_s30 + $0x38] sm:$0xff]  ;;  %v24014_v59 = vld [vmem:[%s23777_s30 + $0x40] sm:$0xff] }
  0x59   : >> { %v23997_v56 = vld [vmem:[%s23777_s30 + $0xb3] sm:$0xff]  ;;  %v24011_v58 = vld [vmem:[%s23777_s30 + $0xbb] sm:$0xff]  ;;  %v24017_v60 = vld [vmem:[%s23777_s30 + $0x44] sm:$0xff] }
  0x5a   : >> { %18082 = vmatmul.mubr.msk.f32.gmra.mrb[6].mxu1 %vm567_vm0, %v23847_v23  ;;  %18394 = vmatmul.mubr.msk.f32.gmra.mrb[6].mxu0 %vm567_vm0, %v23850_v24  ;;  %v24028_v61 = vld [vmem:[%s23777_s30 + $0x48] sm:$0xff]  ;;  %v24034_v63 = vld [vmem:[%s23777_s30 + $0x50] sm:$0xff]  ;;  %v24042_v4 = vld [vmem:[%s28873_s1 + $0x80] sm:$0xff] }
  0x5b   : >> { %18084 = vmatprep.mubr.msk.f32.mxu1 %vm567_vm0, %v23853_v25  ;;  %18410 = vmatprep.mubr.msk.f32.mxu0 %vm567_vm0, %v23856_v26  ;;  %v24031_v62 = vld [vmem:[%s23777_s30 + $0x4c] sm:$0xff]  ;;  %v24037_v3 = vld [vmem:[%s23777_s30 + $0x54] sm:$0xff]  ;;  %v24055_v6 = vld [vmem:[%s23777_s30 + $0x5c] sm:$0xff] }
  0x5c   : >> { %v24052_v5 = vld [vmem:[%s23777_s30 + $0x58] sm:$0xff]  ;;  %v24060_v7 = vld [vmem:[%s23777_s30 + $0x60] sm:$0xff]  ;;  %v24075_v11 = vld [vmem:[%s23777_s30 + $0x68] sm:$0xff] }
  0x5d   : >> { %v24063_v9 = vld [vmem:[%s23777_s30 + $0x64] sm:$0xff]  ;;  %v24084_v15 = vld [vmem:[%s23777_s30 + $0x74] sm:$0xff]  ;;  %v24113_v1 = vld [vmem:[%s23777_s30 + $0x8c] sm:$0xff] }
  0x5e   : >> { %18085 = vmatmul.mubr.msk.f32.gmra.mrb[8].mxu1 %vm567_vm0, %v23867_v27  ;;  %18411 = vmatmul.mubr.msk.f32.vlgmr.msra.gmra.mrb[0].mxu0 %vm567_vm0, %v23870_v28  ;;  %28882 = vst [vmem:[#allocation18_spill] sm:$0xff] %v24113_v1  ;;  %v14304_v2 = vld [vmem:[%s23777_s30 + $0x12] sm:$0xff]  ;;  %v24256_v27 = vld [vmem:[%s23777_s30 + $0xc0] sm:$0xff] }
  0x5f   : >> { %18435 = vmatpush3.msra.mxu0 %v14726_v13  ;;  %18087 = vmatprep.mubr.msk.f32.mxu1 %vm567_vm0, %v23873_v29  ;;  %v24078_v13 = vld [vmem:[%s23777_s30 + $0x6c] sm:$0xff]  ;;  %v24117_v0 = vld [vmem:[%s23777_s30 + $0x94] sm:$0xff]  ;;  %v24134_v29 = vld [vmem:[%s23777_s30 + $0x22] sm:$0xff]  ;;  %28898 = vst [vmem:[#allocation34_spill] sm:$0xff] %v24256_v27 }
  0x60   : >> { %18413 = vmatprep.mubr.msk.f32.mxu0 %vm567_vm0, %v23876_v30  ;;  %18460 = vmatprep.subr.mxu0 %v23881_v31  ;;  %28883 = vst [vmem:[#allocation19_spill] sm:$0xff] %v24117_v0  ;;  %28885 = vst [vmem:[#allocation21_spill] sm:$0xff] %v24134_v29 }
  0x62   : >> { %18088 = vmatmul.mubr.msk.f32.gmra.mrb[10].mxu1 %vm567_vm0, %v23890_v32  ;;  %18414 = vmatmul.mubr.msk.f32.gmra.mrb[2].mxu0 %vm567_vm0, %v23893_v33  ;;  %v14386_v32 = vld [vmem:[%s28873_s1 + $0x20] sm:$0xff] }
  0x63   : >> { %18090 = vmatprep.mubr.msk.f32.mxu1 %vm567_vm0, %v23898_v34  ;;  %18416 = vmatprep.mubr.msk.f32.mxu0 %vm567_vm0, %v23901_v35 }
  0x66   : >> { %18091 = vmatmul.mubr.msk.f32.gmra.mrb[12].mxu1 %vm567_vm0, %v23913_v36  ;;  %18417 = vmatmul.mubr.msk.f32.gmra.mrb[4].mxu0 %vm567_vm0, %v23916_v37 }
  0x67   : >> { %18093 = vmatprep.mubr.msk.f32.mxu1 %vm567_vm0, %v23919_v38  ;;  %18419 = vmatprep.mubr.msk.f32.mxu0 %vm567_vm0, %v23922_v39 }
  0x6a   : >> { %18094 = vmatmul.mubr.msk.f32.gmra.mrb[14].mxu1 %vm567_vm0, %v23933_v40  ;;  %18420 = vmatmul.mubr.msk.f32.gmra.mrb[6].mxu0 %vm567_vm0, %v23936_v41 }
  0x6b   : >> { %18098 = vmatprep.mubr.msk.f32.mxu1 %vm567_vm0, %v530_v42  ;;  %18422 = vmatprep.mubr.msk.f32.mxu0 %vm567_vm0, %v23940_v43  ;;  %v24098_v42 = vld [vmem:[%s23777_s30 + $0x7c] sm:$0xff] }
  0x6e   : >> { %18099 = vmatmul.mubr.msk.f32.vlgmr.msra.gmra.mrb[0].mxu1 %vm567_vm0, %v531_v44  ;;  %18423 = vmatmul.mubr.msk.f32.gmra.mrb[8].mxu0 %vm567_vm0, %v23951_v45  ;;  %v14302_v44 = vld [vmem:[%s23777_s30 + $0x2] sm:$0xff] }
  0x6f   : >> { %18123 = vmatpush3.msra.mxu1 %v23803_v14  ;;  %18101 = vmatprep.mubr.msk.f32.mxu1 %vm567_vm0, %v532_v46  ;;  %v24081_v14 = vld [vmem:[%s23777_s30 + $0x70] sm:$0xff]  ;;  %v24102_v46 = vld [vmem:[%s23777_s30 + $0x84] sm:$0xff] }
  0x70   : >> { %18425 = vmatprep.mubr.msk.f32.mxu0 %vm567_vm0, %v23955_v47  ;;  %18148 = vmatprep.subr.mxu1 %v23960_v48  ;;  %28881 = vst [vmem:[#allocation17_spill] sm:$0xff] %v24102_v46 }
  0x72   : >> { %18102 = vmatmul.mubr.msk.f32.gmra.mrb[2].mxu1 %vm567_vm0, %v533_v49  ;;  %18426 = vmatmul.mubr.msk.f32.gmra.mrb[10].mxu0 %vm567_vm0, %v23969_v50  ;;  %v14303_v49 = vld [vmem:[%s23777_s30 + $0xa] sm:$0xff] }
  0x73   : >> { %18104 = vmatprep.mubr.msk.f32.mxu1 %vm567_vm0, %v23974_v51  ;;  %18428 = vmatprep.mubr.msk.f32.mxu0 %vm567_vm0, %v23977_v52 }
  0x76   : >> { %18105 = vmatmul.mubr.msk.f32.gmra.mrb[4].mxu1 %vm567_vm0, %v23988_v53  ;;  %18429 = vmatmul.mubr.msk.f32.gmra.mrb[12].mxu0 %vm567_vm0, %v23991_v54 }
  0x77   : >> { %18107 = vmatprep.mubr.msk.f32.mxu1 %vm567_vm0, %v23994_v55  ;;  %18431 = vmatprep.mubr.msk.f32.mxu0 %vm567_vm0, %v23997_v56 }
  0x7a   : >> { %18108 = vmatmul.mubr.msk.f32.gmra.mrb[6].mxu1 %vm567_vm0, %v24008_v57  ;;  %18432 = vmatmul.mubr.msk.f32.gmra.mrb[14].mxu0 %vm567_vm0, %v24011_v58 }
  0x7b   : >> { %18110 = vmatprep.mubr.msk.f32.mxu1 %vm567_vm0, %v24014_v59  ;;  %18436 = vmatprep.mubr.msk.f32.mxu0 %vm567_vm0, %v24017_v60 }
  0x7e   : >> { %18111 = vmatmul.mubr.msk.f32.gmra.mrb[8].mxu1 %vm567_vm0, %v24028_v61  ;;  %18437 = vmatmul.mubr.msk.f32.vlgmr.msra.gmra.mrb[0].mxu0 %vm567_vm0, %v24031_v62 }
  0x7f   : >> { %18461 = vmatpush3.msra.mxu0 %v23881_v31  ;;  %18113 = vmatprep.mubr.msk.f32.mxu1 %vm567_vm0, %v24034_v63  ;;  %v24095_v31 = vld [vmem:[%s23777_s30 + $0x78] sm:$0xff] }
  0x80   : >> { %18439 = vmatprep.mubr.msk.f32.mxu0 %vm567_vm0, %v24037_v3  ;;  %18486 = vmatprep.subr.mxu0 %v24042_v4 }
  0x82   : >> { %18114 = vmatmul.mubr.msk.f32.gmra.mrb[10].mxu1 %vm567_vm0, %v24052_v5  ;;  %18440 = vmatmul.mubr.msk.f32.gmra.mrb[2].mxu0 %vm567_vm0, %v24055_v6 }
  0x83   : >> { %18116 = vmatprep.mubr.msk.f32.mxu1 %vm567_vm0, %v24060_v7  ;;  %18442 = vmatprep.mubr.msk.f32.mxu0 %vm567_vm0, %v24063_v9 }
  0x86   : >> { %18117 = vmatmul.mubr.msk.f32.gmra.mrb[12].mxu1 %vm567_vm0, %v24075_v11  ;;  %18443 = vmatmul.mubr.msk.f32.gmra.mrb[4].mxu0 %vm567_vm0, %v24078_v13 }
  0x87   : >> { %18119 = vmatprep.mubr.msk.f32.mxu1 %vm567_vm0, %v24081_v14  ;;  %18445 = vmatprep.mubr.msk.f32.mxu0 %vm567_vm0, %v24084_v15 }
  0x8a   : >> { %18120 = vmatmul.mubr.msk.f32.gmra.mrb[14].mxu1 %vm567_vm0, %v24095_v31  ;;  %18446 = vmatmul.mubr.msk.f32.gmra.mrb[6].mxu0 %vm567_vm0, %v24098_v42 }
  0x8b   : >> { %18124 = vmatprep.mubr.msk.f32.mxu1 %vm567_vm0, %v14302_v44  ;;  %18448 = vmatprep.mubr.msk.f32.mxu0 %vm567_vm0, %v24102_v46  ;;  %v14305_v44 = vld [vmem:[%s23777_s30 + $0x1a] sm:$0xff] }
  0x8c   : >> { %v24129_v46 = vld [vmem:[%s23777_s30 + $0x9c] sm:$0xff] }
  0x8d   : >> { %28884 = vst [vmem:[#allocation20_spill] sm:$0xff] %v24129_v46 }
  0x8e   : >> { %18125 = vmatmul.mubr.msk.f32.vlgmr.msra.gmra.mrb[0].mxu1 %vm567_vm0, %v14303_v49  ;;  %18449 = vmatmul.mubr.msk.f32.gmra.mrb[8].mxu0 %vm567_vm0, %v24113_v1  ;;  %v24137_v49 = vld [vmem:[%s23777_s30 + $0xa4] sm:$0xff]  ;;  %v24156_v1 = vld [vmem:[%s23777_s30 + $0xb4] sm:$0xff] }
  0x8f   : >> { %18149 = vmatpush3.msra.mxu1 %v23960_v48  ;;  %18127 = vmatprep.mubr.msk.f32.mxu1 %vm567_vm0, %v14304_v2  ;;  %28886 = vst [vmem:[#allocation22_spill] sm:$0xff] %v24137_v49  ;;  %v24147_v2 = vld [vmem:[%s23777_s30 + $0x2a] sm:$0xff]  ;;  %28890 = vst [vmem:[#allocation26_spill] sm:$0xff] %v24156_v1 }
  0x90   : >> { %18451 = vmatprep.mubr.msk.f32.mxu0 %vm567_vm0, %v24117_v0  ;;  %18174 = vmatprep.subr.mxu1 %v14386_v32  ;;  %28887 = vst [vmem:[#allocation23_spill] sm:$0xff] %v24147_v2  ;;  %v24150_v48 = vld [vmem:[%s23777_s30 + $0xac] sm:$0xff] }
  0x91   : >> { %28888 = vst [vmem:[#allocation24_spill] sm:$0xff] %v24150_v48  ;;  %v24153_v0 = vld [vmem:[%s23777_s30 + $0x32] sm:$0xff] }
  0x92   : >> { %18128 = vmatmul.mubr.msk.f32.gmra.mrb[2].mxu1 %vm567_vm0, %v14305_v44  ;;  %18452 = vmatmul.mubr.msk.f32.gmra.mrb[10].mxu0 %vm567_vm0, %v24129_v46  ;;  %28889 = vst [vmem:[#allocation25_spill] sm:$0xff] %v24153_v0  ;;  %v24167_v44 = vld [vmem:[%s23777_s30 + $0x3a] sm:$0xff]  ;;  %v24253_v46 = vld [vmem:[%s23777_s30 + $0x23] sm:$0xff] }
  0x93   : >> { %18130 = vmatprep.mubr.msk.f32.mxu1 %vm567_vm0, %v24134_v29  ;;  %18454 = vmatprep.mubr.msk.f32.mxu0 %vm567_vm0, %v24137_v49  ;;  %28891 = vst [vmem:[#allocation27_spill] sm:$0xff] %v24167_v44  ;;  %v24170_v49 = vld [vmem:[%s23777_s30 + $0xbc] sm:$0xff]  ;;  %v14420_v29 = vld [vmem:[%s28873_s1 + $0x28] sm:$0xff]  ;;  %28897 = vst [vmem:[#allocation33_spill] sm:$0xff] %v24253_v46 }
  0x94   : >> { %28892 = vst [vmem:[#allocation28_spill] sm:$0xff] %v24170_v49 }
  0x96   : >> { %18131 = vmatmul.mubr.msk.f32.gmra.mrb[4].mxu1 %vm567_vm0, %v24147_v2  ;;  %18455 = vmatmul.mubr.msk.f32.gmra.mrb[12].mxu0 %vm567_vm0, %v24150_v48  ;;  %v14338_v48 = vld [vmem:[%s23777_s30 + $0x13] sm:$0xff] }
  0x97   : >> { %18133 = vmatprep.mubr.msk.f32.mxu1 %vm567_vm0, %v24153_v0  ;;  %18457 = vmatprep.mubr.msk.f32.mxu0 %vm567_vm0, %v24156_v1  ;;  %v14828_v1 = vld [vmem:[%s28873_s1 + $0x88] sm:$0xff]  ;;  %v24237_v2 = vld [vmem:[%s23777_s30 + $0xb0] sm:$0xff] }
  0x98   : >> { %v24233_v0 = vld [vmem:[%s23777_s30 + $0xa8] sm:$0xff]  ;;  %28895 = vst [vmem:[#allocation31_spill] sm:$0xff] %v24237_v2 }
  0x99   : >> { %28894 = vst [vmem:[#allocation30_spill] sm:$0xff] %v24233_v0 }
  0x9a   : >> { %18134 = vmatmul.mubr.msk.f32.gmra.mrb[6].mxu1 %vm567_vm0, %v24167_v44  ;;  %18458 = vmatmul.mubr.msk.f32.gmra.mrb[14].mxu0 %vm567_vm0, %v24170_v49  ;;  %v24222_v49 = vld [vmem:[%s23777_s30 + $0xa0] sm:$0xff]  ;;  %v14337_v44 = vld [vmem:[%s23777_s30 + $0xb] sm:$0xff] }
  0x9b   : >> { %18136 = vmatprep.mubr.msk.f32.mxu1 %vm567_vm0, %v23781_v8  ;;  %18462 = vmatprep.mubr.msk.f32.mxu0 %vm567_vm0, %v24060_v7  ;;  %v24193_v8 = vld [vmem:[%s23777_s30 + $0x80] sm:$0xff]  ;;  %28893 = vst [vmem:[#allocation29_spill] sm:$0xff] %v24222_v49 }
  0x9e   : >> { %18137 = vmatmul.mubr.msk.f32.gmra.mrb[8].mxu1 %vm567_vm0, %v23788_v10  ;;  %18463 = vmatmul.mubr.msk.f32.vlgmr.msra.gmra.mrb[0].mxu0 %vm567_vm0, %v24075_v11  ;;  %v14336_v10 = vld [vmem:[%s23777_s30 + $0x3] sm:$0xff] }
  0x9f   : >> { %18487 = vmatpush3.msra.mxu0 %v24042_v4  ;;  %18139 = vmatprep.mubr.msk.f32.mxu1 %vm567_vm0, %v23792_v12  ;;  %v24204_v4 = vld [vmem:[%s23777_s30 + $0x88] sm:$0xff]  ;;  %v24207_v12 = vld [vmem:[%s23777_s30 + $0x90] sm:$0xff] }
  0xa0   : >> { %18465 = vmatprep.mubr.msk.f32.mxu0 %vm567_vm0, %v24081_v14  ;;  %18512 = vmatprep.subr.mxu0 %v14828_v1 }
  0xa2   : >> { %18140 = vmatmul.mubr.msk.f32.gmra.mrb[10].mxu1 %vm567_vm0, %v23807_v16  ;;  %18466 = vmatmul.mubr.msk.f32.gmra.mrb[2].mxu0 %vm567_vm0, %v24095_v31  ;;  %v24218_v16 = vld [vmem:[%s23777_s30 + $0x98] sm:$0xff] }
  0xa3   : >> { %18142 = vmatprep.mubr.msk.f32.mxu1 %vm567_vm0, %v23816_v18  ;;  %18468 = vmatprep.mubr.msk.f32.mxu0 %vm567_vm0, %v24193_v8 }
  0xa6   : >> { %18143 = vmatmul.mubr.msk.f32.gmra.mrb[12].mxu1 %vm567_vm0, %v23830_v20  ;;  %18469 = vmatmul.mubr.msk.f32.gmra.mrb[4].mxu0 %vm567_vm0, %v24204_v4 }
  0xa7   : >> { %18145 = vmatprep.mubr.msk.f32.mxu1 %vm567_vm0, %v23836_v22  ;;  %18471 = vmatprep.mubr.msk.f32.mxu0 %vm567_vm0, %v24207_v12 }
  0xaa   : >> { %18146 = vmatmul.mubr.msk.f32.gmra.mrb[14].mxu1 %vm567_vm0, %v23850_v24  ;;  %18472 = vmatmul.mubr.msk.f32.gmra.mrb[6].mxu0 %vm567_vm0, %v24218_v16 }
  0xab   : >> { %18150 = vmatprep.mubr.msk.f32.mxu1 %vm567_vm0, %v14336_v10  ;;  %18474 = vmatprep.mubr.msk.f32.mxu0 %vm567_vm0, %v24222_v49  ;;  %v14339_v10 = vld [vmem:[%s23777_s30 + $0x1b] sm:$0xff] }
  0xac   : >> { %v24248_v49 = vld [vmem:[%s23777_s30 + $0xb8] sm:$0xff] }
  0xad   : >> { %28896 = vst [vmem:[#allocation32_spill] sm:$0xff] %v24248_v49 }
  0xae   : >> { %18151 = vmatmul.mubr.msk.f32.vlgmr.msra.gmra.mrb[0].mxu1 %vm567_vm0, %v14337_v44  ;;  %18475 = vmatmul.mubr.msk.f32.gmra.mrb[8].mxu0 %vm567_vm0, %v24233_v0  ;;  %v24272_v44 = vld [vmem:[%s23777_s30 + $0x33] sm:$0xff]  ;;  %v24374_v0 = vld [vmem:[%s23777_s30 + $0xc1] sm:$0xff] }
  0xaf   : >> { %18175 = vmatpush3.msra.mxu1 %v14386_v32  ;;  %18153 = vmatprep.mubr.msk.f32.mxu1 %vm567_vm0, %v14338_v48  ;;  %v24266_v32 = vld [vmem:[%s23777_s30 + $0x2b] sm:$0xff]  ;;  %28901 = vst [vmem:[#allocation37_spill] sm:$0xff] %v24272_v44  ;;  %28907 = vst [vmem:[#allocation43_spill] sm:$0xff] %v24374_v0 }
  0xb0   : >> { %18477 = vmatprep.mubr.msk.f32.mxu0 %vm567_vm0, %v24237_v2  ;;  %18200 = vmatprep.subr.mxu1 %v14420_v29  ;;  %28899 = vst [vmem:[#allocation35_spill] sm:$0xff] %v24266_v32  ;;  %v24269_v48 = vld [vmem:[%s23777_s30 + $0xc8] sm:$0xff]  ;;  %v24275_v2 = vld [vmem:[%s23777_s30 + $0xd0] sm:$0xff] }
  0xb1   : >> { %28900 = vst [vmem:[#allocation36_spill] sm:$0xff] %v24269_v48  ;;  %28902 = vst [vmem:[#allocation38_spill] sm:$0xff] %v24275_v2 }
  0xb2   : >> { %18154 = vmatmul.mubr.msk.f32.gmra.mrb[2].mxu1 %vm567_vm0, %v14339_v10  ;;  %18478 = vmatmul.mubr.msk.f32.gmra.mrb[10].mxu0 %vm567_vm0, %v24248_v49  ;;  %v24286_v10 = vld [vmem:[%s23777_s30 + $0x3b] sm:$0xff]  ;;  %v24371_v49 = vld [vmem:[%s23777_s30 + $0x24] sm:$0xff] }
  0xb3   : >> { %18156 = vmatprep.mubr.msk.f32.mxu1 %vm567_vm0, %v24253_v46  ;;  %18480 = vmatprep.mubr.msk.f32.mxu0 %vm567_vm0, %v24256_v27  ;;  %28903 = vst [vmem:[#allocation39_spill] sm:$0xff] %v24286_v10  ;;  %v24289_v27 = vld [vmem:[%s23777_s30 + $0xd8] sm:$0xff]  ;;  %v14454_v46 = vld [vmem:[%s28873_s1 + $0x30] sm:$0xff] }
  0xb4   : >> { %28904 = vst [vmem:[#allocation40_spill] sm:$0xff] %v24289_v27 }
  0xb6   : >> { %18157 = vmatmul.mubr.msk.f32.gmra.mrb[4].mxu1 %vm567_vm0, %v24266_v32  ;;  %18481 = vmatmul.mubr.msk.f32.gmra.mrb[12].mxu0 %vm567_vm0, %v24269_v48  ;;  %v14372_v48 = vld [vmem:[%s23777_s30 + $0x14] sm:$0xff] }
  0xb7   : >> { %18159 = vmatprep.mubr.msk.f32.mxu1 %vm567_vm0, %v24272_v44  ;;  %18483 = vmatprep.mubr.msk.f32.mxu0 %vm567_vm0, %v24275_v2  ;;  %v14862_v2 = vld [vmem:[%s28873_s1 + $0x90] sm:$0xff] }
  0xb8   : >> { %v24351_v44 = vld [vmem:[%s23777_s30 + $0xa9] sm:$0xff]  ;;  %v24355_v32 = vld [vmem:[%s23777_s30 + $0xb1] sm:$0xff] }
  0xb9   : >> { %28906 = vst [vmem:[#allocation42_spill] sm:$0xff] %v24355_v32 }
  0xba   : >> { %18160 = vmatmul.mubr.msk.f32.gmra.mrb[6].mxu1 %vm567_vm0, %v24286_v10  ;;  %18484 = vmatmul.mubr.msk.f32.gmra.mrb[14].mxu0 %vm567_vm0, %v24289_v27  ;;  %v24340_v27 = vld [vmem:[%s23777_s30 + $0xa1] sm:$0xff]  ;;  %v14371_v10 = vld [vmem:[%s23777_s30 + $0xc] sm:$0xff] }
  0xbb   : >> { %18162 = vmatprep.mubr.msk.f32.mxu1 %vm567_vm0, %v23856_v26  ;;  %18488 = vmatprep.mubr.msk.f32.mxu0 %vm567_vm0, %v23898_v34  ;;  %v24311_v26 = vld [vmem:[%s23777_s30 + $0x81] sm:$0xff]  ;;  %28905 = vst [vmem:[#allocation41_spill] sm:$0xff] %v24340_v27 }
  0xbe   : >> { %18163 = vmatmul.mubr.msk.f32.gmra.mrb[8].mxu1 %vm567_vm0, %v23870_v28  ;;  %18489 = vmatmul.mubr.msk.f32.vlgmr.msra.gmra.mrb[0].mxu0 %vm567_vm0, %v23913_v36  ;;  %v24325_v28 = vld [vmem:[%s23777_s30 + $0x91] sm:$0xff] }
  0xbf   : >> { %18513 = vmatpush3.msra.mxu0 %v14828_v1  ;;  %18165 = vmatprep.mubr.msk.f32.mxu1 %vm567_vm0, %v23876_v30  ;;  %v24322_v1 = vld [vmem:[%s23777_s30 + $0x89] sm:$0xff]  ;;  %v24336_v30 = vld [vmem:[%s23777_s30 + $0x99] sm:$0xff] }
  0xc0   : >> { %18491 = vmatprep.mubr.msk.f32.mxu0 %vm567_vm0, %v23919_v38  ;;  %18538 = vmatprep.subr.mxu0 %v14862_v2 }
  0xc2   : >> { %18166 = vmatmul.mubr.msk.f32.gmra.mrb[10].mxu1 %vm567_vm0, %v23893_v33  ;;  %18492 = vmatmul.mubr.msk.f32.gmra.mrb[2].mxu0 %vm567_vm0, %v23933_v40  ;;  %v14370_v33 = vld [vmem:[%s23777_s30 + $0x4] sm:$0xff] }
  0xc3   : >> { %18168 = vmatprep.mubr.msk.f32.mxu1 %vm567_vm0, %v23901_v35  ;;  %18494 = vmatprep.mubr.msk.f32.mxu0 %vm567_vm0, %v24311_v26 }
  0xc6   : >> { %18169 = vmatmul.mubr.msk.f32.gmra.mrb[12].mxu1 %vm567_vm0, %v23916_v37  ;;  %18495 = vmatmul.mubr.msk.f32.gmra.mrb[4].mxu0 %vm567_vm0, %v24322_v1 }
  0xc7   : >> { %18171 = vmatprep.mubr.msk.f32.mxu1 %vm567_vm0, %v23922_v39  ;;  %18497 = vmatprep.mubr.msk.f32.mxu0 %vm567_vm0, %v24325_v28 }
  0xca   : >> { %18172 = vmatmul.mubr.msk.f32.gmra.mrb[14].mxu1 %vm567_vm0, %v23936_v41  ;;  %18498 = vmatmul.mubr.msk.f32.gmra.mrb[6].mxu0 %vm567_vm0, %v24336_v30 }
  0xcb   : >> { %18176 = vmatprep.mubr.msk.f32.mxu1 %vm567_vm0, %v14370_v33  ;;  %18500 = vmatprep.mubr.msk.f32.mxu0 %vm567_vm0, %v24340_v27  ;;  %v14373_v33 = vld [vmem:[%s23777_s30 + $0x1c] sm:$0xff] }
  0xcc   : >> { %v24366_v27 = vld [vmem:[%s23777_s30 + $0xb9] sm:$0xff] }
  0xce   : >> { %18177 = vmatmul.mubr.msk.f32.vlgmr.msra.gmra.mrb[0].mxu1 %vm567_vm0, %v14371_v10  ;;  %18501 = vmatmul.mubr.msk.f32.gmra.mrb[8].mxu0 %vm567_vm0, %v24351_v44  ;;  %v24390_v10 = vld [vmem:[%s23777_s30 + $0x34] sm:$0xff] }
  0xcf   : >> { %18201 = vmatpush3.msra.mxu1 %v14420_v29  ;;  %18179 = vmatprep.mubr.msk.f32.mxu1 %vm567_vm0, %v14372_v48  ;;  %v24384_v29 = vld [vmem:[%s23777_s30 + $0x2c] sm:$0xff]  ;;  %28908 = vst [vmem:[#allocation44_spill] sm:$0xff] %v24390_v10 }
  0xd0   : >> { %18503 = vmatprep.mubr.msk.f32.mxu0 %vm567_vm0, %v24355_v32  ;;  %18226 = vmatprep.subr.mxu1 %v14454_v46  ;;  %v24387_v48 = vld [vmem:[%s23777_s30 + $0xc9] sm:$0xff]  ;;  %v24393_v32 = vld [vmem:[%s23777_s30 + $0xd1] sm:$0xff] }
  0xd1   : >> { %28909 = vst [vmem:[#allocation45_spill] sm:$0xff] %v24393_v32 }
  0xd2   : >> { %18180 = vmatmul.mubr.msk.f32.gmra.mrb[2].mxu1 %vm567_vm0, %v14373_v33  ;;  %18504 = vmatmul.mubr.msk.f32.gmra.mrb[10].mxu0 %vm567_vm0, %v24366_v27  ;;  %v24404_v33 = vld [vmem:[%s23777_s30 + $0x3c] sm:$0xff] }
  0xd3   : >> { %18182 = vmatprep.mubr.msk.f32.mxu1 %vm567_vm0, %v24371_v49  ;;  %18506 = vmatprep.mubr.msk.f32.mxu0 %vm567_vm0, %v24374_v0  ;;  %28910 = vst [vmem:[#allocation46_spill] sm:$0xff] %v24404_v33  ;;  %v24407_v0 = vld [vmem:[%s23777_s30 + $0xd9] sm:$0xff] }
  0xd4   : >> { %28911 = vst [vmem:[#allocation47_spill] sm:$0xff] %v24407_v0 }
  0xd6   : >> { %18183 = vmatmul.mubr.msk.f32.gmra.mrb[4].mxu1 %vm567_vm0, %v24384_v29  ;;  %18507 = vmatmul.mubr.msk.f32.gmra.mrb[12].mxu0 %vm567_vm0, %v24387_v48 }
  0xd7   : >> { %18185 = vmatprep.mubr.msk.f32.mxu1 %vm567_vm0, %v24390_v10  ;;  %18509 = vmatprep.mubr.msk.f32.mxu0 %vm567_vm0, %v24393_v32  ;;  %v14896_v32 = vld [vmem:[%s28873_s1 + $0x98] sm:$0xff] }
  0xd8   : >> { %v14488_v10 = vld [vmem:[%s28873_s1 + $0x38] sm:$0xff] }
  0xda   : >> { %18186 = vmatmul.mubr.msk.f32.gmra.mrb[6].mxu1 %vm567_vm0, %v24404_v33  ;;  %18510 = vmatmul.mubr.msk.f32.gmra.mrb[14].mxu0 %vm567_vm0, %v24407_v0  ;;  %v24468_v0 = vld [vmem:[%s23777_s30 + $0xaa] sm:$0xff]  ;;  %v24471_v33 = vld [vmem:[%s23777_s30 + $0xb2] sm:$0xff] }
  0xdb   : >> { %18188 = vmatprep.mubr.msk.f32.mxu1 %vm567_vm0, %v24017_v60  ;;  %18514 = vmatprep.mubr.msk.f32.mxu0 %vm567_vm0, %v23816_v18  ;;  %v24429_v60 = vld [vmem:[%s23777_s30 + $0x82] sm:$0xff] }
  0xde   : >> { %18189 = vmatmul.mubr.msk.f32.gmra.mrb[8].mxu1 %vm567_vm0, %v24031_v62  ;;  %18515 = vmatmul.mubr.msk.f32.vlgmr.msra.gmra.mrb[0].mxu0 %vm567_vm0, %v23830_v20  ;;  %v24440_v62 = vld [vmem:[%s23777_s30 + $0x8a] sm:$0xff] }
  0xdf   : >> { %18539 = vmatpush3.msra.mxu0 %v14862_v2  ;;  %18191 = vmatprep.mubr.msk.f32.mxu1 %vm567_vm0, %v24037_v3  ;;  %v24443_v3 = vld [vmem:[%s23777_s30 + $0x92] sm:$0xff]  ;;  %v24457_v2 = vld [vmem:[%s23777_s30 + $0xa2] sm:$0xff] }
  0xe0   : >> { %18517 = vmatprep.mubr.msk.f32.mxu0 %vm567_vm0, %v23836_v22  ;;  %18564 = vmatprep.subr.mxu0 %v14896_v32  ;;  %28912 = vst [vmem:[#allocation48_spill] sm:$0xff] %v24457_v2 }
  0xe2   : >> { %18192 = vmatmul.mubr.msk.f32.gmra.mrb[10].mxu1 %vm567_vm0, %v24055_v6  ;;  %18518 = vmatmul.mubr.msk.f32.gmra.mrb[2].mxu0 %vm567_vm0, %v23850_v24  ;;  %v24454_v6 = vld [vmem:[%s23777_s30 + $0x9a] sm:$0xff] }
  0xe3   : >> { %18194 = vmatprep.mubr.msk.f32.mxu1 %vm567_vm0, %v24063_v9  ;;  %18520 = vmatprep.mubr.msk.f32.mxu0 %vm567_vm0, %v24429_v60 }
  0xe6   : >> { %18195 = vmatmul.mubr.msk.f32.gmra.mrb[12].mxu1 %vm567_vm0, %v24078_v13  ;;  %18521 = vmatmul.mubr.msk.f32.gmra.mrb[4].mxu0 %vm567_vm0, %v24440_v62 }
  0xe7   : >> { %18197 = vmatprep.mubr.msk.f32.mxu1 %vm567_vm0, %v24084_v15  ;;  %18523 = vmatprep.mubr.msk.f32.mxu0 %vm567_vm0, %v24443_v3 }
  0xea   : >> { %18198 = vmatmul.mubr.msk.f32.gmra.mrb[14].mxu1 %vm567_vm0, %v24098_v42  ;;  %18524 = vmatmul.mubr.msk.f32.gmra.mrb[6].mxu0 %vm567_vm0, %v24454_v6 }
  0xeb   : >> { %18202 = vmatprep.mubr.msk.f32.mxu1 %vm567_vm0, %v23974_v51  ;;  %18526 = vmatprep.mubr.msk.f32.mxu0 %vm567_vm0, %v24457_v2  ;;  %v24483_v51 = vld [vmem:[%s23777_s30 + $0xba] sm:$0xff]  ;;  %v24488_v2 = vld [vmem:[%s23777_s30 + $0xc2] sm:$0xff] }
  0xee   : >> { %18203 = vmatmul.mubr.msk.f32.vlgmr.msra.gmra.mrb[0].mxu1 %vm567_vm0, %v23988_v53  ;;  %18527 = vmatmul.mubr.msk.f32.gmra.mrb[8].mxu0 %vm567_vm0, %v24468_v0  ;;  %v24499_v53 = vld [vmem:[%s23777_s30 + $0xca] sm:$0xff] }
  0xef   : >> { %18227 = vmatpush3.msra.mxu1 %v14454_v46  ;;  %18205 = vmatprep.mubr.msk.f32.mxu1 %vm567_vm0, %v23994_v55  ;;  %v24502_v55 = vld [vmem:[%s23777_s30 + $0xd2] sm:$0xff]  ;;  %v28939_v46 = vld [vmem:[#allocation36_spill] sm:$0xff] }
  0xf0   : >> { %18529 = vmatprep.mubr.msk.f32.mxu0 %vm567_vm0, %v24471_v33  ;;  %18252 = vmatprep.subr.mxu1 %v14488_v10 }
  0xf2   : >> { %18206 = vmatmul.mubr.msk.f32.gmra.mrb[2].mxu1 %vm567_vm0, %v24008_v57  ;;  %18530 = vmatmul.mubr.msk.f32.gmra.mrb[10].mxu0 %vm567_vm0, %v24483_v51  ;;  %v24513_v57 = vld [vmem:[%s23777_s30 + $0xda] sm:$0xff] }
  0xf3   : >> { %18208 = vmatprep.mubr.msk.f32.mxu1 %vm567_vm0, %v24014_v59  ;;  %18532 = vmatprep.mubr.msk.f32.mxu0 %vm567_vm0, %v24488_v2  ;;  %v14930_v59 = vld [vmem:[%s28873_s1 + $0xa0] sm:$0xff] }
  0xf6   : >> { %18209 = vmatmul.mubr.msk.f32.gmra.mrb[4].mxu1 %vm567_vm0, %v24028_v61  ;;  %18533 = vmatmul.mubr.msk.f32.gmra.mrb[12].mxu0 %vm567_vm0, %v24499_v53  ;;  %v28926_v61 = vld [vmem:[#allocation27_spill] sm:$0xff] }
  0xf7   : >> { %18211 = vmatprep.mubr.msk.f32.mxu1 %vm567_vm0, %v24034_v63  ;;  %18535 = vmatprep.mubr.msk.f32.mxu0 %vm567_vm0, %v24502_v55  ;;  %v28927_v63 = vld [vmem:[#allocation28_spill] sm:$0xff] }
  0xfa   : >> { %18212 = vmatmul.mubr.msk.f32.gmra.mrb[6].mxu1 %vm567_vm0, %v24052_v5  ;;  %18536 = vmatmul.mubr.msk.f32.gmra.mrb[14].mxu0 %vm567_vm0, %v24513_v57  ;;  %v28928_v5 = vld [vmem:[#allocation10_spill] sm:$0xff] }
  0xfb   : >> { %18214 = vmatprep.mubr.msk.f32.mxu1 %vm567_vm0, %v24060_v7  ;;  %18540 = vmatprep.mubr.msk.f32.mxu0 %vm567_vm0, %v23901_v35  ;;  %v14522_v35 = vld [vmem:[%s28873_s1 + $0x40] sm:$0xff]  ;;  %v24663_v7 = vld [vmem:[%s23777_s30 + $0xcc] sm:$0xff] }
  0xfe   : >> { %18215 = vmatmul.mubr.msk.f32.gmra.mrb[8].mxu1 %vm567_vm0, %v24075_v11  ;;  %18541 = vmatmul.mubr.msk.f32.vlgmr.msra.gmra.mrb[0].mxu0 %vm567_vm0, %v23916_v37  ;;  %v28913_v37 = vld [vmem:[#allocation14_spill] sm:$0xff]  ;;  %v28929_v11 = vld [vmem:[#allocation11_spill] sm:$0xff] }
  0xff   : >> { %18565 = vmatpush3.msra.mxu0 %v14896_v32  ;;  %18217 = vmatprep.mubr.msk.f32.mxu1 %vm567_vm0, %v24081_v14  ;;  %v24677_v14 = vld [vmem:[%s23777_s30 + $0xdc] sm:$0xff]  ;;  %v28941_v32 = vld [vmem:[#allocation38_spill] sm:$0xff] }
 0x100   : >> { %18543 = vmatprep.mubr.msk.f32.mxu0 %vm567_vm0, %v23922_v39  ;;  %18590 = vmatprep.subr.mxu0 %v14930_v59  ;;  %v28915_v39 = vld [vmem:[#allocation16_spill] sm:$0xff] }
 0x102   : >> { %18218 = vmatmul.mubr.msk.f32.gmra.mrb[10].mxu1 %vm567_vm0, %v24095_v31  ;;  %18544 = vmatmul.mubr.msk.f32.gmra.mrb[2].mxu0 %vm567_vm0, %v23936_v41  ;;  %v14964_v41 = vld [vmem:[%s28873_s1 + $0xa8] sm:$0xff]  ;;  %v14998_v31 = vld [vmem:[%s28873_s1 + $0xb0] sm:$0xff] }
 0x103   : >> { %18220 = vmatprep.mubr.msk.f32.mxu1 %vm567_vm0, %v24193_v8  ;;  %18546 = vmatprep.mubr.msk.f32.mxu0 %vm567_vm0, %v23940_v43  ;;  %v28920_v43 = vld [vmem:[#allocation21_spill] sm:$0xff] }
 0x106   : >> { %18221 = vmatmul.mubr.msk.f32.gmra.mrb[12].mxu1 %vm567_vm0, %v24204_v4  ;;  %18547 = vmatmul.mubr.msk.f32.gmra.mrb[4].mxu0 %vm567_vm0, %v23951_v45  ;;  %v28921_v45 = vld [vmem:[#allocation22_spill] sm:$0xff] }
 0x107   : >> { %18223 = vmatprep.mubr.msk.f32.mxu1 %vm567_vm0, %v24207_v12  ;;  %18549 = vmatprep.mubr.msk.f32.mxu0 %vm567_vm0, %v23955_v47  ;;  %v14556_v47 = vld [vmem:[%s28873_s1 + $0x48] sm:$0xff] }
 0x10a   : >> { %18224 = vmatmul.mubr.msk.f32.gmra.mrb[14].mxu1 %vm567_vm0, %v24218_v16  ;;  %18550 = vmatmul.mubr.msk.f32.gmra.mrb[6].mxu0 %vm567_vm0, %v23969_v50  ;;  %v28922_v50 = vld [vmem:[#allocation23_spill] sm:$0xff] }
 0x10b   : >> { %18228 = vmatprep.mubr.msk.f32.mxu1 %vm567_vm0, %v23813_v17  ;;  %18552 = vmatprep.mubr.msk.f32.mxu0 %vm567_vm0, %v23977_v52  ;;  %v24570_v17 = vld [vmem:[%s23777_s30 + $0xc3] sm:$0xff] }
 0x10c   : >> { %v28923_v52 = vld [vmem:[#allocation24_spill] sm:$0xff] }
 0x10e   : >> { %18229 = vmatmul.mubr.msk.f32.vlgmr.msra.gmra.mrb[0].mxu1 %vm567_vm0, %v23827_v19  ;;  %18553 = vmatmul.mubr.msk.f32.gmra.mrb[8].mxu0 %vm567_vm0, %v23991_v54  ;;  %v24581_v19 = vld [vmem:[%s23777_s30 + $0xcb] sm:$0xff] }
 0x10f   : >> { %18253 = vmatpush3.msra.mxu1 %v14488_v10  ;;  %18231 = vmatprep.mubr.msk.f32.mxu1 %vm567_vm0, %v23833_v21  ;;  %v24584_v21 = vld [vmem:[%s23777_s30 + $0xd3] sm:$0xff]  ;;  %v28924_v54 = vld [vmem:[#allocation25_spill] sm:$0xff] }
 0x110   : >> { %18555 = vmatprep.mubr.msk.f32.mxu0 %vm567_vm0, %v23997_v56  ;;  %18278 = vmatprep.subr.mxu1 %v14522_v35  ;;  %v28925_v56 = vld [vmem:[#allocation26_spill] sm:$0xff]  ;;  %v14510_v10 = vld [vmem:[%s23777_s30 + $0x43] sm:$0xff] }
 0x112   : >> { %18232 = vmatmul.mubr.msk.f32.gmra.mrb[2].mxu1 %vm567_vm0, %v23847_v23  ;;  %18556 = vmatmul.mubr.msk.f32.gmra.mrb[10].mxu0 %vm567_vm0, %v24011_v58  ;;  %v28914_v23 = vld [vmem:[#allocation15_spill] sm:$0xff]  ;;  %v24652_v58 = vld [vmem:[%s23777_s30 + $0xc4] sm:$0xff] }
 0x113   : >> { %18234 = vmatprep.mubr.msk.f32.mxu1 %vm567_vm0, %v23853_v25  ;;  %18558 = vmatprep.mubr.msk.f32.mxu0 %vm567_vm0, %v24570_v17  ;;  %v24595_v25 = vld [vmem:[%s23777_s30 + $0xdb] sm:$0xff] }
 0x116   : >> { %18235 = vmatmul.mubr.msk.f32.gmra.mrb[4].mxu1 %vm567_vm0, %v28913_v37  ;;  %18559 = vmatmul.mubr.msk.f32.gmra.mrb[12].mxu0 %vm567_vm0, %v24581_v19  ;;  %v28943_v37 = vld [vmem:[#allocation40_spill] sm:$0xff] }
 0x117   : >> { %18237 = vmatprep.mubr.msk.f32.mxu1 %vm567_vm0, %v28914_v23  ;;  %18561 = vmatprep.mubr.msk.f32.mxu0 %vm567_vm0, %v24584_v21  ;;  %v14511_v23 = vld [vmem:[%s23777_s30 + $0x4b] sm:$0xff] }
 0x11a   : >> { %18238 = vmatmul.mubr.msk.f32.gmra.mrb[6].mxu1 %vm567_vm0, %v28915_v39  ;;  %18562 = vmatmul.mubr.msk.f32.gmra.mrb[14].mxu0 %vm567_vm0, %v24595_v25  ;;  %v14927_v39 = vld [vmem:[%s23777_s30 + $0xe8] sm:$0xff] }
 0x11b   : >> { %18240 = vmatprep.mubr.msk.f32.mxu1 %vm567_vm0, %v23898_v34  ;;  %18566 = vmatprep.mubr.msk.f32.mxu0 %vm567_vm0, %v24063_v9  ;;  %v28916_v34 = vld [vmem:[#allocation17_spill] sm:$0xff]  ;;  %v24666_v9 = vld [vmem:[%s23777_s30 + $0xd4] sm:$0xff] }
 0x11e   : >> { %18241 = vmatmul.mubr.msk.f32.gmra.mrb[8].mxu1 %vm567_vm0, %v23913_v36  ;;  %18567 = vmatmul.mubr.msk.f32.vlgmr.msra.gmra.mrb[0].mxu0 %vm567_vm0, %v24078_v13  ;;  %v28917_v36 = vld [vmem:[#allocation18_spill] sm:$0xff]  ;;  %v28930_v13 = vld [vmem:[#allocation12_spill] sm:$0xff] }
 0x11f   : >> { %18591 = vmatpush3.msra.mxu0 %v14930_v59  ;;  %18243 = vmatprep.mubr.msk.f32.mxu1 %vm567_vm0, %v23919_v38  ;;  %v28918_v38 = vld [vmem:[#allocation19_spill] sm:$0xff] }
 0x120   : >> { %18569 = vmatprep.mubr.msk.f32.mxu0 %vm567_vm0, %v24084_v15  ;;  %18616 = vmatprep.subr.mxu0 %v14964_v41  ;;  %v28931_v15 = vld [vmem:[#allocation13_spill] sm:$0xff]  ;;  %v14926_v59 = vld [vmem:[%s23777_s30 + $0xe0] sm:$0xff] }
 0x122   : >> { %18244 = vmatmul.mubr.msk.f32.gmra.mrb[10].mxu1 %vm567_vm0, %v23933_v40  ;;  %18570 = vmatmul.mubr.msk.f32.gmra.mrb[2].mxu0 %vm567_vm0, %v24098_v42  ;;  %v28919_v40 = vld [vmem:[#allocation20_spill] sm:$0xff]  ;;  %v28938_v42 = vld [vmem:[#allocation35_spill] sm:$0xff] }
 0x123   : >> { %18246 = vmatprep.mubr.msk.f32.mxu1 %vm567_vm0, %v24311_v26  ;;  %18572 = vmatprep.mubr.msk.f32.mxu0 %vm567_vm0, %v28916_v34  ;;  %v14928_v34 = vld [vmem:[%s23777_s30 + $0xf0] sm:$0xff] }
 0x126   : >> { %18247 = vmatmul.mubr.msk.f32.gmra.mrb[12].mxu1 %vm567_vm0, %v24322_v1  ;;  %18573 = vmatmul.mubr.msk.f32.gmra.mrb[4].mxu0 %vm567_vm0, %v28917_v36  ;;  %v14513_v36 = vld [vmem:[%s23777_s30 + $0x5b] sm:$0xff] }
 0x127   : >> { %18249 = vmatprep.mubr.msk.f32.mxu1 %vm567_vm0, %v24325_v28  ;;  %18575 = vmatprep.mubr.msk.f32.mxu0 %vm567_vm0, %v28918_v38  ;;  %v14929_v38 = vld [vmem:[%s23777_s30 + $0xf8] sm:$0xff] }
 0x12a   : >> { %18250 = vmatmul.mubr.msk.f32.gmra.mrb[14].mxu1 %vm567_vm0, %v24336_v30  ;;  %18576 = vmatmul.mubr.msk.f32.gmra.mrb[6].mxu0 %vm567_vm0, %v28919_v40  ;;  %v14514_v40 = vld [vmem:[%s23777_s30 + $0x63] sm:$0xff] }
 0x12b   : >> { %18254 = vmatprep.mubr.msk.f32.mxu1 %vm567_vm0, %v28920_v43  ;;  %18578 = vmatprep.mubr.msk.f32.mxu0 %vm567_vm0, %v28921_v45  ;;  %v14515_v43 = vld [vmem:[%s23777_s30 + $0x6b] sm:$0xff]  ;;  %v14516_v45 = vld [vmem:[%s23777_s30 + $0x73] sm:$0xff] }
 0x12e   : >> { %18255 = vmatmul.mubr.msk.f32.vlgmr.msra.gmra.mrb[0].mxu1 %vm567_vm0, %v28922_v50  ;;  %18579 = vmatmul.mubr.msk.f32.gmra.mrb[8].mxu0 %vm567_vm0, %v28923_v52  ;;  %v14517_v50 = vld [vmem:[%s23777_s30 + $0x7b] sm:$0xff]  ;;  %v24780_v52 = vld [vmem:[%s23777_s30 + $0x8b] sm:$0xff] }
 0x12f   : >> { %18279 = vmatpush3.msra.mxu1 %v14522_v35  ;;  %18257 = vmatprep.mubr.msk.f32.mxu1 %vm567_vm0, %v28924_v54  ;;  %v28942_v35 = vld [vmem:[#allocation39_spill] sm:$0xff] }
 0x130   : >> { %18581 = vmatprep.mubr.msk.f32.mxu0 %vm567_vm0, %v28925_v56  ;;  %18304 = vmatprep.subr.mxu1 %v14556_v47  ;;  %v24783_v54 = vld [vmem:[%s23777_s30 + $0x93] sm:$0xff] }
 0x131   : >> { %v28946_v56 = vld [vmem:[#allocation43_spill] sm:$0xff] }
 0x132   : >> { %18258 = vmatmul.mubr.msk.f32.gmra.mrb[2].mxu1 %vm567_vm0, %v28926_v61  ;;  %18582 = vmatmul.mubr.msk.f32.gmra.mrb[10].mxu0 %vm567_vm0, %v28927_v63  ;;  %v14544_v61 = vld [vmem:[%s23777_s30 + $0x44] sm:$0xff] }
 0x133   : >> { %18260 = vmatprep.mubr.msk.f32.mxu1 %vm567_vm0, %v28928_v5  ;;  %18584 = vmatprep.mubr.msk.f32.mxu0 %vm567_vm0, %v24652_v58  ;;  %v14960_v63 = vld [vmem:[%s23777_s30 + $0xe1] sm:$0xff]  ;;  %v28949_v5 = vld [vmem:[#allocation46_spill] sm:$0xff] }
 0x136   : >> { %18261 = vmatmul.mubr.msk.f32.gmra.mrb[4].mxu1 %vm567_vm0, %v28929_v11  ;;  %18585 = vmatmul.mubr.msk.f32.gmra.mrb[12].mxu0 %vm567_vm0, %v24663_v7  ;;  %v14961_v11 = vld [vmem:[%s23777_s30 + $0xe9] sm:$0xff] }
 0x137   : >> { %18263 = vmatprep.mubr.msk.f32.mxu1 %vm567_vm0, %v28930_v13  ;;  %18587 = vmatprep.mubr.msk.f32.mxu0 %vm567_vm0, %v24666_v9  ;;  %v14546_v13 = vld [vmem:[%s23777_s30 + $0x54] sm:$0xff] }
 0x13a   : >> { %18264 = vmatmul.mubr.msk.f32.gmra.mrb[6].mxu1 %vm567_vm0, %v28931_v15  ;;  %18588 = vmatmul.mubr.msk.f32.gmra.mrb[14].mxu0 %vm567_vm0, %v24677_v14  ;;  %v14962_v15 = vld [vmem:[%s23777_s30 + $0xf1] sm:$0xff] }
 0x13b   : >> { %18266 = vmatprep.mubr.msk.f32.mxu1 %vm567_vm0, %v23816_v18  ;;  %18592 = vmatprep.mubr.msk.f32.mxu0 %vm567_vm0, %v24193_v8  ;;  %v28932_v8 = vld [vmem:[#allocation29_spill] sm:$0xff]  ;;  %v28933_v18 = vld [vmem:[#allocation30_spill] sm:$0xff] }
 0x13e   : >> { %18267 = vmatmul.mubr.msk.f32.gmra.mrb[8].mxu1 %vm567_vm0, %v23830_v20  ;;  %18593 = vmatmul.mubr.msk.f32.vlgmr.msra.gmra.mrb[0].mxu0 %vm567_vm0, %v24204_v4  ;;  %v28936_v20 = vld [vmem:[#allocation33_spill] sm:$0xff] }
 0x13f   : >> { %18617 = vmatpush3.msra.mxu0 %v14964_v41  ;;  %18269 = vmatprep.mubr.msk.f32.mxu1 %vm567_vm0, %v23836_v22  ;;  %v28937_v22 = vld [vmem:[#allocation34_spill] sm:$0xff]  ;;  %v28940_v4 = vld [vmem:[#allocation37_spill] sm:$0xff] }
 0x140   : >> { %18595 = vmatprep.mubr.msk.f32.mxu0 %vm567_vm0, %v24207_v12  ;;  %18642 = vmatprep.subr.mxu0 %v14998_v31  ;;  %v28934_v12 = vld [vmem:[#allocation31_spill] sm:$0xff] }
 0x141   : >> { %v14512_v41 = vld [vmem:[%s23777_s30 + $0x53] sm:$0xff] }
 0x142   : >> { %18270 = vmatmul.mubr.msk.f32.gmra.mrb[10].mxu1 %vm567_vm0, %v23850_v24  ;;  %18596 = vmatmul.mubr.msk.f32.gmra.mrb[2].mxu0 %vm567_vm0, %v24218_v16  ;;  %v28935_v16 = vld [vmem:[#allocation32_spill] sm:$0xff]  ;;  %v14590_v24 = vld [vmem:[%s28873_s1 + $0x50] sm:$0xff] }
 0x143   : >> { %18272 = vmatprep.mubr.msk.f32.mxu1 %vm567_vm0, %v24429_v60  ;;  %18598 = vmatprep.mubr.msk.f32.mxu0 %vm567_vm0, %v28932_v8  ;;  %v14963_v8 = vld [vmem:[%s23777_s30 + $0xf9] sm:$0xff] }
 0x146   : >> { %18273 = vmatmul.mubr.msk.f32.gmra.mrb[12].mxu1 %vm567_vm0, %v24440_v62  ;;  %18599 = vmatmul.mubr.msk.f32.gmra.mrb[4].mxu0 %vm567_vm0, %v28933_v18  ;;  %v14548_v18 = vld [vmem:[%s23777_s30 + $0x64] sm:$0xff] }
 0x147   : >> { %18275 = vmatprep.mubr.msk.f32.mxu1 %vm567_vm0, %v24443_v3  ;;  %18601 = vmatprep.mubr.msk.f32.mxu0 %vm567_vm0, %v28934_v12  ;;  %v14549_v12 = vld [vmem:[%s23777_s30 + $0x6c] sm:$0xff] }
 0x14a   : >> { %18276 = vmatmul.mubr.msk.f32.gmra.mrb[14].mxu1 %vm567_vm0, %v24454_v6  ;;  %18602 = vmatmul.mubr.msk.f32.gmra.mrb[6].mxu0 %vm567_vm0, %v28935_v16  ;;  %v14550_v16 = vld [vmem:[%s23777_s30 + $0x74] sm:$0xff] }
 0x14b   : >> { %18280 = vmatprep.mubr.msk.f32.mxu1 %vm567_vm0, %v28936_v20  ;;  %18604 = vmatprep.mubr.msk.f32.mxu0 %vm567_vm0, %v28937_v22  ;;  %v15066_v20 = vld [vmem:[%s28873_s1 + $0xc0] sm:$0xff] }
 0x14c   : >> { %v14551_v22 = vld [vmem:[%s23777_s30 + $0x7c] sm:$0xff] }
 0x14e   : >> { %18281 = vmatmul.mubr.msk.f32.vlgmr.msra.gmra.mrb[0].mxu1 %vm567_vm0, %v28938_v42  ;;  %18605 = vmatmul.mubr.msk.f32.gmra.mrb[8].mxu0 %vm567_vm0, %v28939_v46  ;;  %v28951_v42 = vld [vmem:[#allocation48_spill] sm:$0xff]  ;;  %v24862_v46 = vld [vmem:[%s23777_s30 + $0x8c] sm:$0xff] }
 0x14f   : >> { %18305 = vmatpush3.msra.mxu1 %v14556_v47  ;;  %18283 = vmatprep.mubr.msk.f32.mxu1 %vm567_vm0, %v28940_v4  ;;  %v15032_v47 = vld [vmem:[%s28873_s1 + $0xb8] sm:$0xff] }
 0x150   : >> { %18607 = vmatprep.mubr.msk.f32.mxu0 %vm567_vm0, %v28941_v32  ;;  %18330 = vmatprep.subr.mxu1 %v14590_v24  ;;  %v24865_v4 = vld [vmem:[%s23777_s30 + $0x94] sm:$0xff]  ;;  %v24876_v32 = vld [vmem:[%s23777_s30 + $0x9c] sm:$0xff] }
 0x152   : >> { %18284 = vmatmul.mubr.msk.f32.gmra.mrb[2].mxu1 %vm567_vm0, %v28942_v35  ;;  %18608 = vmatmul.mubr.msk.f32.gmra.mrb[10].mxu0 %vm567_vm0, %v28943_v37  ;;  %v14576_v35 = vld [vmem:[%s23777_s30 + $0x50] sm:$0xff]  ;;  %v14577_v37 = vld [vmem:[%s23777_s30 + $0x58] sm:$0xff] }
 0x153   : >> { %18286 = vmatprep.mubr.msk.f32.mxu1 %vm567_vm0, %v14510_v10  ;;  %18610 = vmatprep.mubr.msk.f32.mxu0 %vm567_vm0, %v14926_v59  ;;  %v14574_v10 = vld [vmem:[%s23777_s30 + $0x40] sm:$0xff]  ;;  %v14575_v59 = vld [vmem:[%s23777_s30 + $0x48] sm:$0xff] }
 0x156   : >> { %18287 = vmatmul.mubr.msk.f32.gmra.mrb[4].mxu1 %vm567_vm0, %v14511_v23  ;;  %18611 = vmatmul.mubr.msk.f32.gmra.mrb[12].mxu0 %vm567_vm0, %v14927_v39  ;;  %v14578_v23 = vld [vmem:[%s23777_s30 + $0x60] sm:$0xff] }
 0x157   : >> { %18289 = vmatprep.mubr.msk.f32.mxu1 %vm567_vm0, %v14512_v41  ;;  %18613 = vmatprep.mubr.msk.f32.mxu0 %vm567_vm0, %v14928_v34  ;;  %v23432_v39 = vld [vmem:[%s28873_s1 + $0x60] sm:$0xff]  ;;  %v14580_v41 = vld [vmem:[%s23777_s30 + $0x70] sm:$0xff] }
 0x158   : >> { %v14996_v34 = vld [vmem:[%s23777_s30 + $0xf2] sm:$0xff] }
 0x15a   : >> { %18290 = vmatmul.mubr.msk.f32.gmra.mrb[6].mxu1 %vm567_vm0, %v14513_v36  ;;  %18614 = vmatmul.mubr.msk.f32.gmra.mrb[14].mxu0 %vm567_vm0, %v14929_v38  ;;  %v14997_v36 = vld [vmem:[%s23777_s30 + $0xfa] sm:$0xff] }
 0x15b   : >> { %18292 = vmatprep.mubr.msk.f32.mxu1 %vm567_vm0, %v14514_v40  ;;  %18618 = vmatprep.mubr.msk.f32.mxu0 %vm567_vm0, %v24311_v26  ;;  %v24770_v26 = vld [vmem:[%s23777_s30 + $0x83] sm:$0xff] }
 0x15c   : >> { %v14582_v38 = vld [vmem:[%s23777_s30 + $0x80] sm:$0xff]  ;;  %v14583_v40 = vld [vmem:[%s23777_s30 + $0x88] sm:$0xff] }
 0x15e   : >> { %18293 = vmatmul.mubr.msk.f32.gmra.mrb[8].mxu1 %vm567_vm0, %v14515_v43  ;;  %18619 = vmatmul.mubr.msk.f32.vlgmr.msra.gmra.mrb[0].mxu0 %vm567_vm0, %v24322_v1  ;;  %v28944_v1 = vld [vmem:[#allocation41_spill] sm:$0xff] }
 0x15f   : >> { %18643 = vmatpush3.msra.mxu0 %v14998_v31  ;;  %18295 = vmatprep.mubr.msk.f32.mxu1 %vm567_vm0, %v14516_v45  ;;  %v14547_v31 = vld [vmem:[%s23777_s30 + $0x5c] sm:$0xff]  ;;  %v14584_v43 = vld [vmem:[%s23777_s30 + $0x90] sm:$0xff] }
 0x160   : >> { %18621 = vmatprep.mubr.msk.f32.mxu0 %vm567_vm0, %v24325_v28  ;;  %18668 = vmatprep.subr.mxu0 %v15032_v47  ;;  %v28945_v28 = vld [vmem:[#allocation42_spill] sm:$0xff] }
 0x161   : >> { %v14585_v45 = vld [vmem:[%s23777_s30 + $0x98] sm:$0xff] }
 0x162   : >> { %18296 = vmatmul.mubr.msk.f32.gmra.mrb[10].mxu1 %vm567_vm0, %v14517_v50  ;;  %18622 = vmatmul.mubr.msk.f32.gmra.mrb[2].mxu0 %vm567_vm0, %v24336_v30  ;;  %v24794_v30 = vld [vmem:[%s23777_s30 + $0x9b] sm:$0xff]  ;;  %v15020_v50 = vld [vmem:[%s23777_s30 + $0xa3] sm:$0xff] }
 0x163   : >> { %18298 = vmatprep.mubr.msk.f32.mxu1 %vm567_vm0, %v24770_v26  ;;  %18624 = vmatprep.mubr.msk.f32.mxu0 %vm567_vm0, %v28944_v1  ;;  %v15021_v1 = vld [vmem:[%s23777_s30 + $0xab] sm:$0xff] }
 0x166   : >> { %18299 = vmatmul.mubr.msk.f32.gmra.mrb[12].mxu1 %vm567_vm0, %v24780_v52  ;;  %18625 = vmatmul.mubr.msk.f32.gmra.mrb[4].mxu0 %vm567_vm0, %v24351_v44  ;;  %v14624_v44 = vld [vmem:[%s28873_s1 + $0x58] sm:$0xff] }
 0x167   : >> { %18301 = vmatprep.mubr.msk.f32.mxu1 %vm567_vm0, %v24783_v54  ;;  %18627 = vmatprep.mubr.msk.f32.mxu0 %vm567_vm0, %v28945_v28  ;;  %v15022_v28 = vld [vmem:[%s23777_s30 + $0xb3] sm:$0xff] }
 0x16a   : >> { %18302 = vmatmul.mubr.msk.f32.gmra.mrb[14].mxu1 %vm567_vm0, %v24794_v30  ;;  %18628 = vmatmul.mubr.msk.f32.gmra.mrb[6].mxu0 %vm567_vm0, %v24366_v27  ;;  %v28947_v27 = vld [vmem:[#allocation44_spill] sm:$0xff] }
 0x16b   : >> { %18306 = vmatprep.mubr.msk.f32.mxu1 %vm567_vm0, %v24371_v49  ;;  %18630 = vmatprep.mubr.msk.f32.mxu0 %vm567_vm0, %v28946_v56  ;;  %v28948_v49 = vld [vmem:[#allocation45_spill] sm:$0xff]  ;;  %v14608_v56 = vld [vmem:[%s23777_s30 + $0x41] sm:$0xff] }
 0x16e   : >> { %18307 = vmatmul.mubr.msk.f32.vlgmr.msra.gmra.mrb[0].mxu1 %vm567_vm0, %v24384_v29  ;;  %18631 = vmatmul.mubr.msk.f32.gmra.mrb[8].mxu0 %vm567_vm0, %v24387_v48  ;;  %v28950_v29 = vld [vmem:[#allocation47_spill] sm:$0xff]  ;;  %v14545_v48 = vld [vmem:[%s23777_s30 + $0x4c] sm:$0xff] }
 0x16f   : >> { %18331 = vmatpush3.msra.mxu1 %v14590_v24  ;;  %18309 = vmatprep.mubr.msk.f32.mxu1 %vm567_vm0, %v28947_v27  ;;  %v24852_v24 = vld [vmem:[%s23777_s30 + $0x84] sm:$0xff]  ;;  %v14610_v27 = vld [vmem:[%s23777_s30 + $0x51] sm:$0xff] }
 0x170   : >> { %18633 = vmatprep.mubr.msk.f32.mxu0 %vm567_vm0, %v28948_v49  ;;  %18356 = vmatprep.subr.mxu1 %v14624_v44  ;;  %v14611_v49 = vld [vmem:[%s23777_s30 + $0x59] sm:$0xff] }
 0x172   : >> { %18310 = vmatmul.mubr.msk.f32.gmra.mrb[2].mxu1 %vm567_vm0, %v28949_v5  ;;  %18634 = vmatmul.mubr.msk.f32.gmra.mrb[10].mxu0 %vm567_vm0, %v28950_v29  ;;  %v14614_v5 = vld [vmem:[%s23777_s30 + $0x71] sm:$0xff] }
 0x173   : >> { %18312 = vmatprep.mubr.msk.f32.mxu1 %vm567_vm0, %v14544_v61  ;;  %18636 = vmatprep.mubr.msk.f32.mxu0 %vm567_vm0, %v14960_v63  ;;  %v15028_v61 = vld [vmem:[%s23777_s30 + $0xe3] sm:$0xff]  ;;  %v15029_v63 = vld [vmem:[%s23777_s30 + $0xeb] sm:$0xff]  ;;  %v15030_v29 = vld [vmem:[%s23777_s30 + $0xf3] sm:$0xff] }
 0x176   : >> { %18313 = vmatmul.mubr.msk.f32.gmra.mrb[4].mxu1 %vm567_vm0, %v14545_v48  ;;  %18637 = vmatmul.mubr.msk.f32.gmra.mrb[12].mxu0 %vm567_vm0, %v14961_v11  ;;  %v14616_v48 = vld [vmem:[%s23777_s30 + $0x81] sm:$0xff]  ;;  %v14617_v11 = vld [vmem:[%s23777_s30 + $0x89] sm:$0xff] }
 0x177   : >> { %18315 = vmatprep.mubr.msk.f32.mxu1 %vm567_vm0, %v14546_v13  ;;  %18639 = vmatprep.mubr.msk.f32.mxu0 %vm567_vm0, %v14962_v15  ;;  %v14618_v13 = vld [vmem:[%s23777_s30 + $0x91] sm:$0xff]  ;;  %v14619_v15 = vld [vmem:[%s23777_s30 + $0x99] sm:$0xff] }
 0x17a   : >> { %18316 = vmatmul.mubr.msk.f32.gmra.mrb[6].mxu1 %vm567_vm0, %v14547_v31  ;;  %18640 = vmatmul.mubr.msk.f32.gmra.mrb[14].mxu0 %vm567_vm0, %v14963_v8  ;;  %v14620_v31 = vld [vmem:[%s23777_s30 + $0xa1] sm:$0xff] }
 0x17b   : >> { %18318 = vmatprep.mubr.msk.f32.mxu1 %vm567_vm0, %v14548_v18  ;;  %18644 = vmatprep.mubr.msk.f32.mxu0 %vm567_vm0, %v24429_v60  ;;  %v15054_v8 = vld [vmem:[%s23777_s30 + $0xa4] sm:$0xff] }
 0x17c   : >> { %v14621_v18 = vld [vmem:[%s23777_s30 + $0xa9] sm:$0xff] }
 0x17e   : >> { %18319 = vmatmul.mubr.msk.f32.gmra.mrb[8].mxu1 %vm567_vm0, %v14549_v12  ;;  %18645 = vmatmul.mubr.msk.f32.vlgmr.msra.gmra.mrb[0].mxu0 %vm567_vm0, %v24440_v62  ;;  %v15055_v12 = vld [vmem:[%s23777_s30 + $0xac] sm:$0xff] }
 0x17f   : >> { %18669 = vmatpush3.msra.mxu0 %v15032_v47  ;;  %18321 = vmatprep.mubr.msk.f32.mxu1 %vm567_vm0, %v14550_v16  ;;  %v14586_v47 = vld [vmem:[%s23777_s30 + $0xa0] sm:$0xff]  ;;  %v14622_v16 = vld [vmem:[%s23777_s30 + $0xb1] sm:$0xff] }
 0x180   : >> { %18647 = vmatprep.mubr.msk.f32.mxu0 %vm567_vm0, %v24443_v3  ;;  %18694 = vmatprep.subr.mxu0 %v15066_v20 }
 0x182   : >> { %18322 = vmatmul.mubr.msk.f32.gmra.mrb[10].mxu1 %vm567_vm0, %v14551_v22  ;;  %18648 = vmatmul.mubr.msk.f32.gmra.mrb[2].mxu0 %vm567_vm0, %v24454_v6  ;;  %v14623_v22 = vld [vmem:[%s23777_s30 + $0xb9] sm:$0xff] }
 0x183   : >> { %18324 = vmatprep.mubr.msk.f32.mxu1 %vm567_vm0, %v24852_v24  ;;  %18650 = vmatprep.mubr.msk.f32.mxu0 %vm567_vm0, %v28951_v42 }
 0x186   : >> { %18325 = vmatmul.mubr.msk.f32.gmra.mrb[12].mxu1 %vm567_vm0, %v24862_v46  ;;  %18651 = vmatmul.mubr.msk.f32.gmra.mrb[4].mxu0 %vm567_vm0, %v24468_v0 }
 0x187   : >> { %18327 = vmatprep.mubr.msk.f32.mxu1 %vm567_vm0, %v24865_v4  ;;  %18653 = vmatprep.mubr.msk.f32.mxu0 %vm567_vm0, %v24471_v33 }
 0x18a   : >> { %18328 = vmatmul.mubr.msk.f32.gmra.mrb[14].mxu1 %vm567_vm0, %v24876_v32  ;;  %18654 = vmatmul.mubr.msk.f32.gmra.mrb[6].mxu0 %vm567_vm0, %v24483_v51 }
 0x18b   : >> { %18332 = vmatprep.mubr.msk.f32.mxu1 %vm567_vm0, %v14574_v10  ;;  %18656 = vmatprep.mubr.msk.f32.mxu0 %vm567_vm0, %v24488_v2  ;;  %v14994_v2 = vld [vmem:[%s23777_s30 + $0xe2] sm:$0xff] }
 0x18e   : >> { %18333 = vmatmul.mubr.msk.f32.vlgmr.msra.gmra.mrb[0].mxu1 %vm567_vm0, %v14575_v59  ;;  %18657 = vmatmul.mubr.msk.f32.gmra.mrb[8].mxu0 %vm567_vm0, %v24499_v53  ;;  %v14579_v53 = vld [vmem:[%s23777_s30 + $0x68] sm:$0xff] }
 0x18f   : >> { %18357 = vmatpush3.msra.mxu1 %v14624_v44  ;;  %18335 = vmatprep.mubr.msk.f32.mxu1 %vm567_vm0, %v14576_v35  ;;  %v14609_v44 = vld [vmem:[%s23777_s30 + $0x49] sm:$0xff] }
 0x190   : >> { %18659 = vmatprep.mubr.msk.f32.mxu0 %vm567_vm0, %v24502_v55  ;;  %22572 = vmatprep.subr.mxu1 %v23432_v39  ;;  %v14995_v55 = vld [vmem:[%s23777_s30 + $0xea] sm:$0xff]  ;;  %v28952_v35 = vld [vmem:[#allocation8_spill] sm:$0xff] }
 0x192   : >> { %18336 = vmatmul.mubr.msk.f32.gmra.mrb[2].mxu1 %vm567_vm0, %v14577_v37  ;;  %18660 = vmatmul.mubr.msk.f32.gmra.mrb[10].mxu0 %vm567_vm0, %v24513_v57  ;;  %v14581_v57 = vld [vmem:[%s23777_s30 + $0x78] sm:$0xff] }
 0x193   : >> { %18338 = vmatprep.mubr.msk.f32.mxu1 %vm567_vm0, %v14578_v23  ;;  %18662 = vmatprep.mubr.msk.f32.mxu0 %vm567_vm0, %v14994_v2 }
 0x196   : >> { %18339 = vmatmul.mubr.msk.f32.gmra.mrb[4].mxu1 %vm567_vm0, %v14579_v53  ;;  %18663 = vmatmul.mubr.msk.f32.gmra.mrb[12].mxu0 %vm567_vm0, %v14995_v55 }
 0x197   : >> { %18341 = vmatprep.mubr.msk.f32.mxu1 %vm567_vm0, %v14580_v41  ;;  %18665 = vmatprep.mubr.msk.f32.mxu0 %vm567_vm0, %v14996_v34 }
 0x19a   : >> { %18342 = vmatmul.mubr.msk.f32.gmra.mrb[6].mxu1 %vm567_vm0, %v14581_v57  ;;  %18666 = vmatmul.mubr.msk.f32.gmra.mrb[14].mxu0 %vm567_vm0, %v14997_v36 }
 0x19b   : >> { %18344 = vmatprep.mubr.msk.f32.mxu1 %vm567_vm0, %v14582_v38  ;;  %18670 = vmatprep.mubr.msk.f32.mxu0 %vm567_vm0, %v24770_v26  ;;  %v14587_v26 = vld [vmem:[%s23777_s30 + $0xa8] sm:$0xff] }
 0x19e   : >> { %18345 = vmatmul.mubr.msk.f32.gmra.mrb[8].mxu1 %vm567_vm0, %v14583_v40  ;;  %18671 = vmatmul.mubr.msk.f32.vlgmr.msra.gmra.mrb[0].mxu0 %vm567_vm0, %v24780_v52  ;;  %v14588_v52 = vld [vmem:[%s23777_s30 + $0xb0] sm:$0xff] }
 0x19f   : >> { %18695 = vmatpush3.msra.mxu0 %v15066_v20  ;;  %18347 = vmatprep.mubr.msk.f32.mxu1 %vm567_vm0, %v14584_v43  ;;  %v15056_v20 = vld [vmem:[%s23777_s30 + $0xb4] sm:$0xff] }
 0x1a0   : >> { %18673 = vmatprep.mubr.msk.f32.mxu0 %vm567_vm0, %v24783_v54  ;;  %v14589_v54 = vld [vmem:[%s23777_s30 + $0xb8] sm:$0xff] }
 0x1a2   : >> { %18348 = vmatmul.mubr.msk.f32.gmra.mrb[10].mxu1 %vm567_vm0, %v14585_v45  ;;  %18674 = vmatmul.mubr.msk.f32.gmra.mrb[2].mxu0 %vm567_vm0, %v24794_v30  ;;  %v15023_v30 = vld [vmem:[%s23777_s30 + $0xbb] sm:$0xff] }
 0x1a3   : >> { %18350 = vmatprep.mubr.msk.f32.mxu1 %vm567_vm0, %v14586_v47  ;;  %18676 = vmatprep.mubr.msk.f32.mxu0 %vm567_vm0, %v15020_v50 }
 0x1a6   : >> { %18351 = vmatmul.mubr.msk.f32.gmra.mrb[12].mxu1 %vm567_vm0, %v14587_v26  ;;  %18677 = vmatmul.mubr.msk.f32.gmra.mrb[4].mxu0 %vm567_vm0, %v15021_v1 }
 0x1a7   : >> { %18353 = vmatprep.mubr.msk.f32.mxu1 %vm567_vm0, %v14588_v52  ;;  %18679 = vmatprep.mubr.msk.f32.mxu0 %vm567_vm0, %v15022_v28 }
 0x1aa   : >> { %18354 = vmatmul.mubr.msk.f32.gmra.mrb[14].mxu1 %vm567_vm0, %v14589_v54  ;;  %18680 = vmatmul.mubr.msk.f32.gmra.mrb[6].mxu0 %vm567_vm0, %v15023_v30 }
 0x1ab   : >> { %18358 = vmatprep.mubr.msk.f32.mxu1 %vm567_vm0, %v14608_v56  ;;  %18682 = vmatprep.mubr.msk.f32.mxu0 %vm567_vm0, %v24570_v17  ;;  %v14612_v17 = vld [vmem:[%s23777_s30 + $0x61] sm:$0xff] }
 0x1ae   : >> { %18359 = vmatmul.mubr.msk.f32.vlgmr.msra.gmra.mrb[0].mxu1 %vm567_vm0, %v14609_v44  ;;  %18683 = vmatmul.mubr.msk.f32.gmra.mrb[8].mxu0 %vm567_vm0, %v24581_v19  ;;  %v14613_v19 = vld [vmem:[%s23777_s30 + $0x69] sm:$0xff] }
 0x1af   : >> { %22573 = vmatpush3.msra.mxu1 %v23432_v39  ;;  %18361 = vmatprep.mubr.msk.f32.mxu1 %vm567_vm0, %v14610_v27 }
 0x1b0   : >> { %18685 = vmatprep.mubr.msk.f32.mxu0 %vm567_vm0, %v24584_v21  ;;  %v14615_v21 = vld [vmem:[%s23777_s30 + $0x79] sm:$0xff] }
 0x1b2   : >> { %18362 = vmatmul.mubr.msk.f32.gmra.mrb[2].mxu1 %vm567_vm0, %v14611_v49  ;;  %18686 = vmatmul.mubr.msk.f32.gmra.mrb[10].mxu0 %vm567_vm0, %v24595_v25  ;;  %v15031_v25 = vld [vmem:[%s23777_s30 + $0xfb] sm:$0xff] }
 0x1b3   : >> { %18364 = vmatprep.mubr.msk.f32.mxu1 %vm567_vm0, %v14612_v17  ;;  %18688 = vmatprep.mubr.msk.f32.mxu0 %vm567_vm0, %v15028_v61 }
 0x1b6   : >> { %18365 = vmatmul.mubr.msk.f32.gmra.mrb[4].mxu1 %vm567_vm0, %v14613_v19  ;;  %18689 = vmatmul.mubr.msk.f32.gmra.mrb[12].mxu0 %vm567_vm0, %v15029_v63 }
 0x1b7   : >> { %18367 = vmatprep.mubr.msk.f32.mxu1 %vm567_vm0, %v14614_v5  ;;  %18691 = vmatprep.mubr.msk.f32.mxu0 %vm567_vm0, %v15030_v29 }
 0x1ba   : >> { %18368 = vmatmul.mubr.msk.f32.gmra.mrb[6].mxu1 %vm567_vm0, %v14615_v21  ;;  %18692 = vmatmul.mubr.msk.f32.gmra.mrb[14].mxu0 %vm567_vm0, %v15031_v25 }
 0x1bb   : >> { %18370 = vmatprep.mubr.msk.f32.mxu1 %vm567_vm0, %v14616_v48  ;;  %18696 = vmatprep.mubr.msk.f32.mxu0 %vm567_vm0, %v24852_v24  ;;  %v15057_v24 = vld [vmem:[%s23777_s30 + $0xbc] sm:$0xff] }
 0x1be   : >> { %18371 = vmatmul.mubr.msk.f32.gmra.mrb[8].mxu1 %vm567_vm0, %v14617_v11  ;;  %18697 = vmatmul.mubr.msk.f32.vlgmr.msra.gmra.mrb[0].mxu0 %vm567_vm0, %v24862_v46  ;;  %v15062_v46 = vld [vmem:[%s23777_s30 + $0xe4] sm:$0xff] }
 0x1bf   : >> { %18373 = vmatprep.mubr.msk.f32.mxu1 %vm567_vm0, %v14618_v13  ;;  %18699 = vmatprep.mubr.msk.f32.mxu0 %vm567_vm0, %v24865_v4 }
 0x1c2   : >> { %18374 = vmatmul.mubr.msk.f32.gmra.mrb[10].mxu1 %vm567_vm0, %v14619_v15  ;;  %18700 = vmatmul.mubr.msk.f32.gmra.mrb[2].mxu0 %vm567_vm0, %v24876_v32 }
 0x1c3   : >> { %18376 = vmatprep.mubr.msk.f32.mxu1 %vm567_vm0, %v14620_v31  ;;  %18702 = vmatprep.mubr.msk.f32.mxu0 %vm567_vm0, %v15054_v8 }
 0x1c6   : >> { %18377 = vmatmul.mubr.msk.f32.gmra.mrb[12].mxu1 %vm567_vm0, %v14621_v18  ;;  %18703 = vmatmul.mubr.msk.f32.gmra.mrb[4].mxu0 %vm567_vm0, %v15055_v12 }
 0x1c7   : >> { %18379 = vmatprep.mubr.msk.f32.mxu1 %vm567_vm0, %v14622_v16  ;;  %18705 = vmatprep.mubr.msk.f32.mxu0 %vm567_vm0, %v15056_v20 }
 0x1ca   : >> { %18380 = vmatmul.mubr.msk.f32.gmra.mrb[14].mxu1 %vm567_vm0, %v14623_v22  ;;  %18706 = vmatmul.mubr.msk.f32.gmra.mrb[6].mxu0 %vm567_vm0, %v15057_v24 }
 0x1cb   : >> { %18396 = vmatprep.mubr.msk.f32.mxu1 %vm567_vm0, %v24429_v60  ;;  %18708 = vmatprep.mubr.msk.f32.mxu0 %vm567_vm0, %v24652_v58  ;;  %v15063_v60 = vld [vmem:[%s23777_s30 + $0xec] sm:$0xff] }
 0x1ce   : >> { %18397 = vmatmul.mubr.msk.f32.vlgmr.msra.gmra.mrb[8].mxu1 %vm567_vm0, %v24440_v62  ;;  %18709 = vmatmul.mubr.msk.f32.gmra.mrb[8].mxu0 %vm567_vm0, %v24663_v7  ;;  %v15064_v62 = vld [vmem:[%s23777_s30 + $0xf4] sm:$0xff] }
 0x1cf   : >> { %18399 = vmatprep.mubr.msk.f32.mxu1 %vm567_vm0, %v24443_v3  ;;  %18711 = vmatprep.mubr.msk.f32.mxu0 %vm567_vm0, %v24666_v9  ;;  %v15065_v3 = vld [vmem:[%s23777_s30 + $0xfc] sm:$0xff]  ;;  %s25049_s30 = scalar_lea.vmem [#allocation2], %s14250_s24  ;;  %s25084_s24 = smov (%p524_p11), 0  }
 0x1d2   : >> { %18400 = vmatmul.mubr.msk.f32.gmra.mrb[10].mxu1 %vm567_vm0, %v24454_v6  ;;  %18712 = vmatmul.mubr.msk.f32.gmra.mrb[10].mxu0 %vm567_vm0, %v24677_v14 }
 0x1d3   : >> { %18402 = vmatprep.mubr.msk.f32.mxu1 %vm567_vm0, %v28951_v42  ;;  %18714 = vmatprep.mubr.msk.f32.mxu0 %vm567_vm0, %v15062_v46 }
 0x1d6   : >> { %18403 = vmatmul.mubr.msk.f32.gmra.mrb[12].mxu1 %vm567_vm0, %v24468_v0  ;;  %18715 = vmatmul.mubr.msk.f32.gmra.mrb[12].mxu0 %vm567_vm0, %v15063_v60 }
 0x1d7   : >> { %18405 = vmatprep.mubr.msk.f32.mxu1 %vm567_vm0, %v24471_v33  ;;  %18717 = vmatprep.mubr.msk.f32.mxu0 %vm567_vm0, %v15064_v62 }
 0x1da   : >> { %18406 = vmatmul.mubr.msk.f32.gmra.mrb[14].mxu1 %vm567_vm0, %v24483_v51  ;;  %18718 = vmatmul.mubr.msk.f32.gmra.mrb[14].mxu0 %vm567_vm0, %v15065_v3 }
 0x281   : >> { %v18360_v6 = vpop.f32.mrb[0].mxu1 }
 0x282   : >> { %v3149_v58 = vpop.f32.mrb[1].mxu1 }
 0x285   : >> { %v18363_v7 = vpop.f32.mrb[2].mxu1 }
 0x286   : >> { %v3159_v9 = vpop.f32.mrb[3].mxu1 }
 0x289   : >> { %v18366_v14 = vpop.f32.mrb[4].mxu1 }
 0x28a   : >> { %v3169_v0 = vpop.f32.mrb[5].mxu1 }
 0x28d   : >> { %v18369_v42 = vpop.f32.mrb[6].mxu1 }
 0x28e   : >> { %v3179_v4 = vpop.f32.mrb[7].mxu1 }
 0x291   : >> { %v18698_v32 = vpop.f32.mrb[0].mxu0 }
 0x292   : >> { %v22574_v10 = vadd.f32 %v18698_v32, %v18360_v6  ;;  %v6126_v33 = vpop.f32.mrb[1].mxu0 }
 0x293   : >> { %v22575_v59 = vadd.f32 %v6126_v33, %v3149_v58 }
 0x294   : >> { %v6228_v37 = vadd.f32 %v22574_v10, %v28952_v35 }
 0x295   : >> { %v6227_v23 = vadd.f32 %v22575_v59, %v28952_v35  ;;  %v18701_v51 = vpop.f32.mrb[2].mxu0 }
 0x296   : >> { %v6244_v2 = vmax.f32 %v6228_v37, 0.0  ;;  %v22576_v39 = vadd.f32 %v18701_v51, %v18363_v7  ;;  %v6136_v53 = vpop.f32.mrb[3].mxu0 }
 0x297   : >> { %v6243_v55 = vmax.f32 %v6227_v23, 0.0  ;;  %v22577_v41 = vadd.f32 %v6136_v53, %v3159_v9 }
 0x298   : >> { %6261 = vst [vmem:[%s25049_s30 + $0x8] sm:$0xff] %v6244_v2  ;;  %v6230_v34 = vadd.f32 %v22576_v39, %v28952_v35 }
 0x299   : >> { %6260 = vst [vmem:[%s25049_s30] sm:$0xff] %v6243_v55  ;;  %v6229_v57 = vadd.f32 %v22577_v41, %v28952_v35  ;;  %v18704_v36 = vpop.f32.mrb[4].mxu0 }
 0x29a   : >> { %v6246_v38 = vmax.f32 %v6230_v34, 0.0  ;;  %v22578_v40 = vadd.f32 %v18704_v36, %v18366_v14  ;;  %v6146_v43 = vpop.f32.mrb[5].mxu0 }
 0x29b   : >> { %v6245_v45 = vmax.f32 %v6229_v57, 0.0  ;;  %v22579_v47 = vadd.f32 %v6146_v43, %v3169_v0 }
 0x29c   : >> { %6263 = vst [vmem:[%s25049_s30 + $0x18] sm:$0xff] %v6246_v38  ;;  %v6232_v50 = vadd.f32 %v22578_v40, %v28952_v35 }
 0x29d   : >> { %6262 = vst [vmem:[%s25049_s30 + $0x10] sm:$0xff] %v6245_v45  ;;  %v6231_v26 = vadd.f32 %v22579_v47, %v28952_v35  ;;  %v18707_v1 = vpop.f32.mrb[6].mxu0 }
 0x29e   : >> { %v6248_v52 = vmax.f32 %v6232_v50, 0.0  ;;  %v22580_v28 = vadd.f32 %v18707_v1, %v18369_v42  ;;  %v6156_v54 = vpop.f32.mrb[7].mxu0 }
 0x29f   : >> { %v6247_v30 = vmax.f32 %v6231_v26, 0.0  ;;  %v22581_v56 = vadd.f32 %v6156_v54, %v3179_v4 }
 0x2a0   : >> { %6265 = vst [vmem:[%s25049_s30 + $0x28] sm:$0xff] %v6248_v52  ;;  %v6234_v44 = vadd.f32 %v22580_v28, %v28952_v35 }
 0x2a1   : >> { %6264 = vst [vmem:[%s25049_s30 + $0x20] sm:$0xff] %v6247_v30  ;;  %v6233_v27 = vadd.f32 %v22581_v56, %v28952_v35  ;;  %v18398_v49 = vpop.f32.mrb[8].mxu1  ;;  %v18710_v17 = vpop.f32.mrb[8].mxu0 }
 0x2a2   : >> { %v6250_v61 = vmax.f32 %v6234_v44, 0.0  ;;  %v22582_v19 = vadd.f32 %v18710_v17, %v18398_v49  ;;  %v3418_v63 = vpop.f32.mrb[9].mxu1  ;;  %v6166_v5 = vpop.f32.mrb[9].mxu0 }
 0x2a3   : >> { %v6249_v29 = vmax.f32 %v6233_v27, 0.0  ;;  %v22583_v21 = vadd.f32 %v6166_v5, %v3418_v63 }
 0x2a4   : >> { %6267 = vst [vmem:[%s25049_s30 + $0x38] sm:$0xff] %v6250_v61  ;;  %v6236_v25 = vadd.f32 %v22582_v19, %v28952_v35 }
 0x2a5   : >> { %6266 = vst [vmem:[%s25049_s30 + $0x30] sm:$0xff] %v6249_v29  ;;  %v6235_v48 = vadd.f32 %v22583_v21, %v28952_v35  ;;  %v18401_v11 = vpop.f32.mrb[10].mxu1  ;;  %v18713_v13 = vpop.f32.mrb[10].mxu0 }
 0x2a6   : >> { %v6252_v15 = vmax.f32 %v6236_v25, 0.0  ;;  %v22584_v31 = vadd.f32 %v18713_v13, %v18401_v11  ;;  %v3428_v8 = vpop.f32.mrb[11].mxu1  ;;  %v6176_v18 = vpop.f32.mrb[11].mxu0 }
 0x2a7   : >> { %v6251_v12 = vmax.f32 %v6235_v48, 0.0  ;;  %v22585_v16 = vadd.f32 %v6176_v18, %v3428_v8 }
 0x2a8   : >> { %6269 = vst [vmem:[%s25049_s30 + $0x48] sm:$0xff] %v6252_v15  ;;  %v6238_v20 = vadd.f32 %v22584_v31, %v28952_v35 }
 0x2a9   : >> { %6268 = vst [vmem:[%s25049_s30 + $0x40] sm:$0xff] %v6251_v12  ;;  %v6237_v22 = vadd.f32 %v22585_v16, %v28952_v35  ;;  %v18404_v24 = vpop.f32.mrb[12].mxu1  ;;  %v18716_v46 = vpop.f32.mrb[12].mxu0 }
 0x2aa   : >> { %v6254_v60 = vmax.f32 %v6238_v20, 0.0  ;;  %v22586_v62 = vadd.f32 %v18716_v46, %v18404_v24  ;;  %v3438_v3 = vpop.f32.mrb[13].mxu1  ;;  %v6186_v6 = vpop.f32.mrb[13].mxu0 }
 0x2ab   : >> { %v6253_v58 = vmax.f32 %v6237_v22, 0.0  ;;  %v22587_v7 = vadd.f32 %v6186_v6, %v3438_v3 }
 0x2ac   : >> { %6271 = vst [vmem:[%s25049_s30 + $0x58] sm:$0xff] %v6254_v60  ;;  %v6240_v9 = vadd.f32 %v22586_v62, %v28952_v35 }
 0x2ad   : >> { %6270 = vst [vmem:[%s25049_s30 + $0x50] sm:$0xff] %v6253_v58  ;;  %v6239_v14 = vadd.f32 %v22587_v7, %v28952_v35  ;;  %v18407_v0 = vpop.f32.mrb[14].mxu1  ;;  %v18719_v42 = vpop.f32.mrb[14].mxu0 }
 0x2ae   : >> { %v6256_v4 = vmax.f32 %v6240_v9, 0.0  ;;  %v22588_v32 = vadd.f32 %v18719_v42, %v18407_v0  ;;  %v3448_v10 = vpop.f32.mrb[15].mxu1  ;;  %v6196_v33 = vpop.f32.mrb[15].mxu0 }
 0x2af   : >> { %v6255_v59 = vmax.f32 %v6239_v14, 0.0  ;;  %v22589_v37 = vadd.f32 %v6196_v33, %v3448_v10  ;;  %526 = sbr.rel (!%p524_p11) target bundleno = 68 (0x44), region = 269 }
 0x2b0   : >> { %6273 = vst [vmem:[%s25049_s30 + $0x68] sm:$0xff] %v6256_v4  ;;  %v6242_v23 = vadd.f32 %v22588_v32, %v28952_v35 }
 0x2b1   : >> { %6272 = vst [vmem:[%s25049_s30 + $0x60] sm:$0xff] %v6255_v59  ;;  %v6241_v51 = vadd.f32 %v22589_v37, %v28952_v35 }
 0x2b2   : >> { %v6258_v2 = vmax.f32 %v6242_v23, 0.0 }
 0x2b3   : >> { %v6257_v39 = vmax.f32 %v6241_v51, 0.0 }
 0x2b4   : >> { %6275 = vst [vmem:[%s25049_s30 + $0x78] sm:$0xff] %v6258_v2 }
 0x2b5   : >> { %6274 = vst [vmem:[%s25049_s30 + $0x70] sm:$0xff] %v6257_v39 }
 0x2b6 LB: >> { %s15084_s21 = sshll.u32 %s23519_s24, 7  ;;  %s6281_s24 = sadd.s32 1, %s23519_s24   ;;  %s23519_s24 = sphi %s25084_s24, %s6281_s24  }
 0x2b7   : >> { %s25092_s15 = scalar_lea.vmem [#allocation2], %s15084_s21  ;;  %s25117_s17 = scalar_lea.vmem [#allocation3], %s15084_s21 }
 0x2b8   : >> { %p6278_p12 = scmp.ge.s32.totalorder %s6281_s24, 8  }
 0x2b9   : > { %s25157_s23 = smov (%p6278_p12), 0  }
 0x2bc   : >> { %v6284_v35 = vld [vmem:[%s25092_s15] sm:$0xff]  ;;  %v6285_v57 = vld [vmem:[%s25092_s15 + $0x8] sm:$0xff]  ;;  %v6286_v45 = vld [vmem:[%s25092_s15 + $0x10] sm:$0xff] }
 0x2bd   : >> { %v15086_v53 = vld [vmem:[%s25092_s15 + $0x1] sm:$0xff]  ;;  %v15087_v36 = vld [vmem:[%s25092_s15 + $0x9] sm:$0xff]  ;;  %v15088_v26 = vld [vmem:[%s25092_s15 + $0x11] sm:$0xff] }
 0x2be   : >> { %v15103_v55 = vld [vmem:[%s25092_s15 + $0x20] sm:$0xff]  ;;  %v6318_v41 = vmax.f32 %v6284_v35, %v15086_v53  ;;  %v6319_v38 = vmax.f32 %v6285_v57, %v15087_v36  ;;  %v15104_v40 = vld [vmem:[%s25092_s15 + $0x28] sm:$0xff]  ;;  %v15105_v1 = vld [vmem:[%s25092_s15 + $0x30] sm:$0xff]  ;;  %v6320_v30 = vmax.f32 %v6286_v45, %v15088_v26 }
 0x2bf   : >> { %v15120_v34 = vld [vmem:[%s25092_s15 + $0x21] sm:$0xff]  ;;  %v15121_v43 = vld [vmem:[%s25092_s15 + $0x29] sm:$0xff]  ;;  %v15122_v52 = vld [vmem:[%s25092_s15 + $0x31] sm:$0xff] }
 0x2c0   : >> { %v6322_v47 = vmax.f32 %v15103_v55, %v15120_v34  ;;  %v6352_v50 = vmax.f32 %v6318_v41, %v15103_v55  ;;  %v6323_v28 = vmax.f32 %v15104_v40, %v15121_v43  ;;  %v6353_v54 = vmax.f32 %v6319_v38, %v15104_v40  ;;  %v6287_v56 = vld [vmem:[%s25092_s15 + $0x18] sm:$0xff]  ;;  %v15107_v63 = vld [vmem:[%s25092_s15 + $0x40] sm:$0xff]  ;;  %v15108_v48 = vld [vmem:[%s25092_s15 + $0x48] sm:$0xff] }
 0x2c1   : >> { %v15089_v44 = vld [vmem:[%s25092_s15 + $0x19] sm:$0xff]  ;;  %v6324_v49 = vmax.f32 %v15105_v1, %v15122_v52  ;;  %v15124_v5 = vld [vmem:[%s25092_s15 + $0x41] sm:$0xff]  ;;  %v6354_v21 = vmax.f32 %v6320_v30, %v15105_v1  ;;  %v15125_v11 = vld [vmem:[%s25092_s15 + $0x49] sm:$0xff] }
 0x2c2   : >> { %v15106_v27 = vld [vmem:[%s25092_s15 + $0x38] sm:$0xff]  ;;  %v6386_v17 = vmax.f32 %v6352_v50, %v15120_v34  ;;  %v6321_v61 = vmax.f32 %v6287_v56, %v15089_v44  ;;  %v6387_v29 = vmax.f32 %v6353_v54, %v15121_v43  ;;  %v6356_v25 = vmax.f32 %v6322_v47, %v15107_v63  ;;  %v15109_v13 = vld [vmem:[%s25092_s15 + $0x50] sm:$0xff]  ;;  %v15111_v62 = vld [vmem:[%s25092_s15 + $0x60] sm:$0xff] }
 0x2c3   : >> { %v15123_v19 = vld [vmem:[%s25092_s15 + $0x39] sm:$0xff]  ;;  %v6357_v8 = vmax.f32 %v6323_v28, %v15108_v48  ;;  %v6358_v18 = vmax.f32 %v6324_v49, %v15109_v13  ;;  %v15126_v12 = vld [vmem:[%s25092_s15 + $0x51] sm:$0xff]  ;;  %v6326_v22 = vmax.f32 %v15107_v63, %v15124_v5  ;;  %v6388_v24 = vmax.f32 %v6354_v21, %v15122_v52  ;;  %v15128_v3 = vld [vmem:[%s25092_s15 + $0x61] sm:$0xff] }
 0x2c4   : >> { %v6325_v15 = vmax.f32 %v15106_v27, %v15123_v19  ;;  %6403 = vst [vmem:[%s25117_s17] sm:$0xff] %v6386_v17  ;;  %v6355_v31 = vmax.f32 %v6321_v61, %v15106_v27  ;;  %v15110_v16 = vld [vmem:[%s25092_s15 + $0x58] sm:$0xff]  ;;  %6404 = vst [vmem:[%s25117_s17 + $0x8] sm:$0xff] %v6387_v29  ;;  %v6390_v46 = vmax.f32 %v6356_v25, %v15124_v5  ;;  %v15112_v58 = vld [vmem:[%s25092_s15 + $0x68] sm:$0xff] }
 0x2c5   : >> { %v15127_v20 = vld [vmem:[%s25092_s15 + $0x59] sm:$0xff]  ;;  %v6327_v6 = vmax.f32 %v15108_v48, %v15125_v11  ;;  %v6391_v9 = vmax.f32 %v6357_v8, %v15125_v11  ;;  %v6392_v14 = vmax.f32 %v6358_v18, %v15126_v12  ;;  %v6360_v0 = vmax.f32 %v6326_v22, %v15111_v62  ;;  %v15129_v42 = vld [vmem:[%s25092_s15 + $0x69] sm:$0xff]  ;;  %v15130_v32 = vld [vmem:[%s25092_s15 + $0x71] sm:$0xff]  ;;  %6405 = vst [vmem:[%s25117_s17 + $0x10] sm:$0xff] %v6388_v24 }
 0x2c6   : >> { %v6359_v60 = vmax.f32 %v6325_v15, %v15110_v16  ;;  %v6389_v7 = vmax.f32 %v6355_v31, %v15123_v19  ;;  %v15113_v4 = vld [vmem:[%s25092_s15 + $0x70] sm:$0xff]  ;;  %6407 = vst [vmem:[%s25117_s17 + $0x20] sm:$0xff] %v6390_v46  ;;  %v6328_v59 = vmax.f32 %v15109_v13, %v15126_v12  ;;  %v6329_v37 = vmax.f32 %v15110_v16, %v15127_v20  ;;  %v15114_v23 = vld [vmem:[%s25092_s15 + $0x78] sm:$0xff]  ;;  %v15115_v2 = vld [vmem:[%s25092_s15 + $0x80] sm:$0xff] }
 0x2c7   : >> { %v6361_v33 = vmax.f32 %v6327_v6, %v15112_v58  ;;  %v15131_v51 = vld [vmem:[%s25092_s15 + $0x79] sm:$0xff]  ;;  %6408 = vst [vmem:[%s25117_s17 + $0x28] sm:$0xff] %v6391_v9  ;;  %6409 = vst [vmem:[%s25117_s17 + $0x30] sm:$0xff] %v6392_v14  ;;  %v6394_v39 = vmax.f32 %v6360_v0, %v15128_v3  ;;  %v6330_v35 = vmax.f32 %v15111_v62, %v15128_v3  ;;  %v15132_v53 = vld [vmem:[%s25092_s15 + $0x81] sm:$0xff] }
 0x2c8   : >> { %v6393_v10 = vmax.f32 %v6359_v60, %v15127_v20  ;;  %6406 = vst [vmem:[%s25117_s17 + $0x18] sm:$0xff] %v6389_v7  ;;  %v6331_v55 = vmax.f32 %v15112_v58, %v15129_v42  ;;  %v15116_v41 = vld [vmem:[%s25092_s15 + $0x88] sm:$0xff]  ;;  %v6332_v57 = vmax.f32 %v15113_v4, %v15130_v32  ;;  %v6362_v38 = vmax.f32 %v6328_v59, %v15113_v4  ;;  %v15117_v43 = vld [vmem:[%s25092_s15 + $0x90] sm:$0xff]  ;;  %v15118_v50 = vld [vmem:[%s25092_s15 + $0x98] sm:$0xff] }
 0x2c9   : >> { %v15133_v34 = vld [vmem:[%s25092_s15 + $0x89] sm:$0xff]  ;;  %v6395_v36 = vmax.f32 %v6361_v33, %v15129_v42  ;;  %v6363_v40 = vmax.f32 %v6329_v37, %v15114_v23  ;;  %v15134_v45 = vld [vmem:[%s25092_s15 + $0x91] sm:$0xff]  ;;  %v6333_v47 = vmax.f32 %v15114_v23, %v15131_v51  ;;  %6411 = vst [vmem:[%s25117_s17 + $0x40] sm:$0xff] %v6394_v39  ;;  %v6364_v26 = vmax.f32 %v6330_v35, %v15115_v2  ;;  %v15135_v28 = vld [vmem:[%s25092_s15 + $0x99] sm:$0xff]  ;;  %6280 = sbr.rel (!%p6278_p12) target bundleno = 694 (0x2b6), region = 280 }
 0x2ca   : >> { %6410 = vst [vmem:[%s25117_s17 + $0x38] sm:$0xff] %v6393_v10  ;;  %v6365_v1 = vmax.f32 %v6331_v55, %v15116_v41  ;;  %v6366_v52 = vmax.f32 %v6332_v57, %v15117_v43  ;;  %v6396_v54 = vmax.f32 %v6362_v38, %v15130_v32 }
 0x2cb   : >> { %6412 = vst [vmem:[%s25117_s17 + $0x48] sm:$0xff] %v6395_v36  ;;  %v6397_v30 = vmax.f32 %v6363_v40, %v15131_v51  ;;  %v6367_v56 = vmax.f32 %v6333_v47, %v15118_v50  ;;  %v6398_v44 = vmax.f32 %v6364_v26, %v15132_v53 }
 0x2cc   : >> { %v6399_v27 = vmax.f32 %v6365_v1, %v15133_v34  ;;  %v6400_v49 = vmax.f32 %v6366_v52, %v15134_v45  ;;  %6413 = vst [vmem:[%s25117_s17 + $0x50] sm:$0xff] %v6396_v54 }
 0x2cd   : >> { %6414 = vst [vmem:[%s25117_s17 + $0x58] sm:$0xff] %v6397_v30  ;;  %v6401_v17 = vmax.f32 %v6367_v56, %v15135_v28  ;;  %6415 = vst [vmem:[%s25117_s17 + $0x60] sm:$0xff] %v6398_v44 }
 0x2ce   : >> { %6416 = vst [vmem:[%s25117_s17 + $0x68] sm:$0xff] %v6399_v27  ;;  %6417 = vst [vmem:[%s25117_s17 + $0x70] sm:$0xff] %v6400_v49 }
 0x2cf   : >> { %6418 = vst [vmem:[%s25117_s17 + $0x78] sm:$0xff] %v6401_v17 }
 0x2d0 LB: >> { %v15154_v61 = vld [vmem:[%s28807_s3 + $0x80] sm:$0xff]  ;;  %v15155_v19 = vld [vmem:[%s28807_s3 + $0x88] sm:$0xff]  ;;  %v15156_v21 = vld [vmem:[%s28807_s3 + $0x90] sm:$0xff]  ;;  %s15136_s30 = sshll.u32 %s23523_s23, 7  ;;  %s6424_s23 = sadd.s32 1, %s23523_s23   ;;  %s23523_s23 = sphi %s25157_s23, %s6424_s23  }
 0x2d1   : >> { %v15517_v63 = vld [vmem:[%s28807_s3 + $0x600] sm:$0xff]  ;;  %v21100_v5 = vpack.c.bf16 %v15155_v19, %v15154_v61  ;;  %v15518_v29 = vld [vmem:[%s28807_s3 + $0x608] sm:$0xff]  ;;  %v15157_v25 = vld [vmem:[%s28807_s3 + $0x98] sm:$0xff]  ;;  %s25219_s1 = scalar_lea.vmem [#allocation3], %s15136_s30  ;;  %p6421_p13 = scmp.ge.s32.totalorder %s6424_s23, 8  }
 0x2d2   : >> { %v21484_v48 = vpack.c.bf16 %v15518_v29, %v15517_v63  ;;  %v21104_v11 = vpack.c.bf16 %v15157_v25, %v15156_v21  ;;  %v15519_v13 = vld [vmem:[%s28807_s3 + $0x610] sm:$0xff]  ;;  %v15520_v15 = vld [vmem:[%s28807_s3 + $0x618] sm:$0xff]  ;;  %v15158_v31 = vld [vmem:[%s28807_s3 + $0xa0] sm:$0xff] }
 0x2d3   : >> { %21101 = vmatprep.subr.bf16.mxu1 %v21100_v5  ;;  %v21488_v8 = vpack.c.bf16 %v15520_v15, %v15519_v13  ;;  %v15159_v18 = vld [vmem:[%s28807_s3 + $0xa8] sm:$0xff]  ;;  %v15521_v12 = vld [vmem:[%s28807_s3 + $0x620] sm:$0xff]  ;;  %v15160_v24 = vld [vmem:[%s28807_s3 + $0xb0] sm:$0xff] }
 0x2d4   : >> { %v15522_v16 = vld [vmem:[%s28807_s3 + $0x628] sm:$0xff]  ;;  %21485 = vmatprep.subr.bf16.mxu0 %v21484_v48  ;;  %21103 = vmatpush3.bf16.msra.mxu1 %v21100_v5  ;;  %v21108_v20 = vpack.c.bf16 %v15159_v18, %v15158_v31  ;;  %v15161_v46 = vld [vmem:[%s28807_s3 + $0xb8] sm:$0xff]  ;;  %v15523_v60 = vld [vmem:[%s28807_s3 + $0x630] sm:$0xff] }
 0x2d5   : >> { %21487 = vmatpush3.bf16.msra.mxu0 %v21484_v48  ;;  %21105 = vmatprep.subr.bf16.mxu1 %v21104_v11  ;;  %v21492_v22 = vpack.c.bf16 %v15522_v16, %v15521_v12  ;;  %v15524_v62 = vld [vmem:[%s28807_s3 + $0x638] sm:$0xff]  ;;  %v21112_v3 = vpack.c.bf16 %v15161_v46, %v15160_v24  ;;  %v15162_v58 = vld [vmem:[%s28807_s3 + $0xc0] sm:$0xff]  ;;  %v15163_v7 = vld [vmem:[%s28807_s3 + $0xc8] sm:$0xff] }
 0x2d6   : >> { %21489 = vmatprep.subr.bf16.mxu0 %v21488_v8  ;;  %v21496_v6 = vpack.c.bf16 %v15524_v62, %v15523_v60  ;;  %v15138_v9 = vld [vmem:[%s25219_s1 + $0x2] sm:$0xff]  ;;  %v21116_v4 = vpack.c.bf16 %v15163_v7, %v15162_v58  ;;  %v15164_v10 = vld [vmem:[%s28807_s3 + $0xd0] sm:$0xff]  ;;  %v15165_v33 = vld [vmem:[%s28807_s3 + $0xd8] sm:$0xff] }
 0x2d7   : >> { %v15525_v14 = vld [vmem:[%s28807_s3 + $0x640] sm:$0xff]  ;;  %v15526_v0 = vld [vmem:[%s28807_s3 + $0x648] sm:$0xff]  ;;  %18752 = vmatprep.mubr.f32.mxu1 %v15138_v9  ;;  %v15527_v59 = vld [vmem:[%s28807_s3 + $0x650] sm:$0xff]  ;;  %v21120_v23 = vpack.c.bf16 %v15165_v33, %v15164_v10 }
 0x2d8   : >> { %21107 = vmatpush3.bf16.msra.mxu1 %v21104_v11  ;;  %v15501_v42 = vld [vmem:[%s25219_s1 + $0x84] sm:$0xff]  ;;  %v21500_v32 = vpack.c.bf16 %v15526_v0, %v15525_v14  ;;  %v15528_v37 = vld [vmem:[%s28807_s3 + $0x658] sm:$0xff]  ;;  %v15168_v34 = vld [vmem:[%s28807_s3 + $0xf0] sm:$0xff] }
 0x2d9   : >> { %21491 = vmatpush3.bf16.msra.mxu0 %v21488_v8  ;;  %21109 = vmatprep.subr.bf16.mxu1 %v21108_v20  ;;  %v21504_v51 = vpack.c.bf16 %v15528_v37, %v15527_v59  ;;  %v15166_v2 = vld [vmem:[%s28807_s3 + $0xe0] sm:$0xff]  ;;  %v15167_v39 = vld [vmem:[%s28807_s3 + $0xe8] sm:$0xff]  ;;  %v15169_v57 = vld [vmem:[%s28807_s3 + $0xf8] sm:$0xff] }
 0x2da   : >> { %21493 = vmatprep.subr.bf16.mxu0 %v21492_v22  ;;  %19424 = vmatprep.mubr.f32.mxu0 %v15501_v42  ;;  %v15529_v35 = vld [vmem:[%s28807_s3 + $0x660] sm:$0xff]  ;;  %v15530_v53 = vld [vmem:[%s28807_s3 + $0x668] sm:$0xff]  ;;  %v21124_v55 = vpack.c.bf16 %v15167_v39, %v15166_v2  ;;  %v15531_v36 = vld [vmem:[%s28807_s3 + $0x670] sm:$0xff]  ;;  %v21128_v40 = vpack.c.bf16 %v15169_v57, %v15168_v34 }
 0x2db   : >> { %v21508_v41 = vpack.c.bf16 %v15530_v53, %v15529_v35  ;;  %v15532_v38 = vld [vmem:[%s28807_s3 + $0x678] sm:$0xff]  ;;  %v6443_v45 = vld [vmem:[%s28807_s3] sm:$0xff]  ;;  %v6444_v47 = vld [vmem:[%s28807_s3 + $0x8] sm:$0xff] }
 0x2dc   : >> { %21111 = vmatpush3.bf16.msra.mxu1 %v21108_v20  ;;  %v21512_v43 = vpack.c.bf16 %v15532_v38, %v15531_v36  ;;  %v15550_v50 = vld [vmem:[%s28807_s3 + $0x680] sm:$0xff]  ;;  %v15551_v26 = vld [vmem:[%s28807_s3 + $0x688] sm:$0xff]  ;;  %v21132_v1 = vpack.c.bf16 %v6444_v47, %v6443_v45  ;;  %v6445_v28 = vld [vmem:[%s28807_s3 + $0x10] sm:$0xff] }
 0x2dd   : >> { %21495 = vmatpush3.bf16.msra.mxu0 %v21492_v22  ;;  %21113 = vmatprep.subr.bf16.mxu1 %v21112_v3  ;;  %v21516_v52 = vpack.c.bf16 %v15551_v26, %v15550_v50  ;;  %v6446_v54 = vld [vmem:[%s28807_s3 + $0x18] sm:$0xff]  ;;  %v15139_v30 = vld [vmem:[%s25219_s1 + $0xa] sm:$0xff]  ;;  %v6447_v63 = vld [vmem:[%s28807_s3 + $0x20] sm:$0xff] }
 0x2de   : >> { %21497 = vmatprep.subr.bf16.mxu0 %v21496_v6  ;;  %v15552_v56 = vld [vmem:[%s28807_s3 + $0x690] sm:$0xff]  ;;  %v15553_v44 = vld [vmem:[%s28807_s3 + $0x698] sm:$0xff]  ;;  %v21136_v17 = vpack.c.bf16 %v6446_v54, %v6445_v28  ;;  %v6448_v5 = vld [vmem:[%s28807_s3 + $0x28] sm:$0xff] }
 0x2df   : >> { %v15502_v27 = vld [vmem:[%s25219_s1 + $0x8c] sm:$0xff]  ;;  %v15503_v61 = vld [vmem:[%s25219_s1 + $0x94] sm:$0xff]  ;;  %v21520_v19 = vpack.c.bf16 %v15553_v44, %v15552_v56  ;;  %v15554_v21 = vld [vmem:[%s28807_s3 + $0x6a0] sm:$0xff]  ;;  %v21140_v13 = vpack.c.bf16 %v6448_v5, %v6447_v63 }
 0x2e0   : >> { %21115 = vmatpush3.bf16.msra.mxu1 %v21112_v3  ;;  %v15140_v49 = vld [vmem:[%s25219_s1 + $0x12] sm:$0xff]  ;;  %v15141_v29 = vld [vmem:[%s25219_s1 + $0x1a] sm:$0xff]  ;;  %v15555_v25 = vld [vmem:[%s28807_s3 + $0x6a8] sm:$0xff] }
 0x2e1   : >> { %21499 = vmatpush3.bf16.msra.mxu0 %v21496_v6  ;;  %21117 = vmatprep.subr.bf16.mxu1 %v21116_v4  ;;  %v15504_v48 = vld [vmem:[%s25219_s1 + $0x9c] sm:$0xff]  ;;  %v15505_v15 = vld [vmem:[%s25219_s1 + $0xa4] sm:$0xff]  ;;  %v21524_v31 = vpack.c.bf16 %v15555_v25, %v15554_v21  ;;  %v6449_v8 = vld [vmem:[%s28807_s3 + $0x30] sm:$0xff] }
 0x2e2   : >> { %21501 = vmatprep.subr.bf16.mxu0 %v21500_v32  ;;  %v15142_v11 = vld [vmem:[%s25219_s1 + $0x22] sm:$0xff]  ;;  %v6450_v18 = vld [vmem:[%s28807_s3 + $0x38] sm:$0xff]  ;;  %v15143_v12 = vld [vmem:[%s25219_s1 + $0x2a] sm:$0xff] }
 0x2e3   : >> { %v15556_v16 = vld [vmem:[%s28807_s3 + $0x6b0] sm:$0xff]  ;;  %v15557_v20 = vld [vmem:[%s28807_s3 + $0x6b8] sm:$0xff]  ;;  %v21144_v46 = vpack.c.bf16 %v6450_v18, %v6449_v8  ;;  %v6451_v3 = vld [vmem:[%s28807_s3 + $0x40] sm:$0xff] }
 0x2e4   : >> { %21119 = vmatpush3.bf16.msra.mxu1 %v21116_v4  ;;  %v15506_v22 = vld [vmem:[%s25219_s1 + $0xac] sm:$0xff]  ;;  %v15507_v60 = vld [vmem:[%s25219_s1 + $0xb4] sm:$0xff]  ;;  %v21528_v62 = vpack.c.bf16 %v15557_v20, %v15556_v16  ;;  %v15558_v7 = vld [vmem:[%s28807_s3 + $0x6c0] sm:$0xff] }
 0x2e5   : >> { %21503 = vmatpush3.bf16.msra.mxu0 %v21500_v32  ;;  %21121 = vmatprep.subr.bf16.mxu1 %v21120_v23  ;;  %v15144_v24 = vld [vmem:[%s25219_s1 + $0x32] sm:$0xff]  ;;  %v6452_v6 = vld [vmem:[%s28807_s3 + $0x48] sm:$0xff]  ;;  %v15145_v58 = vld [vmem:[%s25219_s1 + $0x3a] sm:$0xff] }
 0x2e6   : >> { %21505 = vmatprep.subr.bf16.mxu0 %v21504_v51  ;;  %v15559_v9 = vld [vmem:[%s28807_s3 + $0x6c8] sm:$0xff]  ;;  %v15508_v14 = vld [vmem:[%s25219_s1 + $0xbc] sm:$0xff]  ;;  %v21148_v42 = vpack.c.bf16 %v6452_v6, %v6451_v3  ;;  %v6453_v10 = vld [vmem:[%s28807_s3 + $0x50] sm:$0xff] }
 0x2e7   : >> { %v15146_v0 = vld [vmem:[%s25219_s1 + $0x42] sm:$0xff]  ;;  %v21532_v32 = vpack.c.bf16 %v15559_v9, %v15558_v7  ;;  %v6454_v33 = vld [vmem:[%s28807_s3 + $0x58] sm:$0xff]  ;;  %v15147_v59 = vld [vmem:[%s25219_s1 + $0x4a] sm:$0xff] }
 0x2e8   : >> { %21123 = vmatpush3.bf16.msra.mxu1 %v21120_v23  ;;  %v15509_v4 = vld [vmem:[%s25219_s1 + $0xc4] sm:$0xff]  ;;  %v15560_v37 = vld [vmem:[%s28807_s3 + $0x6d0] sm:$0xff]  ;;  %v15561_v23 = vld [vmem:[%s28807_s3 + $0x6d8] sm:$0xff]  ;;  %v21152_v39 = vpack.c.bf16 %v6454_v33, %v6453_v10 }
 0x2e9   : >> { %21507 = vmatpush3.bf16.msra.mxu0 %v21504_v51  ;;  %21125 = vmatprep.subr.bf16.mxu1 %v21124_v55  ;;  %v15510_v51 = vld [vmem:[%s25219_s1 + $0xcc] sm:$0xff]  ;;  %v15511_v35 = vld [vmem:[%s25219_s1 + $0xd4] sm:$0xff]  ;;  %v21536_v53 = vpack.c.bf16 %v15561_v23, %v15560_v37  ;;  %v15562_v57 = vld [vmem:[%s28807_s3 + $0x6e0] sm:$0xff] }
 0x2ea   : >> { %21509 = vmatprep.subr.bf16.mxu0 %v21508_v41  ;;  %v15148_v2 = vld [vmem:[%s25219_s1 + $0x52] sm:$0xff]  ;;  %v15149_v34 = vld [vmem:[%s25219_s1 + $0x5a] sm:$0xff]  ;;  %v15563_v36 = vld [vmem:[%s28807_s3 + $0x6e8] sm:$0xff] }
 0x2eb   : >> { %v15512_v38 = vld [vmem:[%s25219_s1 + $0xdc] sm:$0xff]  ;;  %v15513_v45 = vld [vmem:[%s25219_s1 + $0xe4] sm:$0xff]  ;;  %v21540_v47 = vpack.c.bf16 %v15563_v36, %v15562_v57  ;;  %v6457_v50 = vld [vmem:[%s28807_s3 + $0x70] sm:$0xff] }
 0x2ec   : >> { %21127 = vmatpush3.bf16.msra.mxu1 %v21124_v55  ;;  %v6455_v55 = vld [vmem:[%s28807_s3 + $0x60] sm:$0xff]  ;;  %v6458_v26 = vld [vmem:[%s28807_s3 + $0x78] sm:$0xff]  ;;  %v15514_v54 = vld [vmem:[%s25219_s1 + $0xec] sm:$0xff] }
 0x2ed   : >> { %21511 = vmatpush3.bf16.msra.mxu0 %v21508_v41  ;;  %21129 = vmatprep.subr.bf16.mxu1 %v21128_v40  ;;  %v6456_v41 = vld [vmem:[%s28807_s3 + $0x68] sm:$0xff]  ;;  %v15565_v28 = vld [vmem:[%s28807_s3 + $0x6f8] sm:$0xff]  ;;  %v21160_v56 = vpack.c.bf16 %v6458_v26, %v6457_v50 }
 0x2ee   : >> { %21513 = vmatprep.subr.bf16.mxu0 %v21512_v43  ;;  %v15515_v44 = vld [vmem:[%s25219_s1 + $0xf4] sm:$0xff]  ;;  %v15584_v63 = vld [vmem:[%s28807_s3 + $0x708] sm:$0xff]  ;;  %v15516_v5 = vld [vmem:[%s25219_s1 + $0xfc] sm:$0xff] }
 0x2ef   : >> { %v15534_v25 = vld [vmem:[%s25219_s1 + $0x86] sm:$0xff]  ;;  %v15586_v8 = vld [vmem:[%s28807_s3 + $0x718] sm:$0xff]  ;;  %v15535_v18 = vld [vmem:[%s25219_s1 + $0x8e] sm:$0xff] }
 0x2f0   : >> { %21131 = vmatpush3.bf16.msra.mxu1 %v21128_v40  ;;  %v15150_v40 = vld [vmem:[%s25219_s1 + $0x62] sm:$0xff]  ;;  %v15536_v20 = vld [vmem:[%s25219_s1 + $0x96] sm:$0xff]  ;;  %v15539_v33 = vld [vmem:[%s25219_s1 + $0xae] sm:$0xff] }
 0x2f1   : >> { %21515 = vmatpush3.bf16.msra.mxu0 %v21512_v43  ;;  %21133 = vmatprep.subr.bf16.mxu1 %v21132_v1  ;;  %v21156_v43 = vpack.c.bf16 %v6456_v41, %v6455_v55  ;;  %v15588_v3 = vld [vmem:[%s28807_s3 + $0x728] sm:$0xff]  ;;  %v15537_v6 = vld [vmem:[%s25219_s1 + $0x9e] sm:$0xff]  ;;  %v15540_v23 = vld [vmem:[%s25219_s1 + $0xb6] sm:$0xff] }
 0x2f2   : >> { %21517 = vmatprep.subr.bf16.mxu0 %v21516_v52  ;;  %v15538_v9 = vld [vmem:[%s25219_s1 + $0xa6] sm:$0xff]  ;;  %v15590_v10 = vld [vmem:[%s28807_s3 + $0x738] sm:$0xff]  ;;  %v15543_v26 = vld [vmem:[%s25219_s1 + $0xce] sm:$0xff] }
 0x2f3   : >> { %18753 = vmatmul.mubr.f32.vlgmr.msra.gmra.mrb[0].mxu1 %v15139_v30  ;;  %v15152_v30 = vld [vmem:[%s25219_s1 + $0x72] sm:$0xff]  ;;  %v15592_v55 = vld [vmem:[%s28807_s3 + $0x748] sm:$0xff]  ;;  %v15541_v41 = vld [vmem:[%s25219_s1 + $0xbe] sm:$0xff] }
 0x2f4   : >> { %19425 = vmatmul.mubr.f32.vlgmr.msra.gmra.mrb[0].mxu0 %v15502_v27  ;;  %21135 = vmatpush3.bf16.msra.mxu1 %v21132_v1  ;;  %v15151_v1 = vld [vmem:[%s25219_s1 + $0x6a] sm:$0xff]  ;;  %v15594_v50 = vld [vmem:[%s28807_s3 + $0x758] sm:$0xff] }
 0x2f5   : >> { %21519 = vmatpush3.bf16.msra.mxu0 %v21516_v52  ;;  %18755 = vmatprep.mubr.f32.mxu1 %v15140_v49  ;;  %v15564_v52 = vld [vmem:[%s28807_s3 + $0x6f0] sm:$0xff]  ;;  %v15187_v49 = vld [vmem:[%s28807_s3 + $0x100] sm:$0xff] }
 0x2f6   : >> { %19427 = vmatprep.mubr.f32.mxu0 %v15503_v61  ;;  %21137 = vmatprep.subr.bf16.mxu1 %v21136_v17  ;;  %v21544_v27 = vpack.c.bf16 %v15565_v28, %v15564_v52  ;;  %v15153_v61 = vld [vmem:[%s25219_s1 + $0x7a] sm:$0xff]  ;;  %v15542_v36 = vld [vmem:[%s25219_s1 + $0xc6] sm:$0xff] }
 0x2f7   : >> { %18756 = vmatmul.mubr.f32.gmra.mrb[2].mxu1 %v15141_v29  ;;  %21521 = vmatprep.subr.bf16.mxu0 %v21520_v19  ;;  %v6427_v29 = vld [vmem:[%s25219_s1] sm:$0xff]  ;;  %v15544_v28 = vld [vmem:[%s25219_s1 + $0xd6] sm:$0xff] }
 0x2f8   : >> { %19428 = vmatmul.mubr.f32.gmra.mrb[2].mxu0 %v15504_v48  ;;  %21139 = vmatpush3.bf16.msra.mxu1 %v21136_v17  ;;  %v15188_v17 = vld [vmem:[%s28807_s3 + $0x108] sm:$0xff] }
 0x2f9   : >> { %21523 = vmatpush3.bf16.msra.mxu0 %v21520_v19  ;;  %18758 = vmatprep.mubr.f32.mxu1 %v15142_v11  ;;  %v15583_v19 = vld [vmem:[%s28807_s3 + $0x700] sm:$0xff]  ;;  %v21164_v21 = vpack.c.bf16 %v15188_v17, %v15187_v49  ;;  %v15189_v11 = vld [vmem:[%s28807_s3 + $0x110] sm:$0xff]  ;;  %v15596_v49 = vld [vmem:[%s28807_s3 + $0x768] sm:$0xff] }
 0x2fa   : >> { %19430 = vmatprep.mubr.f32.mxu0 %v15505_v15  ;;  %21141 = vmatprep.subr.bf16.mxu1 %v21140_v13  ;;  %v21548_v48 = vpack.c.bf16 %v15584_v63, %v15583_v19  ;;  %v25412_v15 = vld [vmem:[%s25219_s1 + $0x8] sm:$0xff]  ;;  %v15545_v17 = vld [vmem:[%s25219_s1 + $0xde] sm:$0xff] }
 0x2fb   : >> { %18759 = vmatmul.mubr.f32.gmra.mrb[4].mxu1 %v15143_v12  ;;  %21525 = vmatprep.subr.bf16.mxu0 %v21524_v31  ;;  %v25422_v12 = vld [vmem:[%s25219_s1 + $0x10] sm:$0xff]  ;;  %v15546_v63 = vld [vmem:[%s25219_s1 + $0xe6] sm:$0xff] }
 0x2fc   : >> { %19431 = vmatmul.mubr.f32.gmra.mrb[4].mxu0 %v15506_v22  ;;  %21143 = vmatpush3.bf16.msra.mxu1 %v21140_v13  ;;  %v15190_v13 = vld [vmem:[%s28807_s3 + $0x118] sm:$0xff] }
 0x2fd   : >> { %21527 = vmatpush3.bf16.msra.mxu0 %v21524_v31  ;;  %18761 = vmatprep.mubr.f32.mxu1 %v15144_v24  ;;  %v15585_v31 = vld [vmem:[%s28807_s3 + $0x710] sm:$0xff]  ;;  %v21168_v16 = vpack.c.bf16 %v15190_v13, %v15189_v11  ;;  %v15191_v24 = vld [vmem:[%s28807_s3 + $0x120] sm:$0xff]  ;;  %v15598_v11 = vld [vmem:[%s28807_s3 + $0x778] sm:$0xff] }
 0x2fe   : >> { %19433 = vmatprep.mubr.f32.mxu0 %v15507_v60  ;;  %21145 = vmatprep.subr.bf16.mxu1 %v21144_v46  ;;  %v21552_v22 = vpack.c.bf16 %v15586_v8, %v15585_v31  ;;  %v25433_v60 = vld [vmem:[%s25219_s1 + $0x18] sm:$0xff]  ;;  %v15547_v13 = vld [vmem:[%s25219_s1 + $0xee] sm:$0xff] }
 0x2ff   : >> { %18762 = vmatmul.mubr.f32.gmra.mrb[6].mxu1 %v15145_v58  ;;  %21529 = vmatprep.subr.bf16.mxu0 %v21528_v62  ;;  %v25444_v58 = vld [vmem:[%s25219_s1 + $0x20] sm:$0xff]  ;;  %v25554_v31 = vld [vmem:[%s25219_s1 + $0x70] sm:$0xff] }
 0x300   : >> { %19434 = vmatmul.mubr.f32.gmra.mrb[6].mxu0 %v15508_v14  ;;  %21147 = vmatpush3.bf16.msra.mxu1 %v21144_v46  ;;  %v15192_v46 = vld [vmem:[%s28807_s3 + $0x128] sm:$0xff] }
 0x301   : >> { %21531 = vmatpush3.bf16.msra.mxu0 %v21528_v62  ;;  %18764 = vmatprep.mubr.f32.mxu1 %v15146_v0  ;;  %v15587_v62 = vld [vmem:[%s28807_s3 + $0x720] sm:$0xff]  ;;  %v21172_v7 = vpack.c.bf16 %v15192_v46, %v15191_v24  ;;  %v15193_v0 = vld [vmem:[%s28807_s3 + $0x130] sm:$0xff]  ;;  %v25565_v24 = vld [vmem:[%s25219_s1 + $0x78] sm:$0xff] }
 0x302   : >> { %19436 = vmatprep.mubr.f32.mxu0 %v15509_v4  ;;  %21149 = vmatprep.subr.bf16.mxu1 %v21148_v42  ;;  %v21556_v14 = vpack.c.bf16 %v15588_v3, %v15587_v62  ;;  %v25455_v4 = vld [vmem:[%s25219_s1 + $0x28] sm:$0xff]  ;;  %v15616_v46 = vld [vmem:[%s28807_s3 + $0x780] sm:$0xff] }
 0x303   : >> { %18765 = vmatmul.mubr.f32.gmra.mrb[8].mxu1 %v15147_v59  ;;  %21533 = vmatprep.subr.bf16.mxu0 %v21532_v32  ;;  %v25466_v59 = vld [vmem:[%s25219_s1 + $0x30] sm:$0xff]  ;;  %v15617_v62 = vld [vmem:[%s28807_s3 + $0x788] sm:$0xff]  ;;  %v15549_v3 = vld [vmem:[%s25219_s1 + $0xfe] sm:$0xff] }
 0x304   : >> { %19437 = vmatmul.mubr.f32.gmra.mrb[8].mxu0 %v15510_v51  ;;  %21151 = vmatpush3.bf16.msra.mxu1 %v21148_v42  ;;  %v15194_v42 = vld [vmem:[%s28807_s3 + $0x138] sm:$0xff] }
 0x305   : >> { %21535 = vmatpush3.bf16.msra.mxu0 %v21532_v32  ;;  %18767 = vmatprep.mubr.f32.mxu1 %v15148_v2  ;;  %v15589_v32 = vld [vmem:[%s28807_s3 + $0x730] sm:$0xff]  ;;  %v21176_v37 = vpack.c.bf16 %v15194_v42, %v15193_v0  ;;  %v15195_v2 = vld [vmem:[%s28807_s3 + $0x140] sm:$0xff]  ;;  %v15223_v42 = vld [vmem:[%s28807_s3 + $0x198] sm:$0xff] }
 0x306   : >> { %19439 = vmatprep.mubr.f32.mxu0 %v15511_v35  ;;  %21153 = vmatprep.subr.bf16.mxu1 %v21152_v39  ;;  %v21560_v51 = vpack.c.bf16 %v15590_v10, %v15589_v32  ;;  %v25477_v35 = vld [vmem:[%s25219_s1 + $0x38] sm:$0xff]  ;;  %v15222_v0 = vld [vmem:[%s28807_s3 + $0x190] sm:$0xff] }
 0x307   : >> { %18768 = vmatmul.mubr.f32.gmra.mrb[10].mxu1 %v15149_v34  ;;  %21537 = vmatprep.subr.bf16.mxu0 %v21536_v53  ;;  %v25488_v34 = vld [vmem:[%s25219_s1 + $0x40] sm:$0xff]  ;;  %v15172_v32 = vld [vmem:[%s25219_s1 + $0xc] sm:$0xff] }
 0x308   : >> { %19440 = vmatmul.mubr.f32.gmra.mrb[10].mxu0 %v15512_v38  ;;  %21155 = vmatpush3.bf16.msra.mxu1 %v21152_v39  ;;  %v15196_v39 = vld [vmem:[%s28807_s3 + $0x148] sm:$0xff]  ;;  %v15618_v10 = vld [vmem:[%s28807_s3 + $0x790] sm:$0xff] }
 0x309   : >> { %21539 = vmatpush3.bf16.msra.mxu0 %v21536_v53  ;;  %18770 = vmatprep.mubr.f32.mxu1 %v15150_v40  ;;  %v15591_v53 = vld [vmem:[%s28807_s3 + $0x740] sm:$0xff]  ;;  %v21180_v57 = vpack.c.bf16 %v15196_v39, %v15195_v2  ;;  %v15197_v40 = vld [vmem:[%s28807_s3 + $0x150] sm:$0xff]  ;;  %v25599_v2 = vld [vmem:[%s25219_s1 + $0x98] sm:$0xff] }
 0x30a   : >> { %19442 = vmatprep.mubr.f32.mxu0 %v15513_v45  ;;  %21157 = vmatprep.subr.bf16.mxu1 %v21156_v43  ;;  %v21564_v38 = vpack.c.bf16 %v15592_v55, %v15591_v53  ;;  %v25499_v45 = vld [vmem:[%s25219_s1 + $0x48] sm:$0xff]  ;;  %v15224_v53 = vld [vmem:[%s28807_s3 + $0x1a0] sm:$0xff] }
 0x30b   : >> { %18771 = vmatmul.mubr.f32.gmra.mrb[12].mxu1 %v15151_v1  ;;  %21541 = vmatprep.subr.bf16.mxu0 %v21540_v47  ;;  %v25510_v1 = vld [vmem:[%s25219_s1 + $0x50] sm:$0xff]  ;;  %v15225_v55 = vld [vmem:[%s28807_s3 + $0x1a8] sm:$0xff] }
 0x30c   : >> { %19443 = vmatmul.mubr.f32.gmra.mrb[12].mxu0 %v15514_v54  ;;  %21159 = vmatpush3.bf16.msra.mxu1 %v21156_v43  ;;  %v15198_v43 = vld [vmem:[%s28807_s3 + $0x158] sm:$0xff] }
 0x30d   : >> { %21543 = vmatpush3.bf16.msra.mxu0 %v21540_v47  ;;  %18773 = vmatprep.mubr.f32.mxu1 %v15152_v30  ;;  %v15593_v47 = vld [vmem:[%s28807_s3 + $0x750] sm:$0xff]  ;;  %v21184_v52 = vpack.c.bf16 %v15198_v43, %v15197_v40  ;;  %v15199_v30 = vld [vmem:[%s28807_s3 + $0x160] sm:$0xff]  ;;  %v21204_v43 = vpack.c.bf16 %v15225_v55, %v15224_v53 }
 0x30e   : >> { %19445 = vmatprep.mubr.f32.mxu0 %v15515_v44  ;;  %21161 = vmatprep.subr.bf16.mxu1 %v21160_v56  ;;  %v21568_v54 = vpack.c.bf16 %v15594_v50, %v15593_v47  ;;  %v25521_v44 = vld [vmem:[%s25219_s1 + $0x58] sm:$0xff]  ;;  %v15175_v40 = vld [vmem:[%s25219_s1 + $0x24] sm:$0xff] }
 0x30f   : >> { %18774 = vmatmul.mubr.f32.gmra.mrb[14].mxu1 %v15153_v61  ;;  %21545 = vmatprep.subr.bf16.mxu0 %v21544_v27  ;;  %v25532_v61 = vld [vmem:[%s25219_s1 + $0x60] sm:$0xff]  ;;  %v25621_v47 = vld [vmem:[%s25219_s1 + $0xa8] sm:$0xff] }
 0x310   : >> { %19446 = vmatmul.mubr.f32.gmra.mrb[14].mxu0 %v15516_v5  ;;  %21163 = vmatpush3.bf16.msra.mxu1 %v21160_v56  ;;  %v15200_v56 = vld [vmem:[%s28807_s3 + $0x168] sm:$0xff] }
 0x311   : >> { %21547 = vmatpush3.bf16.msra.mxu0 %v21544_v27  ;;  %18808 = vmatprep.mubr.f32.mxu1 %v6427_v29  ;;  %v15595_v27 = vld [vmem:[%s28807_s3 + $0x760] sm:$0xff]  ;;  %v21188_v19 = vpack.c.bf16 %v15200_v56, %v15199_v30  ;;  %v15201_v29 = vld [vmem:[%s28807_s3 + $0x170] sm:$0xff]  ;;  %v15623_v30 = vld [vmem:[%s28807_s3 + $0x7b8] sm:$0xff] }
 0x312   : >> { %19480 = vmatprep.mubr.f32.mxu0 %v15534_v25  ;;  %21165 = vmatprep.subr.bf16.mxu1 %v21164_v21  ;;  %v21572_v5 = vpack.c.bf16 %v15596_v49, %v15595_v27  ;;  %v25543_v25 = vld [vmem:[%s25219_s1 + $0x68] sm:$0xff]  ;;  %v25638_v56 = vld [vmem:[%s25219_s1 + $0xb0] sm:$0xff] }
 0x313   : >> { %18809 = vmatmul.mubr.f32.vlgmr.msra.gmra.mrb[0].mxu1 %v25412_v15  ;;  %21549 = vmatprep.subr.bf16.mxu0 %v21548_v48  ;;  %v15177_v27 = vld [vmem:[%s25219_s1 + $0x34] sm:$0xff]  ;;  %v15183_v53 = vld [vmem:[%s25219_s1 + $0x64] sm:$0xff] }
 0x314   : >> { %19481 = vmatmul.mubr.f32.vlgmr.msra.gmra.mrb[0].mxu0 %v15535_v18  ;;  %21167 = vmatpush3.bf16.msra.mxu1 %v21164_v21  ;;  %v15202_v21 = vld [vmem:[%s28807_s3 + $0x178] sm:$0xff] }
 0x315   : >> { %21551 = vmatpush3.bf16.msra.mxu0 %v21548_v48  ;;  %18811 = vmatprep.mubr.f32.mxu1 %v25422_v12  ;;  %v15597_v48 = vld [vmem:[%s28807_s3 + $0x770] sm:$0xff]  ;;  %v21192_v8 = vpack.c.bf16 %v15202_v21, %v15201_v29  ;;  %v15178_v29 = vld [vmem:[%s25219_s1 + $0x3c] sm:$0xff] }
 0x316   : >> { %19483 = vmatprep.mubr.f32.mxu0 %v15536_v20  ;;  %21169 = vmatprep.subr.bf16.mxu1 %v21168_v16  ;;  %v15548_v18 = vld [vmem:[%s25219_s1 + $0xf6] sm:$0xff]  ;;  %v15220_v20 = vld [vmem:[%s28807_s3 + $0x180] sm:$0xff] }
 0x317   : >> { %18812 = vmatmul.mubr.f32.gmra.mrb[2].mxu1 %v25433_v60  ;;  %21553 = vmatprep.subr.bf16.mxu0 %v21552_v22  ;;  %v15624_v21 = vld [vmem:[%s28807_s3 + $0x7c0] sm:$0xff] }
 0x318   : >> { %19484 = vmatmul.mubr.f32.gmra.mrb[2].mxu0 %v15537_v6  ;;  %21171 = vmatpush3.bf16.msra.mxu1 %v21168_v16  ;;  %v21576_v16 = vpack.c.bf16 %v15598_v11, %v15597_v48  ;;  %v15171_v6 = vld [vmem:[%s25219_s1 + $0x4] sm:$0xff] }
 0x319   : >> { %21555 = vmatpush3.bf16.msra.mxu0 %v21552_v22  ;;  %18814 = vmatprep.mubr.f32.mxu1 %v25444_v58  ;;  %v15221_v22 = vld [vmem:[%s28807_s3 + $0x188] sm:$0xff]  ;;  %v25660_v11 = vld [vmem:[%s25219_s1 + $0xc0] sm:$0xff] }
 0x31a   : >> { %19486 = vmatprep.mubr.f32.mxu0 %v15538_v9  ;;  %21173 = vmatprep.subr.bf16.mxu1 %v21172_v7  ;;  %v25578_v9 = vld [vmem:[%s25219_s1 + $0x88] sm:$0xff] }
 0x31b   : >> { %18815 = vmatmul.mubr.f32.gmra.mrb[4].mxu1 %v25455_v4  ;;  %21557 = vmatprep.subr.bf16.mxu0 %v21556_v14  ;;  %v15625_v48 = vld [vmem:[%s28807_s3 + $0x7c8] sm:$0xff] }
 0x31c   : >> { %19487 = vmatmul.mubr.f32.gmra.mrb[4].mxu0 %v15539_v33  ;;  %21175 = vmatpush3.bf16.msra.mxu1 %v21172_v7  ;;  %v21196_v7 = vpack.c.bf16 %v15221_v22, %v15220_v20  ;;  %v15619_v33 = vld [vmem:[%s28807_s3 + $0x798] sm:$0xff]  ;;  %v15230_v20 = vld [vmem:[%s28807_s3 + $0x1d0] sm:$0xff] }
 0x31d   : >> { %21559 = vmatpush3.bf16.msra.mxu0 %v21556_v14  ;;  %18817 = vmatprep.mubr.f32.mxu1 %v25466_v59  ;;  %v21580_v14 = vpack.c.bf16 %v15617_v62, %v15616_v46  ;;  %v21584_v39 = vpack.c.bf16 %v15619_v33, %v15618_v10  ;;  %v15231_v22 = vld [vmem:[%s28807_s3 + $0x1d8] sm:$0xff]  ;;  %v15180_v46 = vld [vmem:[%s25219_s1 + $0x4c] sm:$0xff] }
 0x31e   : >> { %19489 = vmatprep.mubr.f32.mxu0 %v15540_v23  ;;  %21177 = vmatprep.subr.bf16.mxu1 %v21176_v37  ;;  %v15173_v23 = vld [vmem:[%s25219_s1 + $0x14] sm:$0xff]  ;;  %v15233_v10 = vld [vmem:[%s28807_s3 + $0x1e8] sm:$0xff]  ;;  %v15182_v33 = vld [vmem:[%s25219_s1 + $0x5c] sm:$0xff] }
 0x31f   : >> { %18818 = vmatmul.mubr.f32.gmra.mrb[6].mxu1 %v25477_v35  ;;  %21561 = vmatprep.subr.bf16.mxu0 %v21560_v51  ;;  %v15626_v62 = vld [vmem:[%s28807_s3 + $0x7d0] sm:$0xff] }
 0x320   : >> { %19490 = vmatmul.mubr.f32.gmra.mrb[6].mxu0 %v15541_v41  ;;  %21179 = vmatpush3.bf16.msra.mxu1 %v21176_v37  ;;  %v25594_v37 = vld [vmem:[%s25219_s1 + $0x90] sm:$0xff]  ;;  %v15174_v41 = vld [vmem:[%s25219_s1 + $0x1c] sm:$0xff] }
 0x321   : >> { %21563 = vmatpush3.bf16.msra.mxu0 %v21560_v51  ;;  %18820 = vmatprep.mubr.f32.mxu1 %v25488_v34  ;;  %v21200_v51 = vpack.c.bf16 %v15223_v42, %v15222_v0  ;;  %v25687_v0 = vld [vmem:[%s25219_s1 + $0xd8] sm:$0xff] }
 0x322   : >> { %19492 = vmatprep.mubr.f32.mxu0 %v15542_v36  ;;  %21181 = vmatprep.subr.bf16.mxu1 %v21180_v57  ;;  %v15621_v36 = vld [vmem:[%s28807_s3 + $0x7a8] sm:$0xff] }
 0x323   : >> { %18821 = vmatmul.mubr.f32.gmra.mrb[8].mxu1 %v25499_v45  ;;  %21565 = vmatprep.subr.bf16.mxu0 %v21564_v38 }
 0x324   : >> { %19493 = vmatmul.mubr.f32.gmra.mrb[8].mxu0 %v15543_v26  ;;  %21183 = vmatpush3.bf16.msra.mxu1 %v21180_v57  ;;  %v15620_v57 = vld [vmem:[%s28807_s3 + $0x7a0] sm:$0xff]  ;;  %v15226_v26 = vld [vmem:[%s28807_s3 + $0x1b0] sm:$0xff] }
 0x325   : >> { %21567 = vmatpush3.bf16.msra.mxu0 %v21564_v38  ;;  %18823 = vmatprep.mubr.f32.mxu1 %v25510_v1  ;;  %v25616_v38 = vld [vmem:[%s25219_s1 + $0xa0] sm:$0xff]  ;;  %v21588_v50 = vpack.c.bf16 %v15621_v36, %v15620_v57  ;;  %v15234_v36 = vld [vmem:[%s28807_s3 + $0x1f0] sm:$0xff] }
 0x326   : >> { %19495 = vmatprep.mubr.f32.mxu0 %v15544_v28  ;;  %21185 = vmatprep.subr.bf16.mxu1 %v21184_v52  ;;  %v15176_v28 = vld [vmem:[%s25219_s1 + $0x2c] sm:$0xff] }
 0x327   : >> { %18824 = vmatmul.mubr.f32.gmra.mrb[10].mxu1 %v25521_v44  ;;  %21569 = vmatprep.subr.bf16.mxu0 %v21568_v54 }
 0x328   : >> { %19496 = vmatmul.mubr.f32.gmra.mrb[10].mxu0 %v15545_v17  ;;  %21187 = vmatpush3.bf16.msra.mxu1 %v21184_v52  ;;  %v15227_v52 = vld [vmem:[%s28807_s3 + $0x1b8] sm:$0xff] }
 0x329   : >> { %21571 = vmatpush3.bf16.msra.mxu0 %v21568_v54  ;;  %18826 = vmatprep.mubr.f32.mxu1 %v25532_v61  ;;  %v15622_v54 = vld [vmem:[%s28807_s3 + $0x7b0] sm:$0xff]  ;;  %v21208_v49 = vpack.c.bf16 %v15227_v52, %v15226_v26  ;;  %v25643_v17 = vld [vmem:[%s25219_s1 + $0xb8] sm:$0xff] }
 0x32a   : >> { %19498 = vmatprep.mubr.f32.mxu0 %v15546_v63  ;;  %21189 = vmatprep.subr.bf16.mxu1 %v21188_v19  ;;  %v15228_v63 = vld [vmem:[%s28807_s3 + $0x1c0] sm:$0xff]  ;;  %v15631_v26 = vld [vmem:[%s28807_s3 + $0x7f8] sm:$0xff]  ;;  %v25726_v52 = vld [vmem:[%s25219_s1 + $0xf0] sm:$0xff] }
 0x32b   : >> { %18827 = vmatmul.mubr.f32.gmra.mrb[12].mxu1 %v25543_v25  ;;  %21573 = vmatprep.subr.bf16.mxu0 %v21572_v5 }
 0x32c   : >> { %19499 = vmatmul.mubr.f32.gmra.mrb[12].mxu0 %v15547_v13  ;;  %21191 = vmatpush3.bf16.msra.mxu1 %v21188_v19  ;;  %v21592_v19 = vpack.c.bf16 %v15623_v30, %v15622_v54  ;;  %v15179_v13 = vld [vmem:[%s25219_s1 + $0x44] sm:$0xff]  ;;  %v25731_v30 = vld [vmem:[%s25219_s1 + $0xf8] sm:$0xff] }
 0x32d   : >> { %21575 = vmatpush3.bf16.msra.mxu0 %v21572_v5  ;;  %18829 = vmatprep.mubr.f32.mxu1 %v25554_v31  ;;  %v15229_v5 = vld [vmem:[%s28807_s3 + $0x1c8] sm:$0xff] }
 0x32e   : >> { %19501 = vmatprep.mubr.f32.mxu0 %v15548_v18  ;;  %21193 = vmatprep.subr.bf16.mxu1 %v21192_v8  ;;  %v25665_v18 = vld [vmem:[%s25219_s1 + $0xc8] sm:$0xff] }
 0x32f   : >> { %18830 = vmatmul.mubr.f32.gmra.mrb[14].mxu1 %v25565_v24  ;;  %21577 = vmatprep.subr.bf16.mxu0 %v21576_v16 }
 0x330   : >> { %19502 = vmatmul.mubr.f32.gmra.mrb[14].mxu0 %v15549_v3  ;;  %21195 = vmatpush3.bf16.msra.mxu1 %v21192_v8  ;;  %v21212_v8 = vpack.c.bf16 %v15229_v5, %v15228_v63  ;;  %v15627_v3 = vld [vmem:[%s28807_s3 + $0x7d8] sm:$0xff]  ;;  %v15649_v5 = vld [vmem:[%s28807_s3 + $0x800] sm:$0xff] }
 0x331   : >> { %21579 = vmatpush3.bf16.msra.mxu0 %v21576_v16  ;;  %18864 = vmatprep.mubr.f32.mxu1 %v15171_v6  ;;  %v21596_v16 = vpack.c.bf16 %v15625_v48, %v15624_v21  ;;  %v25682_v6 = vld [vmem:[%s25219_s1 + $0xd0] sm:$0xff]  ;;  %v21600_v42 = vpack.c.bf16 %v15627_v3, %v15626_v62  ;;  %v15186_v63 = vld [vmem:[%s25219_s1 + $0x7c] sm:$0xff]  ;;  %v15204_v48 = vld [vmem:[%s25219_s1 + $0x6] sm:$0xff] }
 0x332   : >> { %19536 = vmatprep.mubr.f32.mxu0 %v25578_v9  ;;  %21197 = vmatprep.subr.bf16.mxu1 %v21196_v7  ;;  %v25748_v21 = vld [vmem:[%s25219_s1 + $0x100] sm:$0xff]  ;;  %v15652_v62 = vld [vmem:[%s28807_s3 + $0x818] sm:$0xff] }
 0x333   : >> { %18865 = vmatmul.mubr.f32.vlgmr.msra.gmra.mrb[0].mxu1 %v15172_v32  ;;  %21581 = vmatprep.subr.bf16.mxu0 %v21580_v14  ;;  %v15232_v32 = vld [vmem:[%s28807_s3 + $0x1e0] sm:$0xff]  ;;  %v15206_v3 = vld [vmem:[%s25219_s1 + $0x16] sm:$0xff] }
 0x334   : >> { %19537 = vmatmul.mubr.f32.vlgmr.msra.gmra.mrb[0].mxu0 %v25594_v37  ;;  %21199 = vmatpush3.bf16.msra.mxu1 %v21196_v7  ;;  %v15181_v7 = vld [vmem:[%s25219_s1 + $0x54] sm:$0xff]  ;;  %v21220_v55 = vpack.c.bf16 %v15233_v10, %v15232_v32  ;;  %v15258_v32 = vld [vmem:[%s28807_s3 + $0x228] sm:$0xff]  ;;  %v15207_v10 = vld [vmem:[%s25219_s1 + $0x1e] sm:$0xff] }
 0x335   : >> { %21583 = vmatpush3.bf16.msra.mxu0 %v21580_v14  ;;  %18867 = vmatprep.mubr.f32.mxu1 %v15173_v23  ;;  %v21216_v14 = vpack.c.bf16 %v15231_v22, %v15230_v20  ;;  %v15628_v23 = vld [vmem:[%s28807_s3 + $0x7e0] sm:$0xff]  ;;  %v15256_v20 = vld [vmem:[%s28807_s3 + $0x218] sm:$0xff]  ;;  %v15205_v22 = vld [vmem:[%s25219_s1 + $0xe] sm:$0xff] }
 0x336   : >> { %19539 = vmatprep.mubr.f32.mxu0 %v25599_v2  ;;  %21201 = vmatprep.subr.bf16.mxu1 %v21200_v51 }
 0x337   : >> { %18868 = vmatmul.mubr.f32.gmra.mrb[2].mxu1 %v15174_v41  ;;  %21585 = vmatprep.subr.bf16.mxu0 %v21584_v39  ;;  %v25709_v41 = vld [vmem:[%s25219_s1 + $0xe8] sm:$0xff] }
 0x338   : >> { %19540 = vmatmul.mubr.f32.gmra.mrb[2].mxu0 %v25616_v38  ;;  %21203 = vmatpush3.bf16.msra.mxu1 %v21200_v51  ;;  %v15629_v51 = vld [vmem:[%s28807_s3 + $0x7e8] sm:$0xff] }
 0x339   : >> { %21587 = vmatpush3.bf16.msra.mxu0 %v21584_v39  ;;  %18870 = vmatprep.mubr.f32.mxu1 %v15175_v40  ;;  %v25704_v39 = vld [vmem:[%s25219_s1 + $0xe0] sm:$0xff]  ;;  %v21604_v57 = vpack.c.bf16 %v15629_v51, %v15628_v23  ;;  %v15235_v40 = vld [vmem:[%s28807_s3 + $0x1f8] sm:$0xff] }
 0x33a   : >> { %19542 = vmatprep.mubr.f32.mxu0 %v25621_v47  ;;  %21205 = vmatprep.subr.bf16.mxu1 %v21204_v43  ;;  %v21224_v54 = vpack.c.bf16 %v15235_v40, %v15234_v36  ;;  %v15208_v23 = vld [vmem:[%s25219_s1 + $0x26] sm:$0xff]  ;;  %v15656_v36 = vld [vmem:[%s28807_s3 + $0x838] sm:$0xff] }
 0x33b   : >> { %18871 = vmatmul.mubr.f32.gmra.mrb[4].mxu1 %v15176_v28  ;;  %21589 = vmatprep.subr.bf16.mxu0 %v21588_v50  ;;  %v15185_v28 = vld [vmem:[%s25219_s1 + $0x74] sm:$0xff] }
 0x33c   : >> { %19543 = vmatmul.mubr.f32.gmra.mrb[4].mxu0 %v25638_v56  ;;  %21207 = vmatpush3.bf16.msra.mxu1 %v21204_v43  ;;  %v15184_v43 = vld [vmem:[%s25219_s1 + $0x6c] sm:$0xff]  ;;  %v15210_v40 = vld [vmem:[%s25219_s1 + $0x36] sm:$0xff] }
 0x33d   : >> { %21591 = vmatpush3.bf16.msra.mxu0 %v21588_v50  ;;  %18873 = vmatprep.mubr.f32.mxu1 %v15177_v27  ;;  %v15630_v50 = vld [vmem:[%s28807_s3 + $0x7f0] sm:$0xff] }
 0x33e   : >> { %19545 = vmatprep.mubr.f32.mxu0 %v25643_v17  ;;  %21209 = vmatprep.subr.bf16.mxu1 %v21208_v49  ;;  %v21608_v27 = vpack.c.bf16 %v15631_v26, %v15630_v50  ;;  %v15261_v50 = vld [vmem:[%s28807_s3 + $0x240] sm:$0xff]  ;;  %v15262_v26 = vld [vmem:[%s28807_s3 + $0x248] sm:$0xff] }
 0x33f   : >> { %18874 = vmatmul.mubr.f32.gmra.mrb[6].mxu1 %v15178_v29  ;;  %21593 = vmatprep.subr.bf16.mxu0 %v21592_v19  ;;  %v15650_v29 = vld [vmem:[%s28807_s3 + $0x808] sm:$0xff] }
 0x340   : >> { %19546 = vmatmul.mubr.f32.gmra.mrb[6].mxu0 %v25660_v11  ;;  %21211 = vmatpush3.bf16.msra.mxu1 %v21208_v49  ;;  %v15253_v49 = vld [vmem:[%s28807_s3 + $0x200] sm:$0xff] }
 0x341   : >> { %21595 = vmatpush3.bf16.msra.mxu0 %v21592_v19  ;;  %18876 = vmatprep.mubr.f32.mxu1 %v15179_v13  ;;  %v15254_v19 = vld [vmem:[%s28807_s3 + $0x208] sm:$0xff] }
 0x342   : >> { %19548 = vmatprep.mubr.f32.mxu0 %v25665_v18  ;;  %21213 = vmatprep.subr.bf16.mxu1 %v21212_v8  ;;  %v21228_v13 = vpack.c.bf16 %v15254_v19, %v15253_v49  ;;  %v21244_v49 = vpack.c.bf16 %v15262_v26, %v15261_v50  ;;  %v15263_v19 = vld [vmem:[%s28807_s3 + $0x250] sm:$0xff]  ;;  %v15683_v50 = vld [vmem:[%s28807_s3 + $0x888] sm:$0xff]  ;;  %v15615_v26 = vld [vmem:[%s25219_s1 + $0x138] sm:$0xff] }
 0x343   : >> { %18877 = vmatmul.mubr.f32.gmra.mrb[8].mxu1 %v15180_v46  ;;  %21597 = vmatprep.subr.bf16.mxu0 %v21596_v16  ;;  %v15651_v46 = vld [vmem:[%s28807_s3 + $0x810] sm:$0xff] }
 0x344   : >> { %19549 = vmatmul.mubr.f32.gmra.mrb[8].mxu0 %v25682_v6  ;;  %21215 = vmatpush3.bf16.msra.mxu1 %v21212_v8  ;;  %v21612_v8 = vpack.c.bf16 %v15650_v29, %v15649_v5  ;;  %v15659_v5 = vld [vmem:[%s28807_s3 + $0x850] sm:$0xff]  ;;  %v15660_v29 = vld [vmem:[%s28807_s3 + $0x858] sm:$0xff] }
 0x345   : >> { %21599 = vmatpush3.bf16.msra.mxu0 %v21596_v16  ;;  %18879 = vmatprep.mubr.f32.mxu1 %v15181_v7  ;;  %v15255_v16 = vld [vmem:[%s28807_s3 + $0x210] sm:$0xff] }
 0x346   : >> { %19551 = vmatprep.mubr.f32.mxu0 %v25687_v0  ;;  %21217 = vmatprep.subr.bf16.mxu1 %v21216_v14  ;;  %v21232_v7 = vpack.c.bf16 %v15256_v20, %v15255_v16  ;;  %v21632_v16 = vpack.c.bf16 %v15660_v29, %v15659_v5  ;;  %v15265_v20 = vld [vmem:[%s28807_s3 + $0x260] sm:$0xff]  ;;  %v15635_v5 = vld [vmem:[%s25219_s1 + $0xd2] sm:$0xff] }
 0x347   : >> { %18880 = vmatmul.mubr.f32.gmra.mrb[10].mxu1 %v15182_v33  ;;  %21601 = vmatprep.subr.bf16.mxu0 %v21600_v42  ;;  %v15654_v33 = vld [vmem:[%s28807_s3 + $0x828] sm:$0xff] }
 0x348   : >> { %19552 = vmatmul.mubr.f32.gmra.mrb[10].mxu0 %v25704_v39  ;;  %21219 = vmatpush3.bf16.msra.mxu1 %v21216_v14  ;;  %v21616_v14 = vpack.c.bf16 %v15652_v62, %v15651_v46  ;;  %v15661_v46 = vld [vmem:[%s28807_s3 + $0x860] sm:$0xff]  ;;  %v15662_v62 = vld [vmem:[%s28807_s3 + $0x868] sm:$0xff] }
 0x349   : >> { %21603 = vmatpush3.bf16.msra.mxu0 %v21600_v42  ;;  %18882 = vmatprep.mubr.f32.mxu1 %v15183_v53  ;;  %v15257_v42 = vld [vmem:[%s28807_s3 + $0x220] sm:$0xff]  ;;  %v15259_v53 = vld [vmem:[%s28807_s3 + $0x230] sm:$0xff] }
 0x34a   : >> { %19554 = vmatprep.mubr.f32.mxu0 %v25709_v41  ;;  %21221 = vmatprep.subr.bf16.mxu1 %v21220_v55  ;;  %v21236_v51 = vpack.c.bf16 %v15258_v32, %v15257_v42  ;;  %v15612_v42 = vld [vmem:[%s25219_s1 + $0x120] sm:$0xff]  ;;  %v21636_v32 = vpack.c.bf16 %v15662_v62, %v15661_v46  ;;  %v15638_v46 = vld [vmem:[%s25219_s1 + $0xea] sm:$0xff] }
 0x34b   : >> { %18883 = vmatmul.mubr.f32.gmra.mrb[12].mxu1 %v15184_v43  ;;  %21605 = vmatprep.subr.bf16.mxu0 %v21604_v57 }
 0x34c   : >> { %19555 = vmatmul.mubr.f32.gmra.mrb[12].mxu0 %v25726_v52  ;;  %21223 = vmatpush3.bf16.msra.mxu1 %v21220_v55  ;;  %v15260_v55 = vld [vmem:[%s28807_s3 + $0x238] sm:$0xff] }
 0x34d   : >> { %21607 = vmatpush3.bf16.msra.mxu0 %v21604_v57  ;;  %18885 = vmatprep.mubr.f32.mxu1 %v15185_v28  ;;  %v15209_v57 = vld [vmem:[%s25219_s1 + $0x2e] sm:$0xff]  ;;  %v21240_v43 = vpack.c.bf16 %v15260_v55, %v15259_v53  ;;  %v15211_v28 = vld [vmem:[%s25219_s1 + $0x3e] sm:$0xff]  ;;  %v15218_v53 = vld [vmem:[%s25219_s1 + $0x76] sm:$0xff] }
 0x34e   : >> { %19557 = vmatprep.mubr.f32.mxu0 %v25731_v30  ;;  %21225 = vmatprep.subr.bf16.mxu1 %v21224_v54 }
 0x34f   : >> { %18886 = vmatmul.mubr.f32.gmra.mrb[14].mxu1 %v15186_v63  ;;  %21609 = vmatprep.subr.bf16.mxu0 %v21608_v27  ;;  %v15264_v63 = vld [vmem:[%s28807_s3 + $0x258] sm:$0xff] }
 0x350   : >> { %19558 = vmatmul.mubr.f32.gmra.mrb[14].mxu0 %v25748_v21  ;;  %21227 = vmatpush3.bf16.msra.mxu1 %v21224_v54  ;;  %v15658_v54 = vld [vmem:[%s28807_s3 + $0x848] sm:$0xff] }
 0x351   : >> { %21611 = vmatpush3.bf16.msra.mxu0 %v21608_v27  ;;  %18920 = vmatprep.mubr.f32.mxu1 %v15204_v48  ;;  %v15212_v27 = vld [vmem:[%s25219_s1 + $0x46] sm:$0xff] }
 0x352   : >> { %19592 = vmatprep.mubr.f32.mxu0 %v25660_v11  ;;  %21229 = vmatprep.subr.bf16.mxu1 %v21228_v13  ;;  %v15653_v11 = vld [vmem:[%s28807_s3 + $0x820] sm:$0xff]  ;;  %v15609_v48 = vld [vmem:[%s25219_s1 + $0x108] sm:$0xff] }
 0x353   : >> { %18921 = vmatmul.mubr.f32.vlgmr.msra.gmra.mrb[0].mxu1 %v15205_v22  ;;  %21613 = vmatprep.subr.bf16.mxu0 %v21612_v8  ;;  %v15266_v22 = vld [vmem:[%s28807_s3 + $0x268] sm:$0xff] }
 0x354   : >> { %19593 = vmatmul.mubr.f32.vlgmr.msra.gmra.mrb[0].mxu0 %v25665_v18  ;;  %21231 = vmatpush3.bf16.msra.mxu1 %v21228_v13  ;;  %v21620_v18 = vpack.c.bf16 %v15654_v33, %v15653_v11  ;;  %v15214_v13 = vld [vmem:[%s25219_s1 + $0x56] sm:$0xff]  ;;  %v15217_v33 = vld [vmem:[%s25219_s1 + $0x6e] sm:$0xff] }
 0x355   : >> { %21615 = vmatpush3.bf16.msra.mxu0 %v21612_v8  ;;  %18923 = vmatprep.mubr.f32.mxu1 %v15206_v3  ;;  %v15610_v8 = vld [vmem:[%s25219_s1 + $0x110] sm:$0xff]  ;;  %v15611_v3 = vld [vmem:[%s25219_s1 + $0x118] sm:$0xff] }
 0x356   : >> { %19595 = vmatprep.mubr.f32.mxu0 %v25682_v6  ;;  %21233 = vmatprep.subr.bf16.mxu1 %v21232_v7  ;;  %v15655_v6 = vld [vmem:[%s28807_s3 + $0x830] sm:$0xff]  ;;  %v15268_v11 = vld [vmem:[%s28807_s3 + $0x278] sm:$0xff] }
 0x357   : >> { %18924 = vmatmul.mubr.f32.gmra.mrb[2].mxu1 %v15207_v10  ;;  %21617 = vmatprep.subr.bf16.mxu0 %v21616_v14  ;;  %v15267_v10 = vld [vmem:[%s28807_s3 + $0x270] sm:$0xff] }
 0x358   : >> { %19596 = vmatmul.mubr.f32.gmra.mrb[2].mxu0 %v25687_v0  ;;  %21235 = vmatpush3.bf16.msra.mxu1 %v21232_v7  ;;  %v21624_v0 = vpack.c.bf16 %v15656_v36, %v15655_v6  ;;  %v15216_v7 = vld [vmem:[%s25219_s1 + $0x66] sm:$0xff]  ;;  %v21256_v55 = vpack.c.bf16 %v15268_v11, %v15267_v10 }
 0x359   : >> { %21619 = vmatpush3.bf16.msra.mxu0 %v21616_v14  ;;  %18926 = vmatprep.mubr.f32.mxu1 %v15208_v23  ;;  %v21252_v14 = vpack.c.bf16 %v15266_v22, %v15265_v20  ;;  %v15663_v23 = vld [vmem:[%s28807_s3 + $0x870] sm:$0xff]  ;;  %v15286_v36 = vld [vmem:[%s28807_s3 + $0x280] sm:$0xff] }
 0x35a   : >> { %19598 = vmatprep.mubr.f32.mxu0 %v25704_v39  ;;  %21237 = vmatprep.subr.bf16.mxu1 %v21236_v51  ;;  %v15657_v39 = vld [vmem:[%s28807_s3 + $0x840] sm:$0xff]  ;;  %v15292_v22 = vld [vmem:[%s28807_s3 + $0x2b0] sm:$0xff] }
 0x35b   : >> { %18927 = vmatmul.mubr.f32.gmra.mrb[4].mxu1 %v15209_v57  ;;  %21621 = vmatprep.subr.bf16.mxu0 %v21620_v18  ;;  %v15614_v57 = vld [vmem:[%s25219_s1 + $0x130] sm:$0xff]  ;;  %v15641_v11 = vld [vmem:[%s25219_s1 + $0x102] sm:$0xff] }
 0x35c   : >> { %19599 = vmatmul.mubr.f32.gmra.mrb[4].mxu0 %v25709_v41  ;;  %21239 = vmatpush3.bf16.msra.mxu1 %v21236_v51  ;;  %v21628_v41 = vpack.c.bf16 %v15658_v54, %v15657_v39  ;;  %v15664_v51 = vld [vmem:[%s28807_s3 + $0x878] sm:$0xff]  ;;  %v15633_v39 = vld [vmem:[%s25219_s1 + $0xc2] sm:$0xff] }
 0x35d   : >> { %21623 = vmatpush3.bf16.msra.mxu0 %v21620_v18  ;;  %18929 = vmatprep.mubr.f32.mxu1 %v15210_v40  ;;  %v15613_v18 = vld [vmem:[%s25219_s1 + $0x128] sm:$0xff]  ;;  %v21640_v6 = vpack.c.bf16 %v15664_v51, %v15663_v23  ;;  %v15296_v23 = vld [vmem:[%s28807_s3 + $0x2d0] sm:$0xff]  ;;  %v15297_v51 = vld [vmem:[%s28807_s3 + $0x2d8] sm:$0xff] }
 0x35e   : >> { %19601 = vmatprep.mubr.f32.mxu0 %v25726_v52  ;;  %21241 = vmatprep.subr.bf16.mxu1 %v21240_v43  ;;  %v15213_v52 = vld [vmem:[%s25219_s1 + $0x4e] sm:$0xff] }
 0x35f   : >> { %18930 = vmatmul.mubr.f32.gmra.mrb[6].mxu1 %v15211_v28  ;;  %21625 = vmatprep.subr.bf16.mxu0 %v21624_v0  ;;  %v15287_v40 = vld [vmem:[%s28807_s3 + $0x288] sm:$0xff] }
 0x360   : >> { %19602 = vmatmul.mubr.f32.gmra.mrb[6].mxu0 %v25731_v30  ;;  %21243 = vmatpush3.bf16.msra.mxu1 %v21240_v43  ;;  %v21248_v30 = vpack.c.bf16 %v15264_v63, %v15263_v19  ;;  %v15219_v43 = vld [vmem:[%s25219_s1 + $0x7e] sm:$0xff]  ;;  %v21260_v28 = vpack.c.bf16 %v15287_v40, %v15286_v36  ;;  %v15634_v63 = vld [vmem:[%s25219_s1 + $0xca] sm:$0xff] }
 0x361   : >> { %21627 = vmatpush3.bf16.msra.mxu0 %v21624_v0  ;;  %18932 = vmatprep.mubr.f32.mxu1 %v15212_v27  ;;  %v15682_v0 = vld [vmem:[%s28807_s3 + $0x880] sm:$0xff]  ;;  %v15288_v27 = vld [vmem:[%s28807_s3 + $0x290] sm:$0xff]  ;;  %v15685_v19 = vld [vmem:[%s28807_s3 + $0x898] sm:$0xff] }
 0x362   : >> { %19604 = vmatprep.mubr.f32.mxu0 %v25748_v21  ;;  %21245 = vmatprep.subr.bf16.mxu1 %v21244_v49  ;;  %v15215_v21 = vld [vmem:[%s25219_s1 + $0x5e] sm:$0xff]  ;;  %v21644_v54 = vpack.c.bf16 %v15683_v50, %v15682_v0  ;;  %v15299_v40 = vld [vmem:[%s28807_s3 + $0x2e8] sm:$0xff] }
 0x363   : >> { %18933 = vmatmul.mubr.f32.gmra.mrb[8].mxu1 %v15213_v52  ;;  %21629 = vmatprep.subr.bf16.mxu0 %v21628_v41  ;;  %v15298_v36 = vld [vmem:[%s28807_s3 + $0x2e0] sm:$0xff]  ;;  %v15695_v0 = vld [vmem:[%s28807_s3 + $0x8e8] sm:$0xff] }
 0x364   : >> { %19605 = vmatmul.mubr.f32.gmra.mrb[8].mxu0 %v15609_v48  ;;  %21247 = vmatpush3.bf16.msra.mxu1 %v21244_v49  ;;  %v15289_v49 = vld [vmem:[%s28807_s3 + $0x298] sm:$0xff]  ;;  %v15290_v48 = vld [vmem:[%s28807_s3 + $0x2a0] sm:$0xff] }
 0x365   : >> { %21631 = vmatpush3.bf16.msra.mxu0 %v21628_v41  ;;  %18935 = vmatprep.mubr.f32.mxu1 %v15214_v13  ;;  %v15684_v41 = vld [vmem:[%s28807_s3 + $0x890] sm:$0xff]  ;;  %v21264_v52 = vpack.c.bf16 %v15289_v49, %v15288_v27  ;;  %v15291_v13 = vld [vmem:[%s28807_s3 + $0x2a8] sm:$0xff]  ;;  %v15644_v50 = vld [vmem:[%s25219_s1 + $0x11a] sm:$0xff] }
 0x366   : >> { %19607 = vmatprep.mubr.f32.mxu0 %v15610_v8  ;;  %21249 = vmatprep.subr.bf16.mxu1 %v21248_v30  ;;  %v21648_v29 = vpack.c.bf16 %v15685_v19, %v15684_v41  ;;  %v21268_v8 = vpack.c.bf16 %v15291_v13, %v15290_v48  ;;  %v15301_v27 = vld [vmem:[%s28807_s3 + $0x2f8] sm:$0xff]  ;;  %v15696_v49 = vld [vmem:[%s28807_s3 + $0x8f0] sm:$0xff]  ;;  %v15320_v48 = vld [vmem:[%s28807_s3 + $0x308] sm:$0xff] }
 0x367   : >> { %18936 = vmatmul.mubr.f32.gmra.mrb[10].mxu1 %v15215_v21  ;;  %21633 = vmatprep.subr.bf16.mxu0 %v21632_v16  ;;  %v15293_v21 = vld [vmem:[%s28807_s3 + $0x2b8] sm:$0xff]  ;;  %v15646_v19 = vld [vmem:[%s25219_s1 + $0x12a] sm:$0xff]  ;;  %v26000_v13 = vld [vmem:[%s25219_s1 + $0x80] sm:$0xff] }
 0x368   : >> { %19608 = vmatmul.mubr.f32.gmra.mrb[10].mxu0 %v15611_v3  ;;  %21251 = vmatpush3.bf16.msra.mxu1 %v21248_v30  ;;  %v15636_v30 = vld [vmem:[%s25219_s1 + $0xda] sm:$0xff]  ;;  %v21272_v62 = vpack.c.bf16 %v15293_v21, %v15292_v22  ;;  %v15639_v3 = vld [vmem:[%s25219_s1 + $0xf2] sm:$0xff] }
 0x369   : >> { %21635 = vmatpush3.bf16.msra.mxu0 %v21632_v16  ;;  %18938 = vmatprep.mubr.f32.mxu1 %v15216_v7  ;;  %v15637_v16 = vld [vmem:[%s25219_s1 + $0xe2] sm:$0xff]  ;;  %v15697_v41 = vld [vmem:[%s28807_s3 + $0x8f8] sm:$0xff]  ;;  %v15321_v22 = vld [vmem:[%s28807_s3 + $0x310] sm:$0xff] }
 0x36a   : >> { %19610 = vmatprep.mubr.f32.mxu0 %v15612_v42  ;;  %21253 = vmatprep.subr.bf16.mxu1 %v21252_v14  ;;  %v15295_v42 = vld [vmem:[%s28807_s3 + $0x2c8] sm:$0xff]  ;;  %v15322_v21 = vld [vmem:[%s28807_s3 + $0x318] sm:$0xff] }
 0x36b   : >> { %18939 = vmatmul.mubr.f32.gmra.mrb[12].mxu1 %v15217_v33  ;;  %21637 = vmatprep.subr.bf16.mxu0 %v21636_v32 }
 0x36c   : >> { %19611 = vmatmul.mubr.f32.gmra.mrb[12].mxu0 %v15613_v18  ;;  %21255 = vmatpush3.bf16.msra.mxu1 %v21252_v14  ;;  %v15294_v14 = vld [vmem:[%s28807_s3 + $0x2c0] sm:$0xff]  ;;  %v15693_v18 = vld [vmem:[%s28807_s3 + $0x8d8] sm:$0xff] }
 0x36d   : >> { %21639 = vmatpush3.bf16.msra.mxu0 %v21636_v32  ;;  %18941 = vmatprep.mubr.f32.mxu1 %v15218_v53  ;;  %v15640_v32 = vld [vmem:[%s25219_s1 + $0xfa] sm:$0xff]  ;;  %v21276_v10 = vpack.c.bf16 %v15295_v42, %v15294_v14  ;;  %v15642_v53 = vld [vmem:[%s25219_s1 + $0x10a] sm:$0xff] }
 0x36e   : >> { %19613 = vmatprep.mubr.f32.mxu0 %v15614_v57  ;;  %21257 = vmatprep.subr.bf16.mxu1 %v21256_v55  ;;  %v15643_v57 = vld [vmem:[%s25219_s1 + $0x112] sm:$0xff]  ;;  %v15323_v14 = vld [vmem:[%s28807_s3 + $0x320] sm:$0xff]  ;;  %v15324_v42 = vld [vmem:[%s28807_s3 + $0x328] sm:$0xff] }
 0x36f   : >> { %18942 = vmatmul.mubr.f32.gmra.mrb[14].mxu1 %v15219_v43  ;;  %21641 = vmatprep.subr.bf16.mxu0 %v21640_v6  ;;  %v15694_v43 = vld [vmem:[%s28807_s3 + $0x8e0] sm:$0xff] }
 0x370   : >> { %19614 = vmatmul.mubr.f32.gmra.mrb[14].mxu0 %v15615_v26  ;;  %21259 = vmatpush3.bf16.msra.mxu1 %v21256_v55  ;;  %v21280_v55 = vpack.c.bf16 %v15297_v51, %v15296_v23  ;;  %v21284_v26 = vpack.c.bf16 %v15299_v40, %v15298_v36  ;;  %v15671_v23 = vld [vmem:[%s25219_s1 + $0xec] sm:$0xff]  ;;  %v15674_v36 = vld [vmem:[%s25219_s1 + $0x104] sm:$0xff] }
 0x371   : >> { %21643 = vmatpush3.bf16.msra.mxu0 %v21640_v6  ;;  %18976 = vmatprep.mubr.f32.mxu1 %v25412_v15  ;;  %v15686_v15 = vld [vmem:[%s28807_s3 + $0x8a0] sm:$0xff] }
 0x372   : >> { %19648 = vmatprep.mubr.f32.mxu0 %v15633_v39  ;;  %21261 = vmatprep.subr.bf16.mxu1 %v21260_v28  ;;  %v21668_v39 = vpack.c.bf16 %v15695_v0, %v15694_v43  ;;  %v15329_v43 = vld [vmem:[%s28807_s3 + $0x350] sm:$0xff]  ;;  %v15330_v0 = vld [vmem:[%s28807_s3 + $0x358] sm:$0xff] }
 0x373   : >> { %18977 = vmatmul.mubr.f32.vlgmr.msra.gmra.mrb[0].mxu1 %v25422_v12  ;;  %21645 = vmatprep.subr.bf16.mxu0 %v21644_v54  ;;  %v15687_v12 = vld [vmem:[%s28807_s3 + $0x8a8] sm:$0xff] }
 0x374   : >> { %19649 = vmatmul.mubr.f32.vlgmr.msra.gmra.mrb[0].mxu0 %v15634_v63  ;;  %21263 = vmatpush3.bf16.msra.mxu1 %v21260_v28  ;;  %v21652_v20 = vpack.c.bf16 %v15687_v12, %v15686_v15  ;;  %v15645_v28 = vld [vmem:[%s25219_s1 + $0x122] sm:$0xff] }
 0x375   : >> { %21647 = vmatpush3.bf16.msra.mxu0 %v21644_v54  ;;  %18979 = vmatprep.mubr.f32.mxu1 %v25433_v60  ;;  %v15688_v60 = vld [vmem:[%s28807_s3 + $0x8b0] sm:$0xff]  ;;  %v15715_v15 = vld [vmem:[%s28807_s3 + $0x900] sm:$0xff]  ;;  %v15716_v12 = vld [vmem:[%s28807_s3 + $0x908] sm:$0xff] }
 0x376   : >> { %19651 = vmatprep.mubr.f32.mxu0 %v15635_v5  ;;  %21265 = vmatprep.subr.bf16.mxu1 %v21264_v52  ;;  %v15300_v54 = vld [vmem:[%s28807_s3 + $0x2f0] sm:$0xff]  ;;  %v21672_v5 = vpack.c.bf16 %v15697_v41, %v15696_v49  ;;  %v15727_v49 = vld [vmem:[%s28807_s3 + $0x960] sm:$0xff] }
 0x377   : >> { %18980 = vmatmul.mubr.f32.gmra.mrb[2].mxu1 %v25444_v58  ;;  %21649 = vmatprep.subr.bf16.mxu0 %v21648_v29  ;;  %v15689_v58 = vld [vmem:[%s28807_s3 + $0x8b8] sm:$0xff]  ;;  %v21288_v63 = vpack.c.bf16 %v15301_v27, %v15300_v54  ;;  %v15331_v54 = vld [vmem:[%s28807_s3 + $0x360] sm:$0xff]  ;;  %v15332_v27 = vld [vmem:[%s28807_s3 + $0x368] sm:$0xff] }
 0x378   : >> { %19652 = vmatmul.mubr.f32.gmra.mrb[2].mxu0 %v15636_v30  ;;  %21267 = vmatpush3.bf16.msra.mxu1 %v21264_v52  ;;  %v21656_v7 = vpack.c.bf16 %v15689_v58, %v15688_v60  ;;  %v15647_v52 = vld [vmem:[%s25219_s1 + $0x132] sm:$0xff]  ;;  %v15648_v30 = vld [vmem:[%s25219_s1 + $0x13a] sm:$0xff] }
 0x379   : >> { %21651 = vmatpush3.bf16.msra.mxu0 %v21648_v29  ;;  %18982 = vmatprep.mubr.f32.mxu1 %v25455_v4  ;;  %v15690_v4 = vld [vmem:[%s28807_s3 + $0x8c0] sm:$0xff]  ;;  %v15717_v60 = vld [vmem:[%s28807_s3 + $0x910] sm:$0xff]  ;;  %v15718_v58 = vld [vmem:[%s28807_s3 + $0x918] sm:$0xff] }
 0x37a   : >> { %19654 = vmatprep.mubr.f32.mxu0 %v15637_v16  ;;  %21269 = vmatprep.subr.bf16.mxu1 %v21268_v8  ;;  %v15319_v29 = vld [vmem:[%s28807_s3 + $0x300] sm:$0xff] }
 0x37b   : >> { %18983 = vmatmul.mubr.f32.gmra.mrb[4].mxu1 %v25466_v59  ;;  %21653 = vmatprep.subr.bf16.mxu0 %v21652_v20  ;;  %v15691_v59 = vld [vmem:[%s28807_s3 + $0x8c8] sm:$0xff]  ;;  %v15677_v41 = vld [vmem:[%s25219_s1 + $0x11c] sm:$0xff] }
 0x37c   : >> { %19655 = vmatmul.mubr.f32.gmra.mrb[4].mxu0 %v15638_v46  ;;  %21271 = vmatpush3.bf16.msra.mxu1 %v21268_v8  ;;  %v21660_v33 = vpack.c.bf16 %v15691_v59, %v15690_v4  ;;  %v21292_v8 = vpack.c.bf16 %v15320_v48, %v15319_v29  ;;  %v15666_v16 = vld [vmem:[%s25219_s1 + $0xc4] sm:$0xff]  ;;  %v15667_v46 = vld [vmem:[%s25219_s1 + $0xcc] sm:$0xff]  ;;  %v15669_v4 = vld [vmem:[%s25219_s1 + $0xdc] sm:$0xff]  ;;  %v21300_v59 = vpack.c.bf16 %v15324_v42, %v15323_v14 }
 0x37d   : >> { %21655 = vmatpush3.bf16.msra.mxu0 %v21652_v20  ;;  %18985 = vmatprep.mubr.f32.mxu1 %v25477_v35  ;;  %v15692_v35 = vld [vmem:[%s28807_s3 + $0x8d0] sm:$0xff]  ;;  %v21676_v20 = vpack.c.bf16 %v15716_v12, %v15715_v15  ;;  %v15334_v29 = vld [vmem:[%s28807_s3 + $0x378] sm:$0xff] }
 0x37e   : >> { %19657 = vmatprep.mubr.f32.mxu0 %v15639_v3  ;;  %21273 = vmatprep.subr.bf16.mxu1 %v21272_v62  ;;  %v21664_v6 = vpack.c.bf16 %v15693_v18, %v15692_v35  ;;  %v15668_v3 = vld [vmem:[%s25219_s1 + $0xd4] sm:$0xff]  ;;  %v15679_v48 = vld [vmem:[%s25219_s1 + $0x12c] sm:$0xff] }
 0x37f   : >> { %18986 = vmatmul.mubr.f32.gmra.mrb[6].mxu1 %v25488_v34  ;;  %21657 = vmatprep.subr.bf16.mxu0 %v21656_v7  ;;  %v15672_v35 = vld [vmem:[%s25219_s1 + $0xf4] sm:$0xff] }
 0x380   : >> { %19658 = vmatmul.mubr.f32.gmra.mrb[6].mxu0 %v15640_v32  ;;  %21275 = vmatpush3.bf16.msra.mxu1 %v21272_v62  ;;  %v21296_v62 = vpack.c.bf16 %v15322_v21, %v15321_v22  ;;  %v15670_v32 = vld [vmem:[%s25219_s1 + $0xe4] sm:$0xff]  ;;  %v15680_v15 = vld [vmem:[%s25219_s1 + $0x134] sm:$0xff] }
 0x381   : >> { %21659 = vmatpush3.bf16.msra.mxu0 %v21656_v7  ;;  %18988 = vmatprep.mubr.f32.mxu1 %v25499_v45  ;;  %v21680_v7 = vpack.c.bf16 %v15718_v58, %v15717_v60  ;;  %v15699_v21 = vld [vmem:[%s25219_s1 + $0xc6] sm:$0xff]  ;;  %v15354_v58 = vld [vmem:[%s28807_s3 + $0x390] sm:$0xff] }
 0x382   : >> { %19660 = vmatprep.mubr.f32.mxu0 %v15641_v11  ;;  %21277 = vmatprep.subr.bf16.mxu1 %v21276_v10  ;;  %v15325_v11 = vld [vmem:[%s28807_s3 + $0x330] sm:$0xff] }
 0x383   : >> { %18989 = vmatmul.mubr.f32.gmra.mrb[8].mxu1 %v25510_v1  ;;  %21661 = vmatprep.subr.bf16.mxu0 %v21660_v33  ;;  %v15701_v42 = vld [vmem:[%s25219_s1 + $0xd6] sm:$0xff] }
 0x384   : >> { %19661 = vmatmul.mubr.f32.gmra.mrb[8].mxu0 %v15642_v53  ;;  %21279 = vmatpush3.bf16.msra.mxu1 %v21276_v10  ;;  %v15327_v53 = vld [vmem:[%s28807_s3 + $0x340] sm:$0xff] }
 0x385   : >> { %21663 = vmatpush3.bf16.msra.mxu0 %v21660_v33  ;;  %18991 = vmatprep.mubr.f32.mxu1 %v25521_v44  ;;  %v15326_v33 = vld [vmem:[%s28807_s3 + $0x338] sm:$0xff] }
 0x386   : >> { %19663 = vmatprep.mubr.f32.mxu0 %v15643_v57  ;;  %21281 = vmatprep.subr.bf16.mxu1 %v21280_v55  ;;  %v21304_v51 = vpack.c.bf16 %v15326_v33, %v15325_v11  ;;  %v15673_v57 = vld [vmem:[%s25219_s1 + $0xfc] sm:$0xff] }
 0x387   : >> { %18992 = vmatmul.mubr.f32.gmra.mrb[10].mxu1 %v25532_v61  ;;  %21665 = vmatprep.subr.bf16.mxu0 %v21664_v6  ;;  %v15702_v11 = vld [vmem:[%s25219_s1 + $0xde] sm:$0xff] }
 0x388   : >> { %19664 = vmatmul.mubr.f32.gmra.mrb[10].mxu0 %v15644_v50  ;;  %21283 = vmatpush3.bf16.msra.mxu1 %v21280_v55  ;;  %v15328_v55 = vld [vmem:[%s28807_s3 + $0x348] sm:$0xff] }
 0x389   : >> { %21667 = vmatpush3.bf16.msra.mxu0 %v21664_v6  ;;  %18994 = vmatprep.mubr.f32.mxu1 %v25543_v25  ;;  %v21308_v6 = vpack.c.bf16 %v15328_v55, %v15327_v53  ;;  %v15675_v50 = vld [vmem:[%s25219_s1 + $0x10c] sm:$0xff]  ;;  %v15307_v33 = vld [vmem:[%s25219_s1 + $0x62] sm:$0xff]  ;;  %v15755_v55 = vld [vmem:[%s28807_s3 + $0x9b8] sm:$0xff] }
 0x38a   : >> { %19666 = vmatprep.mubr.f32.mxu0 %v15645_v28  ;;  %21285 = vmatprep.subr.bf16.mxu1 %v21284_v26  ;;  %v15676_v28 = vld [vmem:[%s25219_s1 + $0x114] sm:$0xff] }
 0x38b   : >> { %18995 = vmatmul.mubr.f32.gmra.mrb[12].mxu1 %v25554_v31  ;;  %21669 = vmatprep.subr.bf16.mxu0 %v21668_v39  ;;  %v15754_v53 = vld [vmem:[%s28807_s3 + $0x9b0] sm:$0xff] }
 0x38c   : >> { %19667 = vmatmul.mubr.f32.gmra.mrb[12].mxu0 %v15646_v19  ;;  %21287 = vmatpush3.bf16.msra.mxu1 %v21284_v26  ;;  %v21312_v26 = vpack.c.bf16 %v15330_v0, %v15329_v43  ;;  %v21316_v19 = vpack.c.bf16 %v15332_v27, %v15331_v54  ;;  %v15361_v43 = vld [vmem:[%s28807_s3 + $0x3c8] sm:$0xff]  ;;  %v15310_v0 = vld [vmem:[%s25219_s1 + $0x7a] sm:$0xff]  ;;  %v15362_v27 = vld [vmem:[%s28807_s3 + $0x3d0] sm:$0xff] }
 0x38d   : >> { %21671 = vmatpush3.bf16.msra.mxu0 %v21668_v39  ;;  %18997 = vmatprep.mubr.f32.mxu1 %v25565_v24 }
 0x38e   : >> { %19669 = vmatprep.mubr.f32.mxu0 %v15647_v52  ;;  %21289 = vmatprep.subr.bf16.mxu1 %v21288_v63 }
 0x38f   : >> { %18998 = vmatmul.mubr.f32.gmra.mrb[14].mxu1 %v26000_v13  ;;  %21673 = vmatprep.subr.bf16.mxu0 %v21672_v5 }
 0x390   : >> { %19670 = vmatmul.mubr.f32.gmra.mrb[14].mxu0 %v15648_v30  ;;  %21291 = vmatpush3.bf16.msra.mxu1 %v21288_v63  ;;  %v15678_v63 = vld [vmem:[%s25219_s1 + $0x124] sm:$0xff] }
 0x391   : >> { %21675 = vmatpush3.bf16.msra.mxu0 %v21672_v5  ;;  %19032 = vmatprep.mubr.f32.mxu1 %v25488_v34  ;;  %v15719_v34 = vld [vmem:[%s28807_s3 + $0x920] sm:$0xff]  ;;  %v15333_v5 = vld [vmem:[%s28807_s3 + $0x370] sm:$0xff] }
 0x392   : >> { %19704 = vmatprep.mubr.f32.mxu0 %v15666_v16  ;;  %21293 = vmatprep.subr.bf16.mxu1 %v21292_v8  ;;  %v15352_v30 = vld [vmem:[%s28807_s3 + $0x380] sm:$0xff] }
 0x393   : >> { %19033 = vmatmul.mubr.f32.vlgmr.msra.gmra.mrb[0].mxu1 %v25499_v45  ;;  %21677 = vmatprep.subr.bf16.mxu0 %v21676_v20  ;;  %v15720_v45 = vld [vmem:[%s28807_s3 + $0x928] sm:$0xff]  ;;  %v15681_v16 = vld [vmem:[%s25219_s1 + $0x13c] sm:$0xff] }
 0x394   : >> { %19705 = vmatmul.mubr.f32.vlgmr.msra.gmra.mrb[0].mxu0 %v15667_v46  ;;  %21295 = vmatpush3.bf16.msra.mxu1 %v21292_v8  ;;  %v21684_v10 = vpack.c.bf16 %v15720_v45, %v15719_v34  ;;  %v15748_v8 = vld [vmem:[%s28807_s3 + $0x980] sm:$0xff]  ;;  %v15304_v46 = vld [vmem:[%s25219_s1 + $0x4a] sm:$0xff] }
 0x395   : >> { %21679 = vmatpush3.bf16.msra.mxu0 %v21676_v20  ;;  %19035 = vmatprep.mubr.f32.mxu1 %v25510_v1  ;;  %v15721_v1 = vld [vmem:[%s28807_s3 + $0x930] sm:$0xff]  ;;  %v15303_v20 = vld [vmem:[%s25219_s1 + $0x42] sm:$0xff] }
 0x396   : >> { %19707 = vmatprep.mubr.f32.mxu0 %v15668_v3  ;;  %21297 = vmatprep.subr.bf16.mxu1 %v21296_v62  ;;  %v15700_v3 = vld [vmem:[%s25219_s1 + $0xce] sm:$0xff]  ;;  %v15356_v45 = vld [vmem:[%s28807_s3 + $0x3a0] sm:$0xff] }
 0x397   : >> { %19036 = vmatmul.mubr.f32.gmra.mrb[2].mxu1 %v25521_v44  ;;  %21681 = vmatprep.subr.bf16.mxu0 %v21680_v7  ;;  %v15722_v44 = vld [vmem:[%s28807_s3 + $0x938] sm:$0xff] }
 0x398   : >> { %19708 = vmatmul.mubr.f32.gmra.mrb[2].mxu0 %v15669_v4  ;;  %21299 = vmatpush3.bf16.msra.mxu1 %v21296_v62  ;;  %v21688_v18 = vpack.c.bf16 %v15722_v44, %v15721_v1  ;;  %v15751_v62 = vld [vmem:[%s28807_s3 + $0x998] sm:$0xff]  ;;  %v15357_v4 = vld [vmem:[%s28807_s3 + $0x3a8] sm:$0xff] }
 0x399   : >> { %21683 = vmatpush3.bf16.msra.mxu0 %v21680_v7  ;;  %19038 = vmatprep.mubr.f32.mxu1 %v25532_v61  ;;  %v15723_v61 = vld [vmem:[%s28807_s3 + $0x940] sm:$0xff]  ;;  %v15305_v7 = vld [vmem:[%s25219_s1 + $0x52] sm:$0xff]  ;;  %v21332_v1 = vpack.c.bf16 %v15357_v4, %v15356_v45  ;;  %v15782_v45 = vld [vmem:[%s28807_s3 + $0xa08] sm:$0xff] }
 0x39a   : >> { %19710 = vmatprep.mubr.f32.mxu0 %v15670_v32  ;;  %21301 = vmatprep.subr.bf16.mxu1 %v21300_v59  ;;  %v15752_v32 = vld [vmem:[%s28807_s3 + $0x9a0] sm:$0xff] }
 0x39b   : >> { %19039 = vmatmul.mubr.f32.gmra.mrb[4].mxu1 %v25543_v25  ;;  %21685 = vmatprep.subr.bf16.mxu0 %v21684_v10  ;;  %v15724_v25 = vld [vmem:[%s28807_s3 + $0x948] sm:$0xff]  ;;  %v15714_v4 = vld [vmem:[%s25219_s1 + $0x13e] sm:$0xff] }
 0x39c   : >> { %19711 = vmatmul.mubr.f32.gmra.mrb[4].mxu0 %v15671_v23  ;;  %21303 = vmatpush3.bf16.msra.mxu1 %v21300_v59  ;;  %v21692_v40 = vpack.c.bf16 %v15724_v25, %v15723_v61  ;;  %v15306_v59 = vld [vmem:[%s25219_s1 + $0x5a] sm:$0xff]  ;;  %v15703_v44 = vld [vmem:[%s25219_s1 + $0xe6] sm:$0xff]  ;;  %v15704_v61 = vld [vmem:[%s25219_s1 + $0xee] sm:$0xff] }
 0x39d   : >> { %21687 = vmatpush3.bf16.msra.mxu0 %v21684_v10  ;;  %19041 = vmatprep.mubr.f32.mxu1 %v25554_v31  ;;  %v15725_v31 = vld [vmem:[%s28807_s3 + $0x950] sm:$0xff]  ;;  %v15753_v10 = vld [vmem:[%s28807_s3 + $0x9a8] sm:$0xff] }
 0x39e   : >> { %19713 = vmatprep.mubr.f32.mxu0 %v15672_v35  ;;  %21305 = vmatprep.subr.bf16.mxu1 %v21304_v51  ;;  %v21716_v23 = vpack.c.bf16 %v15753_v10, %v15752_v32  ;;  %v15359_v35 = vld [vmem:[%s28807_s3 + $0x3b8] sm:$0xff]  ;;  %v26269_v10 = vld [vmem:[%s25219_s1 + $0xc8] sm:$0xff] }
 0x39f   : >> { %19042 = vmatmul.mubr.f32.gmra.mrb[6].mxu1 %v25565_v24  ;;  %21689 = vmatprep.subr.bf16.mxu0 %v21688_v18  ;;  %v15726_v24 = vld [vmem:[%s28807_s3 + $0x958] sm:$0xff] }
 0x3a0   : >> { %19714 = vmatmul.mubr.f32.gmra.mrb[6].mxu0 %v15673_v57  ;;  %21307 = vmatpush3.bf16.msra.mxu1 %v21304_v51  ;;  %v21696_v39 = vpack.c.bf16 %v15726_v24, %v15725_v31  ;;  %v15358_v51 = vld [vmem:[%s28807_s3 + $0x3b0] sm:$0xff]  ;;  %v15756_v31 = vld [vmem:[%s28807_s3 + $0x9c0] sm:$0xff]  ;;  %v15757_v24 = vld [vmem:[%s28807_s3 + $0x9c8] sm:$0xff] }
 0x3a1   : >> { %21691 = vmatpush3.bf16.msra.mxu0 %v21688_v18  ;;  %19044 = vmatprep.mubr.f32.mxu1 %v26000_v13  ;;  %v21320_v13 = vpack.c.bf16 %v15334_v29, %v15333_v5  ;;  %v15308_v18 = vld [vmem:[%s25219_s1 + $0x6a] sm:$0xff]  ;;  %v15309_v25 = vld [vmem:[%s25219_s1 + $0x72] sm:$0xff]  ;;  %v21336_v57 = vpack.c.bf16 %v15359_v35, %v15358_v51  ;;  %v21724_v54 = vpack.c.bf16 %v15757_v24, %v15756_v31 }
 0x3a2   : >> { %19716 = vmatprep.mubr.f32.mxu0 %v15674_v36  ;;  %21309 = vmatprep.subr.bf16.mxu1 %v21308_v6  ;;  %v21720_v36 = vpack.c.bf16 %v15755_v55, %v15754_v53  ;;  %v15709_v29 = vld [vmem:[%s25219_s1 + $0x116] sm:$0xff]  ;;  %v26312_v24 = vld [vmem:[%s25219_s1 + $0xe8] sm:$0xff] }
 0x3a3   : >> { %19045 = vmatmul.mubr.f32.gmra.mrb[8].mxu1 %v25578_v9  ;;  %21693 = vmatprep.subr.bf16.mxu0 %v21692_v40  ;;  %v15728_v9 = vld [vmem:[%s28807_s3 + $0x968] sm:$0xff]  ;;  %v15784_v51 = vld [vmem:[%s28807_s3 + $0xa18] sm:$0xff]  ;;  %v26285_v35 = vld [vmem:[%s25219_s1 + $0xd0] sm:$0xff] }
 0x3a4   : >> { %19717 = vmatmul.mubr.f32.gmra.mrb[8].mxu0 %v15675_v50  ;;  %21311 = vmatpush3.bf16.msra.mxu1 %v21308_v6  ;;  %v21700_v52 = vpack.c.bf16 %v15728_v9, %v15727_v49  ;;  %v15705_v6 = vld [vmem:[%s25219_s1 + $0xf6] sm:$0xff]  ;;  %v15706_v50 = vld [vmem:[%s25219_s1 + $0xfe] sm:$0xff]  ;;  %v15312_v9 = vld [vmem:[%s25219_s1 + $0x8a] sm:$0xff] }
 0x3a5   : >> { %21695 = vmatpush3.bf16.msra.mxu0 %v21692_v40  ;;  %19047 = vmatprep.mubr.f32.mxu1 %v25594_v37  ;;  %v15729_v37 = vld [vmem:[%s28807_s3 + $0x970] sm:$0xff]  ;;  %v15360_v40 = vld [vmem:[%s28807_s3 + $0x3c0] sm:$0xff]  ;;  %v15363_v49 = vld [vmem:[%s28807_s3 + $0x3d8] sm:$0xff] }
 0x3a6   : >> { %19719 = vmatprep.mubr.f32.mxu0 %v15676_v28  ;;  %21313 = vmatprep.subr.bf16.mxu1 %v21312_v26  ;;  %v21340_v28 = vpack.c.bf16 %v15361_v43, %v15360_v40  ;;  %v21344_v5 = vpack.c.bf16 %v15363_v49, %v15362_v27  ;;  %v26290_v55 = vld [vmem:[%s25219_s1 + $0xd8] sm:$0xff]  ;;  %v15786_v40 = vld [vmem:[%s28807_s3 + $0xa28] sm:$0xff]  ;;  %v26307_v43 = vld [vmem:[%s25219_s1 + $0xe0] sm:$0xff] }
 0x3a7   : >> { %19048 = vmatmul.mubr.f32.gmra.mrb[10].mxu1 %v25599_v2  ;;  %21697 = vmatprep.subr.bf16.mxu0 %v21696_v39  ;;  %v15730_v2 = vld [vmem:[%s28807_s3 + $0x978] sm:$0xff]  ;;  %v26329_v49 = vld [vmem:[%s25219_s1 + $0xf0] sm:$0xff] }
 0x3a8   : >> { %19720 = vmatmul.mubr.f32.gmra.mrb[10].mxu0 %v15677_v41  ;;  %21315 = vmatpush3.bf16.msra.mxu1 %v21312_v26  ;;  %v21704_v12 = vpack.c.bf16 %v15730_v2, %v15729_v37  ;;  %v15311_v26 = vld [vmem:[%s25219_s1 + $0x82] sm:$0xff]  ;;  %v15758_v41 = vld [vmem:[%s28807_s3 + $0x9d0] sm:$0xff]  ;;  %v15788_v27 = vld [vmem:[%s28807_s3 + $0xa38] sm:$0xff] }
 0x3a9   : >> { %21699 = vmatpush3.bf16.msra.mxu0 %v21696_v39  ;;  %19050 = vmatprep.mubr.f32.mxu1 %v25616_v38  ;;  %v15353_v38 = vld [vmem:[%s28807_s3 + $0x388] sm:$0xff]  ;;  %v15364_v2 = vld [vmem:[%s28807_s3 + $0x3e0] sm:$0xff] }
 0x3aa   : >> { %19722 = vmatprep.mubr.f32.mxu0 %v15678_v63  ;;  %21317 = vmatprep.subr.bf16.mxu1 %v21316_v19  ;;  %v21324_v22 = vpack.c.bf16 %v15353_v38, %v15352_v30  ;;  %v15707_v39 = vld [vmem:[%s25219_s1 + $0x106] sm:$0xff]  ;;  %v15708_v63 = vld [vmem:[%s25219_s1 + $0x10e] sm:$0xff]  ;;  %v15710_v30 = vld [vmem:[%s25219_s1 + $0x11e] sm:$0xff] }
 0x3ab   : >> { %19051 = vmatmul.mubr.f32.gmra.mrb[12].mxu1 %v25621_v47  ;;  %21701 = vmatprep.subr.bf16.mxu0 %v21700_v52  ;;  %v15749_v47 = vld [vmem:[%s28807_s3 + $0x988] sm:$0xff] }
 0x3ac   : >> { %19723 = vmatmul.mubr.f32.gmra.mrb[12].mxu0 %v15679_v48  ;;  %21319 = vmatpush3.bf16.msra.mxu1 %v21316_v19  ;;  %v21708_v60 = vpack.c.bf16 %v15749_v47, %v15748_v8  ;;  %v15759_v19 = vld [vmem:[%s28807_s3 + $0x9d8] sm:$0xff]  ;;  %v15365_v48 = vld [vmem:[%s28807_s3 + $0x3e8] sm:$0xff] }
 0x3ad   : >> { %21703 = vmatpush3.bf16.msra.mxu0 %v21700_v52  ;;  %19053 = vmatprep.mubr.f32.mxu1 %v25638_v56  ;;  %v15355_v56 = vld [vmem:[%s28807_s3 + $0x398] sm:$0xff]  ;;  %v21728_v37 = vpack.c.bf16 %v15759_v19, %v15758_v41  ;;  %v15315_v38 = vld [vmem:[%s25219_s1 + $0xa2] sm:$0xff]  ;;  %v21348_v8 = vpack.c.bf16 %v15365_v48, %v15364_v2 }
 0x3ae   : >> { %19725 = vmatprep.mubr.f32.mxu0 %v15680_v15  ;;  %21321 = vmatprep.subr.bf16.mxu1 %v21320_v13  ;;  %v21328_v14 = vpack.c.bf16 %v15355_v56, %v15354_v58  ;;  %v15313_v52 = vld [vmem:[%s25219_s1 + $0x92] sm:$0xff]  ;;  %v15760_v15 = vld [vmem:[%s28807_s3 + $0x9e0] sm:$0xff]  ;;  %v15790_v2 = vld [vmem:[%s28807_s3 + $0xa48] sm:$0xff] }
 0x3af   : >> { %19054 = vmatmul.mubr.f32.gmra.mrb[14].mxu1 %v25643_v17  ;;  %21705 = vmatprep.subr.bf16.mxu0 %v21704_v12  ;;  %v15750_v17 = vld [vmem:[%s28807_s3 + $0x990] sm:$0xff]  ;;  %v15711_v47 = vld [vmem:[%s25219_s1 + $0x126] sm:$0xff]  ;;  %v15763_v58 = vld [vmem:[%s28807_s3 + $0x9f8] sm:$0xff] }
 0x3b0   : >> { %19726 = vmatmul.mubr.f32.gmra.mrb[14].mxu0 %v15681_v16  ;;  %21323 = vmatpush3.bf16.msra.mxu1 %v21320_v13  ;;  %v21712_v34 = vpack.c.bf16 %v15751_v62, %v15750_v17  ;;  %v15314_v13 = vld [vmem:[%s25219_s1 + $0x9a] sm:$0xff]  ;;  %v15712_v56 = vld [vmem:[%s25219_s1 + $0x12e] sm:$0xff] }
 0x3b1   : >> { %21707 = vmatpush3.bf16.msra.mxu0 %v21704_v12  ;;  %19088 = vmatprep.mubr.f32.mxu1 %v15303_v20  ;;  %v15761_v12 = vld [vmem:[%s28807_s3 + $0x9e8] sm:$0xff]  ;;  %v15366_v20 = vld [vmem:[%s28807_s3 + $0x3f0] sm:$0xff]  ;;  %v26334_v19 = vld [vmem:[%s25219_s1 + $0xf8] sm:$0xff] }
 0x3b2   : >> { %19760 = vmatprep.mubr.f32.mxu0 %v15699_v21  ;;  %21325 = vmatprep.subr.bf16.mxu1 %v21324_v22  ;;  %v21732_v16 = vpack.c.bf16 %v15761_v12, %v15760_v15  ;;  %v15316_v21 = vld [vmem:[%s25219_s1 + $0xaa] sm:$0xff]  ;;  %v15713_v62 = vld [vmem:[%s25219_s1 + $0x136] sm:$0xff]  ;;  %v26351_v48 = vld [vmem:[%s25219_s1 + $0x100] sm:$0xff] }
 0x3b3   : >> { %19089 = vmatmul.mubr.f32.vlgmr.msra.gmra.mrb[0].mxu1 %v15304_v46  ;;  %21709 = vmatprep.subr.bf16.mxu0 %v21708_v60  ;;  %v15317_v46 = vld [vmem:[%s25219_s1 + $0xb2] sm:$0xff]  ;;  %v26356_v12 = vld [vmem:[%s25219_s1 + $0x108] sm:$0xff] }
 0x3b4   : >> { %19761 = vmatmul.mubr.f32.vlgmr.msra.gmra.mrb[0].mxu0 %v15700_v3  ;;  %21327 = vmatpush3.bf16.msra.mxu1 %v21324_v22  ;;  %v15367_v22 = vld [vmem:[%s28807_s3 + $0x3f8] sm:$0xff] }
 0x3b5   : >> { %21711 = vmatpush3.bf16.msra.mxu0 %v21708_v60  ;;  %19091 = vmatprep.mubr.f32.mxu1 %v15305_v7  ;;  %v15762_v60 = vld [vmem:[%s28807_s3 + $0x9f0] sm:$0xff]  ;;  %v21352_v17 = vpack.c.bf16 %v15367_v22, %v15366_v20  ;;  %v15385_v7 = vld [vmem:[%s28807_s3 + $0x400] sm:$0xff]  ;;  %v15792_v20 = vld [vmem:[%s28807_s3 + $0xa58] sm:$0xff] }
 0x3b6   : >> { %19763 = vmatprep.mubr.f32.mxu0 %v15701_v42  ;;  %21329 = vmatprep.subr.bf16.mxu1 %v21328_v14  ;;  %v21736_v3 = vpack.c.bf16 %v15763_v58, %v15762_v60  ;;  %v15318_v42 = vld [vmem:[%s25219_s1 + $0xba] sm:$0xff]  ;;  %v26373_v22 = vld [vmem:[%s25219_s1 + $0x110] sm:$0xff] }
 0x3b7   : >> { %19092 = vmatmul.mubr.f32.gmra.mrb[2].mxu1 %v15306_v59  ;;  %21713 = vmatprep.subr.bf16.mxu0 %v21712_v34  ;;  %v15336_v59 = vld [vmem:[%s25219_s1 + $0x44] sm:$0xff]  ;;  %v26378_v58 = vld [vmem:[%s25219_s1 + $0x118] sm:$0xff] }
 0x3b8   : >> { %19764 = vmatmul.mubr.f32.gmra.mrb[2].mxu0 %v15702_v11  ;;  %21331 = vmatpush3.bf16.msra.mxu1 %v21328_v14  ;;  %v15386_v14 = vld [vmem:[%s28807_s3 + $0x408] sm:$0xff] }
 0x3b9   : >> { %21715 = vmatpush3.bf16.msra.mxu0 %v21712_v34  ;;  %19094 = vmatprep.mubr.f32.mxu1 %v15307_v33  ;;  %v15781_v34 = vld [vmem:[%s28807_s3 + $0xa00] sm:$0xff]  ;;  %v21356_v32 = vpack.c.bf16 %v15386_v14, %v15385_v7  ;;  %v15387_v33 = vld [vmem:[%s28807_s3 + $0x410] sm:$0xff]  ;;  %v15794_v7 = vld [vmem:[%s28807_s3 + $0xa68] sm:$0xff] }
 0x3ba   : >> { %19766 = vmatprep.mubr.f32.mxu0 %v15703_v44  ;;  %21333 = vmatprep.subr.bf16.mxu1 %v21332_v1  ;;  %v21740_v11 = vpack.c.bf16 %v15782_v45, %v15781_v34  ;;  %v15337_v44 = vld [vmem:[%s25219_s1 + $0x4c] sm:$0xff]  ;;  %v26395_v14 = vld [vmem:[%s25219_s1 + $0x120] sm:$0xff] }
 0x3bb   : >> { %19095 = vmatmul.mubr.f32.gmra.mrb[4].mxu1 %v15308_v18  ;;  %21717 = vmatprep.subr.bf16.mxu0 %v21716_v23  ;;  %v15338_v18 = vld [vmem:[%s25219_s1 + $0x54] sm:$0xff]  ;;  %v26400_v45 = vld [vmem:[%s25219_s1 + $0x128] sm:$0xff] }
 0x3bc   : >> { %19767 = vmatmul.mubr.f32.gmra.mrb[4].mxu0 %v15704_v61  ;;  %21335 = vmatpush3.bf16.msra.mxu1 %v21332_v1  ;;  %v15388_v1 = vld [vmem:[%s28807_s3 + $0x418] sm:$0xff] }
 0x3bd   : >> { %21719 = vmatpush3.bf16.msra.mxu0 %v21716_v23  ;;  %19097 = vmatprep.mubr.f32.mxu1 %v15309_v25  ;;  %v15783_v23 = vld [vmem:[%s28807_s3 + $0xa10] sm:$0xff]  ;;  %v21360_v53 = vpack.c.bf16 %v15388_v1, %v15387_v33  ;;  %v15389_v25 = vld [vmem:[%s28807_s3 + $0x420] sm:$0xff]  ;;  %v15796_v1 = vld [vmem:[%s28807_s3 + $0xa78] sm:$0xff] }
 0x3be   : >> { %19769 = vmatprep.mubr.f32.mxu0 %v15705_v6  ;;  %21337 = vmatprep.subr.bf16.mxu1 %v21336_v57  ;;  %v21744_v61 = vpack.c.bf16 %v15784_v51, %v15783_v23  ;;  %v15339_v6 = vld [vmem:[%s25219_s1 + $0x5c] sm:$0xff]  ;;  %v15795_v33 = vld [vmem:[%s28807_s3 + $0xa70] sm:$0xff] }
 0x3bf   : >> { %19098 = vmatmul.mubr.f32.gmra.mrb[6].mxu1 %v15310_v0  ;;  %21721 = vmatprep.subr.bf16.mxu0 %v21720_v36  ;;  %v15340_v0 = vld [vmem:[%s25219_s1 + $0x64] sm:$0xff]  ;;  %v15350_v23 = vld [vmem:[%s25219_s1 + $0xb4] sm:$0xff] }
 0x3c0   : >> { %19770 = vmatmul.mubr.f32.gmra.mrb[6].mxu0 %v15706_v50  ;;  %21339 = vmatpush3.bf16.msra.mxu1 %v21336_v57  ;;  %v15390_v57 = vld [vmem:[%s28807_s3 + $0x428] sm:$0xff] }
 0x3c1   : >> { %21723 = vmatpush3.bf16.msra.mxu0 %v21720_v36  ;;  %19100 = vmatprep.mubr.f32.mxu1 %v15311_v26  ;;  %v15785_v36 = vld [vmem:[%s28807_s3 + $0xa20] sm:$0xff]  ;;  %v21364_v31 = vpack.c.bf16 %v15390_v57, %v15389_v25  ;;  %v15391_v26 = vld [vmem:[%s28807_s3 + $0x430] sm:$0xff]  ;;  %v15419_v25 = vld [vmem:[%s28807_s3 + $0x488] sm:$0xff] }
 0x3c2   : >> { %19772 = vmatprep.mubr.f32.mxu0 %v15707_v39  ;;  %21341 = vmatprep.subr.bf16.mxu1 %v21340_v28  ;;  %v21748_v50 = vpack.c.bf16 %v15786_v40, %v15785_v36  ;;  %v15341_v39 = vld [vmem:[%s25219_s1 + $0x6c] sm:$0xff]  ;;  %v15351_v57 = vld [vmem:[%s25219_s1 + $0xbc] sm:$0xff] }
 0x3c3   : >> { %19101 = vmatmul.mubr.f32.gmra.mrb[8].mxu1 %v15312_v9  ;;  %21725 = vmatprep.subr.bf16.mxu0 %v21724_v54  ;;  %v15342_v9 = vld [vmem:[%s25219_s1 + $0x74] sm:$0xff]  ;;  %v15815_v36 = vld [vmem:[%s28807_s3 + $0xa88] sm:$0xff]  ;;  %v26439_v40 = vld [vmem:[%s25219_s1 + $0x140] sm:$0xff] }
 0x3c4   : >> { %19773 = vmatmul.mubr.f32.gmra.mrb[8].mxu0 %v15708_v63  ;;  %21343 = vmatpush3.bf16.msra.mxu1 %v21340_v28  ;;  %v15392_v28 = vld [vmem:[%s28807_s3 + $0x438] sm:$0xff] }
 0x3c5   : >> { %21727 = vmatpush3.bf16.msra.mxu0 %v21724_v54  ;;  %19103 = vmatprep.mubr.f32.mxu1 %v15313_v52  ;;  %v15787_v54 = vld [vmem:[%s28807_s3 + $0xa30] sm:$0xff]  ;;  %v21368_v41 = vpack.c.bf16 %v15392_v28, %v15391_v26  ;;  %v15393_v52 = vld [vmem:[%s28807_s3 + $0x440] sm:$0xff]  ;;  %v15421_v28 = vld [vmem:[%s28807_s3 + $0x498] sm:$0xff] }
 0x3c6   : >> { %19775 = vmatprep.mubr.f32.mxu0 %v15709_v29  ;;  %21345 = vmatprep.subr.bf16.mxu1 %v21344_v5  ;;  %v21752_v63 = vpack.c.bf16 %v15788_v27, %v15787_v54  ;;  %v15343_v29 = vld [vmem:[%s25219_s1 + $0x7c] sm:$0xff]  ;;  %v15420_v26 = vld [vmem:[%s28807_s3 + $0x490] sm:$0xff] }
 0x3c7   : >> { %19104 = vmatmul.mubr.f32.gmra.mrb[10].mxu1 %v15314_v13  ;;  %21729 = vmatprep.subr.bf16.mxu0 %v21728_v37  ;;  %v15344_v13 = vld [vmem:[%s25219_s1 + $0x84] sm:$0xff]  ;;  %v15816_v54 = vld [vmem:[%s28807_s3 + $0xa90] sm:$0xff]  ;;  %v15817_v27 = vld [vmem:[%s28807_s3 + $0xa98] sm:$0xff] }
 0x3c8   : >> { %19776 = vmatmul.mubr.f32.gmra.mrb[10].mxu0 %v15710_v30  ;;  %21347 = vmatpush3.bf16.msra.mxu1 %v21344_v5  ;;  %v15394_v5 = vld [vmem:[%s28807_s3 + $0x448] sm:$0xff] }
 0x3c9   : >> { %21731 = vmatpush3.bf16.msra.mxu0 %v21728_v37  ;;  %19106 = vmatprep.mubr.f32.mxu1 %v15315_v38  ;;  %v15789_v37 = vld [vmem:[%s28807_s3 + $0xa40] sm:$0xff]  ;;  %v21372_v15 = vpack.c.bf16 %v15394_v5, %v15393_v52  ;;  %v15395_v38 = vld [vmem:[%s28807_s3 + $0x450] sm:$0xff]  ;;  %v15423_v5 = vld [vmem:[%s28807_s3 + $0x4a8] sm:$0xff] }
 0x3ca   : >> { %19778 = vmatprep.mubr.f32.mxu0 %v15711_v47  ;;  %21349 = vmatprep.subr.bf16.mxu1 %v21348_v8  ;;  %v21756_v30 = vpack.c.bf16 %v15790_v2, %v15789_v37  ;;  %v15345_v47 = vld [vmem:[%s25219_s1 + $0x8c] sm:$0xff]  ;;  %v15422_v52 = vld [vmem:[%s28807_s3 + $0x4a0] sm:$0xff] }
 0x3cb   : >> { %19107 = vmatmul.mubr.f32.gmra.mrb[12].mxu1 %v15316_v21  ;;  %21733 = vmatprep.subr.bf16.mxu0 %v21732_v16  ;;  %v15346_v21 = vld [vmem:[%s25219_s1 + $0x94] sm:$0xff]  ;;  %v15818_v37 = vld [vmem:[%s28807_s3 + $0xaa0] sm:$0xff]  ;;  %v15819_v2 = vld [vmem:[%s28807_s3 + $0xaa8] sm:$0xff] }
 0x3cc   : >> { %19779 = vmatmul.mubr.f32.gmra.mrb[12].mxu0 %v15712_v56  ;;  %21351 = vmatpush3.bf16.msra.mxu1 %v21348_v8  ;;  %v15396_v8 = vld [vmem:[%s28807_s3 + $0x458] sm:$0xff] }
 0x3cd   : >> { %21735 = vmatpush3.bf16.msra.mxu0 %v21732_v16  ;;  %19109 = vmatprep.mubr.f32.mxu1 %v15317_v46  ;;  %v15791_v16 = vld [vmem:[%s28807_s3 + $0xa50] sm:$0xff]  ;;  %v21376_v60 = vpack.c.bf16 %v15396_v8, %v15395_v38  ;;  %v15397_v46 = vld [vmem:[%s28807_s3 + $0x460] sm:$0xff] }
 0x3ce   : >> { %19781 = vmatprep.mubr.f32.mxu0 %v15713_v62  ;;  %21353 = vmatprep.subr.bf16.mxu1 %v21352_v17  ;;  %v21760_v56 = vpack.c.bf16 %v15792_v20, %v15791_v16  ;;  %v15347_v62 = vld [vmem:[%s25219_s1 + $0x9c] sm:$0xff]  ;;  %v15374_v38 = vld [vmem:[%s25219_s1 + $0x6e] sm:$0xff] }
 0x3cf   : >> { %19110 = vmatmul.mubr.f32.gmra.mrb[14].mxu1 %v15318_v42  ;;  %21737 = vmatprep.subr.bf16.mxu0 %v21736_v3  ;;  %v15348_v42 = vld [vmem:[%s25219_s1 + $0xa4] sm:$0xff]  ;;  %v15820_v8 = vld [vmem:[%s28807_s3 + $0xab0] sm:$0xff] }
 0x3d0   : >> { %19782 = vmatmul.mubr.f32.gmra.mrb[14].mxu0 %v15714_v4  ;;  %21355 = vmatpush3.bf16.msra.mxu1 %v21352_v17  ;;  %v15398_v17 = vld [vmem:[%s28807_s3 + $0x468] sm:$0xff]  ;;  %v15375_v16 = vld [vmem:[%s25219_s1 + $0x76] sm:$0xff] }
 0x3d1   : >> { %21739 = vmatpush3.bf16.msra.mxu0 %v21736_v3  ;;  %19144 = vmatprep.mubr.f32.mxu1 %v15336_v59  ;;  %v15793_v3 = vld [vmem:[%s28807_s3 + $0xa60] sm:$0xff]  ;;  %v21380_v34 = vpack.c.bf16 %v15398_v17, %v15397_v46  ;;  %v15399_v59 = vld [vmem:[%s28807_s3 + $0x470] sm:$0xff]  ;;  %v15823_v46 = vld [vmem:[%s28807_s3 + $0xac8] sm:$0xff] }
 0x3d2   : >> { %19816 = vmatprep.mubr.f32.mxu0 %v26269_v10  ;;  %21357 = vmatprep.subr.bf16.mxu1 %v21356_v32  ;;  %v21764_v4 = vpack.c.bf16 %v15794_v7, %v15793_v3  ;;  %v15377_v17 = vld [vmem:[%s25219_s1 + $0x86] sm:$0xff]  ;;  %v15428_v7 = vld [vmem:[%s28807_s3 + $0x4d0] sm:$0xff] }
 0x3d3   : >> { %19145 = vmatmul.mubr.f32.vlgmr.msra.gmra.mrb[0].mxu1 %v15337_v44  ;;  %21741 = vmatprep.subr.bf16.mxu0 %v21740_v11  ;;  %v26417_v44 = vld [vmem:[%s25219_s1 + $0x130] sm:$0xff] }
 0x3d4   : >> { %19817 = vmatmul.mubr.f32.vlgmr.msra.gmra.mrb[0].mxu0 %v26285_v35  ;;  %21359 = vmatpush3.bf16.msra.mxu1 %v21356_v32  ;;  %v15400_v32 = vld [vmem:[%s28807_s3 + $0x478] sm:$0xff] }
 0x3d5   : >> { %21743 = vmatpush3.bf16.msra.mxu0 %v21740_v11  ;;  %19147 = vmatprep.mubr.f32.mxu1 %v15338_v18  ;;  %v15349_v11 = vld [vmem:[%s25219_s1 + $0xac] sm:$0xff]  ;;  %v21384_v51 = vpack.c.bf16 %v15400_v32, %v15399_v59  ;;  %v26422_v18 = vld [vmem:[%s25219_s1 + $0x138] sm:$0xff] }
 0x3d6   : >> { %19819 = vmatprep.mubr.f32.mxu0 %v26290_v55  ;;  %21361 = vmatprep.subr.bf16.mxu1 %v21360_v53  ;;  %v15379_v59 = vld [vmem:[%s25219_s1 + $0x96] sm:$0xff] }
 0x3d7   : >> { %19148 = vmatmul.mubr.f32.gmra.mrb[2].mxu1 %v15339_v6  ;;  %21745 = vmatprep.subr.bf16.mxu0 %v21744_v61  ;;  %v15814_v6 = vld [vmem:[%s28807_s3 + $0xa80] sm:$0xff] }
 0x3d8   : >> { %19820 = vmatmul.mubr.f32.gmra.mrb[2].mxu0 %v26307_v43  ;;  %21363 = vmatpush3.bf16.msra.mxu1 %v21360_v53  ;;  %v21768_v53 = vpack.c.bf16 %v15796_v1, %v15795_v33  ;;  %v15430_v1 = vld [vmem:[%s28807_s3 + $0x4e0] sm:$0xff] }
 0x3d9   : >> { %21747 = vmatpush3.bf16.msra.mxu0 %v21744_v61  ;;  %19150 = vmatprep.mubr.f32.mxu1 %v15340_v0  ;;  %v15418_v61 = vld [vmem:[%s28807_s3 + $0x480] sm:$0xff] }
 0x3da   : >> { %19822 = vmatprep.mubr.f32.mxu0 %v26312_v24  ;;  %21365 = vmatprep.subr.bf16.mxu1 %v21364_v31  ;;  %v15369_v0 = vld [vmem:[%s25219_s1 + $0x46] sm:$0xff] }
 0x3db   : >> { %19151 = vmatmul.mubr.f32.gmra.mrb[4].mxu1 %v15341_v39  ;;  %21749 = vmatprep.subr.bf16.mxu0 %v21748_v50  ;;  %v15370_v39 = vld [vmem:[%s25219_s1 + $0x4e] sm:$0xff] }
 0x3dc   : >> { %19823 = vmatmul.mubr.f32.gmra.mrb[4].mxu0 %v26329_v49  ;;  %21367 = vmatpush3.bf16.msra.mxu1 %v21364_v31  ;;  %v21388_v31 = vpack.c.bf16 %v15419_v25, %v15418_v61  ;;  %v15381_v61 = vld [vmem:[%s25219_s1 + $0xa6] sm:$0xff] }
 0x3dd   : >> { %21751 = vmatpush3.bf16.msra.mxu0 %v21748_v50  ;;  %19153 = vmatprep.mubr.f32.mxu1 %v15342_v9  ;;  %v21772_v50 = vpack.c.bf16 %v15815_v36, %v15814_v6  ;;  %v15371_v9 = vld [vmem:[%s25219_s1 + $0x56] sm:$0xff] }
 0x3de   : >> { %19825 = vmatprep.mubr.f32.mxu0 %v26334_v19  ;;  %21369 = vmatprep.subr.bf16.mxu1 %v21368_v41  ;;  %v15432_v36 = vld [vmem:[%s28807_s3 + $0x4f0] sm:$0xff] }
 0x3df   : >> { %19154 = vmatmul.mubr.f32.gmra.mrb[6].mxu1 %v15343_v29  ;;  %21753 = vmatprep.subr.bf16.mxu0 %v21752_v63  ;;  %v15372_v29 = vld [vmem:[%s25219_s1 + $0x5e] sm:$0xff] }
 0x3e0   : >> { %19826 = vmatmul.mubr.f32.gmra.mrb[6].mxu0 %v26351_v48  ;;  %21371 = vmatpush3.bf16.msra.mxu1 %v21368_v41  ;;  %v21392_v41 = vpack.c.bf16 %v15421_v28, %v15420_v26  ;;  %v26566_v26 = vld [vmem:[%s25219_s1 + $0x168] sm:$0xff]  ;;  %v15383_v28 = vld [vmem:[%s25219_s1 + $0xb6] sm:$0xff] }
 0x3e1   : >> { %21755 = vmatpush3.bf16.msra.mxu0 %v21752_v63  ;;  %19156 = vmatprep.mubr.f32.mxu1 %v15344_v13  ;;  %v21776_v63 = vpack.c.bf16 %v15817_v27, %v15816_v54  ;;  %v21396_v13 = vpack.c.bf16 %v15423_v5, %v15422_v52  ;;  %v26571_v54 = vld [vmem:[%s25219_s1 + $0x170] sm:$0xff]  ;;  %v15847_v52 = vld [vmem:[%s28807_s3 + $0xb00] sm:$0xff]  ;;  %v15848_v5 = vld [vmem:[%s28807_s3 + $0xb08] sm:$0xff] }
 0x3e2   : >> { %19828 = vmatprep.mubr.f32.mxu0 %v26356_v12  ;;  %21373 = vmatprep.subr.bf16.mxu1 %v21372_v15 }
 0x3e3   : >> { %19157 = vmatmul.mubr.f32.gmra.mrb[8].mxu1 %v15345_v47  ;;  %21757 = vmatprep.subr.bf16.mxu0 %v21756_v30  ;;  %v15821_v47 = vld [vmem:[%s28807_s3 + $0xab8] sm:$0xff] }
 0x3e4   : >> { %19829 = vmatmul.mubr.f32.gmra.mrb[8].mxu0 %v26373_v22  ;;  %21375 = vmatpush3.bf16.msra.mxu1 %v21372_v15  ;;  %v21780_v15 = vpack.c.bf16 %v15819_v2, %v15818_v37  ;;  %v15402_v37 = vld [vmem:[%s25219_s1 + $0x48] sm:$0xff] }
 0x3e5   : >> { %21759 = vmatpush3.bf16.msra.mxu0 %v21756_v30  ;;  %19159 = vmatprep.mubr.f32.mxu1 %v15346_v21  ;;  %v15425_v30 = vld [vmem:[%s28807_s3 + $0x4b8] sm:$0xff]  ;;  %v15426_v21 = vld [vmem:[%s28807_s3 + $0x4c0] sm:$0xff] }
 0x3e6   : >> { %19831 = vmatprep.mubr.f32.mxu0 %v26378_v58  ;;  %21377 = vmatprep.subr.bf16.mxu1 %v21376_v60 }
 0x3e7   : >> { %19160 = vmatmul.mubr.f32.gmra.mrb[10].mxu1 %v15347_v62  ;;  %21761 = vmatprep.subr.bf16.mxu0 %v21760_v56 }
 0x3e8   : >> { %19832 = vmatmul.mubr.f32.gmra.mrb[10].mxu0 %v26395_v14  ;;  %21379 = vmatpush3.bf16.msra.mxu1 %v21376_v60  ;;  %v15427_v60 = vld [vmem:[%s28807_s3 + $0x4c8] sm:$0xff] }
 0x3e9   : >> { %21763 = vmatpush3.bf16.msra.mxu0 %v21760_v56  ;;  %19162 = vmatprep.mubr.f32.mxu1 %v15348_v42  ;;  %v15822_v56 = vld [vmem:[%s28807_s3 + $0xac0] sm:$0xff]  ;;  %v21404_v62 = vpack.c.bf16 %v15427_v60, %v15426_v21  ;;  %v15378_v42 = vld [vmem:[%s25219_s1 + $0x8e] sm:$0xff] }
 0x3ea   : >> { %19834 = vmatprep.mubr.f32.mxu0 %v26400_v45  ;;  %21381 = vmatprep.subr.bf16.mxu1 %v21380_v34  ;;  %v21788_v3 = vpack.c.bf16 %v15823_v46, %v15822_v56  ;;  %v15455_v60 = vld [vmem:[%s28807_s3 + $0x520] sm:$0xff] }
 0x3eb   : >> { %19163 = vmatmul.mubr.f32.gmra.mrb[12].mxu1 %v15349_v11  ;;  %21765 = vmatprep.subr.bf16.mxu0 %v21764_v4  ;;  %v26527_v11 = vld [vmem:[%s25219_s1 + $0x150] sm:$0xff]  ;;  %v15405_v56 = vld [vmem:[%s25219_s1 + $0x60] sm:$0xff] }
 0x3ec   : >> { %19835 = vmatmul.mubr.f32.gmra.mrb[12].mxu0 %v26417_v44  ;;  %21383 = vmatpush3.bf16.msra.mxu1 %v21380_v34  ;;  %v15824_v34 = vld [vmem:[%s28807_s3 + $0xad0] sm:$0xff]  ;;  %v15851_v46 = vld [vmem:[%s28807_s3 + $0xb20] sm:$0xff] }
 0x3ed   : >> { %21767 = vmatpush3.bf16.msra.mxu0 %v21764_v4  ;;  %19165 = vmatprep.mubr.f32.mxu1 %v15350_v23  ;;  %v26522_v4 = vld [vmem:[%s25219_s1 + $0x148] sm:$0xff]  ;;  %v15380_v23 = vld [vmem:[%s25219_s1 + $0x9e] sm:$0xff] }
 0x3ee   : >> { %19837 = vmatprep.mubr.f32.mxu0 %v26422_v18  ;;  %21385 = vmatprep.subr.bf16.mxu1 %v21384_v51 }
 0x3ef   : >> { %19166 = vmatmul.mubr.f32.gmra.mrb[14].mxu1 %v15351_v57  ;;  %21769 = vmatprep.subr.bf16.mxu0 %v21768_v53  ;;  %v26549_v57 = vld [vmem:[%s25219_s1 + $0x160] sm:$0xff] }
 0x3f0   : >> { %19838 = vmatmul.mubr.f32.gmra.mrb[14].mxu0 %v26439_v40  ;;  %21387 = vmatpush3.bf16.msra.mxu1 %v21384_v51  ;;  %v15826_v51 = vld [vmem:[%s28807_s3 + $0xae0] sm:$0xff] }
 0x3f1   : >> { %21771 = vmatpush3.bf16.msra.mxu0 %v21768_v53  ;;  %19200 = vmatprep.mubr.f32.mxu1 %v15369_v0  ;;  %v26544_v53 = vld [vmem:[%s25219_s1 + $0x158] sm:$0xff]  ;;  %v15382_v0 = vld [vmem:[%s25219_s1 + $0xae] sm:$0xff] }
 0x3f2   : >> { %19872 = vmatprep.mubr.f32.mxu0 %v26351_v48  ;;  %21389 = vmatprep.subr.bf16.mxu1 %v21388_v31  ;;  %v15373_v48 = vld [vmem:[%s25219_s1 + $0x66] sm:$0xff] }
 0x3f3   : >> { %19201 = vmatmul.mubr.f32.vlgmr.msra.gmra.mrb[0].mxu1 %v15370_v39  ;;  %21773 = vmatprep.subr.bf16.mxu0 %v21772_v50 }
 0x3f4   : >> { %19873 = vmatmul.mubr.f32.vlgmr.msra.gmra.mrb[0].mxu0 %v26356_v12  ;;  %21391 = vmatpush3.bf16.msra.mxu1 %v21388_v31  ;;  %v15424_v12 = vld [vmem:[%s28807_s3 + $0x4b0] sm:$0xff] }
 0x3f5   : >> { %21775 = vmatpush3.bf16.msra.mxu0 %v21772_v50  ;;  %19203 = vmatprep.mubr.f32.mxu1 %v15371_v9  ;;  %v21400_v20 = vpack.c.bf16 %v15425_v30, %v15424_v12  ;;  %v15828_v31 = vld [vmem:[%s28807_s3 + $0xaf0] sm:$0xff]  ;;  %v15829_v50 = vld [vmem:[%s28807_s3 + $0xaf8] sm:$0xff]  ;;  %v15451_v9 = vld [vmem:[%s28807_s3 + $0x500] sm:$0xff] }
 0x3f6   : >> { %19875 = vmatprep.mubr.f32.mxu0 %v26373_v22  ;;  %21393 = vmatprep.subr.bf16.mxu1 %v21392_v41  ;;  %v21784_v22 = vpack.c.bf16 %v15821_v47, %v15820_v8  ;;  %v21800_v27 = vpack.c.bf16 %v15829_v50, %v15828_v31  ;;  %v15454_v12 = vld [vmem:[%s28807_s3 + $0x518] sm:$0xff]  ;;  %v15403_v30 = vld [vmem:[%s25219_s1 + $0x50] sm:$0xff]  ;;  %v26659_v31 = vld [vmem:[%s25219_s1 + $0x88] sm:$0xff] }
 0x3f7   : >> { %19204 = vmatmul.mubr.f32.gmra.mrb[2].mxu1 %v15372_v29  ;;  %21777 = vmatprep.subr.bf16.mxu0 %v21776_v63  ;;  %v26588_v29 = vld [vmem:[%s25219_s1 + $0x178] sm:$0xff]  ;;  %v15799_v47 = vld [vmem:[%s25219_s1 + $0x10a] sm:$0xff] }
 0x3f8   : >> { %19876 = vmatmul.mubr.f32.gmra.mrb[2].mxu0 %v26378_v58  ;;  %21395 = vmatpush3.bf16.msra.mxu1 %v21392_v41  ;;  %v15376_v58 = vld [vmem:[%s25219_s1 + $0x7e] sm:$0xff]  ;;  %v15452_v41 = vld [vmem:[%s28807_s3 + $0x508] sm:$0xff] }
 0x3f9   : >> { %21779 = vmatpush3.bf16.msra.mxu0 %v21776_v63  ;;  %19206 = vmatprep.mubr.f32.mxu1 %v15373_v48  ;;  %v15384_v63 = vld [vmem:[%s25219_s1 + $0xbe] sm:$0xff]  ;;  %v21420_v2 = vpack.c.bf16 %v15452_v41, %v15451_v9  ;;  %v26670_v41 = vld [vmem:[%s25219_s1 + $0x90] sm:$0xff] }
 0x3fa   : >> { %19878 = vmatprep.mubr.f32.mxu0 %v26395_v14  ;;  %21397 = vmatprep.subr.bf16.mxu1 %v21396_v13  ;;  %v15429_v14 = vld [vmem:[%s28807_s3 + $0x4d8] sm:$0xff]  ;;  %v15798_v48 = vld [vmem:[%s25219_s1 + $0x102] sm:$0xff] }
 0x3fb   : >> { %19207 = vmatmul.mubr.f32.gmra.mrb[4].mxu1 %v15374_v38  ;;  %21781 = vmatprep.subr.bf16.mxu0 %v21780_v15  ;;  %v21408_v32 = vpack.c.bf16 %v15429_v14, %v15428_v7  ;;  %v15849_v38 = vld [vmem:[%s28807_s3 + $0xb10] sm:$0xff]  ;;  %v15850_v8 = vld [vmem:[%s28807_s3 + $0xb18] sm:$0xff]  ;;  %v15802_v14 = vld [vmem:[%s25219_s1 + $0x122] sm:$0xff] }
 0x3fc   : >> { %19879 = vmatmul.mubr.f32.gmra.mrb[4].mxu0 %v26400_v45  ;;  %21399 = vmatpush3.bf16.msra.mxu1 %v21396_v13  ;;  %v15825_v45 = vld [vmem:[%s28807_s3 + $0xad8] sm:$0xff]  ;;  %v21804_v13 = vpack.c.bf16 %v15848_v5, %v15847_v52  ;;  %v21808_v21 = vpack.c.bf16 %v15850_v8, %v15849_v38  ;;  %v15807_v5 = vld [vmem:[%s25219_s1 + $0x14a] sm:$0xff]  ;;  %v15859_v38 = vld [vmem:[%s28807_s3 + $0xb60] sm:$0xff] }
 0x3fd   : >> { %21783 = vmatpush3.bf16.msra.mxu0 %v21780_v15  ;;  %19209 = vmatprep.mubr.f32.mxu1 %v15375_v16  ;;  %v21792_v33 = vpack.c.bf16 %v15825_v45, %v15824_v34  ;;  %v15453_v15 = vld [vmem:[%s28807_s3 + $0x510] sm:$0xff]  ;;  %v15404_v16 = vld [vmem:[%s25219_s1 + $0x58] sm:$0xff]  ;;  %v15860_v8 = vld [vmem:[%s28807_s3 + $0xb68] sm:$0xff] }
 0x3fe   : >> { %19881 = vmatprep.mubr.f32.mxu0 %v26417_v44  ;;  %21401 = vmatprep.subr.bf16.mxu1 %v21400_v20  ;;  %v15431_v44 = vld [vmem:[%s28807_s3 + $0x4e8] sm:$0xff]  ;;  %v15457_v34 = vld [vmem:[%s28807_s3 + $0x530] sm:$0xff]  ;;  %v15458_v45 = vld [vmem:[%s28807_s3 + $0x538] sm:$0xff] }
 0x3ff   : >> { %19210 = vmatmul.mubr.f32.gmra.mrb[6].mxu1 %v15376_v58  ;;  %21785 = vmatprep.subr.bf16.mxu0 %v21784_v22  ;;  %v21412_v25 = vpack.c.bf16 %v15431_v44, %v15430_v1  ;;  %v15456_v58 = vld [vmem:[%s28807_s3 + $0x528] sm:$0xff]  ;;  %v15408_v44 = vld [vmem:[%s25219_s1 + $0x78] sm:$0xff] }
 0x400   : >> { %19882 = vmatmul.mubr.f32.gmra.mrb[6].mxu0 %v26422_v18  ;;  %21403 = vmatpush3.bf16.msra.mxu1 %v21400_v20  ;;  %v15827_v18 = vld [vmem:[%s28807_s3 + $0xae8] sm:$0xff]  ;;  %v21424_v20 = vpack.c.bf16 %v15454_v12, %v15453_v15  ;;  %v21428_v7 = vpack.c.bf16 %v15456_v58, %v15455_v60  ;;  %v15462_v9 = vld [vmem:[%s28807_s3 + $0x558] sm:$0xff]  ;;  %v15463_v15 = vld [vmem:[%s28807_s3 + $0x560] sm:$0xff] }
 0x401   : >> { %21787 = vmatpush3.bf16.msra.mxu0 %v21784_v22  ;;  %19212 = vmatprep.mubr.f32.mxu1 %v15377_v17  ;;  %v21796_v6 = vpack.c.bf16 %v15827_v18, %v15826_v51  ;;  %v15800_v22 = vld [vmem:[%s25219_s1 + $0x112] sm:$0xff]  ;;  %v15852_v17 = vld [vmem:[%s28807_s3 + $0xb28] sm:$0xff] }
 0x402   : >> { %19884 = vmatprep.mubr.f32.mxu0 %v26439_v40  ;;  %21405 = vmatprep.subr.bf16.mxu1 %v21404_v62  ;;  %v15433_v40 = vld [vmem:[%s28807_s3 + $0x4f8] sm:$0xff]  ;;  %v15803_v1 = vld [vmem:[%s25219_s1 + $0x12a] sm:$0xff] }
 0x403   : >> { %19213 = vmatmul.mubr.f32.gmra.mrb[8].mxu1 %v15378_v42  ;;  %21789 = vmatprep.subr.bf16.mxu0 %v21788_v3  ;;  %v21416_v39 = vpack.c.bf16 %v15433_v40, %v15432_v36  ;;  %v21812_v42 = vpack.c.bf16 %v15852_v17, %v15851_v46  ;;  %v15804_v51 = vld [vmem:[%s25219_s1 + $0x132] sm:$0xff]  ;;  %v15855_v36 = vld [vmem:[%s28807_s3 + $0xb40] sm:$0xff]  ;;  %v15856_v40 = vld [vmem:[%s28807_s3 + $0xb48] sm:$0xff] }
 0x404   : >> { %19885 = vmatmul.mubr.f32.gmra.mrb[8].mxu0 %v26522_v4  ;;  %21407 = vmatpush3.bf16.msra.mxu1 %v21404_v62  ;;  %v15801_v62 = vld [vmem:[%s25219_s1 + $0x11a] sm:$0xff]  ;;  %v15464_v12 = vld [vmem:[%s28807_s3 + $0x568] sm:$0xff]  ;;  %v15465_v60 = vld [vmem:[%s28807_s3 + $0x570] sm:$0xff] }
 0x405   : >> { %21791 = vmatpush3.bf16.msra.mxu0 %v21788_v3  ;;  %19215 = vmatprep.mubr.f32.mxu1 %v15379_v59  ;;  %v15406_v3 = vld [vmem:[%s25219_s1 + $0x68] sm:$0xff]  ;;  %v15407_v59 = vld [vmem:[%s25219_s1 + $0x70] sm:$0xff]  ;;  %v15858_v52 = vld [vmem:[%s28807_s3 + $0xb58] sm:$0xff] }
 0x406   : >> { %19887 = vmatprep.mubr.f32.mxu0 %v26527_v11  ;;  %21409 = vmatprep.subr.bf16.mxu1 %v21408_v32  ;;  %v15466_v58 = vld [vmem:[%s28807_s3 + $0x578] sm:$0xff]  ;;  %v15861_v46 = vld [vmem:[%s28807_s3 + $0xb70] sm:$0xff] }
 0x407   : >> { %19216 = vmatmul.mubr.f32.gmra.mrb[10].mxu1 %v15380_v23  ;;  %21793 = vmatprep.subr.bf16.mxu0 %v21792_v33  ;;  %v21432_v23 = vpack.c.bf16 %v15458_v45, %v15457_v34  ;;  %v15862_v17 = vld [vmem:[%s28807_s3 + $0xb78] sm:$0xff]  ;;  %v15484_v34 = vld [vmem:[%s28807_s3 + $0x580] sm:$0xff]  ;;  %v15485_v45 = vld [vmem:[%s28807_s3 + $0x588] sm:$0xff] }
 0x408   : >> { %19888 = vmatmul.mubr.f32.gmra.mrb[10].mxu0 %v26544_v53  ;;  %21411 = vmatpush3.bf16.msra.mxu1 %v21408_v32  ;;  %v15853_v32 = vld [vmem:[%s28807_s3 + $0xb30] sm:$0xff] }
 0x409   : >> { %21795 = vmatpush3.bf16.msra.mxu0 %v21792_v33  ;;  %19218 = vmatprep.mubr.f32.mxu1 %v15381_v61  ;;  %v15854_v33 = vld [vmem:[%s28807_s3 + $0xb38] sm:$0xff]  ;;  %v15459_v61 = vld [vmem:[%s28807_s3 + $0x540] sm:$0xff] }
 0x40a   : >> { %19890 = vmatprep.mubr.f32.mxu0 %v26549_v57  ;;  %21413 = vmatprep.subr.bf16.mxu1 %v21412_v25  ;;  %v21816_v18 = vpack.c.bf16 %v15854_v33, %v15853_v32  ;;  %v15880_v32 = vld [vmem:[%s28807_s3 + $0xb80] sm:$0xff]  ;;  %v15881_v33 = vld [vmem:[%s28807_s3 + $0xb88] sm:$0xff] }
 0x40b   : >> { %19219 = vmatmul.mubr.f32.gmra.mrb[12].mxu1 %v15382_v0  ;;  %21797 = vmatprep.subr.bf16.mxu0 %v21796_v6  ;;  %v15805_v0 = vld [vmem:[%s25219_s1 + $0x13a] sm:$0xff] }
 0x40c   : >> { %19891 = vmatmul.mubr.f32.gmra.mrb[12].mxu0 %v26566_v26  ;;  %21415 = vmatpush3.bf16.msra.mxu1 %v21412_v25  ;;  %v15460_v25 = vld [vmem:[%s28807_s3 + $0x548] sm:$0xff] }
 0x40d   : >> { %21799 = vmatpush3.bf16.msra.mxu0 %v21796_v6  ;;  %19221 = vmatprep.mubr.f32.mxu1 %v15383_v28  ;;  %v26649_v6 = vld [vmem:[%s25219_s1 + $0x80] sm:$0xff]  ;;  %v21436_v50 = vpack.c.bf16 %v15460_v25, %v15459_v61  ;;  %v15487_v61 = vld [vmem:[%s28807_s3 + $0x598] sm:$0xff]  ;;  %v15882_v25 = vld [vmem:[%s28807_s3 + $0xb90] sm:$0xff] }
 0x40e   : >> { %19893 = vmatprep.mubr.f32.mxu0 %v26571_v54  ;;  %21417 = vmatprep.subr.bf16.mxu1 %v21416_v39  ;;  %v15806_v28 = vld [vmem:[%s25219_s1 + $0x142] sm:$0xff] }
 0x40f   : >> { %19222 = vmatmul.mubr.f32.gmra.mrb[14].mxu1 %v15384_v63  ;;  %21801 = vmatprep.subr.bf16.mxu0 %v21800_v27  ;;  %v15857_v63 = vld [vmem:[%s28807_s3 + $0xb50] sm:$0xff] }
 0x410   : >> { %19894 = vmatmul.mubr.f32.gmra.mrb[14].mxu0 %v26588_v29  ;;  %21419 = vmatpush3.bf16.msra.mxu1 %v21416_v39  ;;  %v21820_v39 = vpack.c.bf16 %v15856_v40, %v15855_v36  ;;  %v15883_v36 = vld [vmem:[%s28807_s3 + $0xb98] sm:$0xff]  ;;  %v15832_v40 = vld [vmem:[%s25219_s1 + $0x10c] sm:$0xff] }
 0x411   : >> { %21803 = vmatpush3.bf16.msra.mxu0 %v21800_v27  ;;  %19256 = vmatprep.mubr.f32.mxu1 %v15402_v37  ;;  %v15461_v27 = vld [vmem:[%s28807_s3 + $0x550] sm:$0xff]  ;;  %v26681_v37 = vld [vmem:[%s25219_s1 + $0x98] sm:$0xff] }
 0x412   : >> { %19928 = vmatprep.mubr.f32.mxu0 %v15798_v48  ;;  %21421 = vmatprep.subr.bf16.mxu1 %v21420_v2  ;;  %v15808_v48 = vld [vmem:[%s25219_s1 + $0x152] sm:$0xff] }
 0x413   : >> { %19257 = vmatmul.mubr.f32.vlgmr.msra.gmra.mrb[0].mxu1 %v15403_v30  ;;  %21805 = vmatprep.subr.bf16.mxu0 %v21804_v13  ;;  %v26692_v30 = vld [vmem:[%s25219_s1 + $0xa0] sm:$0xff] }
 0x414   : >> { %19929 = vmatmul.mubr.f32.vlgmr.msra.gmra.mrb[0].mxu0 %v15799_v47  ;;  %21423 = vmatpush3.bf16.msra.mxu1 %v21420_v2  ;;  %v21440_v2 = vpack.c.bf16 %v15462_v9, %v15461_v27  ;;  %v15809_v47 = vld [vmem:[%s25219_s1 + $0x15a] sm:$0xff]  ;;  %v15489_v27 = vld [vmem:[%s28807_s3 + $0x5a8] sm:$0xff] }
 0x415   : >> { %21807 = vmatpush3.bf16.msra.mxu0 %v21804_v13  ;;  %19259 = vmatprep.mubr.f32.mxu1 %v15404_v16  ;;  %v21824_v13 = vpack.c.bf16 %v15858_v52, %v15857_v63  ;;  %v26703_v16 = vld [vmem:[%s25219_s1 + $0xa8] sm:$0xff]  ;;  %v15834_v9 = vld [vmem:[%s25219_s1 + $0x11c] sm:$0xff] }
 0x416   : >> { %19931 = vmatprep.mubr.f32.mxu0 %v15800_v22  ;;  %21425 = vmatprep.subr.bf16.mxu1 %v21424_v20  ;;  %v15810_v22 = vld [vmem:[%s25219_s1 + $0x162] sm:$0xff] }
 0x417   : >> { %19260 = vmatmul.mubr.f32.gmra.mrb[2].mxu1 %v15405_v56  ;;  %21809 = vmatprep.subr.bf16.mxu0 %v21808_v21  ;;  %v26714_v56 = vld [vmem:[%s25219_s1 + $0xb0] sm:$0xff]  ;;  %v15835_v52 = vld [vmem:[%s25219_s1 + $0x124] sm:$0xff] }
 0x418   : >> { %19932 = vmatmul.mubr.f32.gmra.mrb[2].mxu0 %v15801_v62  ;;  %21427 = vmatpush3.bf16.msra.mxu1 %v21424_v20  ;;  %v21444_v20 = vpack.c.bf16 %v15464_v12, %v15463_v15  ;;  %v15811_v62 = vld [vmem:[%s25219_s1 + $0x16a] sm:$0xff]  ;;  %v15837_v12 = vld [vmem:[%s25219_s1 + $0x134] sm:$0xff] }
 0x419   : >> { %21811 = vmatpush3.bf16.msra.mxu0 %v21808_v21  ;;  %19262 = vmatprep.mubr.f32.mxu1 %v15406_v3  ;;  %v21828_v21 = vpack.c.bf16 %v15860_v8, %v15859_v38  ;;  %v26725_v3 = vld [vmem:[%s25219_s1 + $0xb8] sm:$0xff]  ;;  %v15492_v8 = vld [vmem:[%s28807_s3 + $0x5c0] sm:$0xff] }
 0x41a   : >> { %19934 = vmatprep.mubr.f32.mxu0 %v15802_v14  ;;  %21429 = vmatprep.subr.bf16.mxu1 %v21428_v7  ;;  %v15812_v14 = vld [vmem:[%s25219_s1 + $0x172] sm:$0xff] }
 0x41b   : >> { %19263 = vmatmul.mubr.f32.gmra.mrb[4].mxu1 %v15407_v59  ;;  %21813 = vmatprep.subr.bf16.mxu0 %v21812_v42  ;;  %v26736_v59 = vld [vmem:[%s25219_s1 + $0xc0] sm:$0xff] }
 0x41c   : >> { %19935 = vmatmul.mubr.f32.gmra.mrb[4].mxu0 %v15803_v1  ;;  %21431 = vmatpush3.bf16.msra.mxu1 %v21428_v7  ;;  %v21448_v7 = vpack.c.bf16 %v15466_v58, %v15465_v60  ;;  %v15813_v1 = vld [vmem:[%s25219_s1 + $0x17a] sm:$0xff]  ;;  %v15494_v58 = vld [vmem:[%s28807_s3 + $0x5d0] sm:$0xff] }
 0x41d   : >> { %21815 = vmatpush3.bf16.msra.mxu0 %v21812_v42  ;;  %19265 = vmatprep.mubr.f32.mxu1 %v15408_v44  ;;  %v21832_v42 = vpack.c.bf16 %v15862_v17, %v15861_v46  ;;  %v21452_v44 = vpack.c.bf16 %v15485_v45, %v15484_v34  ;;  %v15495_v46 = vld [vmem:[%s28807_s3 + $0x5d8] sm:$0xff]  ;;  %v15497_v34 = vld [vmem:[%s28807_s3 + $0x5e8] sm:$0xff]  ;;  %v15892_v45 = vld [vmem:[%s28807_s3 + $0xbe0] sm:$0xff] }
 0x41e   : >> { %19937 = vmatprep.mubr.f32.mxu0 %v15804_v51  ;;  %21433 = vmatprep.subr.bf16.mxu1 %v21432_v23  ;;  %v21836_v51 = vpack.c.bf16 %v15881_v33, %v15880_v32  ;;  %v15891_v17 = vld [vmem:[%s28807_s3 + $0xbd8] sm:$0xff]  ;;  %v15843_v33 = vld [vmem:[%s25219_s1 + $0x164] sm:$0xff] }
 0x41f   : >> { %19266 = vmatmul.mubr.f32.gmra.mrb[6].mxu1 %v26649_v6  ;;  %21817 = vmatprep.subr.bf16.mxu0 %v21816_v18 }
 0x420   : >> { %19938 = vmatmul.mubr.f32.gmra.mrb[6].mxu0 %v15805_v0  ;;  %21435 = vmatpush3.bf16.msra.mxu1 %v21432_v23  ;;  %v15831_v23 = vld [vmem:[%s25219_s1 + $0x104] sm:$0xff] }
 0x421   : >> { %21819 = vmatpush3.bf16.msra.mxu0 %v21816_v18  ;;  %19268 = vmatprep.mubr.f32.mxu1 %v26659_v31  ;;  %v15486_v18 = vld [vmem:[%s28807_s3 + $0x590] sm:$0xff] }
 0x422   : >> { %19940 = vmatprep.mubr.f32.mxu0 %v15806_v28  ;;  %21437 = vmatprep.subr.bf16.mxu1 %v21436_v50  ;;  %v21456_v0 = vpack.c.bf16 %v15487_v61, %v15486_v18  ;;  %v21840_v28 = vpack.c.bf16 %v15883_v36, %v15882_v25  ;;  %v15845_v61 = vld [vmem:[%s25219_s1 + $0x174] sm:$0xff]  ;;  %v15913_v36 = vld [vmem:[%s28807_s3 + $0xc00] sm:$0xff] }
 0x423   : >> { %19269 = vmatmul.mubr.f32.gmra.mrb[8].mxu1 %v26670_v41  ;;  %21821 = vmatprep.subr.bf16.mxu0 %v21820_v39 }
 0x424   : >> { %19941 = vmatmul.mubr.f32.gmra.mrb[8].mxu0 %v15807_v5  ;;  %21439 = vmatpush3.bf16.msra.mxu1 %v21436_v50  ;;  %v15833_v50 = vld [vmem:[%s25219_s1 + $0x114] sm:$0xff] }
 0x425   : >> { %21823 = vmatpush3.bf16.msra.mxu0 %v21820_v39  ;;  %19271 = vmatprep.mubr.f32.mxu1 %v26681_v37  ;;  %v15488_v39 = vld [vmem:[%s28807_s3 + $0x5a0] sm:$0xff] }
 0x426   : >> { %19943 = vmatprep.mubr.f32.mxu0 %v15808_v48  ;;  %21441 = vmatprep.subr.bf16.mxu1 %v21440_v2  ;;  %v21460_v63 = vpack.c.bf16 %v15489_v27, %v15488_v39  ;;  %v15491_v48 = vld [vmem:[%s28807_s3 + $0x5b8] sm:$0xff]  ;;  %v15469_v39 = vld [vmem:[%s25219_s1 + $0x8a] sm:$0xff] }
 0x427   : >> { %19272 = vmatmul.mubr.f32.gmra.mrb[10].mxu1 %v26692_v30  ;;  %21825 = vmatprep.subr.bf16.mxu0 %v21824_v13  ;;  %v15865_v27 = vld [vmem:[%s25219_s1 + $0x10e] sm:$0xff] }
 0x428   : >> { %19944 = vmatmul.mubr.f32.gmra.mrb[10].mxu0 %v15809_v47  ;;  %21443 = vmatpush3.bf16.msra.mxu1 %v21440_v2  ;;  %v15490_v2 = vld [vmem:[%s28807_s3 + $0x5b0] sm:$0xff]  ;;  %v15493_v47 = vld [vmem:[%s28807_s3 + $0x5c8] sm:$0xff] }
 0x429   : >> { %21827 = vmatpush3.bf16.msra.mxu0 %v21824_v13  ;;  %19274 = vmatprep.mubr.f32.mxu1 %v26703_v16  ;;  %v15836_v13 = vld [vmem:[%s25219_s1 + $0x12c] sm:$0xff]  ;;  %v21464_v15 = vpack.c.bf16 %v15491_v48, %v15490_v2  ;;  %v15472_v2 = vld [vmem:[%s25219_s1 + $0xa2] sm:$0xff] }
 0x42a   : >> { %19946 = vmatprep.mubr.f32.mxu0 %v15810_v22  ;;  %21445 = vmatprep.subr.bf16.mxu1 %v21444_v20  ;;  %v21468_v22 = vpack.c.bf16 %v15493_v47, %v15492_v8  ;;  %v15870_v47 = vld [vmem:[%s25219_s1 + $0x136] sm:$0xff] }
 0x42b   : >> { %19275 = vmatmul.mubr.f32.gmra.mrb[12].mxu1 %v26714_v56  ;;  %21829 = vmatprep.subr.bf16.mxu0 %v21828_v21 }
 0x42c   : >> { %19947 = vmatmul.mubr.f32.gmra.mrb[12].mxu0 %v15811_v62  ;;  %21447 = vmatpush3.bf16.msra.mxu1 %v21444_v20  ;;  %v15838_v20 = vld [vmem:[%s25219_s1 + $0x13c] sm:$0xff]  ;;  %v15840_v62 = vld [vmem:[%s25219_s1 + $0x14c] sm:$0xff] }
 0x42d   : >> { %21831 = vmatpush3.bf16.msra.mxu0 %v21828_v21  ;;  %19277 = vmatprep.mubr.f32.mxu1 %v26725_v3  ;;  %v15839_v21 = vld [vmem:[%s25219_s1 + $0x144] sm:$0xff] }
 0x42e   : >> { %19949 = vmatprep.mubr.f32.mxu0 %v15812_v14  ;;  %21449 = vmatprep.subr.bf16.mxu1 %v21448_v7 }
 0x42f   : >> { %19278 = vmatmul.mubr.f32.gmra.mrb[14].mxu1 %v26736_v59  ;;  %21833 = vmatprep.subr.bf16.mxu0 %v21832_v42 }
 0x430   : >> { %19950 = vmatmul.mubr.f32.gmra.mrb[14].mxu0 %v15813_v1  ;;  %21451 = vmatpush3.bf16.msra.mxu1 %v21448_v7  ;;  %v15841_v7 = vld [vmem:[%s25219_s1 + $0x154] sm:$0xff] }
 0x431   : >> { %21835 = vmatpush3.bf16.msra.mxu0 %v21832_v42  ;;  %19312 = vmatprep.mubr.f32.mxu1 %v26649_v6  ;;  %v15884_v6 = vld [vmem:[%s28807_s3 + $0xba0] sm:$0xff] }
 0x432   : >> { %19984 = vmatprep.mubr.f32.mxu0 %v15831_v23  ;;  %21453 = vmatprep.subr.bf16.mxu1 %v21452_v44  ;;  %v15496_v42 = vld [vmem:[%s28807_s3 + $0x5e0] sm:$0xff]  ;;  %v15499_v23 = vld [vmem:[%s28807_s3 + $0x5f8] sm:$0xff] }
 0x433   : >> { %19313 = vmatmul.mubr.f32.vlgmr.msra.gmra.mrb[0].mxu1 %v26659_v31  ;;  %21837 = vmatprep.subr.bf16.mxu0 %v21836_v51  ;;  %v15885_v31 = vld [vmem:[%s28807_s3 + $0xba8] sm:$0xff]  ;;  %v21476_v32 = vpack.c.bf16 %v15497_v34, %v15496_v42  ;;  %v15925_v42 = vld [vmem:[%s28807_s3 + $0xc60] sm:$0xff] }
 0x434   : >> { %19985 = vmatmul.mubr.f32.vlgmr.msra.gmra.mrb[0].mxu0 %v15832_v40  ;;  %21455 = vmatpush3.bf16.msra.mxu1 %v21452_v44  ;;  %v21844_v5 = vpack.c.bf16 %v15885_v31, %v15884_v6  ;;  %v15498_v44 = vld [vmem:[%s28807_s3 + $0x5f0] sm:$0xff]  ;;  %v15914_v40 = vld [vmem:[%s28807_s3 + $0xc08] sm:$0xff] }
 0x435   : >> { %21839 = vmatpush3.bf16.msra.mxu0 %v21836_v51  ;;  %19315 = vmatprep.mubr.f32.mxu1 %v26670_v41  ;;  %v15886_v41 = vld [vmem:[%s28807_s3 + $0xbb0] sm:$0xff]  ;;  %v21480_v18 = vpack.c.bf16 %v15499_v23, %v15498_v44  ;;  %v15926_v34 = vld [vmem:[%s28807_s3 + $0xc68] sm:$0xff]  ;;  %v15928_v44 = vld [vmem:[%s28807_s3 + $0xc78] sm:$0xff] }
 0x436   : >> { %19987 = vmatprep.mubr.f32.mxu0 %v15833_v50  ;;  %21457 = vmatprep.subr.bf16.mxu1 %v21456_v0  ;;  %v15844_v51 = vld [vmem:[%s25219_s1 + $0x16c] sm:$0xff]  ;;  %v15866_v31 = vld [vmem:[%s25219_s1 + $0x116] sm:$0xff] }
 0x437   : >> { %19316 = vmatmul.mubr.f32.gmra.mrb[2].mxu1 %v26681_v37  ;;  %21841 = vmatprep.subr.bf16.mxu0 %v21840_v28  ;;  %v15887_v37 = vld [vmem:[%s28807_s3 + $0xbb8] sm:$0xff]  ;;  %v15864_v50 = vld [vmem:[%s25219_s1 + $0x106] sm:$0xff] }
 0x438   : >> { %19988 = vmatmul.mubr.f32.gmra.mrb[2].mxu0 %v15834_v9  ;;  %21459 = vmatpush3.bf16.msra.mxu1 %v21456_v0  ;;  %v21848_v38 = vpack.c.bf16 %v15887_v37, %v15886_v41  ;;  %v21868_v0 = vpack.c.bf16 %v15914_v40, %v15913_v36  ;;  %v15917_v9 = vld [vmem:[%s28807_s3 + $0xc20] sm:$0xff]  ;;  %v15919_v37 = vld [vmem:[%s28807_s3 + $0xc30] sm:$0xff]  ;;  %v15897_v36 = vld [vmem:[%s25219_s1 + $0x108] sm:$0xff] }
 0x439   : >> { %21843 = vmatpush3.bf16.msra.mxu0 %v21840_v28  ;;  %19318 = vmatprep.mubr.f32.mxu1 %v26692_v30  ;;  %v15888_v30 = vld [vmem:[%s28807_s3 + $0xbc0] sm:$0xff]  ;;  %v15915_v28 = vld [vmem:[%s28807_s3 + $0xc10] sm:$0xff] }
 0x43a   : >> { %19990 = vmatprep.mubr.f32.mxu0 %v15835_v52  ;;  %21461 = vmatprep.subr.bf16.mxu1 %v21460_v63  ;;  %v15471_v52 = vld [vmem:[%s25219_s1 + $0x9a] sm:$0xff]  ;;  %v15868_v41 = vld [vmem:[%s25219_s1 + $0x126] sm:$0xff]  ;;  %v15898_v40 = vld [vmem:[%s25219_s1 + $0x110] sm:$0xff] }
 0x43b   : >> { %19319 = vmatmul.mubr.f32.gmra.mrb[4].mxu1 %v26703_v16  ;;  %21845 = vmatprep.subr.bf16.mxu0 %v21844_v5  ;;  %v15889_v16 = vld [vmem:[%s28807_s3 + $0xbc8] sm:$0xff] }
 0x43c   : >> { %19991 = vmatmul.mubr.f32.gmra.mrb[4].mxu0 %v15836_v13  ;;  %21463 = vmatpush3.bf16.msra.mxu1 %v21460_v63  ;;  %v21852_v60 = vpack.c.bf16 %v15889_v16, %v15888_v30  ;;  %v15918_v63 = vld [vmem:[%s28807_s3 + $0xc28] sm:$0xff]  ;;  %v15920_v13 = vld [vmem:[%s28807_s3 + $0xc38] sm:$0xff]  ;;  %v15921_v30 = vld [vmem:[%s28807_s3 + $0xc40] sm:$0xff] }
 0x43d   : >> { %21847 = vmatpush3.bf16.msra.mxu0 %v21844_v5  ;;  %19321 = vmatprep.mubr.f32.mxu1 %v26714_v56  ;;  %v15890_v56 = vld [vmem:[%s28807_s3 + $0xbd0] sm:$0xff]  ;;  %v15867_v5 = vld [vmem:[%s25219_s1 + $0x11e] sm:$0xff]  ;;  %v21876_v48 = vpack.c.bf16 %v15918_v63, %v15917_v9  ;;  %v21880_v8 = vpack.c.bf16 %v15920_v13, %v15919_v37  ;;  %v15922_v16 = vld [vmem:[%s28807_s3 + $0xc48] sm:$0xff] }
 0x43e   : >> { %19993 = vmatprep.mubr.f32.mxu0 %v15837_v12  ;;  %21465 = vmatprep.subr.bf16.mxu1 %v21464_v15  ;;  %v21856_v14 = vpack.c.bf16 %v15891_v17, %v15890_v56  ;;  %v15869_v12 = vld [vmem:[%s25219_s1 + $0x12e] sm:$0xff]  ;;  %v15924_v56 = vld [vmem:[%s28807_s3 + $0xc58] sm:$0xff] }
 0x43f   : >> { %19322 = vmatmul.mubr.f32.gmra.mrb[6].mxu1 %v26725_v3  ;;  %21849 = vmatprep.subr.bf16.mxu0 %v21848_v38  ;;  %v21472_v3 = vpack.c.bf16 %v15495_v46, %v15494_v58  ;;  %v15872_v58 = vld [vmem:[%s25219_s1 + $0x146] sm:$0xff]  ;;  %v15923_v46 = vld [vmem:[%s28807_s3 + $0xc50] sm:$0xff] }
 0x440   : >> { %19994 = vmatmul.mubr.f32.gmra.mrb[6].mxu0 %v15838_v20  ;;  %21467 = vmatpush3.bf16.msra.mxu1 %v21464_v15  ;;  %v15473_v15 = vld [vmem:[%s25219_s1 + $0xaa] sm:$0xff]  ;;  %v15475_v20 = vld [vmem:[%s25219_s1 + $0xba] sm:$0xff] }
 0x441   : >> { %21851 = vmatpush3.bf16.msra.mxu0 %v21848_v38  ;;  %19324 = vmatprep.mubr.f32.mxu1 %v26736_v59  ;;  %v15842_v59 = vld [vmem:[%s25219_s1 + $0x15c] sm:$0xff]  ;;  %v15474_v38 = vld [vmem:[%s25219_s1 + $0xb2] sm:$0xff]  ;;  %v15477_v17 = vld [vmem:[%s25219_s1 + $0xca] sm:$0xff] }
 0x442   : >> { %19996 = vmatprep.mubr.f32.mxu0 %v15839_v21  ;;  %21469 = vmatprep.subr.bf16.mxu1 %v21468_v22  ;;  %v15476_v21 = vld [vmem:[%s25219_s1 + $0xc2] sm:$0xff]  ;;  %v15481_v23 = vld [vmem:[%s25219_s1 + $0xea] sm:$0xff] }
 0x443   : >> { %19325 = vmatmul.mubr.f32.gmra.mrb[8].mxu1 %v26269_v10  ;;  %21853 = vmatprep.subr.bf16.mxu0 %v21852_v60  ;;  %v15893_v10 = vld [vmem:[%s28807_s3 + $0xbe8] sm:$0xff] }
 0x444   : >> { %19997 = vmatmul.mubr.f32.gmra.mrb[8].mxu0 %v15840_v62  ;;  %21471 = vmatpush3.bf16.msra.mxu1 %v21468_v22  ;;  %v21860_v1 = vpack.c.bf16 %v15893_v10, %v15892_v45  ;;  %v15871_v22 = vld [vmem:[%s25219_s1 + $0x13e] sm:$0xff]  ;;  %v15873_v62 = vld [vmem:[%s25219_s1 + $0x14e] sm:$0xff] }
 0x445   : >> { %21855 = vmatpush3.bf16.msra.mxu0 %v21852_v60  ;;  %19327 = vmatprep.mubr.f32.mxu1 %v26285_v35  ;;  %v15894_v35 = vld [vmem:[%s28807_s3 + $0xbf0] sm:$0xff]  ;;  %v21884_v60 = vpack.c.bf16 %v15922_v16, %v15921_v30  ;;  %v15479_v45 = vld [vmem:[%s25219_s1 + $0xda] sm:$0xff] }
 0x446   : >> { %19999 = vmatprep.mubr.f32.mxu0 %v15841_v7  ;;  %21473 = vmatprep.subr.bf16.mxu1 %v21472_v3  ;;  %v21888_v7 = vpack.c.bf16 %v15924_v56, %v15923_v46  ;;  %v15875_v10 = vld [vmem:[%s25219_s1 + $0x15e] sm:$0xff] }
 0x447   : >> { %19328 = vmatmul.mubr.f32.gmra.mrb[10].mxu1 %v26290_v55  ;;  %21857 = vmatprep.subr.bf16.mxu0 %v21856_v14  ;;  %v15895_v55 = vld [vmem:[%s28807_s3 + $0xbf8] sm:$0xff] }
 0x448   : >> { %20000 = vmatmul.mubr.f32.gmra.mrb[10].mxu0 %v15842_v59  ;;  %21475 = vmatpush3.bf16.msra.mxu1 %v21472_v3  ;;  %v21864_v25 = vpack.c.bf16 %v15895_v55, %v15894_v35  ;;  %v15478_v3 = vld [vmem:[%s25219_s1 + $0xd2] sm:$0xff]  ;;  %v15480_v59 = vld [vmem:[%s25219_s1 + $0xe2] sm:$0xff] }
 0x449   : >> { %21859 = vmatpush3.bf16.msra.mxu0 %v21856_v14  ;;  %19330 = vmatprep.mubr.f32.mxu1 %v26307_v43  ;;  %v15846_v43 = vld [vmem:[%s25219_s1 + $0x17c] sm:$0xff]  ;;  %v15877_v35 = vld [vmem:[%s25219_s1 + $0x16e] sm:$0xff] }
 0x44a   : >> { %20002 = vmatprep.mubr.f32.mxu0 %v15843_v33  ;;  %21477 = vmatprep.subr.bf16.mxu1 %v21476_v32  ;;  %v15874_v14 = vld [vmem:[%s25219_s1 + $0x156] sm:$0xff]  ;;  %v15876_v33 = vld [vmem:[%s25219_s1 + $0x166] sm:$0xff] }
 0x44b   : >> { %19331 = vmatmul.mubr.f32.gmra.mrb[12].mxu1 %v26312_v24  ;;  %21861 = vmatprep.subr.bf16.mxu0 %v21860_v1  ;;  %v15468_v24 = vld [vmem:[%s25219_s1 + $0x82] sm:$0xff]  ;;  %v15482_v55 = vld [vmem:[%s25219_s1 + $0xf2] sm:$0xff] }
 0x44c   : >> { %20003 = vmatmul.mubr.f32.gmra.mrb[12].mxu0 %v15844_v51  ;;  %21479 = vmatpush3.bf16.msra.mxu1 %v21476_v32  ;;  %v21892_v32 = vpack.c.bf16 %v15926_v34, %v15925_v42  ;;  %v28953_v42 = vld [vmem:[#allocation9_spill] sm:$0xff] }
 0x44d   : >> { %21863 = vmatpush3.bf16.msra.mxu0 %v21860_v1  ;;  %19333 = vmatprep.mubr.f32.mxu1 %v26329_v49  ;;  %v15916_v49 = vld [vmem:[%s28807_s3 + $0xc18] sm:$0xff]  ;;  %v15927_v1 = vld [vmem:[%s28807_s3 + $0xc70] sm:$0xff] }
 0x44e   : >> { %20005 = vmatprep.mubr.f32.mxu0 %v15845_v61  ;;  %21481 = vmatprep.subr.bf16.mxu1 %v21480_v18  ;;  %v21872_v6 = vpack.c.bf16 %v15916_v49, %v15915_v28  ;;  %v21896_v51 = vpack.c.bf16 %v15928_v44, %v15927_v1  ;;  %v15483_v61 = vld [vmem:[%s25219_s1 + $0xfa] sm:$0xff] }
 0x44f   : >> { %19334 = vmatmul.mubr.f32.gmra.mrb[14].mxu1 %v26334_v19  ;;  %21865 = vmatprep.subr.bf16.mxu0 %v21864_v25  ;;  %v15470_v19 = vld [vmem:[%s25219_s1 + $0x92] sm:$0xff] }
 0x450   : >> { %20006 = vmatmul.mubr.f32.gmra.mrb[14].mxu0 %v15846_v43  ;;  %21483 = vmatpush3.bf16.msra.mxu1 %v21480_v18  ;;  %v15878_v18 = vld [vmem:[%s25219_s1 + $0x176] sm:$0xff] }
 0x451   : >> { %21867 = vmatpush3.bf16.msra.mxu0 %v21864_v25  ;;  %19368 = vmatprep.mubr.f32.mxu1 %v15468_v24  ;;  %v15879_v25 = vld [vmem:[%s25219_s1 + $0x17e] sm:$0xff] }
 0x452   : >> { %20040 = vmatprep.mubr.f32.mxu0 %v15864_v50  ;;  %21869 = vmatprep.subr.bf16.mxu0 %v21868_v0  ;;  %v15899_v43 = vld [vmem:[%s25219_s1 + $0x118] sm:$0xff]  ;;  %v15900_v24 = vld [vmem:[%s25219_s1 + $0x120] sm:$0xff]  ;;  %v15902_v50 = vld [vmem:[%s25219_s1 + $0x130] sm:$0xff] }
 0x453   : >> { %19369 = vmatmul.mubr.f32.vlgmr.msra.gmra.mrb[0].mxu1 %v15469_v39  ;;  %22958 = vmatprep.subr.bf16.mxu1 %v21868_v0  ;;  %v15903_v28 = vld [vmem:[%s25219_s1 + $0x138] sm:$0xff] }
 0x454   : >> { %20041 = vmatmul.mubr.f32.vlgmr.msra.gmra.mrb[0].mxu0 %v15865_v27  ;;  %22966 = vmatpush3.bf16.msra.mxu1 %v21868_v0 }
 0x455   : >> { %21871 = vmatpush3.bf16.msra.mxu0 %v21868_v0  ;;  %19371 = vmatprep.mubr.f32.mxu1 %v15470_v19  ;;  %v15901_v0 = vld [vmem:[%s25219_s1 + $0x128] sm:$0xff] }
 0x456   : >> { %20043 = vmatprep.mubr.f32.mxu0 %v15866_v31  ;;  %21873 = vmatprep.subr.bf16.mxu0 %v21872_v6 }
 0x457   : >> { %19372 = vmatmul.mubr.f32.gmra.mrb[2].mxu1 %v15471_v52  ;;  %22959 = vmatprep.subr.bf16.mxu1 %v21872_v6 }
 0x458   : >> { %20044 = vmatmul.mubr.f32.gmra.mrb[2].mxu0 %v15867_v5  ;;  %22967 = vmatpush3.bf16.msra.mxu1 %v21872_v6 }
 0x459   : >> { %21875 = vmatpush3.bf16.msra.mxu0 %v21872_v6  ;;  %19374 = vmatprep.mubr.f32.mxu1 %v15472_v2 }
 0x45a   : >> { %20046 = vmatprep.mubr.f32.mxu0 %v15868_v41  ;;  %21877 = vmatprep.subr.bf16.mxu0 %v21876_v48 }
 0x45b   : >> { %19375 = vmatmul.mubr.f32.gmra.mrb[4].mxu1 %v15473_v15  ;;  %22960 = vmatprep.subr.bf16.mxu1 %v21876_v48 }
 0x45c   : >> { %20047 = vmatmul.mubr.f32.gmra.mrb[4].mxu0 %v15869_v12  ;;  %22968 = vmatpush3.bf16.msra.mxu1 %v21876_v48 }
 0x45d   : >> { %21879 = vmatpush3.bf16.msra.mxu0 %v21876_v48  ;;  %19377 = vmatprep.mubr.f32.mxu1 %v15474_v38 }
 0x45e   : >> { %20049 = vmatprep.mubr.f32.mxu0 %v15870_v47  ;;  %21881 = vmatprep.subr.bf16.mxu0 %v21880_v8 }
 0x45f   : >> { %19378 = vmatmul.mubr.f32.gmra.mrb[6].mxu1 %v15475_v20  ;;  %22961 = vmatprep.subr.bf16.mxu1 %v21880_v8 }
 0x460   : >> { %20050 = vmatmul.mubr.f32.gmra.mrb[6].mxu0 %v15871_v22  ;;  %22969 = vmatpush3.bf16.msra.mxu1 %v21880_v8 }
 0x461   : >> { %21883 = vmatpush3.bf16.msra.mxu0 %v21880_v8  ;;  %19380 = vmatprep.mubr.f32.mxu1 %v15476_v21 }
 0x462   : >> { %20052 = vmatprep.mubr.f32.mxu0 %v15872_v58  ;;  %21885 = vmatprep.subr.bf16.mxu0 %v21884_v60 }
 0x463   : >> { %19381 = vmatmul.mubr.f32.gmra.mrb[8].mxu1 %v15477_v17  ;;  %22962 = vmatprep.subr.bf16.mxu1 %v21884_v60 }
 0x464   : >> { %20053 = vmatmul.mubr.f32.gmra.mrb[8].mxu0 %v15873_v62  ;;  %22970 = vmatpush3.bf16.msra.mxu1 %v21884_v60 }
 0x465   : >> { %21887 = vmatpush3.bf16.msra.mxu0 %v21884_v60  ;;  %19383 = vmatprep.mubr.f32.mxu1 %v15478_v3 }
 0x466   : >> { %20055 = vmatprep.mubr.f32.mxu0 %v15874_v14  ;;  %21889 = vmatprep.subr.bf16.mxu0 %v21888_v7 }
 0x467   : >> { %19384 = vmatmul.mubr.f32.gmra.mrb[10].mxu1 %v15479_v45  ;;  %22963 = vmatprep.subr.bf16.mxu1 %v21888_v7 }
 0x468   : >> { %20056 = vmatmul.mubr.f32.gmra.mrb[10].mxu0 %v15875_v10  ;;  %22971 = vmatpush3.bf16.msra.mxu1 %v21888_v7 }
 0x469   : >> { %21891 = vmatpush3.bf16.msra.mxu0 %v21888_v7  ;;  %19386 = vmatprep.mubr.f32.mxu1 %v15480_v59 }
 0x46a   : >> { %20058 = vmatprep.mubr.f32.mxu0 %v15876_v33  ;;  %21893 = vmatprep.subr.bf16.mxu0 %v21892_v32 }
 0x46b   : >> { %19387 = vmatmul.mubr.f32.gmra.mrb[12].mxu1 %v15481_v23  ;;  %22964 = vmatprep.subr.bf16.mxu1 %v21892_v32 }
 0x46c   : >> { %20059 = vmatmul.mubr.f32.gmra.mrb[12].mxu0 %v15877_v35  ;;  %22972 = vmatpush3.bf16.msra.mxu1 %v21892_v32 }
 0x46d   : >> { %21895 = vmatpush3.bf16.msra.mxu0 %v21892_v32  ;;  %19389 = vmatprep.mubr.f32.mxu1 %v15482_v55 }
 0x46e   : >> { %20061 = vmatprep.mubr.f32.mxu0 %v15878_v18  ;;  %21897 = vmatprep.subr.bf16.mxu0 %v21896_v51 }
 0x46f   : >> { %19390 = vmatmul.mubr.f32.gmra.mrb[14].mxu1 %v15483_v61  ;;  %22965 = vmatprep.subr.bf16.mxu1 %v21896_v51 }
 0x470   : >> { %20062 = vmatmul.mubr.f32.gmra.mrb[14].mxu0 %v15879_v25  ;;  %22973 = vmatpush3.bf16.msra.mxu1 %v21896_v51 }
 0x471   : >> { %21899 = vmatpush3.bf16.msra.mxu0 %v21896_v51  ;;  %20096 = vmatprep.mubr.f32.mxu0 %v15897_v36 }
 0x472   : >> { %20108 = vmatprep.mubr.f32.mxu1 %v26522_v4  ;;  %v15912_v4 = vld [vmem:[%s25219_s1 + $0x180] sm:$0xff] }
 0x473   : >> { %20109 = vmatmul.mubr.f32.vlgmr.msra.gmra.mrb[16].mxu1 %v26527_v11  ;;  %v15904_v11 = vld [vmem:[%s25219_s1 + $0x140] sm:$0xff]  ;;  %s26975_s1 = scalar_lea.vmem [#allocation2], %s15136_s30  ;;  %s27013_s30 = smov (%p6421_p13), 0  }
 0x474   : >> { %20097 = vmatmul.mubr.f32.vlgmr.msra.gmra.mrb[0].mxu0 %v15898_v40  ;;  %20111 = vmatprep.mubr.f32.mxu1 %v26544_v53 }
 0x475   : >> { %20099 = vmatprep.mubr.f32.mxu0 %v15899_v43 }
 0x477   : >> { %20112 = vmatmul.mubr.f32.gmra.mrb[18].mxu1 %v26549_v57 }
 0x478   : >> { %20100 = vmatmul.mubr.f32.gmra.mrb[2].mxu0 %v15900_v24  ;;  %20114 = vmatprep.mubr.f32.mxu1 %v26566_v26 }
 0x479   : >> { %20102 = vmatprep.mubr.f32.mxu0 %v15901_v0 }
 0x47b   : >> { %20115 = vmatmul.mubr.f32.gmra.mrb[20].mxu1 %v26571_v54 }
 0x47c   : >> { %20103 = vmatmul.mubr.f32.gmra.mrb[4].mxu0 %v15902_v50  ;;  %20117 = vmatprep.mubr.f32.mxu1 %v26588_v29 }
 0x47d   : >> { %20105 = vmatprep.mubr.f32.mxu0 %v15903_v28 }
 0x47f   : >> { %20118 = vmatmul.mubr.f32.gmra.mrb[22].mxu1 %v15912_v4 }
 0x480   : >> { %20106 = vmatmul.mubr.f32.gmra.mrb[6].mxu0 %v15904_v11 }
 0x526   : >> { %v19370_v53 = vpop.f32.mrb[0].mxu1 }
 0x527   : >> { %v8649_v49 = vpop.f32.mrb[1].mxu1 }
 0x52a   : >> { %v19373_v39 = vpop.f32.mrb[2].mxu1 }
 0x52b   : >> { %v8659_v57 = vpop.f32.mrb[3].mxu1 }
 0x52e   : >> { %v26959_v27 = vpop.f32.mrb[4].mxu1 }
 0x52f   : >> { %v26961_v26 = vpop.f32.mrb[5].mxu1 }
 0x532   : >> { %v26963_v19 = vpop.f32.mrb[6].mxu1 }
 0x533   : >> { %v26965_v6 = vpop.f32.mrb[7].mxu1 }
 0x536   : >> { %v19382_v54 = vpop.f32.mrb[8].mxu1 }
 0x537   : >> { %v20054_v31 = vpop.f32.mrb[8].mxu0  ;;  %v8689_v29 = vpop.f32.mrb[9].mxu1 }
 0x538   : >> { %v22982_v9 = vadd.f32 %v20054_v31, %v19382_v54  ;;  %v11041_v63 = vpop.f32.mrb[9].mxu0 }
 0x539   : >> { %v22984_v52 = vadd.f32 %v11041_v63, %v8689_v29 }
 0x53a   : >> { %v19385_v5 = vpop.f32.mrb[10].mxu1 }
 0x53b   : >> { %v20057_v2 = vpop.f32.mrb[10].mxu0  ;;  %v8699_v48 = vpop.f32.mrb[11].mxu1 }
 0x53c   : >> { %v22986_v41 = vadd.f32 %v20057_v2, %v19385_v5  ;;  %v11051_v37 = vpop.f32.mrb[11].mxu0 }
 0x53d   : >> { %v22988_v13 = vadd.f32 %v11051_v37, %v8699_v48 }
 0x53e   : >> { %v19388_v15 = vpop.f32.mrb[12].mxu1 }
 0x53f   : >> { %v20060_v12 = vpop.f32.mrb[12].mxu0  ;;  %v8709_v38 = vpop.f32.mrb[13].mxu1 }
 0x540   : >> { %v22990_v8 = vadd.f32 %v20060_v12, %v19388_v15  ;;  %v11061_v47 = vpop.f32.mrb[13].mxu0 }
 0x541   : >> { %v22992_v30 = vadd.f32 %v11061_v47, %v8709_v38 }
 0x542   : >> { %v19391_v16 = vpop.f32.mrb[14].mxu1 }
 0x543   : >> { %v20063_v20 = vpop.f32.mrb[14].mxu0  ;;  %v8719_v22 = vpop.f32.mrb[15].mxu1 }
 0x544   : >> { %v22994_v21 = vadd.f32 %v20063_v20, %v19391_v16  ;;  %v11071_v60 = vpop.f32.mrb[15].mxu0 }
 0x545   : >> { %v26967_v58 = vadd.f32 %v11071_v60, %v8719_v22 }
 0x546   : >> { %v20110_v46 = vpop.f32.mrb[16].mxu1 }
 0x547   : >> { %v20098_v56 = vpop.f32.mrb[0].mxu0  ;;  %v22983_v17 = vadd.f32 %v22982_v9, %v20110_v46  ;;  %v11237_v62 = vpop.f32.mrb[17].mxu1 }
 0x548   : >> { %v22974_v3 = vadd.f32 %v20098_v56, %v19370_v53  ;;  %v11197_v7 = vpop.f32.mrb[1].mxu0  ;;  %v22985_v14 = vadd.f32 %v22984_v52, %v11237_v62 }
 0x549   : >> { %v11307_v34 = vadd.f32 %v22983_v17, %v28953_v42  ;;  %v22975_v45 = vadd.f32 %v11197_v7, %v8649_v49 }
 0x54a   : >> { %v11299_v10 = vadd.f32 %v22974_v3, %v28953_v42  ;;  %v11306_v59 = vadd.f32 %v22985_v14, %v28953_v42  ;;  %v20113_v32 = vpop.f32.mrb[18].mxu1 }
 0x54b   : >> { %v11323_v33 = vmax.f32 %v11307_v34, 0.0  ;;  %v11298_v1 = vadd.f32 %v22975_v45, %v28953_v42  ;;  %v20101_v44 = vpop.f32.mrb[2].mxu0  ;;  %v22987_v23 = vadd.f32 %v22986_v41, %v20113_v32  ;;  %v11247_v35 = vpop.f32.mrb[19].mxu1 }
 0x54c   : >> { %v11315_v55 = vmax.f32 %v11299_v10, 0.0  ;;  %v11322_v51 = vmax.f32 %v11306_v59, 0.0  ;;  %v22976_v18 = vadd.f32 %v20101_v44, %v19373_v39  ;;  %v11207_v61 = vpop.f32.mrb[3].mxu0  ;;  %v22989_v25 = vadd.f32 %v22988_v13, %v11247_v35 }
 0x54d   : >> { %11340 = vst [vmem:[%s26975_s1 + $0x48] sm:$0xff] %v11323_v33  ;;  %v11314_v36 = vmax.f32 %v11298_v1, 0.0  ;;  %v11309_v40 = vadd.f32 %v22987_v23, %v28953_v42  ;;  %v22977_v43 = vadd.f32 %v11207_v61, %v8659_v57 }
 0x54e   : >> { %11332 = vst [vmem:[%s26975_s1 + $0x8] sm:$0xff] %v11315_v55  ;;  %11339 = vst [vmem:[%s26975_s1 + $0x40] sm:$0xff] %v11322_v51  ;;  %v11301_v24 = vadd.f32 %v22976_v18, %v28953_v42  ;;  %v11308_v0 = vadd.f32 %v22989_v25, %v28953_v42  ;;  %v20116_v50 = vpop.f32.mrb[20].mxu1 }
 0x54f   : >> { %11331 = vst [vmem:[%s26975_s1] sm:$0xff] %v11314_v36  ;;  %v11325_v28 = vmax.f32 %v11309_v40, 0.0  ;;  %v11300_v4 = vadd.f32 %v22977_v43, %v28953_v42  ;;  %v20104_v11 = vpop.f32.mrb[4].mxu0  ;;  %v22991_v53 = vadd.f32 %v22990_v8, %v20116_v50  ;;  %v11257_v49 = vpop.f32.mrb[21].mxu1 }
 0x550   : >> { %v11317_v39 = vmax.f32 %v11301_v24, 0.0  ;;  %v11324_v57 = vmax.f32 %v11308_v0, 0.0  ;;  %v22978_v54 = vadd.f32 %v20104_v11, %v26959_v27  ;;  %v11217_v31 = vpop.f32.mrb[5].mxu0  ;;  %v22993_v29 = vadd.f32 %v22992_v30, %v11257_v49 }
 0x551   : >> { %11342 = vst [vmem:[%s26975_s1 + $0x58] sm:$0xff] %v11325_v28  ;;  %v11316_v9 = vmax.f32 %v11300_v4, 0.0  ;;  %v11311_v63 = vadd.f32 %v22991_v53, %v28953_v42  ;;  %v22979_v52 = vadd.f32 %v11217_v31, %v26961_v26 }
 0x552   : >> { %11334 = vst [vmem:[%s26975_s1 + $0x18] sm:$0xff] %v11317_v39  ;;  %11341 = vst [vmem:[%s26975_s1 + $0x50] sm:$0xff] %v11324_v57  ;;  %v11303_v5 = vadd.f32 %v22978_v54, %v28953_v42  ;;  %v11310_v2 = vadd.f32 %v22993_v29, %v28953_v42  ;;  %v20119_v48 = vpop.f32.mrb[22].mxu1 }
 0x553   : >> { %11333 = vst [vmem:[%s26975_s1 + $0x10] sm:$0xff] %v11316_v9  ;;  %v11327_v27 = vmax.f32 %v11311_v63, 0.0  ;;  %v11302_v41 = vadd.f32 %v22979_v52, %v28953_v42  ;;  %v20107_v37 = vpop.f32.mrb[6].mxu0  ;;  %v22995_v13 = vadd.f32 %v22994_v21, %v20119_v48  ;;  %v11267_v15 = vpop.f32.mrb[23].mxu1 }
 0x554   : >> { %v11319_v12 = vmax.f32 %v11303_v5, 0.0  ;;  %v11326_v26 = vmax.f32 %v11310_v2, 0.0  ;;  %v22980_v38 = vadd.f32 %v20107_v37, %v26963_v19  ;;  %v11227_v8 = vpop.f32.mrb[7].mxu0  ;;  %v22997_v47 = vadd.f32 %v26967_v58, %v11267_v15 }
 0x555   : >> { %11344 = vst [vmem:[%s26975_s1 + $0x68] sm:$0xff] %v11327_v27  ;;  %v11318_v30 = vmax.f32 %v11302_v41, 0.0  ;;  %v11313_v16 = vadd.f32 %v22995_v13, %v28953_v42  ;;  %v22981_v20 = vadd.f32 %v11227_v8, %v26965_v6  ;;  %6423 = sbr.rel (!%p6421_p13) target bundleno = 720 (0x2d0), region = 291 }
 0x556   : >> { %11336 = vst [vmem:[%s26975_s1 + $0x28] sm:$0xff] %v11319_v12  ;;  %11343 = vst [vmem:[%s26975_s1 + $0x60] sm:$0xff] %v11326_v26  ;;  %v11305_v22 = vadd.f32 %v22980_v38, %v28953_v42  ;;  %v11312_v21 = vadd.f32 %v22997_v47, %v28953_v42 }
 0x557   : >> { %11335 = vst [vmem:[%s26975_s1 + $0x20] sm:$0xff] %v11318_v30  ;;  %v11329_v19 = vmax.f32 %v11313_v16, 0.0  ;;  %v11304_v60 = vadd.f32 %v22981_v20, %v28953_v42 }
 0x558   : >> { %v11321_v58 = vmax.f32 %v11305_v22, 0.0  ;;  %v11328_v46 = vmax.f32 %v11312_v21, 0.0 }
 0x559   : >> { %11346 = vst [vmem:[%s26975_s1 + $0x78] sm:$0xff] %v11329_v19  ;;  %v11320_v56 = vmax.f32 %v11304_v60, 0.0 }
 0x55a   : >> { %11338 = vst [vmem:[%s26975_s1 + $0x38] sm:$0xff] %v11321_v58  ;;  %11345 = vst [vmem:[%s26975_s1 + $0x70] sm:$0xff] %v11328_v46 }
 0x55b   : >> { %11337 = vst [vmem:[%s26975_s1 + $0x30] sm:$0xff] %v11320_v56 }
 0x55c LB: >> { %s15930_s20 = sshll.u32 %s23527_s30, 7  ;;  %s11352_s30 = sadd.s32 1, %s23527_s30   ;;  %s23527_s30 = sphi %s27013_s30, %s11352_s30  }
 0x55d   : >> { %s27021_s21 = scalar_lea.vmem [#allocation2], %s15930_s20  ;;  %s27054_s23 = scalar_lea.vmem [#allocation3], %s15930_s20 }
 0x55e   : >> { %p11349_p0 = scmp.ge.s32.totalorder %s11352_s30, 8  }
 0x55f   : > { %vm23531_vm1 = vmmov (%p11349_p0), 0   ;;  %s16366_s17 = sshll.u32 (%p11349_p0), %s23624_s29, 4  ;;  %s13992_s16 = sshll.u32 (%p11349_p0), %s23754_s2, 4  ;;  %s28761_s16 = int_to_ptr.vmem [resolvable:$true] %s13992_s16 }
 0x560   : > { %s28759_s1 = scalar_lea.hbm (%p11349_p0), %s28817_s13, %s16366_s17  ;;  %s28955_s30 = sand.u32 (%p11349_p0), 1, %s23503_s26  }
 0x561   : > { %s13980_s20 = scalar_lea.sflag (%p11349_p0), [#allocation5], %s28955_s30  ;;  %s23532_s29 = smov (%p11349_p0), [#allocation4]  }
 0x562   : >> { %v11355_v6 = vld [vmem:[%s27021_s21] sm:$0xff]  ;;  %v11356_v7 = vld [vmem:[%s27021_s21 + $0x8] sm:$0xff]  ;;  %v11357_v10 = vld [vmem:[%s27021_s21 + $0x10] sm:$0xff] }
 0x563   : >> { %v15932_v17 = vld [vmem:[%s27021_s21 + $0x2] sm:$0xff]  ;;  %v15933_v14 = vld [vmem:[%s27021_s21 + $0xa] sm:$0xff]  ;;  %v15934_v33 = vld [vmem:[%s27021_s21 + $0x12] sm:$0xff] }
 0x564   : >> { %v11389_v62 = vmax.f32 %v11355_v6, %v15932_v17  ;;  %v15949_v3 = vld [vmem:[%s27021_s21 + $0x40] sm:$0xff]  ;;  %v11390_v34 = vmax.f32 %v11356_v7, %v15933_v14  ;;  %v27030_v45 = vld [vmem:[%s27021_s21 + $0x48] sm:$0xff]  ;;  %v27036_v1 = vld [vmem:[%s27021_s21 + $0x50] sm:$0xff]  ;;  %v11391_v23 = vmax.f32 %v11357_v10, %v15934_v33 }
 0x565   : >> { %v15966_v42 = vld [vmem:[%s27021_s21 + $0x42] sm:$0xff]  ;;  %v15967_v32 = vld [vmem:[%s27021_s21 + $0x4a] sm:$0xff]  ;;  %v27040_v35 = vld [vmem:[%s27021_s21 + $0x52] sm:$0xff] }
 0x566   : >> { %v11423_v59 = vmax.f32 %v11389_v62, %v15949_v3  ;;  %v11424_v44 = vmax.f32 %v11390_v34, %v27030_v45  ;;  %v11358_v55 = vld [vmem:[%s27021_s21 + $0x18] sm:$0xff]  ;;  %v11359_v40 = vld [vmem:[%s27021_s21 + $0x20] sm:$0xff]  ;;  %v11425_v0 = vmax.f32 %v11391_v23, %v27036_v1  ;;  %v11360_v11 = vld [vmem:[%s27021_s21 + $0x28] sm:$0xff]  ;;  %v11397_v54 = vmax.f32 %v15949_v3, %v15966_v42 }
 0x567   : >> { %v15935_v51 = vld [vmem:[%s27021_s21 + $0x1a] sm:$0xff]  ;;  %v15936_v43 = vld [vmem:[%s27021_s21 + $0x22] sm:$0xff]  ;;  %v15937_v49 = vld [vmem:[%s27021_s21 + $0x2a] sm:$0xff]  ;;  %v11398_v2 = vmax.f32 %v27030_v45, %v15967_v32  ;;  %v11399_v15 = vmax.f32 %v27036_v1, %v27040_v35 }
 0x568   : >> { %v15952_v18 = vld [vmem:[%s27021_s21 + $0x58] sm:$0xff]  ;;  %v11457_v61 = vmax.f32 %v11423_v59, %v15966_v42  ;;  %v11392_v25 = vmax.f32 %v11358_v55, %v15935_v51  ;;  %v11458_v24 = vmax.f32 %v11424_v44, %v15967_v32  ;;  %v11393_v50 = vmax.f32 %v11359_v40, %v15936_v43  ;;  %v15953_v28 = vld [vmem:[%s27021_s21 + $0x60] sm:$0xff]  ;;  %v15954_v39 = vld [vmem:[%s27021_s21 + $0x68] sm:$0xff] }
 0x569   : >> { %v15969_v36 = vld [vmem:[%s27021_s21 + $0x5a] sm:$0xff]  ;;  %v15970_v4 = vld [vmem:[%s27021_s21 + $0x62] sm:$0xff]  ;;  %v15971_v57 = vld [vmem:[%s27021_s21 + $0x6a] sm:$0xff]  ;;  %v11459_v31 = vmax.f32 %v11425_v0, %v27040_v35  ;;  %v11394_v9 = vmax.f32 %v11360_v11, %v15937_v49 }
 0x56a   : >> { %11474 = vst [vmem:[%s27054_s23] sm:$0xff] %v11457_v61  ;;  %v11426_v53 = vmax.f32 %v11392_v25, %v15952_v18  ;;  %11475 = vst [vmem:[%s27054_s23 + $0x8] sm:$0xff] %v11458_v24  ;;  %v11427_v29 = vmax.f32 %v11393_v50, %v15953_v28  ;;  %v11361_v63 = vld [vmem:[%s27021_s21 + $0x30] sm:$0xff]  ;;  %v11362_v37 = vld [vmem:[%s27021_s21 + $0x38] sm:$0xff]  ;;  %v11400_v12 = vmax.f32 %v15952_v18, %v15969_v36 }
 0x56b   : >> { %v15938_v52 = vld [vmem:[%s27021_s21 + $0x32] sm:$0xff]  ;;  %v15939_v13 = vld [vmem:[%s27021_s21 + $0x3a] sm:$0xff]  ;;  %11476 = vst [vmem:[%s27054_s23 + $0x10] sm:$0xff] %v11459_v31  ;;  %v11428_v38 = vmax.f32 %v11394_v9, %v15954_v39  ;;  %v11401_v20 = vmax.f32 %v15953_v28, %v15970_v4  ;;  %v15974_v19 = vld [vmem:[%s27021_s21 + $0x82] sm:$0xff]  ;;  %v11402_v46 = vmax.f32 %v15954_v39, %v15971_v57 }
 0x56c   : >> { %v15955_v5 = vld [vmem:[%s27021_s21 + $0x70] sm:$0xff]  ;;  %v11460_v48 = vmax.f32 %v11426_v53, %v15969_v36  ;;  %v11395_v27 = vmax.f32 %v11361_v63, %v15938_v52  ;;  %v11461_v26 = vmax.f32 %v11427_v29, %v15970_v4  ;;  %v11396_v8 = vmax.f32 %v11362_v37, %v15939_v13  ;;  %v15956_v47 = vld [vmem:[%s27021_s21 + $0x78] sm:$0xff]  ;;  %v15957_v16 = vld [vmem:[%s27021_s21 + $0x80] sm:$0xff] }
 0x56d   : >> { %v15972_v41 = vld [vmem:[%s27021_s21 + $0x72] sm:$0xff]  ;;  %v15973_v30 = vld [vmem:[%s27021_s21 + $0x7a] sm:$0xff]  ;;  %v11431_v21 = vmax.f32 %v11397_v54, %v15957_v16  ;;  %v15958_v60 = vld [vmem:[%s27021_s21 + $0x88] sm:$0xff]  ;;  %v11462_v6 = vmax.f32 %v11428_v38, %v15971_v57  ;;  %v23530_v54 = vmov (%p11349_p0), 0.0|0.0  }
 0x56e   : >> { %11477 = vst [vmem:[%s27054_s23 + $0x18] sm:$0xff] %v11460_v48  ;;  %v11429_v22 = vmax.f32 %v11395_v27, %v15955_v5  ;;  %v15975_v58 = vld [vmem:[%s27021_s21 + $0x8a] sm:$0xff]  ;;  %v11403_v56 = vmax.f32 %v15955_v5, %v15972_v41  ;;  %11478 = vst [vmem:[%s27054_s23 + $0x20] sm:$0xff] %v11461_v26  ;;  %v11430_v17 = vmax.f32 %v11396_v8, %v15956_v47  ;;  %v15976_v7 = vld [vmem:[%s27021_s21 + $0x92] sm:$0xff]  ;;  %21900 = vmatprep.subr.bf16.mxu0 (%p11349_p0), %v23530_v54  ;;  %v28954_v48 = vmov (%p11349_p0), 0.0  }
 0x56f   : >> { %v11432_v62 = vmax.f32 %v11398_v2, %v15958_v60  ;;  %v15959_v3 = vld [vmem:[%s27021_s21 + $0x90] sm:$0xff]  ;;  %v15960_v14 = vld [vmem:[%s27021_s21 + $0x98] sm:$0xff]  ;;  %v11404_v42 = vmax.f32 %v15956_v47, %v15973_v30  ;;  %v11465_v45 = vmax.f32 %v11431_v21, %v15974_v19  ;;  %v15961_v33 = vld [vmem:[%s27021_s21 + $0xa0] sm:$0xff]  ;;  %11479 = vst [vmem:[%s27054_s23 + $0x28] sm:$0xff] %v11462_v6  ;;  %21924 = vmatprep.subr.bf16.mxu1 (%p11349_p0), %v23530_v54 }
 0x570   : >> { %v11463_v34 = vmax.f32 %v11429_v22, %v15972_v41  ;;  %v11433_v10 = vmax.f32 %v11399_v15, %v15959_v3  ;;  %v11434_v59 = vmax.f32 %v11400_v12, %v15960_v14  ;;  %v15977_v32 = vld [vmem:[%s27021_s21 + $0x9a] sm:$0xff]  ;;  %v15978_v1 = vld [vmem:[%s27021_s21 + $0xa2] sm:$0xff]  ;;  %v11464_v44 = vmax.f32 %v11430_v17, %v15973_v30  ;;  %v15979_v51 = vld [vmem:[%s27021_s21 + $0xaa] sm:$0xff]  ;;  %20152 = vmatprep.mubr.msk.f32.mxu0 (%p11349_p0), %vm23531_vm1, %v28954_v48 }
 0x571   : >> { %v11466_v23 = vmax.f32 %v11432_v62, %v15975_v58  ;;  %v11435_v35 = vmax.f32 %v11401_v20, %v15961_v33  ;;  %v15962_v55 = vld [vmem:[%s27021_s21 + $0xa8] sm:$0xff]  ;;  %v15963_v18 = vld [vmem:[%s27021_s21 + $0xb0] sm:$0xff]  ;;  %11482 = vst [vmem:[%s27054_s23 + $0x40] sm:$0xff] %v11465_v45  ;;  %v15964_v24 = vld [vmem:[%s27021_s21 + $0xb8] sm:$0xff]  ;;  %11351 = sbr.rel (!%p11349_p0) target bundleno = 1372 (0x55c), region = 302  ;;  %20187 = vmatprep.mubr.msk.f32.mxu1 (%p11349_p0), %vm23531_vm1, %v28954_v48 }
 0x572   : >> { %11480 = vst [vmem:[%s27054_s23 + $0x30] sm:$0xff] %v11463_v34  ;;  %v11467_v61 = vmax.f32 %v11433_v10, %v15976_v7  ;;  %v11468_v25 = vmax.f32 %v11434_v59, %v15977_v32  ;;  %v11436_v36 = vmax.f32 %v11402_v46, %v15962_v55  ;;  %v11437_v40 = vmax.f32 %v11403_v56, %v15963_v18  ;;  %v15980_v43 = vld [vmem:[%s27021_s21 + $0xb2] sm:$0xff]  ;;  %v15981_v0 = vld [vmem:[%s27021_s21 + $0xba] sm:$0xff]  ;;  %v15983_v39 = vld [vmem:[%s28809_s5 + $0x88] sm:$0xff] (%p11349_p0)  ;;  %s23433_s21 = scalar_lea.vmem (%p11349_p0), %s28761_s16, 16 }
 0x573   : >> { %11481 = vst [vmem:[%s27054_s23 + $0x38] sm:$0xff] %v11464_v44  ;;  %11483 = vst [vmem:[%s27054_s23 + $0x48] sm:$0xff] %v11466_v23  ;;  %v11469_v50 = vmax.f32 %v11435_v35, %v15978_v1  ;;  %v11438_v28 = vmax.f32 %v11404_v42, %v15964_v24  ;;  %v15982_v49 = vld [vmem:[%s28809_s5 + $0x80] sm:$0xff] (%p11349_p0)  ;;  %v11492_v29 = vld [vmem:[%s28809_s5 + $0x8] sm:$0xff] (%p11349_p0)  ;;  %p23434_p1 = scmp.ne.s32.totalorder (%p11349_p0), %s28761_s16, %s23433_s21 }
 0x574   : >> { %11484 = vst [vmem:[%s27054_s23 + $0x50] sm:$0xff] %v11467_v61  ;;  %11485 = vst [vmem:[%s27054_s23 + $0x58] sm:$0xff] %v11468_v25  ;;  %v11470_v4 = vmax.f32 %v11436_v36, %v15979_v51  ;;  %v11471_v11 = vmax.f32 %v11437_v40, %v15980_v43  ;;  %v11491_v57 = vld [vmem:[%s28809_s5] sm:$0xff] (%p11349_p0)  ;;  %v21901_v31 = vpack.c.bf16 (%p11349_p0), %v15983_v39, %v15982_v49  ;;  %v15984_v9 = vld [vmem:[%s28809_s5 + $0x90] sm:$0xff] (%p11349_p0) }
 0x575   : >> { %11486 = vst [vmem:[%s27054_s23 + $0x60] sm:$0xff] %v11469_v50  ;;  %v11472_v53 = vmax.f32 %v11438_v28, %v15981_v0  ;;  %v15985_v63 = vld [vmem:[%s28809_s5 + $0x98] sm:$0xff] (%p11349_p0)  ;;  %v21925_v52 = vpack.c.bf16 (%p11349_p0), %v11492_v29, %v11491_v57  ;;  %v11493_v5 = vld [vmem:[%s28809_s5 + $0x10] sm:$0xff] (%p11349_p0)  ;;  %v15986_v37 = vld [vmem:[%s28809_s5 + $0xa0] sm:$0xff] (%p11349_p0)  ;;  %p23435_p2 = pnand (%p11349_p0), %p23434_p1, %p23641_p5 }
 0x576   : >> { %11487 = vst [vmem:[%s27054_s23 + $0x68] sm:$0xff] %v11470_v4  ;;  %11488 = vst [vmem:[%s27054_s23 + $0x70] sm:$0xff] %v11471_v11  ;;  %v11494_v2 = vld [vmem:[%s28809_s5 + $0x18] sm:$0xff] (%p11349_p0)  ;;  %21902 = vmatpush3.bf16.msra.mxu0 (%p11349_p0), %v21901_v31  ;;  %v21904_v27 = vpack.c.bf16 (%p11349_p0), %v15985_v63, %v15984_v9  ;;  %v15987_v13 = vld [vmem:[%s28809_s5 + $0xa8] sm:$0xff] (%p11349_p0) }
 0x577   : >> { %11489 = vst [vmem:[%s27054_s23 + $0x78] sm:$0xff] %v11472_v53  ;;  %21926 = vmatpush3.bf16.msra.mxu1 (%p11349_p0), %v21925_v52  ;;  %21903 = vmatprep.subr.bf16.mxu0 (%p11349_p0), %v23530_v54  ;;  %v21928_v41 = vpack.c.bf16 (%p11349_p0), %v11494_v2, %v11493_v5  ;;  %v11495_v15 = vld [vmem:[%s28809_s5 + $0x20] sm:$0xff] (%p11349_p0)  ;;  %v11496_v12 = vld [vmem:[%s28809_s5 + $0x28] sm:$0xff] (%p11349_p0)  ;;  %v21907_v26 = vpack.c.bf16 (%p11349_p0), %v15987_v13, %v15986_v37  ;;  %v15988_v8 = vld [vmem:[%s28809_s5 + $0xb0] sm:$0xff] (%p11349_p0)  ;;  %p23436_p3 = pneg (%p11349_p0), %p23435_p2  ;;  %s23437_s23 = sshll.u32 (%p11349_p0), %s23532_s29, 4  ;;  %s23438_s23 = int_to_ptr.vmem [resolvable:$false] %s23437_s23 }
 0x578   : > { %21927 = vmatprep.subr.bf16.mxu1 %v23530_v54  ;;  %v21931_v38 = vpack.c.bf16 %v11496_v12, %v11495_v15  ;;  %v15989_v47 = vld [vmem:[%s28809_s5 + $0xb8] sm:$0xff]  ;;  %v11497_v30 = vld [vmem:[%s28809_s5 + $0x30] sm:$0xff]  ;;  %v15990_v21 = vld [vmem:[%s28809_s5 + $0xc0] sm:$0xff]  ;;  %s23439_s24 = scalar_lea.vmem %s23438_s23, 32  ;;  %p23440_p4 = scmp.lt.s32.totalorder %s28761_s16, %s23438_s23 }
 0x579   : > { %v11498_v16 = vld [vmem:[%s28809_s5 + $0x38] sm:$0xff]  ;;  %v21910_v20 = vpack.c.bf16 %v15989_v47, %v15988_v8  ;;  %v15991_v19 = vld [vmem:[%s28809_s5 + $0xc8] sm:$0xff]  ;;  %v11499_v60 = vld [vmem:[%s28809_s5 + $0x40] sm:$0xff]  ;;  %p23441_p7 = scmp.lt.s32.totalorder %s23439_s24, %s23433_s21 }
 0x57a   : > { %21905 = vmatpush3.bf16.msra.mxu0 %v21904_v27  ;;  %v21934_v22 = vpack.c.bf16 %v11498_v16, %v11497_v30  ;;  %v11500_v58 = vld [vmem:[%s28809_s5 + $0x48] sm:$0xff]  ;;  %v21913_v46 = vpack.c.bf16 %v15991_v19, %v15990_v21  ;;  %v15992_v6 = vld [vmem:[%s28809_s5 + $0xd0] sm:$0xff]  ;;  %v15993_v17 = vld [vmem:[%s28809_s5 + $0xd8] sm:$0xff] }
 0x57b   : > { %21929 = vmatpush3.bf16.msra.mxu1 %v21928_v41  ;;  %21906 = vmatprep.subr.bf16.mxu0 %v23530_v54  ;;  %v21937_v56 = vpack.c.bf16 %v11500_v58, %v11499_v60  ;;  %v11501_v62 = vld [vmem:[%s28809_s5 + $0x50] sm:$0xff]  ;;  %v11502_v3 = vld [vmem:[%s28809_s5 + $0x58] sm:$0xff]  ;;  %v21916_v7 = vpack.c.bf16 %v15993_v17, %v15992_v6  ;;  %v15994_v42 = vld [vmem:[%s28809_s5 + $0xe0] sm:$0xff]  ;;  %p23442_p8 = por %p23441_p7, %p23440_p4 }
 0x57c   : > { %21930 = vmatprep.subr.bf16.mxu1 %v23530_v54  ;;  %v21940_v14 = vpack.c.bf16 %v11502_v3, %v11501_v62  ;;  %v15995_v34 = vld [vmem:[%s28809_s5 + $0xe8] sm:$0xff]  ;;  %v11503_v45 = vld [vmem:[%s28809_s5 + $0x60] sm:$0xff]  ;;  %v15996_v33 = vld [vmem:[%s28809_s5 + $0xf0] sm:$0xff] }
 0x57d   : > { %v11504_v10 = vld [vmem:[%s28809_s5 + $0x68] sm:$0xff]  ;;  %v21919_v59 = vpack.c.bf16 %v15995_v34, %v15994_v42  ;;  %v15997_v1 = vld [vmem:[%s28809_s5 + $0xf8] sm:$0xff]  ;;  %v11505_v44 = vld [vmem:[%s28809_s5 + $0x70] sm:$0xff]  ;;  %p23443_p9 = pnand %p23442_p8, %p23436_p3 }
 0x57e   : > { %21908 = vmatpush3.bf16.msra.mxu0 %v21907_v26  ;;  %v21943_v32 = vpack.c.bf16 %v11504_v10, %v11503_v45  ;;  %v11506_v23 = vld [vmem:[%s28809_s5 + $0x78] sm:$0xff]  ;;  %v21922_v35 = vpack.c.bf16 %v15997_v1, %v15996_v33  ;;  %v15998_v51 = vld [vmem:[%s28809_s5 + $0x100] sm:$0xff]  ;;  %v15999_v18 = vld [vmem:[%s28809_s5 + $0x108] sm:$0xff] }
 0x57f   : > { %21932 = vmatpush3.bf16.msra.mxu1 %v21931_v38  ;;  %21909 = vmatprep.subr.bf16.mxu0 %v23530_v54  ;;  %v21946_v55 = vpack.c.bf16 %v11506_v23, %v11505_v44  ;;  %v16014_v61 = vld [vmem:[%s28809_s5 + $0x180] sm:$0xff]  ;;  %v16015_v25 = vld [vmem:[%s28809_s5 + $0x188] sm:$0xff]  ;;  %v21949_v40 = vpack.c.bf16 %v15999_v18, %v15998_v51  ;;  %v16000_v0 = vld [vmem:[%s28809_s5 + $0x110] sm:$0xff] }
 0x580   : > { %21933 = vmatprep.subr.bf16.mxu1 %v23530_v54  ;;  %v11507_v36 = vld [vmem:[#allocation3 + $0x4] sm:$0x1]  ;;  %v11490_v43 = vld [vmem:[#allocation3] sm:$0x1]  ;;  %v21973_v24 = vpack.c.bf16 %v16015_v25, %v16014_v61  ;;  %v16001_v50 = vld [vmem:[%s28809_s5 + $0x118] sm:$0xff] }
 0x581   : > { %v16016_v28 = vld [vmem:[%s28809_s5 + $0x190] sm:$0xff]  ;;  %v16017_v4 = vld [vmem:[%s28809_s5 + $0x198] sm:$0xff]  ;;  %v21952_v11 = vpack.c.bf16 %v16001_v50, %v16000_v0  ;;  %v16002_v49 = vld [vmem:[%s28809_s5 + $0x120] sm:$0xff] }
 0x582   : > { %21911 = vmatpush3.bf16.msra.mxu0 %v21910_v20  ;;  %v21976_v53 = vpack.c.bf16 %v16017_v4, %v16016_v28  ;;  %v16003_v39 = vld [vmem:[%s28809_s5 + $0x128] sm:$0xff]  ;;  %v16018_v57 = vld [vmem:[%s28809_s5 + $0x1a0] sm:$0xff]  ;;  %v16004_v63 = vld [vmem:[%s28809_s5 + $0x130] sm:$0xff] }
 0x583   : > { %21935 = vmatpush3.bf16.msra.mxu1 %v21934_v22  ;;  %21912 = vmatprep.subr.bf16.mxu0 %v23530_v54  ;;  %v16019_v31 = vld [vmem:[%s28809_s5 + $0x1a8] sm:$0xff]  ;;  %v21955_v29 = vpack.c.bf16 %v16003_v39, %v16002_v49  ;;  %v16005_v52 = vld [vmem:[%s28809_s5 + $0x138] sm:$0xff]  ;;  %v16020_v5 = vld [vmem:[%s28809_s5 + $0x1b0] sm:$0xff] }
 0x584   : > { %21936 = vmatprep.subr.bf16.mxu1 %v23530_v54  ;;  %v21979_v9 = vpack.c.bf16 %v16019_v31, %v16018_v57  ;;  %v16021_v2 = vld [vmem:[%s28809_s5 + $0x1b8] sm:$0xff]  ;;  %v21958_v27 = vpack.c.bf16 %v16005_v52, %v16004_v63  ;;  %v16006_v37 = vld [vmem:[%s28809_s5 + $0x140] sm:$0xff]  ;;  %v16007_v13 = vld [vmem:[%s28809_s5 + $0x148] sm:$0xff] }
 0x585   : > { %v21982_v41 = vpack.c.bf16 %v16021_v2, %v16020_v5  ;;  %v16022_v15 = vld [vmem:[%s28809_s5 + $0x1c0] sm:$0xff]  ;;  %v16023_v12 = vld [vmem:[%s28809_s5 + $0x1c8] sm:$0xff]  ;;  %v21961_v26 = vpack.c.bf16 %v16007_v13, %v16006_v37  ;;  %v16008_v8 = vld [vmem:[%s28809_s5 + $0x150] sm:$0xff] }
 0x586   : > { %21914 = vmatpush3.bf16.msra.mxu0 %v21913_v46  ;;  %v21985_v38 = vpack.c.bf16 %v16023_v12, %v16022_v15  ;;  %v16009_v47 = vld [vmem:[%s28809_s5 + $0x158] sm:$0xff]  ;;  %v16024_v30 = vld [vmem:[%s28809_s5 + $0x1d0] sm:$0xff]  ;;  %v16010_v21 = vld [vmem:[%s28809_s5 + $0x160] sm:$0xff] }
 0x587   : > { %21938 = vmatpush3.bf16.msra.mxu1 %v21937_v56  ;;  %21915 = vmatprep.subr.bf16.mxu0 %v23530_v54  ;;  %v16025_v16 = vld [vmem:[%s28809_s5 + $0x1d8] sm:$0xff]  ;;  %v21964_v20 = vpack.c.bf16 %v16009_v47, %v16008_v8  ;;  %v16011_v19 = vld [vmem:[%s28809_s5 + $0x168] sm:$0xff]  ;;  %v16026_v60 = vld [vmem:[%s28809_s5 + $0x1e0] sm:$0xff] }
 0x588   : > { %21939 = vmatprep.subr.bf16.mxu1 %v23530_v54  ;;  %v21988_v22 = vpack.c.bf16 %v16025_v16, %v16024_v30  ;;  %v16027_v58 = vld [vmem:[%s28809_s5 + $0x1e8] sm:$0xff]  ;;  %v21967_v46 = vpack.c.bf16 %v16011_v19, %v16010_v21  ;;  %v16012_v6 = vld [vmem:[%s28809_s5 + $0x170] sm:$0xff]  ;;  %v16013_v17 = vld [vmem:[%s28809_s5 + $0x178] sm:$0xff] }
 0x589   : > { %v21991_v56 = vpack.c.bf16 %v16027_v58, %v16026_v60  ;;  %v16028_v62 = vld [vmem:[%s28809_s5 + $0x1f0] sm:$0xff]  ;;  %v16029_v3 = vld [vmem:[%s28809_s5 + $0x1f8] sm:$0xff]  ;;  %v16030_v42 = vld [vmem:[%s28809_s5 + $0x200] sm:$0xff] }
 0x58a   : > { %21917 = vmatpush3.bf16.msra.mxu0 %v21916_v7  ;;  %v21970_v7 = vpack.c.bf16 %v16013_v17, %v16012_v6  ;;  %v16031_v34 = vld [vmem:[%s28809_s5 + $0x208] sm:$0xff]  ;;  %v16046_v45 = vld [vmem:[%s28809_s5 + $0x280] sm:$0xff]  ;;  %v16032_v44 = vld [vmem:[%s28809_s5 + $0x210] sm:$0xff] }
 0x58b   : > { %21941 = vmatpush3.bf16.msra.mxu1 %v21940_v14  ;;  %21918 = vmatprep.subr.bf16.mxu0 %v23530_v54  ;;  %v21994_v14 = vpack.c.bf16 %v16029_v3, %v16028_v62  ;;  %v16047_v10 = vld [vmem:[%s28809_s5 + $0x288] sm:$0xff]  ;;  %v16033_v23 = vld [vmem:[%s28809_s5 + $0x218] sm:$0xff]  ;;  %v16034_v61 = vld [vmem:[%s28809_s5 + $0x220] sm:$0xff] }
 0x58c   : > { %21942 = vmatprep.subr.bf16.mxu1 %v23530_v54  ;;  %v11754_v33 = vld [vmem:[#allocation3 + $0xc] sm:$0x1]  ;;  %v22021_v1 = vpack.c.bf16 %v16047_v10, %v16046_v45  ;;  %v22000_v51 = vpack.c.bf16 %v16033_v23, %v16032_v44  ;;  %v16036_v0 = vld [vmem:[%s28809_s5 + $0x230] sm:$0xff]  ;;  %v16037_v50 = vld [vmem:[%s28809_s5 + $0x238] sm:$0xff] }
 0x58d   : > { %v16035_v25 = vld [vmem:[%s28809_s5 + $0x228] sm:$0xff]  ;;  %v16052_v28 = vld [vmem:[%s28809_s5 + $0x2b0] sm:$0xff]  ;;  %v16053_v4 = vld [vmem:[%s28809_s5 + $0x2b8] sm:$0xff] }
 0x58e   : > { %21920 = vmatpush3.bf16.msra.mxu0 %v21919_v59  ;;  %v11665_v59 = vld [vmem:[#allocation3 + $0x8] sm:$0x1]  ;;  %v16038_v49 = vld [vmem:[%s28809_s5 + $0x240] sm:$0xff]  ;;  %v16040_v63 = vld [vmem:[%s28809_s5 + $0x250] sm:$0xff] }
 0x58f   : > { %21944 = vmatpush3.bf16.msra.mxu1 %v21943_v32  ;;  %21921 = vmatprep.subr.bf16.mxu0 %v23530_v54  ;;  %v21997_v32 = vpack.c.bf16 %v16031_v34, %v16030_v42  ;;  %v16039_v39 = vld [vmem:[%s28809_s5 + $0x248] sm:$0xff]  ;;  %v16054_v57 = vld [vmem:[%s28809_s5 + $0x2c0] sm:$0xff]  ;;  %v16041_v52 = vld [vmem:[%s28809_s5 + $0x258] sm:$0xff] }
 0x590   : > { %21945 = vmatprep.subr.bf16.mxu1 %v23530_v54  ;;  %v16055_v31 = vld [vmem:[%s28809_s5 + $0x2c8] sm:$0xff]  ;;  %v16056_v5 = vld [vmem:[%s28809_s5 + $0x2d0] sm:$0xff]  ;;  %v16057_v2 = vld [vmem:[%s28809_s5 + $0x2d8] sm:$0xff] }
 0x591   : > { %v16042_v37 = vld [vmem:[%s28809_s5 + $0x260] sm:$0xff]  ;;  %v16043_v13 = vld [vmem:[%s28809_s5 + $0x268] sm:$0xff]  ;;  %v16044_v8 = vld [vmem:[%s28809_s5 + $0x270] sm:$0xff] }
 0x592   : > { %21923 = vmatpush3.bf16.msra.mxu0 %v21922_v35  ;;  %v16048_v35 = vld [vmem:[%s28809_s5 + $0x290] sm:$0xff]  ;;  %v16058_v15 = vld [vmem:[%s28809_s5 + $0x2e0] sm:$0xff]  ;;  %v16059_v12 = vld [vmem:[%s28809_s5 + $0x2e8] sm:$0xff] }
 0x593   : > { %21947 = vmatpush3.bf16.msra.mxu1 %v21946_v55  ;;  %21948 = vmatprep.subr.bf16.mxu0 %v23530_v54  ;;  %v16049_v55 = vld [vmem:[%s28809_s5 + $0x298] sm:$0xff]  ;;  %v16060_v30 = vld [vmem:[%s28809_s5 + $0x2f0] sm:$0xff]  ;;  %v16062_v21 = vld [vmem:[%s28809_s5 + $0x300] sm:$0xff] }
 0x594   : > { %21972 = vmatprep.subr.bf16.mxu1 %v23530_v54  ;;  %v22024_v18 = vpack.c.bf16 %v16049_v55, %v16048_v35  ;;  %v16045_v47 = vld [vmem:[%s28809_s5 + $0x278] sm:$0xff]  ;;  %v16063_v19 = vld [vmem:[%s28809_s5 + $0x308] sm:$0xff]  ;;  %v16078_v60 = vld [vmem:[%s28809_s5 + $0x380] sm:$0xff] }
 0x595   : > { %20153 = vmatmul.mubr.f32.vlgmr.msra.gmra.mrb[0].mxu0 %v11507_v36  ;;  %v16050_v36 = vld [vmem:[%s28809_s5 + $0x2a0] sm:$0xff]  ;;  %v16061_v16 = vld [vmem:[%s28809_s5 + $0x2f8] sm:$0xff]  ;;  %v16079_v58 = vld [vmem:[%s28809_s5 + $0x388] sm:$0xff] }
 0x596   : > { %20188 = vmatmul.mubr.f32.vlgmr.msra.gmra.mrb[0].mxu1 %v11490_v43  ;;  %21950 = vmatpush3.bf16.msra.mxu0 %v21949_v40  ;;  %v16051_v40 = vld [vmem:[%s28809_s5 + $0x2a8] sm:$0xff]  ;;  %v22003_v43 = vpack.c.bf16 %v16035_v25, %v16034_v61  ;;  %v11932_v6 = vld [vmem:[#allocation3 + $0x80] sm:$0x1]  ;;  %v22069_v17 = vpack.c.bf16 %v16079_v58, %v16078_v60  ;;  %v16064_v62 = vld [vmem:[%s28809_s5 + $0x310] sm:$0xff] }
 0x597   : > { %21974 = vmatpush3.bf16.msra.mxu1 %v21973_v24  ;;  %21951 = vmatprep.subr.bf16.mxu0 %v23530_v54  ;;  %v22027_v24 = vpack.c.bf16 %v16051_v40, %v16050_v36  ;;  %v16065_v3 = vld [vmem:[%s28809_s5 + $0x318] sm:$0xff]  ;;  %v16066_v45 = vld [vmem:[%s28809_s5 + $0x320] sm:$0xff]  ;;  %v16067_v10 = vld [vmem:[%s28809_s5 + $0x328] sm:$0xff] }
 0x598   : > { %21975 = vmatprep.subr.bf16.mxu1 %v23530_v54  ;;  %20222 = vmatprep.mubr.msk.f32.mxu0 %vm23531_vm1, %v28954_v48  ;;  %v22048_v42 = vpack.c.bf16 %v16065_v3, %v16064_v62  ;;  %v16068_v44 = vld [vmem:[%s28809_s5 + $0x330] sm:$0xff]  ;;  %v16069_v23 = vld [vmem:[%s28809_s5 + $0x338] sm:$0xff]  ;;  %v16070_v61 = vld [vmem:[%s28809_s5 + $0x340] sm:$0xff] }
 0x599   : > { %20257 = vmatprep.mubr.msk.f32.mxu1 %vm23531_vm1, %v28954_v48  ;;  %v16084_v35 = vld [vmem:[%s28809_s5 + $0x3b0] sm:$0xff]  ;;  %v16085_v55 = vld [vmem:[%s28809_s5 + $0x3b8] sm:$0xff]  ;;  %v16071_v25 = vld [vmem:[%s28809_s5 + $0x348] sm:$0xff] }
 0x59a   : > { %21953 = vmatpush3.bf16.msra.mxu0 %v21952_v11  ;;  %v22006_v11 = vpack.c.bf16 %v16037_v50, %v16036_v0  ;;  %v16086_v36 = vld [vmem:[%s28809_s5 + $0x3c0] sm:$0xff]  ;;  %v16087_v40 = vld [vmem:[%s28809_s5 + $0x3c8] sm:$0xff]  ;;  %v16072_v0 = vld [vmem:[%s28809_s5 + $0x350] sm:$0xff] }
 0x59b   : > { %21977 = vmatpush3.bf16.msra.mxu1 %v21976_v53  ;;  %21954 = vmatprep.subr.bf16.mxu0 %v23530_v54  ;;  %v22030_v53 = vpack.c.bf16 %v16053_v4, %v16052_v28  ;;  %v16073_v50 = vld [vmem:[%s28809_s5 + $0x358] sm:$0xff]  ;;  %v16088_v28 = vld [vmem:[%s28809_s5 + $0x3d0] sm:$0xff]  ;;  %v16098_v60 = vld [vmem:[%s28809_s5 + $0x420] sm:$0xff] }
 0x59c   : > { %21978 = vmatprep.subr.bf16.mxu1 %v23530_v54  ;;  %v16089_v4 = vld [vmem:[%s28809_s5 + $0x3d8] sm:$0xff]  ;;  %v16099_v58 = vld [vmem:[%s28809_s5 + $0x428] sm:$0xff]  ;;  %v16100_v62 = vld [vmem:[%s28809_s5 + $0x430] sm:$0xff] }
 0x59d   : > { %v16101_v3 = vld [vmem:[%s28809_s5 + $0x438] sm:$0xff] }
 0x59e   : > { %21956 = vmatpush3.bf16.msra.mxu0 %v21955_v29  ;;  %v22009_v29 = vpack.c.bf16 %v16039_v39, %v16038_v49  ;;  %v16074_v49 = vld [vmem:[%s28809_s5 + $0x360] sm:$0xff]  ;;  %v16075_v39 = vld [vmem:[%s28809_s5 + $0x368] sm:$0xff] }
 0x59f   : > { %21980 = vmatpush3.bf16.msra.mxu1 %v21979_v9  ;;  %21957 = vmatprep.subr.bf16.mxu0 %v23530_v54  ;;  %v22033_v9 = vpack.c.bf16 %v16055_v31, %v16054_v57  ;;  %v16090_v57 = vld [vmem:[%s28809_s5 + $0x3e0] sm:$0xff]  ;;  %v16091_v31 = vld [vmem:[%s28809_s5 + $0x3e8] sm:$0xff] }
 0x5a0   : > { %21981 = vmatprep.subr.bf16.mxu1 %v23530_v54 }
 0x5a2   : > { %21959 = vmatpush3.bf16.msra.mxu0 %v21958_v27  ;;  %v22012_v27 = vpack.c.bf16 %v16041_v52, %v16040_v63  ;;  %v16076_v63 = vld [vmem:[%s28809_s5 + $0x370] sm:$0xff]  ;;  %v16077_v52 = vld [vmem:[%s28809_s5 + $0x378] sm:$0xff] }
 0x5a3   : > { %21983 = vmatpush3.bf16.msra.mxu1 %v21982_v41  ;;  %21960 = vmatprep.subr.bf16.mxu0 %v23530_v54  ;;  %v22036_v41 = vpack.c.bf16 %v16057_v2, %v16056_v5  ;;  %v16092_v5 = vld [vmem:[%s28809_s5 + $0x3f0] sm:$0xff]  ;;  %v16093_v2 = vld [vmem:[%s28809_s5 + $0x3f8] sm:$0xff] }
 0x5a4   : > { %21984 = vmatprep.subr.bf16.mxu1 %v23530_v54 }
 0x5a6   : > { %21962 = vmatpush3.bf16.msra.mxu0 %v21961_v26  ;;  %v22015_v26 = vpack.c.bf16 %v16043_v13, %v16042_v37  ;;  %v16094_v37 = vld [vmem:[%s28809_s5 + $0x400] sm:$0xff]  ;;  %v16095_v13 = vld [vmem:[%s28809_s5 + $0x408] sm:$0xff] }
 0x5a7   : > { %21986 = vmatpush3.bf16.msra.mxu1 %v21985_v38  ;;  %21963 = vmatprep.subr.bf16.mxu0 %v23530_v54  ;;  %v22039_v38 = vpack.c.bf16 %v16059_v12, %v16058_v15  ;;  %v16110_v15 = vld [vmem:[%s28809_s5 + $0x480] sm:$0xff]  ;;  %v16111_v12 = vld [vmem:[%s28809_s5 + $0x488] sm:$0xff] }
 0x5a8   : > { %21987 = vmatprep.subr.bf16.mxu1 %v23530_v54 }
 0x5aa   : > { %21965 = vmatpush3.bf16.msra.mxu0 %v21964_v20  ;;  %v22018_v20 = vpack.c.bf16 %v16045_v47, %v16044_v8  ;;  %v12110_v8 = vld [vmem:[#allocation3 + $0x88] sm:$0x1]  ;;  %v22117_v47 = vpack.c.bf16 %v16111_v12, %v16110_v15  ;;  %v16130_v15 = vld [vmem:[%s28809_s5 + $0x520] sm:$0xff] }
 0x5ab   : > { %21989 = vmatpush3.bf16.msra.mxu1 %v21988_v22  ;;  %21966 = vmatprep.subr.bf16.mxu0 %v23530_v54  ;;  %v22042_v22 = vpack.c.bf16 %v16061_v16, %v16060_v30  ;;  %v16096_v30 = vld [vmem:[%s28809_s5 + $0x410] sm:$0xff]  ;;  %v16097_v16 = vld [vmem:[%s28809_s5 + $0x418] sm:$0xff]  ;;  %v16131_v12 = vld [vmem:[%s28809_s5 + $0x528] sm:$0xff] }
 0x5ac   : > { %21990 = vmatprep.subr.bf16.mxu1 %v23530_v54 }
 0x5ae   : > { %21968 = vmatpush3.bf16.msra.mxu0 %v21967_v46  ;;  %v11843_v46 = vld [vmem:[#allocation3 + $0x10] sm:$0x1] }
 0x5af   : > { %21992 = vmatpush3.bf16.msra.mxu1 %v21991_v56  ;;  %21969 = vmatprep.subr.bf16.mxu0 %v23530_v54  ;;  %v22045_v56 = vpack.c.bf16 %v16063_v19, %v16062_v21  ;;  %v22096_v21 = vpack.c.bf16 %v16097_v16, %v16096_v30  ;;  %v16132_v30 = vld [vmem:[%s28809_s5 + $0x530] sm:$0xff]  ;;  %v16133_v16 = vld [vmem:[%s28809_s5 + $0x538] sm:$0xff] }
 0x5b0   : > { %21993 = vmatprep.subr.bf16.mxu1 %v23530_v54 }
 0x5b2   : > { %21971 = vmatpush3.bf16.msra.mxu0 %v21970_v7  ;;  %v16080_v7 = vld [vmem:[%s28809_s5 + $0x390] sm:$0xff] }
 0x5b3   : > { %21995 = vmatpush3.bf16.msra.mxu1 %v21994_v14  ;;  %21996 = vmatprep.subr.bf16.mxu0 %v23530_v54  ;;  %v16081_v14 = vld [vmem:[%s28809_s5 + $0x398] sm:$0xff] }
 0x5b4   : > { %22020 = vmatprep.subr.bf16.mxu1 %v23530_v54  ;;  %v22072_v34 = vpack.c.bf16 %v16081_v14, %v16080_v7  ;;  %v16116_v7 = vld [vmem:[%s28809_s5 + $0x4b0] sm:$0xff]  ;;  %v16117_v14 = vld [vmem:[%s28809_s5 + $0x4b8] sm:$0xff] }
 0x5b5   : > { %20223 = vmatmul.mubr.f32.vlgmr.msra.gmra.mrb[2].mxu0 %v11665_v59  ;;  %v16082_v59 = vld [vmem:[%s28809_s5 + $0x3a0] sm:$0xff] }
 0x5b6   : > { %21998 = vmatpush3.bf16.msra.mxu0 %v21997_v32  ;;  %20258 = vmatmul.mubr.f32.vlgmr.msra.gmra.mrb[2].mxu1 %v11754_v33  ;;  %v16083_v32 = vld [vmem:[%s28809_s5 + $0x3a8] sm:$0xff]  ;;  %v22051_v33 = vpack.c.bf16 %v16067_v10, %v16066_v45  ;;  %v16102_v45 = vld [vmem:[%s28809_s5 + $0x440] sm:$0xff] }
 0x5b7   : > { %22022 = vmatpush3.bf16.msra.mxu1 %v22021_v1  ;;  %21999 = vmatprep.subr.bf16.mxu0 %v23530_v54  ;;  %v22075_v1 = vpack.c.bf16 %v16083_v32, %v16082_v59  ;;  %v16103_v10 = vld [vmem:[%s28809_s5 + $0x448] sm:$0xff]  ;;  %v16118_v59 = vld [vmem:[%s28809_s5 + $0x4c0] sm:$0xff] }
 0x5b8   : > { %22023 = vmatprep.subr.bf16.mxu1 %v23530_v54  ;;  %20292 = vmatprep.mubr.msk.f32.mxu0 %vm23531_vm1, %v28954_v48  ;;  %v16119_v32 = vld [vmem:[%s28809_s5 + $0x4c8] sm:$0xff] }
 0x5b9   : > { %20327 = vmatprep.mubr.msk.f32.mxu1 %vm23531_vm1, %v28954_v48 }
 0x5ba   : > { %22001 = vmatpush3.bf16.msra.mxu0 %v22000_v51  ;;  %v22054_v51 = vpack.c.bf16 %v16069_v23, %v16068_v44  ;;  %v16104_v44 = vld [vmem:[%s28809_s5 + $0x450] sm:$0xff]  ;;  %v16105_v23 = vld [vmem:[%s28809_s5 + $0x458] sm:$0xff] }
 0x5bb   : > { %22025 = vmatpush3.bf16.msra.mxu1 %v22024_v18  ;;  %22002 = vmatprep.subr.bf16.mxu0 %v23530_v54  ;;  %v22078_v18 = vpack.c.bf16 %v16085_v55, %v16084_v35  ;;  %v16120_v35 = vld [vmem:[%s28809_s5 + $0x4d0] sm:$0xff]  ;;  %v16121_v55 = vld [vmem:[%s28809_s5 + $0x4d8] sm:$0xff] }
 0x5bc   : > { %22026 = vmatprep.subr.bf16.mxu1 %v23530_v54 }
 0x5be   : > { %22004 = vmatpush3.bf16.msra.mxu0 %v22003_v43  ;;  %v22057_v43 = vpack.c.bf16 %v16071_v25, %v16070_v61  ;;  %v16106_v61 = vld [vmem:[%s28809_s5 + $0x460] sm:$0xff]  ;;  %v16107_v25 = vld [vmem:[%s28809_s5 + $0x468] sm:$0xff] }
 0x5bf   : > { %22028 = vmatpush3.bf16.msra.mxu1 %v22027_v24  ;;  %22005 = vmatprep.subr.bf16.mxu0 %v23530_v54  ;;  %v22081_v24 = vpack.c.bf16 %v16087_v40, %v16086_v36  ;;  %v16122_v36 = vld [vmem:[%s28809_s5 + $0x4e0] sm:$0xff]  ;;  %v16123_v40 = vld [vmem:[%s28809_s5 + $0x4e8] sm:$0xff] }
 0x5c0   : > { %22029 = vmatprep.subr.bf16.mxu1 %v23530_v54 }
 0x5c2   : > { %22007 = vmatpush3.bf16.msra.mxu0 %v22006_v11  ;;  %v22060_v11 = vpack.c.bf16 %v16073_v50, %v16072_v0  ;;  %v16108_v0 = vld [vmem:[%s28809_s5 + $0x470] sm:$0xff]  ;;  %v16109_v50 = vld [vmem:[%s28809_s5 + $0x478] sm:$0xff] }
 0x5c3   : > { %22031 = vmatpush3.bf16.msra.mxu1 %v22030_v53  ;;  %22008 = vmatprep.subr.bf16.mxu0 %v23530_v54  ;;  %v22084_v53 = vpack.c.bf16 %v16089_v4, %v16088_v28  ;;  %v16124_v28 = vld [vmem:[%s28809_s5 + $0x4f0] sm:$0xff]  ;;  %v16125_v4 = vld [vmem:[%s28809_s5 + $0x4f8] sm:$0xff] }
 0x5c4   : > { %22032 = vmatprep.subr.bf16.mxu1 %v23530_v54 }
 0x5c6   : > { %22010 = vmatpush3.bf16.msra.mxu0 %v22009_v29  ;;  %v22063_v29 = vpack.c.bf16 %v16075_v39, %v16074_v49  ;;  %v16126_v49 = vld [vmem:[%s28809_s5 + $0x500] sm:$0xff]  ;;  %v16127_v39 = vld [vmem:[%s28809_s5 + $0x508] sm:$0xff] }
 0x5c7   : > { %22034 = vmatpush3.bf16.msra.mxu1 %v22033_v9  ;;  %22011 = vmatprep.subr.bf16.mxu0 %v23530_v54  ;;  %v22087_v9 = vpack.c.bf16 %v16091_v31, %v16090_v57  ;;  %v16142_v57 = vld [vmem:[%s28809_s5 + $0x580] sm:$0xff]  ;;  %v16143_v31 = vld [vmem:[%s28809_s5 + $0x588] sm:$0xff] }
 0x5c8   : > { %22035 = vmatprep.subr.bf16.mxu1 %v23530_v54 }
 0x5ca   : > { %22013 = vmatpush3.bf16.msra.mxu0 %v22012_v27  ;;  %v22066_v27 = vpack.c.bf16 %v16077_v52, %v16076_v63  ;;  %v12288_v63 = vld [vmem:[#allocation3 + $0x90] sm:$0x1]  ;;  %v22165_v52 = vpack.c.bf16 %v16143_v31, %v16142_v57  ;;  %v16162_v57 = vld [vmem:[%s28809_s5 + $0x620] sm:$0xff]  ;;  %v16163_v31 = vld [vmem:[%s28809_s5 + $0x628] sm:$0xff] }
 0x5cb   : > { %22037 = vmatpush3.bf16.msra.mxu1 %v22036_v41  ;;  %22014 = vmatprep.subr.bf16.mxu0 %v23530_v54  ;;  %v22090_v41 = vpack.c.bf16 %v16093_v2, %v16092_v5  ;;  %v16128_v5 = vld [vmem:[%s28809_s5 + $0x510] sm:$0xff]  ;;  %v16129_v2 = vld [vmem:[%s28809_s5 + $0x518] sm:$0xff] }
 0x5cc   : > { %22038 = vmatprep.subr.bf16.mxu1 %v23530_v54 }
 0x5ce   : > { %22016 = vmatpush3.bf16.msra.mxu0 %v22015_v26  ;;  %v12021_v26 = vld [vmem:[#allocation3 + $0x84] sm:$0x1] }
 0x5cf   : > { %22040 = vmatpush3.bf16.msra.mxu1 %v22039_v38  ;;  %22017 = vmatprep.subr.bf16.mxu0 %v23530_v54  ;;  %v22093_v38 = vpack.c.bf16 %v16095_v13, %v16094_v37  ;;  %v22144_v37 = vpack.c.bf16 %v16129_v2, %v16128_v5  ;;  %v16164_v5 = vld [vmem:[%s28809_s5 + $0x630] sm:$0xff]  ;;  %v16165_v2 = vld [vmem:[%s28809_s5 + $0x638] sm:$0xff] }
 0x5d0   : > { %22041 = vmatprep.subr.bf16.mxu1 %v23530_v54 }
 0x5d2   : > { %22019 = vmatpush3.bf16.msra.mxu0 %v22018_v20  ;;  %v16112_v20 = vld [vmem:[%s28809_s5 + $0x490] sm:$0xff] }
 0x5d3   : > { %22043 = vmatpush3.bf16.msra.mxu1 %v22042_v22  ;;  %22044 = vmatprep.subr.bf16.mxu0 %v23530_v54  ;;  %v16113_v22 = vld [vmem:[%s28809_s5 + $0x498] sm:$0xff] }
 0x5d4   : > { %22068 = vmatprep.subr.bf16.mxu1 %v23530_v54  ;;  %v22120_v19 = vpack.c.bf16 %v16113_v22, %v16112_v20  ;;  %v16148_v20 = vld [vmem:[%s28809_s5 + $0x5b0] sm:$0xff]  ;;  %v16149_v22 = vld [vmem:[%s28809_s5 + $0x5b8] sm:$0xff] }
 0x5d5   : > { %20293 = vmatmul.mubr.f32.vlgmr.msra.gmra.mrb[4].mxu0 %v11843_v46  ;;  %v16114_v46 = vld [vmem:[%s28809_s5 + $0x4a0] sm:$0xff] }
 0x5d6   : > { %22046 = vmatpush3.bf16.msra.mxu0 %v22045_v56  ;;  %20328 = vmatmul.mubr.f32.vlgmr.msra.gmra.mrb[4].mxu1 %v11932_v6  ;;  %v16115_v56 = vld [vmem:[%s28809_s5 + $0x4a8] sm:$0xff]  ;;  %v22099_v6 = vpack.c.bf16 %v16099_v58, %v16098_v60  ;;  %v16134_v60 = vld [vmem:[%s28809_s5 + $0x540] sm:$0xff] }
 0x5d7   : > { %22070 = vmatpush3.bf16.msra.mxu1 %v22069_v17  ;;  %22047 = vmatprep.subr.bf16.mxu0 %v23530_v54  ;;  %v22123_v17 = vpack.c.bf16 %v16115_v56, %v16114_v46  ;;  %v16135_v58 = vld [vmem:[%s28809_s5 + $0x548] sm:$0xff]  ;;  %v16150_v46 = vld [vmem:[%s28809_s5 + $0x5c0] sm:$0xff] }
 0x5d8   : > { %22071 = vmatprep.subr.bf16.mxu1 %v23530_v54  ;;  %20362 = vmatprep.mubr.msk.f32.mxu0 %vm23531_vm1, %v28954_v48  ;;  %v16151_v56 = vld [vmem:[%s28809_s5 + $0x5c8] sm:$0xff] }
 0x5d9   : > { %20397 = vmatprep.mubr.msk.f32.mxu1 %vm23531_vm1, %v28954_v48 }
 0x5da   : > { %22049 = vmatpush3.bf16.msra.mxu0 %v22048_v42  ;;  %v22102_v42 = vpack.c.bf16 %v16101_v3, %v16100_v62  ;;  %v16136_v62 = vld [vmem:[%s28809_s5 + $0x550] sm:$0xff]  ;;  %v16137_v3 = vld [vmem:[%s28809_s5 + $0x558] sm:$0xff] }
 0x5db   : > { %22073 = vmatpush3.bf16.msra.mxu1 %v22072_v34  ;;  %22050 = vmatprep.subr.bf16.mxu0 %v23530_v54  ;;  %v22126_v34 = vpack.c.bf16 %v16117_v14, %v16116_v7  ;;  %v16152_v7 = vld [vmem:[%s28809_s5 + $0x5d0] sm:$0xff]  ;;  %v16153_v14 = vld [vmem:[%s28809_s5 + $0x5d8] sm:$0xff] }
 0x5dc   : > { %22074 = vmatprep.subr.bf16.mxu1 %v23530_v54 }
 0x5de   : > { %22052 = vmatpush3.bf16.msra.mxu0 %v22051_v33  ;;  %v22105_v33 = vpack.c.bf16 %v16103_v10, %v16102_v45  ;;  %v16138_v45 = vld [vmem:[%s28809_s5 + $0x560] sm:$0xff]  ;;  %v16139_v10 = vld [vmem:[%s28809_s5 + $0x568] sm:$0xff] }
 0x5df   : > { %22076 = vmatpush3.bf16.msra.mxu1 %v22075_v1  ;;  %22053 = vmatprep.subr.bf16.mxu0 %v23530_v54  ;;  %v22129_v1 = vpack.c.bf16 %v16119_v32, %v16118_v59  ;;  %v16154_v59 = vld [vmem:[%s28809_s5 + $0x5e0] sm:$0xff]  ;;  %v16155_v32 = vld [vmem:[%s28809_s5 + $0x5e8] sm:$0xff] }
 0x5e0   : > { %22077 = vmatprep.subr.bf16.mxu1 %v23530_v54 }
 0x5e2   : > { %22055 = vmatpush3.bf16.msra.mxu0 %v22054_v51  ;;  %v22108_v51 = vpack.c.bf16 %v16105_v23, %v16104_v44  ;;  %v16140_v44 = vld [vmem:[%s28809_s5 + $0x570] sm:$0xff]  ;;  %v16141_v23 = vld [vmem:[%s28809_s5 + $0x578] sm:$0xff] }
 0x5e3   : > { %22079 = vmatpush3.bf16.msra.mxu1 %v22078_v18  ;;  %22056 = vmatprep.subr.bf16.mxu0 %v23530_v54  ;;  %v22132_v18 = vpack.c.bf16 %v16121_v55, %v16120_v35  ;;  %v16156_v35 = vld [vmem:[%s28809_s5 + $0x5f0] sm:$0xff]  ;;  %v16157_v55 = vld [vmem:[%s28809_s5 + $0x5f8] sm:$0xff] }
 0x5e4   : > { %22080 = vmatprep.subr.bf16.mxu1 %v23530_v54 }
 0x5e6   : > { %22058 = vmatpush3.bf16.msra.mxu0 %v22057_v43  ;;  %v22111_v43 = vpack.c.bf16 %v16107_v25, %v16106_v61  ;;  %v16158_v61 = vld [vmem:[%s28809_s5 + $0x600] sm:$0xff]  ;;  %v16159_v25 = vld [vmem:[%s28809_s5 + $0x608] sm:$0xff] }
 0x5e7   : > { %22082 = vmatpush3.bf16.msra.mxu1 %v22081_v24  ;;  %22059 = vmatprep.subr.bf16.mxu0 %v23530_v54  ;;  %v22135_v24 = vpack.c.bf16 %v16123_v40, %v16122_v36  ;;  %v16174_v36 = vld [vmem:[%s28809_s5 + $0x680] sm:$0xff]  ;;  %v16175_v40 = vld [vmem:[%s28809_s5 + $0x688] sm:$0xff] }
 0x5e8   : > { %22083 = vmatprep.subr.bf16.mxu1 %v23530_v54 }
 0x5ea   : > { %22061 = vmatpush3.bf16.msra.mxu0 %v22060_v11  ;;  %v22114_v11 = vpack.c.bf16 %v16109_v50, %v16108_v0  ;;  %v12466_v0 = vld [vmem:[#allocation3 + $0x104] sm:$0x1]  ;;  %v22213_v50 = vpack.c.bf16 %v16175_v40, %v16174_v36  ;;  %v16195_v40 = vld [vmem:[%s28809_s5 + $0x728] sm:$0xff] }
 0x5eb   : > { %22085 = vmatpush3.bf16.msra.mxu1 %v22084_v53  ;;  %22062 = vmatprep.subr.bf16.mxu0 %v23530_v54  ;;  %v22138_v53 = vpack.c.bf16 %v16125_v4, %v16124_v28  ;;  %v16160_v28 = vld [vmem:[%s28809_s5 + $0x610] sm:$0xff]  ;;  %v16161_v4 = vld [vmem:[%s28809_s5 + $0x618] sm:$0xff]  ;;  %v16194_v36 = vld [vmem:[%s28809_s5 + $0x720] sm:$0xff] }
 0x5ec   : > { %22086 = vmatprep.subr.bf16.mxu1 %v23530_v54 }
 0x5ee   : > { %22064 = vmatpush3.bf16.msra.mxu0 %v22063_v29  ;;  %v12199_v29 = vld [vmem:[#allocation3 + $0x8c] sm:$0x1] }
 0x5ef   : > { %22088 = vmatpush3.bf16.msra.mxu1 %v22087_v9  ;;  %22065 = vmatprep.subr.bf16.mxu0 %v23530_v54  ;;  %v22141_v9 = vpack.c.bf16 %v16127_v39, %v16126_v49  ;;  %v22192_v49 = vpack.c.bf16 %v16161_v4, %v16160_v28  ;;  %v16196_v28 = vld [vmem:[%s28809_s5 + $0x730] sm:$0xff]  ;;  %v16197_v4 = vld [vmem:[%s28809_s5 + $0x738] sm:$0xff] }
 0x5f0   : > { %22089 = vmatprep.subr.bf16.mxu1 %v23530_v54 }
 0x5f2   : > { %22067 = vmatpush3.bf16.msra.mxu0 %v22066_v27  ;;  %v16144_v27 = vld [vmem:[%s28809_s5 + $0x590] sm:$0xff] }
 0x5f3   : > { %22091 = vmatpush3.bf16.msra.mxu1 %v22090_v41  ;;  %22092 = vmatprep.subr.bf16.mxu0 %v23530_v54  ;;  %v16145_v41 = vld [vmem:[%s28809_s5 + $0x598] sm:$0xff] }
 0x5f4   : > { %22116 = vmatprep.subr.bf16.mxu1 %v23530_v54  ;;  %v22168_v13 = vpack.c.bf16 %v16145_v41, %v16144_v27  ;;  %v16180_v27 = vld [vmem:[%s28809_s5 + $0x6b0] sm:$0xff]  ;;  %v16181_v41 = vld [vmem:[%s28809_s5 + $0x6b8] sm:$0xff] }
 0x5f5   : > { %20363 = vmatmul.mubr.f32.vlgmr.msra.gmra.mrb[6].mxu0 %v12021_v26  ;;  %v16146_v26 = vld [vmem:[%s28809_s5 + $0x5a0] sm:$0xff] }
 0x5f6   : > { %22094 = vmatpush3.bf16.msra.mxu0 %v22093_v38  ;;  %20398 = vmatmul.mubr.f32.vlgmr.msra.gmra.mrb[6].mxu1 %v12110_v8  ;;  %v16147_v38 = vld [vmem:[%s28809_s5 + $0x5a8] sm:$0xff]  ;;  %v22147_v8 = vpack.c.bf16 %v16131_v12, %v16130_v15  ;;  %v16166_v15 = vld [vmem:[%s28809_s5 + $0x640] sm:$0xff] }
 0x5f7   : > { %22118 = vmatpush3.bf16.msra.mxu1 %v22117_v47  ;;  %22095 = vmatprep.subr.bf16.mxu0 %v23530_v54  ;;  %v22171_v47 = vpack.c.bf16 %v16147_v38, %v16146_v26  ;;  %v16167_v12 = vld [vmem:[%s28809_s5 + $0x648] sm:$0xff]  ;;  %v16182_v26 = vld [vmem:[%s28809_s5 + $0x6c0] sm:$0xff] }
 0x5f8   : > { %22119 = vmatprep.subr.bf16.mxu1 %v23530_v54  ;;  %20432 = vmatprep.mubr.msk.f32.mxu0 %vm23531_vm1, %v28954_v48  ;;  %v16183_v38 = vld [vmem:[%s28809_s5 + $0x6c8] sm:$0xff] }
 0x5f9   : > { %20467 = vmatprep.mubr.msk.f32.mxu1 %vm23531_vm1, %v28954_v48 }
 0x5fa   : > { %22097 = vmatpush3.bf16.msra.mxu0 %v22096_v21  ;;  %v22150_v21 = vpack.c.bf16 %v16133_v16, %v16132_v30  ;;  %v16168_v30 = vld [vmem:[%s28809_s5 + $0x650] sm:$0xff]  ;;  %v16169_v16 = vld [vmem:[%s28809_s5 + $0x658] sm:$0xff] }
 0x5fb   : > { %22121 = vmatpush3.bf16.msra.mxu1 %v22120_v19  ;;  %22098 = vmatprep.subr.bf16.mxu0 %v23530_v54  ;;  %v22174_v19 = vpack.c.bf16 %v16149_v22, %v16148_v20  ;;  %v16184_v20 = vld [vmem:[%s28809_s5 + $0x6d0] sm:$0xff]  ;;  %v16185_v22 = vld [vmem:[%s28809_s5 + $0x6d8] sm:$0xff] }
 0x5fc   : > { %22122 = vmatprep.subr.bf16.mxu1 %v23530_v54 }
 0x5fe   : > { %22100 = vmatpush3.bf16.msra.mxu0 %v22099_v6  ;;  %v22153_v6 = vpack.c.bf16 %v16135_v58, %v16134_v60  ;;  %v16170_v60 = vld [vmem:[%s28809_s5 + $0x660] sm:$0xff]  ;;  %v16171_v58 = vld [vmem:[%s28809_s5 + $0x668] sm:$0xff] }
 0x5ff   : > { %22124 = vmatpush3.bf16.msra.mxu1 %v22123_v17  ;;  %22101 = vmatprep.subr.bf16.mxu0 %v23530_v54  ;;  %v22177_v17 = vpack.c.bf16 %v16151_v56, %v16150_v46  ;;  %v16186_v46 = vld [vmem:[%s28809_s5 + $0x6e0] sm:$0xff]  ;;  %v16187_v56 = vld [vmem:[%s28809_s5 + $0x6e8] sm:$0xff] }
 0x600   : > { %22125 = vmatprep.subr.bf16.mxu1 %v23530_v54 }
 0x602   : > { %22103 = vmatpush3.bf16.msra.mxu0 %v22102_v42  ;;  %v22156_v42 = vpack.c.bf16 %v16137_v3, %v16136_v62  ;;  %v16172_v62 = vld [vmem:[%s28809_s5 + $0x670] sm:$0xff]  ;;  %v16173_v3 = vld [vmem:[%s28809_s5 + $0x678] sm:$0xff] }
 0x603   : > { %22127 = vmatpush3.bf16.msra.mxu1 %v22126_v34  ;;  %22104 = vmatprep.subr.bf16.mxu0 %v23530_v54  ;;  %v22180_v34 = vpack.c.bf16 %v16153_v14, %v16152_v7  ;;  %v16188_v7 = vld [vmem:[%s28809_s5 + $0x6f0] sm:$0xff]  ;;  %v16189_v14 = vld [vmem:[%s28809_s5 + $0x6f8] sm:$0xff] }
 0x604   : > { %22128 = vmatprep.subr.bf16.mxu1 %v23530_v54 }
 0x606   : > { %22106 = vmatpush3.bf16.msra.mxu0 %v22105_v33  ;;  %v22159_v33 = vpack.c.bf16 %v16139_v10, %v16138_v45  ;;  %v16190_v45 = vld [vmem:[%s28809_s5 + $0x700] sm:$0xff]  ;;  %v16191_v10 = vld [vmem:[%s28809_s5 + $0x708] sm:$0xff] }
 0x607   : > { %22130 = vmatpush3.bf16.msra.mxu1 %v22129_v1  ;;  %22107 = vmatprep.subr.bf16.mxu0 %v23530_v54  ;;  %v22183_v1 = vpack.c.bf16 %v16155_v32, %v16154_v59  ;;  %v16206_v59 = vld [vmem:[%s28809_s5 + $0x780] sm:$0xff]  ;;  %v16207_v32 = vld [vmem:[%s28809_s5 + $0x788] sm:$0xff] }
 0x608   : > { %22131 = vmatprep.subr.bf16.mxu1 %v23530_v54 }
 0x60a   : > { %22109 = vmatpush3.bf16.msra.mxu0 %v22108_v51  ;;  %v22162_v51 = vpack.c.bf16 %v16141_v23, %v16140_v44  ;;  %v12644_v44 = vld [vmem:[#allocation3 + $0x10c] sm:$0x1]  ;;  %v22261_v23 = vpack.c.bf16 %v16207_v32, %v16206_v59  ;;  %v16225_v59 = vld [vmem:[%s28809_s5 + $0x818] sm:$0xff]  ;;  %v16240_v32 = vld [vmem:[%s28809_s5 + $0x890] sm:$0xff] }
 0x60b   : > { %22133 = vmatpush3.bf16.msra.mxu1 %v22132_v18  ;;  %22110 = vmatprep.subr.bf16.mxu0 %v23530_v54  ;;  %v22186_v18 = vpack.c.bf16 %v16157_v55, %v16156_v35  ;;  %v16192_v35 = vld [vmem:[%s28809_s5 + $0x710] sm:$0xff]  ;;  %v16193_v55 = vld [vmem:[%s28809_s5 + $0x718] sm:$0xff] }
 0x60c   : > { %22134 = vmatprep.subr.bf16.mxu1 %v23530_v54 }
 0x60e   : > { %22112 = vmatpush3.bf16.msra.mxu0 %v22111_v43  ;;  %v12377_v43 = vld [vmem:[#allocation3 + $0x100] sm:$0x1] }
 0x60f   : > { %22136 = vmatpush3.bf16.msra.mxu1 %v22135_v24  ;;  %22113 = vmatprep.subr.bf16.mxu0 %v23530_v54  ;;  %v22189_v24 = vpack.c.bf16 %v16159_v25, %v16158_v61  ;;  %v22240_v61 = vpack.c.bf16 %v16193_v55, %v16192_v35  ;;  %v16227_v35 = vld [vmem:[%s28809_s5 + $0x828] sm:$0xff]  ;;  %v16242_v55 = vld [vmem:[%s28809_s5 + $0x8a0] sm:$0xff] }
 0x610   : > { %22137 = vmatprep.subr.bf16.mxu1 %v23530_v54 }
 0x612   : > { %22115 = vmatpush3.bf16.msra.mxu0 %v22114_v11  ;;  %v16176_v11 = vld [vmem:[%s28809_s5 + $0x690] sm:$0xff] }
 0x613   : > { %22139 = vmatpush3.bf16.msra.mxu1 %v22138_v53  ;;  %22140 = vmatprep.subr.bf16.mxu0 %v23530_v54  ;;  %v16177_v53 = vld [vmem:[%s28809_s5 + $0x698] sm:$0xff] }
 0x614   : > { %22164 = vmatprep.subr.bf16.mxu1 %v23530_v54  ;;  %v22216_v39 = vpack.c.bf16 %v16177_v53, %v16176_v11  ;;  %v16212_v11 = vld [vmem:[%s28809_s5 + $0x7b0] sm:$0xff]  ;;  %v16213_v53 = vld [vmem:[%s28809_s5 + $0x7b8] sm:$0xff] }
 0x615   : > { %20433 = vmatmul.mubr.f32.vlgmr.msra.gmra.mrb[8].mxu0 %v12199_v29  ;;  %v16178_v29 = vld [vmem:[%s28809_s5 + $0x6a0] sm:$0xff] }
 0x616   : > { %22142 = vmatpush3.bf16.msra.mxu0 %v22141_v9  ;;  %20468 = vmatmul.mubr.f32.vlgmr.msra.gmra.mrb[8].mxu1 %v12288_v63  ;;  %v16179_v9 = vld [vmem:[%s28809_s5 + $0x6a8] sm:$0xff]  ;;  %v22195_v63 = vpack.c.bf16 %v16163_v31, %v16162_v57  ;;  %v16198_v57 = vld [vmem:[%s28809_s5 + $0x740] sm:$0xff] }
 0x617   : > { %22166 = vmatpush3.bf16.msra.mxu1 %v22165_v52  ;;  %22143 = vmatprep.subr.bf16.mxu0 %v23530_v54  ;;  %v22219_v52 = vpack.c.bf16 %v16179_v9, %v16178_v29  ;;  %v16199_v31 = vld [vmem:[%s28809_s5 + $0x748] sm:$0xff]  ;;  %v16214_v29 = vld [vmem:[%s28809_s5 + $0x7c0] sm:$0xff] }
 0x618   : > { %22167 = vmatprep.subr.bf16.mxu1 %v23530_v54  ;;  %20502 = vmatprep.mubr.msk.f32.mxu0 %vm23531_vm1, %v28954_v48  ;;  %v16215_v9 = vld [vmem:[%s28809_s5 + $0x7c8] sm:$0xff] }
 0x619   : > { %20537 = vmatprep.mubr.msk.f32.mxu1 %vm23531_vm1, %v28954_v48 }
 0x61a   : > { %22145 = vmatpush3.bf16.msra.mxu0 %v22144_v37  ;;  %v22198_v37 = vpack.c.bf16 %v16165_v2, %v16164_v5  ;;  %v16200_v5 = vld [vmem:[%s28809_s5 + $0x750] sm:$0xff]  ;;  %v16201_v2 = vld [vmem:[%s28809_s5 + $0x758] sm:$0xff] }
 0x61b   : > { %22169 = vmatpush3.bf16.msra.mxu1 %v22168_v13  ;;  %22146 = vmatprep.subr.bf16.mxu0 %v23530_v54  ;;  %v22222_v13 = vpack.c.bf16 %v16181_v41, %v16180_v27  ;;  %v16216_v27 = vld [vmem:[%s28809_s5 + $0x7d0] sm:$0xff]  ;;  %v16217_v41 = vld [vmem:[%s28809_s5 + $0x7d8] sm:$0xff] }
 0x61c   : > { %22170 = vmatprep.subr.bf16.mxu1 %v23530_v54 }
 0x61e   : > { %22148 = vmatpush3.bf16.msra.mxu0 %v22147_v8  ;;  %v22201_v8 = vpack.c.bf16 %v16167_v12, %v16166_v15  ;;  %v16202_v15 = vld [vmem:[%s28809_s5 + $0x760] sm:$0xff]  ;;  %v16203_v12 = vld [vmem:[%s28809_s5 + $0x768] sm:$0xff] }
 0x61f   : > { %22172 = vmatpush3.bf16.msra.mxu1 %v22171_v47  ;;  %22149 = vmatprep.subr.bf16.mxu0 %v23530_v54  ;;  %v22225_v47 = vpack.c.bf16 %v16183_v38, %v16182_v26  ;;  %v16218_v38 = vld [vmem:[%s28809_s5 + $0x7e0] sm:$0xff] }
 0x620   : > { %22173 = vmatprep.subr.bf16.mxu1 %v23530_v54 }
 0x622   : > { %22151 = vmatpush3.bf16.msra.mxu0 %v22150_v21  ;;  %v22204_v21 = vpack.c.bf16 %v16169_v16, %v16168_v30 }
 0x623   : > { %22175 = vmatpush3.bf16.msra.mxu1 %v22174_v19  ;;  %22152 = vmatprep.subr.bf16.mxu0 %v23530_v54  ;;  %v22228_v19 = vpack.c.bf16 %v16185_v22, %v16184_v20  ;;  %v22255_v20 = vpack.c.bf16 %v16203_v12, %v16202_v15 }
 0x624   : > { %22176 = vmatprep.subr.bf16.mxu1 %v23530_v54 }
 0x626   : > { %22154 = vmatpush3.bf16.msra.mxu0 %v22153_v6  ;;  %v22207_v6 = vpack.c.bf16 %v16171_v58, %v16170_v60  ;;  %v16205_v60 = vld [vmem:[%s28809_s5 + $0x778] sm:$0xff]  ;;  %v16220_v58 = vld [vmem:[%s28809_s5 + $0x7f0] sm:$0xff] }
 0x627   : > { %22178 = vmatpush3.bf16.msra.mxu1 %v22177_v17  ;;  %22155 = vmatprep.subr.bf16.mxu0 %v23530_v54  ;;  %v22231_v17 = vpack.c.bf16 %v16187_v56, %v16186_v46  ;;  %v16221_v46 = vld [vmem:[%s28809_s5 + $0x7f8] sm:$0xff] }
 0x628   : > { %22179 = vmatprep.subr.bf16.mxu1 %v23530_v54 }
 0x62a   : > { %22157 = vmatpush3.bf16.msra.mxu0 %v22156_v42  ;;  %v22210_v42 = vpack.c.bf16 %v16173_v3, %v16172_v62  ;;  %v16223_v62 = vld [vmem:[%s28809_s5 + $0x808] sm:$0xff]  ;;  %v16238_v3 = vld [vmem:[%s28809_s5 + $0x880] sm:$0xff] }
 0x62b   : > { %22181 = vmatpush3.bf16.msra.mxu1 %v22180_v34  ;;  %22158 = vmatprep.subr.bf16.mxu0 %v23530_v54  ;;  %v22234_v34 = vpack.c.bf16 %v16189_v14, %v16188_v7  ;;  %v16239_v7 = vld [vmem:[%s28809_s5 + $0x888] sm:$0xff]  ;;  %v12733_v14 = vld [vmem:[#allocation3 + $0x110] sm:$0x1] }
 0x62c   : > { %22182 = vmatprep.subr.bf16.mxu1 %v23530_v54 }
 0x62e   : > { %22160 = vmatpush3.bf16.msra.mxu0 %v22159_v33  ;;  %v12555_v33 = vld [vmem:[#allocation3 + $0x108] sm:$0x1] }
 0x62f   : > { %22184 = vmatpush3.bf16.msra.mxu1 %v22183_v1  ;;  %22161 = vmatprep.subr.bf16.mxu0 %v23530_v54  ;;  %v22237_v1 = vpack.c.bf16 %v16191_v10, %v16190_v45  ;;  %v22309_v45 = vpack.c.bf16 %v16239_v7, %v16238_v3  ;;  %v16224_v10 = vld [vmem:[%s28809_s5 + $0x810] sm:$0xff]  ;;  %v16257_v7 = vld [vmem:[%s28809_s5 + $0x918] sm:$0xff] }
 0x630   : > { %22185 = vmatprep.subr.bf16.mxu1 %v23530_v54  ;;  %v16256_v3 = vld [vmem:[%s28809_s5 + $0x910] sm:$0xff] }
 0x632   : > { %22163 = vmatpush3.bf16.msra.mxu0 %v22162_v51  ;;  %v16208_v51 = vld [vmem:[%s28809_s5 + $0x790] sm:$0xff] }
 0x633   : > { %22187 = vmatpush3.bf16.msra.mxu1 %v22186_v18  ;;  %22188 = vmatprep.subr.bf16.mxu0 %v23530_v54  ;;  %v16209_v18 = vld [vmem:[%s28809_s5 + $0x798] sm:$0xff] }
 0x634   : > { %22212 = vmatprep.subr.bf16.mxu1 %v23530_v54  ;;  %v22264_v25 = vpack.c.bf16 %v16209_v18, %v16208_v51  ;;  %v16243_v51 = vld [vmem:[%s28809_s5 + $0x8a8] sm:$0xff] }
 0x635   : > { %20503 = vmatmul.mubr.f32.vlgmr.msra.gmra.mrb[10].mxu0 %v12377_v43  ;;  %v16210_v43 = vld [vmem:[%s28809_s5 + $0x7a0] sm:$0xff] }
 0x636   : > { %22190 = vmatpush3.bf16.msra.mxu0 %v22189_v24  ;;  %20538 = vmatmul.mubr.f32.vlgmr.msra.gmra.mrb[10].mxu1 %v12466_v0  ;;  %v16211_v24 = vld [vmem:[%s28809_s5 + $0x7a8] sm:$0xff]  ;;  %v22243_v0 = vpack.c.bf16 %v16195_v40, %v16194_v36  ;;  %v16229_v36 = vld [vmem:[%s28809_s5 + $0x838] sm:$0xff]  ;;  %v16244_v40 = vld [vmem:[%s28809_s5 + $0x8b0] sm:$0xff] }
 0x637   : > { %22214 = vmatpush3.bf16.msra.mxu1 %v22213_v50  ;;  %22191 = vmatprep.subr.bf16.mxu0 %v23530_v54  ;;  %v22267_v50 = vpack.c.bf16 %v16211_v24, %v16210_v43  ;;  %v16245_v43 = vld [vmem:[%s28809_s5 + $0x8b8] sm:$0xff] }
 0x638   : > { %22215 = vmatprep.subr.bf16.mxu1 %v23530_v54  ;;  %20572 = vmatprep.mubr.msk.f32.mxu0 %vm23531_vm1, %v28954_v48 }
 0x639   : > { %20607 = vmatprep.mubr.msk.f32.mxu1 %vm23531_vm1, %v28954_v48 }
 0x63a   : > { %22193 = vmatpush3.bf16.msra.mxu0 %v22192_v49  ;;  %v22246_v49 = vpack.c.bf16 %v16197_v4, %v16196_v28  ;;  %v16231_v28 = vld [vmem:[%s28809_s5 + $0x848] sm:$0xff]  ;;  %v16246_v4 = vld [vmem:[%s28809_s5 + $0x8c0] sm:$0xff] }
 0x63b   : > { %22217 = vmatpush3.bf16.msra.mxu1 %v22216_v39  ;;  %22194 = vmatprep.subr.bf16.mxu0 %v23530_v54  ;;  %v22270_v39 = vpack.c.bf16 %v16213_v53, %v16212_v11  ;;  %v16247_v11 = vld [vmem:[%s28809_s5 + $0x8c8] sm:$0xff] }
 0x63c   : > { %22218 = vmatprep.subr.bf16.mxu1 %v23530_v54 }
 0x63e   : > { %22196 = vmatpush3.bf16.msra.mxu0 %v22195_v63  ;;  %v22249_v63 = vpack.c.bf16 %v16199_v31, %v16198_v57  ;;  %v16233_v57 = vld [vmem:[%s28809_s5 + $0x858] sm:$0xff]  ;;  %v16248_v31 = vld [vmem:[%s28809_s5 + $0x8d0] sm:$0xff] }
 0x63f   : > { %22220 = vmatpush3.bf16.msra.mxu1 %v22219_v52  ;;  %22197 = vmatprep.subr.bf16.mxu0 %v23530_v54  ;;  %v22273_v52 = vpack.c.bf16 %v16215_v9, %v16214_v29  ;;  %v16249_v29 = vld [vmem:[%s28809_s5 + $0x8d8] sm:$0xff] }
 0x640   : > { %22221 = vmatprep.subr.bf16.mxu1 %v23530_v54 }
 0x642   : > { %22199 = vmatpush3.bf16.msra.mxu0 %v22198_v37  ;;  %v22252_v37 = vpack.c.bf16 %v16201_v2, %v16200_v5  ;;  %v16235_v5 = vld [vmem:[%s28809_s5 + $0x868] sm:$0xff] }
 0x643   : > { %22223 = vmatpush3.bf16.msra.mxu1 %v22222_v13  ;;  %22200 = vmatprep.subr.bf16.mxu0 %v23530_v54  ;;  %v22276_v13 = vpack.c.bf16 %v16217_v41, %v16216_v27  ;;  %v16250_v27 = vld [vmem:[%s28809_s5 + $0x8e0] sm:$0xff]  ;;  %v16251_v41 = vld [vmem:[%s28809_s5 + $0x8e8] sm:$0xff] }
 0x644   : > { %22224 = vmatprep.subr.bf16.mxu1 %v23530_v54 }
 0x646   : > { %22202 = vmatpush3.bf16.msra.mxu0 %v22201_v8  ;;  %v16219_v8 = vld [vmem:[%s28809_s5 + $0x7e8] sm:$0xff] }
 0x647   : > { %22226 = vmatpush3.bf16.msra.mxu1 %v22225_v47  ;;  %22203 = vmatprep.subr.bf16.mxu0 %v23530_v54 }
 0x648   : > { %22227 = vmatprep.subr.bf16.mxu1 %v23530_v54 }
 0x64a   : > { %22205 = vmatpush3.bf16.msra.mxu0 %v22204_v21  ;;  %v22279_v21 = vpack.c.bf16 %v16219_v8, %v16218_v38  ;;  %v22327_v8 = vpack.c.bf16 %v16251_v41, %v16250_v27 }
 0x64b   : > { %22229 = vmatpush3.bf16.msra.mxu1 %v22228_v19  ;;  %22206 = vmatprep.subr.bf16.mxu0 %v23530_v54  ;;  %v16204_v19 = vld [vmem:[%s28809_s5 + $0x770] sm:$0xff] }
 0x64c   : > { %22230 = vmatprep.subr.bf16.mxu1 %v23530_v54  ;;  %v22258_v56 = vpack.c.bf16 %v16205_v60, %v16204_v19  ;;  %v16254_v19 = vld [vmem:[%s28809_s5 + $0x900] sm:$0xff]  ;;  %v16255_v60 = vld [vmem:[%s28809_s5 + $0x908] sm:$0xff] }
 0x64e   : > { %22208 = vmatpush3.bf16.msra.mxu0 %v22207_v6  ;;  %v22282_v6 = vpack.c.bf16 %v16221_v46, %v16220_v58  ;;  %v16270_v58 = vld [vmem:[%s28809_s5 + $0x980] sm:$0xff]  ;;  %v16271_v46 = vld [vmem:[%s28809_s5 + $0x988] sm:$0xff] }
 0x64f   : > { %22232 = vmatpush3.bf16.msra.mxu1 %v22231_v17  ;;  %22209 = vmatprep.subr.bf16.mxu0 %v23530_v54  ;;  %v16222_v17 = vld [vmem:[%s28809_s5 + $0x800] sm:$0xff] }
 0x650   : > { %22233 = vmatprep.subr.bf16.mxu1 %v23530_v54 }
 0x652   : > { %22211 = vmatpush3.bf16.msra.mxu0 %v22210_v42  ;;  %v22285_v42 = vpack.c.bf16 %v16223_v62, %v16222_v17  ;;  %v13000_v17 = vld [vmem:[#allocation3 + $0x188] sm:$0x1]  ;;  %v22357_v62 = vpack.c.bf16 %v16271_v46, %v16270_v58  ;;  %v16288_v58 = vld [vmem:[%s28809_s5 + $0xa10] sm:$0xff]  ;;  %v16289_v46 = vld [vmem:[%s28809_s5 + $0xa18] sm:$0xff] }
 0x653   : > { %22235 = vmatpush3.bf16.msra.mxu1 %v22234_v34  ;;  %22236 = vmatprep.subr.bf16.mxu0 %v23530_v54  ;;  %v12822_v34 = vld [vmem:[#allocation3 + $0x180] sm:$0x1] }
 0x654   : > { %22260 = vmatprep.subr.bf16.mxu1 %v23530_v54 }
 0x655   : > { %20573 = vmatmul.mubr.f32.vlgmr.msra.gmra.mrb[12].mxu0 %v12555_v33  ;;  %v16241_v33 = vld [vmem:[%s28809_s5 + $0x898] sm:$0xff] }
 0x656   : > { %22238 = vmatpush3.bf16.msra.mxu0 %v22237_v1  ;;  %20608 = vmatmul.mubr.f32.vlgmr.msra.gmra.mrb[12].mxu1 %v12644_v44  ;;  %v22288_v1 = vpack.c.bf16 %v16225_v59, %v16224_v10  ;;  %v22312_v44 = vpack.c.bf16 %v16241_v33, %v16240_v32  ;;  %v16258_v10 = vld [vmem:[%s28809_s5 + $0x920] sm:$0xff]  ;;  %v16259_v59 = vld [vmem:[%s28809_s5 + $0x928] sm:$0xff] }
 0x657   : > { %22262 = vmatpush3.bf16.msra.mxu1 %v22261_v23  ;;  %22239 = vmatprep.subr.bf16.mxu0 %v23530_v54  ;;  %v16226_v23 = vld [vmem:[%s28809_s5 + $0x820] sm:$0xff]  ;;  %v16275_v33 = vld [vmem:[%s28809_s5 + $0x9a8] sm:$0xff] }
 0x658   : > { %22263 = vmatprep.subr.bf16.mxu1 %v23530_v54  ;;  %20642 = vmatprep.mubr.msk.f32.mxu0 %vm23531_vm1, %v28954_v48  ;;  %v22291_v18 = vpack.c.bf16 %v16227_v35, %v16226_v23  ;;  %v16274_v32 = vld [vmem:[%s28809_s5 + $0x9a0] sm:$0xff]  ;;  %v16260_v23 = vld [vmem:[%s28809_s5 + $0x930] sm:$0xff]  ;;  %v16261_v35 = vld [vmem:[%s28809_s5 + $0x938] sm:$0xff] }
 0x659   : > { %20677 = vmatprep.mubr.msk.f32.mxu1 %vm23531_vm1, %v28954_v48 }
 0x65a   : > { %22241 = vmatpush3.bf16.msra.mxu0 %v22240_v61  ;;  %v22315_v61 = vpack.c.bf16 %v16243_v51, %v16242_v55  ;;  %v16276_v55 = vld [vmem:[%s28809_s5 + $0x9b0] sm:$0xff]  ;;  %v16277_v51 = vld [vmem:[%s28809_s5 + $0x9b8] sm:$0xff] }
 0x65b   : > { %22265 = vmatpush3.bf16.msra.mxu1 %v22264_v25  ;;  %22242 = vmatprep.subr.bf16.mxu0 %v23530_v54  ;;  %v16228_v25 = vld [vmem:[%s28809_s5 + $0x830] sm:$0xff] }
 0x65c   : > { %22266 = vmatprep.subr.bf16.mxu1 %v23530_v54  ;;  %v22294_v24 = vpack.c.bf16 %v16229_v36, %v16228_v25  ;;  %v16262_v25 = vld [vmem:[%s28809_s5 + $0x940] sm:$0xff]  ;;  %v16263_v36 = vld [vmem:[%s28809_s5 + $0x948] sm:$0xff] }
 0x65e   : > { %22244 = vmatpush3.bf16.msra.mxu0 %v22243_v0  ;;  %v22318_v0 = vpack.c.bf16 %v16245_v43, %v16244_v40  ;;  %v16278_v40 = vld [vmem:[%s28809_s5 + $0x9c0] sm:$0xff]  ;;  %v16279_v43 = vld [vmem:[%s28809_s5 + $0x9c8] sm:$0xff] }
 0x65f   : > { %22268 = vmatpush3.bf16.msra.mxu1 %v22267_v50  ;;  %22245 = vmatprep.subr.bf16.mxu0 %v23530_v54  ;;  %v16230_v50 = vld [vmem:[%s28809_s5 + $0x840] sm:$0xff] }
 0x660   : > { %22269 = vmatprep.subr.bf16.mxu1 %v23530_v54  ;;  %v22297_v53 = vpack.c.bf16 %v16231_v28, %v16230_v50  ;;  %v16264_v50 = vld [vmem:[%s28809_s5 + $0x950] sm:$0xff]  ;;  %v16265_v28 = vld [vmem:[%s28809_s5 + $0x958] sm:$0xff] }
 0x662   : > { %22247 = vmatpush3.bf16.msra.mxu0 %v22246_v49  ;;  %v22321_v49 = vpack.c.bf16 %v16247_v11, %v16246_v4  ;;  %v16280_v4 = vld [vmem:[%s28809_s5 + $0x9d0] sm:$0xff]  ;;  %v16281_v11 = vld [vmem:[%s28809_s5 + $0x9d8] sm:$0xff] }
 0x663   : > { %22271 = vmatpush3.bf16.msra.mxu1 %v22270_v39  ;;  %22248 = vmatprep.subr.bf16.mxu0 %v23530_v54  ;;  %v16232_v39 = vld [vmem:[%s28809_s5 + $0x850] sm:$0xff] }
 0x664   : > { %22272 = vmatprep.subr.bf16.mxu1 %v23530_v54  ;;  %v22300_v9 = vpack.c.bf16 %v16233_v57, %v16232_v39  ;;  %v16266_v39 = vld [vmem:[%s28809_s5 + $0x960] sm:$0xff]  ;;  %v16267_v57 = vld [vmem:[%s28809_s5 + $0x968] sm:$0xff] }
 0x666   : > { %22250 = vmatpush3.bf16.msra.mxu0 %v22249_v63  ;;  %v22324_v63 = vpack.c.bf16 %v16249_v29, %v16248_v31  ;;  %v16282_v29 = vld [vmem:[%s28809_s5 + $0x9e0] sm:$0xff] }
 0x667   : > { %22274 = vmatpush3.bf16.msra.mxu1 %v22273_v52  ;;  %22251 = vmatprep.subr.bf16.mxu0 %v23530_v54  ;;  %v16234_v52 = vld [vmem:[%s28809_s5 + $0x860] sm:$0xff] }
 0x668   : > { %v11591_v26 = vpop.f32.mrb[0].mxu0  ;;  %22275 = vmatprep.subr.bf16.mxu1 %v23530_v54  ;;  %v22303_v12 = vpack.c.bf16 %v16235_v5, %v16234_v52 }
 0x669   : > { %v20154_v47 = vpop.f32.mrb[1].mxu0  ;;  %v11661_v30 = vpop.f32.mrb[0].mxu1 }
 0x66a   : > { %v28018_v16 = vadd.f32 %v11661_v30, %v11591_v26  ;;  %22253 = vmatpush3.bf16.msra.mxu0 %v22252_v37  ;;  %v20189_v22 = vpop.f32.mrb[1].mxu1  ;;  %v16236_v47 = vld [vmem:[%s28809_s5 + $0x870] sm:$0xff]  ;;  %v16237_v30 = vld [vmem:[%s28809_s5 + $0x878] sm:$0xff] }
 0x66b   : > { %22277 = vmatpush3.bf16.msra.mxu1 %v22276_v13  ;;  %22254 = vmatprep.subr.bf16.mxu0 %v23530_v54  ;;  %v22306_v22 = vpack.c.bf16 %v16237_v30, %v16236_v47  ;;  %v16286_v47 = vld [vmem:[%s28809_s5 + $0xa00] sm:$0xff]  ;;  %v16287_v30 = vld [vmem:[%s28809_s5 + $0xa08] sm:$0xff] }
 0x66c   : > { %22278 = vmatprep.subr.bf16.mxu1 %v23530_v54 }
 0x66e   : > { %22256 = vmatpush3.bf16.msra.mxu0 %v22255_v20  ;;  %v16253_v20 = vld [vmem:[%s28809_s5 + $0x8f8] sm:$0xff] }
 0x66f   : > { %22280 = vmatpush3.bf16.msra.mxu1 %v22279_v21  ;;  %22257 = vmatprep.subr.bf16.mxu0 %v23530_v54 }
 0x670   : > { %22281 = vmatprep.subr.bf16.mxu1 %v23530_v54 }
 0x672   : > { %22259 = vmatpush3.bf16.msra.mxu0 %v22258_v56  ;;  %v12911_v56 = vld [vmem:[#allocation3 + $0x184] sm:$0x1] }
 0x673   : > { %22283 = vmatpush3.bf16.msra.mxu1 %v22282_v6  ;;  %22284 = vmatprep.subr.bf16.mxu0 %v23530_v54  ;;  %v22333_v6 = vpack.c.bf16 %v16255_v60, %v16254_v19  ;;  %v13178_v19 = vld [vmem:[#allocation3 + $0x190] sm:$0x1] }
 0x674   : > { %22308 = vmatprep.subr.bf16.mxu1 %v23530_v54 }
 0x675   : > { %20643 = vmatmul.mubr.f32.vlgmr.msra.gmra.mrb[14].mxu0 %v12733_v14  ;;  %v16272_v14 = vld [vmem:[%s28809_s5 + $0x990] sm:$0xff] }
 0x676   : > { %22286 = vmatpush3.bf16.msra.mxu0 %v22285_v42  ;;  %20678 = vmatmul.mubr.f32.vlgmr.msra.gmra.mrb[14].mxu1 %v12822_v34  ;;  %v16273_v42 = vld [vmem:[%s28809_s5 + $0x998] sm:$0xff]  ;;  %v22336_v34 = vpack.c.bf16 %v16257_v7, %v16256_v3  ;;  %v16290_v3 = vld [vmem:[%s28809_s5 + $0xa20] sm:$0xff]  ;;  %v16291_v7 = vld [vmem:[%s28809_s5 + $0xa28] sm:$0xff] }
 0x677   : > { %22310 = vmatpush3.bf16.msra.mxu1 %v22309_v45  ;;  %22287 = vmatprep.subr.bf16.mxu0 %v23530_v54  ;;  %v22360_v45 = vpack.c.bf16 %v16273_v42, %v16272_v14  ;;  %v16306_v14 = vld [vmem:[%s28809_s5 + $0xaa0] sm:$0xff]  ;;  %v16307_v42 = vld [vmem:[%s28809_s5 + $0xaa8] sm:$0xff] }
 0x678   : > { %22311 = vmatprep.subr.bf16.mxu1 %v23530_v54  ;;  %20712 = vmatprep.mubr.msk.f32.mxu0 %vm23531_vm1, %v28954_v48 }
 0x679   : > { %20747 = vmatprep.mubr.msk.f32.mxu1 %vm23531_vm1, %v28954_v48 }
 0x67a   : > { %22289 = vmatpush3.bf16.msra.mxu0 %v22288_v1  ;;  %v22339_v1 = vpack.c.bf16 %v16259_v59, %v16258_v10  ;;  %v16292_v10 = vld [vmem:[%s28809_s5 + $0xa30] sm:$0xff]  ;;  %v16293_v59 = vld [vmem:[%s28809_s5 + $0xa38] sm:$0xff] }
 0x67b   : > { %22313 = vmatpush3.bf16.msra.mxu1 %v22312_v44  ;;  %22290 = vmatprep.subr.bf16.mxu0 %v23530_v54  ;;  %v22363_v44 = vpack.c.bf16 %v16275_v33, %v16274_v32  ;;  %v16308_v32 = vld [vmem:[%s28809_s5 + $0xab0] sm:$0xff]  ;;  %v16309_v33 = vld [vmem:[%s28809_s5 + $0xab8] sm:$0xff] }
 0x67c   : > { %22314 = vmatprep.subr.bf16.mxu1 %v23530_v54 }
 0x67e   : > { %22292 = vmatpush3.bf16.msra.mxu0 %v22291_v18  ;;  %v22342_v18 = vpack.c.bf16 %v16261_v35, %v16260_v23  ;;  %v16294_v23 = vld [vmem:[%s28809_s5 + $0xa40] sm:$0xff]  ;;  %v16295_v35 = vld [vmem:[%s28809_s5 + $0xa48] sm:$0xff] }
 0x67f   : > { %22316 = vmatpush3.bf16.msra.mxu1 %v22315_v61  ;;  %22293 = vmatprep.subr.bf16.mxu0 %v23530_v54  ;;  %v22366_v61 = vpack.c.bf16 %v16277_v51, %v16276_v55  ;;  %v16310_v55 = vld [vmem:[%s28809_s5 + $0xac0] sm:$0xff]  ;;  %v16311_v51 = vld [vmem:[%s28809_s5 + $0xac8] sm:$0xff] }
 0x680   : > { %22317 = vmatprep.subr.bf16.mxu1 %v23530_v54 }
 0x682   : > { %22295 = vmatpush3.bf16.msra.mxu0 %v22294_v24  ;;  %v22345_v24 = vpack.c.bf16 %v16263_v36, %v16262_v25  ;;  %v16296_v25 = vld [vmem:[%s28809_s5 + $0xa50] sm:$0xff]  ;;  %v16297_v36 = vld [vmem:[%s28809_s5 + $0xa58] sm:$0xff] }
 0x683   : > { %22319 = vmatpush3.bf16.msra.mxu1 %v22318_v0  ;;  %22296 = vmatprep.subr.bf16.mxu0 %v23530_v54  ;;  %v22369_v0 = vpack.c.bf16 %v16279_v43, %v16278_v40  ;;  %v16312_v40 = vld [vmem:[%s28809_s5 + $0xad0] sm:$0xff]  ;;  %v16313_v43 = vld [vmem:[%s28809_s5 + $0xad8] sm:$0xff] }
 0x684   : > { %22320 = vmatprep.subr.bf16.mxu1 %v23530_v54 }
 0x686   : > { %22298 = vmatpush3.bf16.msra.mxu0 %v22297_v53  ;;  %v22348_v53 = vpack.c.bf16 %v16265_v28, %v16264_v50  ;;  %v16298_v50 = vld [vmem:[%s28809_s5 + $0xa60] sm:$0xff]  ;;  %v16299_v28 = vld [vmem:[%s28809_s5 + $0xa68] sm:$0xff] }
 0x687   : > { %22322 = vmatpush3.bf16.msra.mxu1 %v22321_v49  ;;  %22299 = vmatprep.subr.bf16.mxu0 %v23530_v54  ;;  %v22372_v49 = vpack.c.bf16 %v16281_v11, %v16280_v4  ;;  %v16314_v11 = vld [vmem:[%s28809_s5 + $0xae0] sm:$0xff] }
 0x688   : > { %v11749_v2 = vpop.f32.mrb[2].mxu0  ;;  %22323 = vmatprep.subr.bf16.mxu1 %v23530_v54 }
 0x689   : > { %v11753_v37 = vadd.f32 %v11749_v2, %v28018_v16  ;;  %v20224_v13 = vpop.f32.mrb[3].mxu0  ;;  %v11838_v15 = vpop.f32.mrb[2].mxu1  ;;  %v16252_v16 = vld [vmem:[%s28809_s5 + $0x8f0] sm:$0xff]  ;;  %v22351_v2 = vpack.c.bf16 %v16267_v57, %v16266_v39 }
 0x68a   : > { %22301 = vmatpush3.bf16.msra.mxu0 %v22300_v9  ;;  %v20259_v26 = vpop.f32.mrb[3].mxu1  ;;  %v22330_v21 = vpack.c.bf16 %v16253_v20, %v16252_v16  ;;  %v16283_v9 = vld [vmem:[%s28809_s5 + $0x9e8] sm:$0xff]  ;;  %v16268_v13 = vld [vmem:[%s28809_s5 + $0x970] sm:$0xff]  ;;  %v16302_v16 = vld [vmem:[%s28809_s5 + $0xa80] sm:$0xff] }
 0x68b   : > { %v28137_v38 = vadd.f32 %v11838_v15, %v11753_v37  ;;  %22325 = vmatpush3.bf16.msra.mxu1 %v22324_v63  ;;  %22302 = vmatprep.subr.bf16.mxu0 %v23530_v54  ;;  %v22375_v37 = vpack.c.bf16 %v16283_v9, %v16282_v29  ;;  %v16269_v15 = vld [vmem:[%s28809_s5 + $0x978] sm:$0xff]  ;;  %v16303_v20 = vld [vmem:[%s28809_s5 + $0xa88] sm:$0xff] }
 0x68c   : > { %22326 = vmatprep.subr.bf16.mxu1 %v23530_v54  ;;  %v16285_v26 = vld [vmem:[%s28809_s5 + $0x9f8] sm:$0xff]  ;;  %v22405_v60 = vpack.c.bf16 %v16303_v20, %v16302_v16  ;;  %v16320_v16 = vld [vmem:[%s28809_s5 + $0xb10] sm:$0xff] }
 0x68d   : > { %v16321_v20 = vld [vmem:[%s28809_s5 + $0xb18] sm:$0xff] }
 0x68e   : > { %22304 = vmatpush3.bf16.msra.mxu0 %v22303_v12  ;;  %v16284_v12 = vld [vmem:[%s28809_s5 + $0x9f0] sm:$0xff] }
 0x68f   : > { %22328 = vmatpush3.bf16.msra.mxu1 %v22327_v8  ;;  %22305 = vmatprep.subr.bf16.mxu0 %v23530_v54  ;;  %v22378_v8 = vpack.c.bf16 %v16285_v26, %v16284_v12  ;;  %v16334_v12 = vld [vmem:[%s28809_s5 + $0xb80] sm:$0xff]  ;;  %v16335_v26 = vld [vmem:[%s28809_s5 + $0xb88] sm:$0xff] }
 0x690   : > { %22329 = vmatprep.subr.bf16.mxu1 %v23530_v54 }
 0x692   : > { %22307 = vmatpush3.bf16.msra.mxu0 %v22306_v22  ;;  %v13089_v22 = vld [vmem:[#allocation3 + $0x18c] sm:$0x1] }
 0x693   : > { %22331 = vmatpush3.bf16.msra.mxu1 %v22330_v21  ;;  %22332 = vmatprep.subr.bf16.mxu0 %v23530_v54  ;;  %v22381_v21 = vpack.c.bf16 %v16287_v30, %v16286_v47  ;;  %v13356_v47 = vld [vmem:[#allocation3 + $0x204] sm:$0x1]  ;;  %v22453_v30 = vpack.c.bf16 %v16335_v26, %v16334_v12  ;;  %v16355_v26 = vld [vmem:[%s28809_s5 + $0xc28] sm:$0xff] }
 0x694   : > { %22356 = vmatprep.subr.bf16.mxu1 %v23530_v54  ;;  %v16354_v12 = vld [vmem:[%s28809_s5 + $0xc20] sm:$0xff] }
 0x695   : > { %20713 = vmatmul.mubr.f32.vlgmr.msra.gmra.mrb[16].mxu0 %v12911_v56  ;;  %v16304_v56 = vld [vmem:[%s28809_s5 + $0xa90] sm:$0xff] }
 0x696   : > { %22334 = vmatpush3.bf16.msra.mxu0 %v22333_v6  ;;  %20748 = vmatmul.mubr.f32.vlgmr.msra.gmra.mrb[16].mxu1 %v13000_v17  ;;  %v16305_v6 = vld [vmem:[%s28809_s5 + $0xa98] sm:$0xff]  ;;  %v22384_v17 = vpack.c.bf16 %v16289_v46, %v16288_v58  ;;  %v16322_v58 = vld [vmem:[%s28809_s5 + $0xb20] sm:$0xff]  ;;  %v16323_v46 = vld [vmem:[%s28809_s5 + $0xb28] sm:$0xff] }
 0x697   : > { %22358 = vmatpush3.bf16.msra.mxu1 %v22357_v62  ;;  %22335 = vmatprep.subr.bf16.mxu0 %v23530_v54  ;;  %v22408_v62 = vpack.c.bf16 %v16305_v6, %v16304_v56  ;;  %v16338_v56 = vld [vmem:[%s28809_s5 + $0xba0] sm:$0xff]  ;;  %v16339_v6 = vld [vmem:[%s28809_s5 + $0xba8] sm:$0xff] }
 0x698   : > { %22359 = vmatprep.subr.bf16.mxu1 %v23530_v54  ;;  %20782 = vmatprep.mubr.msk.f32.mxu0 %vm23531_vm1, %v28954_v48 }
 0x699   : > { %20817 = vmatprep.mubr.msk.f32.mxu1 %vm23531_vm1, %v28954_v48 }
 0x69a   : > { %22337 = vmatpush3.bf16.msra.mxu0 %v22336_v34  ;;  %v22387_v34 = vpack.c.bf16 %v16291_v7, %v16290_v3  ;;  %v16324_v3 = vld [vmem:[%s28809_s5 + $0xb30] sm:$0xff]  ;;  %v16325_v7 = vld [vmem:[%s28809_s5 + $0xb38] sm:$0xff] }
 0x69b   : > { %22361 = vmatpush3.bf16.msra.mxu1 %v22360_v45  ;;  %22338 = vmatprep.subr.bf16.mxu0 %v23530_v54  ;;  %v22411_v45 = vpack.c.bf16 %v16307_v42, %v16306_v14  ;;  %v16340_v14 = vld [vmem:[%s28809_s5 + $0xbb0] sm:$0xff]  ;;  %v16341_v42 = vld [vmem:[%s28809_s5 + $0xbb8] sm:$0xff] }
 0x69c   : > { %22362 = vmatprep.subr.bf16.mxu1 %v23530_v54 }
 0x69e   : > { %22340 = vmatpush3.bf16.msra.mxu0 %v22339_v1  ;;  %v22390_v1 = vpack.c.bf16 %v16293_v59, %v16292_v10  ;;  %v16326_v10 = vld [vmem:[%s28809_s5 + $0xb40] sm:$0xff]  ;;  %v16327_v59 = vld [vmem:[%s28809_s5 + $0xb48] sm:$0xff] }
 0x69f   : > { %22364 = vmatpush3.bf16.msra.mxu1 %v22363_v44  ;;  %22341 = vmatprep.subr.bf16.mxu0 %v23530_v54  ;;  %v22414_v44 = vpack.c.bf16 %v16309_v33, %v16308_v32  ;;  %v16342_v32 = vld [vmem:[%s28809_s5 + $0xbc0] sm:$0xff]  ;;  %v16343_v33 = vld [vmem:[%s28809_s5 + $0xbc8] sm:$0xff] }
 0x6a0   : > { %22365 = vmatprep.subr.bf16.mxu1 %v23530_v54 }
 0x6a2   : > { %22343 = vmatpush3.bf16.msra.mxu0 %v22342_v18  ;;  %v22393_v18 = vpack.c.bf16 %v16295_v35, %v16294_v23  ;;  %v16328_v23 = vld [vmem:[%s28809_s5 + $0xb50] sm:$0xff]  ;;  %v16329_v35 = vld [vmem:[%s28809_s5 + $0xb58] sm:$0xff] }
 0x6a3   : > { %22367 = vmatpush3.bf16.msra.mxu1 %v22366_v61  ;;  %22344 = vmatprep.subr.bf16.mxu0 %v23530_v54  ;;  %v22417_v61 = vpack.c.bf16 %v16311_v51, %v16310_v55  ;;  %v16344_v55 = vld [vmem:[%s28809_s5 + $0xbd0] sm:$0xff]  ;;  %v16345_v51 = vld [vmem:[%s28809_s5 + $0xbd8] sm:$0xff] }
 0x6a4   : > { %22368 = vmatprep.subr.bf16.mxu1 %v23530_v54 }
 0x6a6   : > { %22346 = vmatpush3.bf16.msra.mxu0 %v22345_v24  ;;  %v22396_v24 = vpack.c.bf16 %v16297_v36, %v16296_v25  ;;  %v16330_v25 = vld [vmem:[%s28809_s5 + $0xb60] sm:$0xff]  ;;  %v16331_v36 = vld [vmem:[%s28809_s5 + $0xb68] sm:$0xff] }
 0x6a7   : > { %22370 = vmatpush3.bf16.msra.mxu1 %v22369_v0  ;;  %22347 = vmatprep.subr.bf16.mxu0 %v23530_v54  ;;  %v22420_v0 = vpack.c.bf16 %v16313_v43, %v16312_v40  ;;  %v16346_v43 = vld [vmem:[%s28809_s5 + $0xbe0] sm:$0xff] }
 0x6a8   : > { %v11927_v31 = vpop.f32.mrb[4].mxu0  ;;  %22371 = vmatprep.subr.bf16.mxu1 %v23530_v54 }
 0x6a9   : > { %v11931_v63 = vadd.f32 %v11927_v31, %v28137_v38  ;;  %v20294_v52 = vpop.f32.mrb[5].mxu0  ;;  %v12016_v5 = vpop.f32.mrb[4].mxu1  ;;  %v22354_v38 = vpack.c.bf16 %v16269_v15, %v16268_v13  ;;  %v22399_v31 = vpack.c.bf16 %v16299_v28, %v16298_v50  ;;  %v16318_v13 = vld [vmem:[%s28809_s5 + $0xb00] sm:$0xff]  ;;  %v16319_v15 = vld [vmem:[%s28809_s5 + $0xb08] sm:$0xff] }
 0x6aa   : > { %22349 = vmatpush3.bf16.msra.mxu0 %v22348_v53  ;;  %v20329_v27 = vpop.f32.mrb[5].mxu1  ;;  %v16315_v53 = vld [vmem:[%s28809_s5 + $0xae8] sm:$0xff]  ;;  %v16300_v52 = vld [vmem:[%s28809_s5 + $0xa70] sm:$0xff] }
 0x6ab   : > { %v28256_v41 = vadd.f32 %v12016_v5, %v11931_v63  ;;  %22373 = vmatpush3.bf16.msra.mxu1 %v22372_v49  ;;  %22350 = vmatprep.subr.bf16.mxu0 %v23530_v54  ;;  %v22423_v63 = vpack.c.bf16 %v16315_v53, %v16314_v11  ;;  %v16301_v5 = vld [vmem:[%s28809_s5 + $0xa78] sm:$0xff] }
 0x6ac   : > { %22374 = vmatprep.subr.bf16.mxu1 %v23530_v54  ;;  %v16317_v27 = vld [vmem:[%s28809_s5 + $0xaf8] sm:$0xff] }
 0x6ae   : > { %22352 = vmatpush3.bf16.msra.mxu0 %v22351_v2  ;;  %v16316_v2 = vld [vmem:[%s28809_s5 + $0xaf0] sm:$0xff] }
 0x6af   : > { %22376 = vmatpush3.bf16.msra.mxu1 %v22375_v37  ;;  %22353 = vmatprep.subr.bf16.mxu0 %v23530_v54  ;;  %v22426_v37 = vpack.c.bf16 %v16317_v27, %v16316_v2  ;;  %v13445_v2 = vld [vmem:[#allocation3 + $0x208] sm:$0x1] }
 0x6b0   : > { %22377 = vmatprep.subr.bf16.mxu1 %v23530_v54 }
 0x6b2   : > { %22355 = vmatpush3.bf16.msra.mxu0 %v22354_v38  ;;  %v13267_v38 = vld [vmem:[#allocation3 + $0x200] sm:$0x1] }
 0x6b3   : > { %22379 = vmatpush3.bf16.msra.mxu1 %v22378_v8  ;;  %22380 = vmatprep.subr.bf16.mxu0 %v23530_v54  ;;  %v22429_v8 = vpack.c.bf16 %v16319_v15, %v16318_v13  ;;  %v16353_v13 = vld [vmem:[%s28809_s5 + $0xc18] sm:$0xff] }
 0x6b4   : > { %22404 = vmatprep.subr.bf16.mxu1 %v23530_v54 }
 0x6b5   : > { %20783 = vmatmul.mubr.f32.vlgmr.msra.gmra.mrb[18].mxu0 %v13089_v22  ;;  %v16336_v22 = vld [vmem:[%s28809_s5 + $0xb90] sm:$0xff] }
 0x6b6   : > { %22382 = vmatpush3.bf16.msra.mxu0 %v22381_v21  ;;  %20818 = vmatmul.mubr.f32.vlgmr.msra.gmra.mrb[18].mxu1 %v13178_v19  ;;  %v16337_v21 = vld [vmem:[%s28809_s5 + $0xb98] sm:$0xff]  ;;  %v22432_v19 = vpack.c.bf16 %v16321_v20, %v16320_v16  ;;  %v16358_v16 = vld [vmem:[%s28809_s5 + $0xc40] sm:$0xff]  ;;  %v16359_v20 = vld [vmem:[%s28809_s5 + $0xc48] sm:$0xff] }
 0x6b7   : > { %22406 = vmatpush3.bf16.msra.mxu1 %v22405_v60  ;;  %22383 = vmatprep.subr.bf16.mxu0 %v23530_v54  ;;  %v22456_v60 = vpack.c.bf16 %v16337_v21, %v16336_v22  ;;  %v22489_v22 = vpack.c.bf16 %v16359_v20, %v16358_v16  ;;  %v16360_v21 = vld [vmem:[%s28809_s5 + $0xc50] sm:$0xff]  ;;  %v13804_v16 = vld [vmem:[%s28813_s9 + $0x8] sm:$0xff] }
 0x6b8   : > { %22407 = vmatprep.subr.bf16.mxu1 %v23530_v54  ;;  %20852 = vmatprep.mubr.msk.f32.mxu0 %vm23531_vm1, %v28954_v48  ;;  %v13805_v20 = vld [vmem:[%s28813_s9 + $0x10] sm:$0xff] }
 0x6b9   : > { %20887 = vmatprep.mubr.msk.f32.mxu1 %vm23531_vm1, %v28954_v48 }
 0x6ba   : > { %22385 = vmatpush3.bf16.msra.mxu0 %v22384_v17  ;;  %v22435_v17 = vpack.c.bf16 %v16323_v46, %v16322_v58  ;;  %v16362_v58 = vld [vmem:[%s28809_s5 + $0xc60] sm:$0xff]  ;;  %v16363_v46 = vld [vmem:[%s28809_s5 + $0xc68] sm:$0xff] }
 0x6bb   : > { %22409 = vmatpush3.bf16.msra.mxu1 %v22408_v62  ;;  %22386 = vmatprep.subr.bf16.mxu0 %v23530_v54  ;;  %v22459_v62 = vpack.c.bf16 %v16339_v6, %v16338_v56 }
 0x6bc   : > { %22410 = vmatprep.subr.bf16.mxu1 %v23530_v54 }
 0x6be   : > { %22388 = vmatpush3.bf16.msra.mxu0 %v22387_v34  ;;  %v22438_v34 = vpack.c.bf16 %v16325_v7, %v16324_v3  ;;  %v22495_v3 = vpack.c.bf16 %v16363_v46, %v16362_v58  ;;  %v13808_v58 = vld [vmem:[%s28813_s9 + $0x28] sm:$0xff] }
 0x6bf   : > { %22412 = vmatpush3.bf16.msra.mxu1 %v22411_v45  ;;  %22389 = vmatprep.subr.bf16.mxu0 %v23530_v54  ;;  %v22462_v45 = vpack.c.bf16 %v16341_v42, %v16340_v14  ;;  %v16364_v42 = vld [vmem:[%s28809_s5 + $0xc70] sm:$0xff] }
 0x6c0   : > { %22413 = vmatprep.subr.bf16.mxu1 %v23530_v54 }
 0x6c2   : > { %22391 = vmatpush3.bf16.msra.mxu0 %v22390_v1  ;;  %v22441_v1 = vpack.c.bf16 %v16327_v59, %v16326_v10  ;;  %v13623_v10 = vld [vmem:[#allocation3 + $0x210] sm:$0x1] }
 0x6c3   : > { %22415 = vmatpush3.bf16.msra.mxu1 %v22414_v44  ;;  %22392 = vmatprep.subr.bf16.mxu0 %v23530_v54  ;;  %v22465_v44 = vpack.c.bf16 %v16343_v33, %v16342_v32 }
 0x6c4   : > { %22416 = vmatprep.subr.bf16.mxu1 %v23530_v54 }
 0x6c6   : > { %22394 = vmatpush3.bf16.msra.mxu0 %v22393_v18  ;;  %v22444_v18 = vpack.c.bf16 %v16329_v35, %v16328_v23 }
 0x6c7   : > { %22418 = vmatpush3.bf16.msra.mxu1 %v22417_v61  ;;  %22395 = vmatprep.subr.bf16.mxu0 %v23530_v54  ;;  %v22468_v61 = vpack.c.bf16 %v16345_v51, %v16344_v55 }
 0x6c8   : > { %v12105_v4 = vpop.f32.mrb[6].mxu0  ;;  %22419 = vmatprep.subr.bf16.mxu1 %v23530_v54 }
 0x6c9   : > { %v12109_v49 = vadd.f32 %v12105_v4, %v28256_v41  ;;  %v20364_v39 = vpop.f32.mrb[7].mxu0  ;;  %v12194_v57 = vpop.f32.mrb[6].mxu1  ;;  %v22402_v41 = vpack.c.bf16 %v16301_v5, %v16300_v52  ;;  %v22447_v4 = vpack.c.bf16 %v16331_v36, %v16330_v25  ;;  %v16350_v52 = vld [vmem:[%s28809_s5 + $0xc00] sm:$0xff]  ;;  %v16351_v5 = vld [vmem:[%s28809_s5 + $0xc08] sm:$0xff] }
 0x6ca   : > { %22397 = vmatpush3.bf16.msra.mxu0 %v22396_v24  ;;  %v20399_v29 = vpop.f32.mrb[7].mxu1  ;;  %v16347_v24 = vld [vmem:[%s28809_s5 + $0xbe8] sm:$0xff]  ;;  %v16332_v39 = vld [vmem:[%s28809_s5 + $0xb70] sm:$0xff]  ;;  %v22477_v27 = vpack.c.bf16 %v16351_v5, %v16350_v52  ;;  %v13715_v36 = vld [vmem:[%s28811_s7] sm:$0xff] }
 0x6cb   : > { %v28375_v9 = vadd.f32 %v12194_v57, %v12109_v49  ;;  %22421 = vmatpush3.bf16.msra.mxu1 %v22420_v0  ;;  %22398 = vmatprep.subr.bf16.mxu0 %v23530_v54  ;;  %v22471_v49 = vpack.c.bf16 %v16347_v24, %v16346_v43  ;;  %v16333_v57 = vld [vmem:[%s28809_s5 + $0xb78] sm:$0xff]  ;;  %v13717_v43 = vld [vmem:[%s28811_s7 + $0x10] sm:$0xff]  ;;  %v13727_v5 = vld [vmem:[%s28811_s7 + $0x60] sm:$0xff] }
 0x6cc   : > { %22422 = vmatprep.subr.bf16.mxu1 %v23530_v54  ;;  %v16349_v29 = vld [vmem:[%s28809_s5 + $0xbf8] sm:$0xff] }
 0x6ce   : > { %22400 = vmatpush3.bf16.msra.mxu0 %v22399_v31  ;;  %v16348_v31 = vld [vmem:[%s28809_s5 + $0xbf0] sm:$0xff] }
 0x6cf   : > { %22424 = vmatpush3.bf16.msra.mxu1 %v22423_v63  ;;  %22401 = vmatprep.subr.bf16.mxu0 %v23530_v54  ;;  %v22474_v63 = vpack.c.bf16 %v16349_v29, %v16348_v31  ;;  %v13724_v31 = vld [vmem:[%s28811_s7 + $0x48] sm:$0xff] }
 0x6d0   : > { %22425 = vmatprep.subr.bf16.mxu1 %v23530_v54 }
 0x6d2   : > { %22403 = vmatpush3.bf16.msra.mxu0 %v22402_v41  ;;  %v13534_v41 = vld [vmem:[#allocation3 + $0x20c] sm:$0x1] }
 0x6d3   : > { %22427 = vmatpush3.bf16.msra.mxu1 %v22426_v37  ;;  %22428 = vmatprep.subr.bf16.mxu0 %v23530_v54  ;;  %v16352_v37 = vld [vmem:[%s28809_s5 + $0xc10] sm:$0xff] }
 0x6d4   : > { %22452 = vmatprep.subr.bf16.mxu1 %v23530_v54  ;;  %v22480_v15 = vpack.c.bf16 %v16353_v13, %v16352_v37 }
 0x6d5   : > { %20853 = vmatmul.mubr.f32.vlgmr.msra.gmra.mrb[20].mxu0 %v13267_v38  ;;  %v22483_v38 = vpack.c.bf16 %v16355_v26, %v16354_v12  ;;  %v13729_v12 = vld [vmem:[%s28811_s7 + $0x70] sm:$0xff]  ;;  %v13730_v26 = vld [vmem:[%s28811_s7 + $0x78] sm:$0xff] }
 0x6d6   : > { %22430 = vmatpush3.bf16.msra.mxu0 %v22429_v8  ;;  %20888 = vmatmul.mubr.f32.vlgmr.msra.gmra.mrb[20].mxu1 %v13356_v47  ;;  %v16356_v8 = vld [vmem:[%s28809_s5 + $0xc30] sm:$0xff]  ;;  %v16357_v47 = vld [vmem:[%s28809_s5 + $0xc38] sm:$0xff] }
 0x6d7   : > { %22454 = vmatpush3.bf16.msra.mxu1 %v22453_v30  ;;  %22431 = vmatprep.subr.bf16.mxu0 %v23530_v54  ;;  %v22486_v30 = vpack.c.bf16 %v16357_v47, %v16356_v8  ;;  %v22522_v8 = vpack.c.bf16 %v13730_v26, %v13729_v12  ;;  %v13898_v12 = vld [vmem:[%s28815_s11 + $0x38] sm:$0xff] }
 0x6d8   : > { %22455 = vmatprep.subr.bf16.mxu1 %v23530_v54  ;;  %20922 = vmatprep.mubr.msk.f32.mxu0 %vm23531_vm1, %v28954_v48 }
 0x6d9   : > { %20957 = vmatprep.mubr.msk.f32.mxu1 %vm23531_vm1, %v28954_v48 }
 0x6da   : > { %22433 = vmatpush3.bf16.msra.mxu0 %v22432_v19  ;;  %v16361_v19 = vld [vmem:[%s28809_s5 + $0xc58] sm:$0xff] }
 0x6db   : > { %22457 = vmatpush3.bf16.msra.mxu1 %v22456_v60  ;;  %22434 = vmatprep.subr.bf16.mxu0 %v23530_v54  ;;  %v22492_v60 = vpack.c.bf16 %v16361_v19, %v16360_v21  ;;  %v13806_v21 = vld [vmem:[%s28813_s9 + $0x18] sm:$0xff] }
 0x6dc   : > { %22458 = vmatprep.subr.bf16.mxu1 %v23530_v54  ;;  %v22528_v19 = vpack.c.bf16 %v13806_v21, %v13805_v20  ;;  %v13904_v21 = vld [vmem:[%s28815_s11 + $0x68] sm:$0xff] }
 0x6de   : > { %22436 = vmatpush3.bf16.msra.mxu0 %v22435_v17 }
 0x6df   : > { %22460 = vmatpush3.bf16.msra.mxu1 %v22459_v62  ;;  %22437 = vmatprep.subr.bf16.mxu0 %v23530_v54 }
 0x6e0   : > { %22461 = vmatprep.subr.bf16.mxu1 %v23530_v54 }
 0x6e2   : > { %22439 = vmatpush3.bf16.msra.mxu0 %v22438_v34  ;;  %v16365_v34 = vld [vmem:[%s28809_s5 + $0xc78] sm:$0xff] }
 0x6e3   : > { %22463 = vmatpush3.bf16.msra.mxu1 %v22462_v45  ;;  %22440 = vmatprep.subr.bf16.mxu0 %v23530_v54  ;;  %v22498_v45 = vpack.c.bf16 %v16365_v34, %v16364_v42  ;;  %v13814_v42 = vld [vmem:[%s28813_s9 + $0x58] sm:$0xff] }
 0x6e4   : > { %22464 = vmatprep.subr.bf16.mxu1 %v23530_v54 }
 0x6e6   : > { %22442 = vmatpush3.bf16.msra.mxu0 %v22441_v1 }
 0x6e7   : > { %22466 = vmatpush3.bf16.msra.mxu1 %v22465_v44  ;;  %22443 = vmatprep.subr.bf16.mxu0 %v23530_v54 }
 0x6e8   : > { %v12283_v40 = vpop.f32.mrb[8].mxu0  ;;  %22467 = vmatprep.subr.bf16.mxu1 %v23530_v54 }
 0x6e9   : > { %v12287_v0 = vadd.f32 %v12283_v40, %v28375_v9  ;;  %v20434_v50 = vpop.f32.mrb[9].mxu0  ;;  %v12372_v28 = vpop.f32.mrb[8].mxu1  ;;  %v22450_v9 = vpack.c.bf16 %v16333_v57, %v16332_v39  ;;  %v13716_v40 = vld [vmem:[%s28811_s7 + $0x8] sm:$0xff]  ;;  %v13723_v57 = vld [vmem:[%s28811_s7 + $0x40] sm:$0xff] }
 0x6ea   : > { %22445 = vmatpush3.bf16.msra.mxu0 %v22444_v18  ;;  %v20469_v11 = vpop.f32.mrb[9].mxu1  ;;  %v22501_v24 = vpack.c.bf16 %v13716_v40, %v13715_v36  ;;  %v22513_v29 = vpack.c.bf16 %v13724_v31, %v13723_v57  ;;  %v13817_v31 = vld [vmem:[%s28813_s9 + $0x70] sm:$0xff] }
 0x6eb   : > { %v12376_v53 = vadd.f32 %v12372_v28, %v12287_v0  ;;  %22469 = vmatpush3.bf16.msra.mxu1 %v22468_v61  ;;  %22446 = vmatprep.subr.bf16.mxu0 %v23530_v54  ;;  %v13718_v0 = vld [vmem:[%s28811_s7 + $0x18] sm:$0xff]  ;;  %v13719_v28 = vld [vmem:[%s28811_s7 + $0x20] sm:$0xff] }
 0x6ec   : > { %22470 = vmatprep.subr.bf16.mxu1 %v23530_v54  ;;  %v22504_v50 = vpack.c.bf16 %v13718_v0, %v13717_v43 }
 0x6ee   : > { %22448 = vmatpush3.bf16.msra.mxu0 %v22447_v4  ;;  %v13720_v4 = vld [vmem:[%s28811_s7 + $0x28] sm:$0xff] }
 0x6ef   : > { %22472 = vmatpush3.bf16.msra.mxu1 %v22471_v49  ;;  %22449 = vmatprep.subr.bf16.mxu0 %v23530_v54  ;;  %v22507_v11 = vpack.c.bf16 %v13720_v4, %v13719_v28  ;;  %v13722_v49 = vld [vmem:[%s28811_s7 + $0x38] sm:$0xff] }
 0x6f0   : > { %22473 = vmatprep.subr.bf16.mxu1 %v23530_v54 }
 0x6f2   : > { %22451 = vmatpush3.bf16.msra.mxu0 %v22450_v9  ;;  %v13725_v9 = vld [vmem:[%s28811_s7 + $0x50] sm:$0xff] }
 0x6f3   : > { %22475 = vmatpush3.bf16.msra.mxu1 %v22474_v63  ;;  %22476 = vmatprep.subr.bf16.mxu0 %v23530_v54  ;;  %v13726_v63 = vld [vmem:[%s28811_s7 + $0x58] sm:$0xff] }
 0x6f4   : > { %22500 = vmatprep.subr.bf16.mxu1 %v23530_v54  ;;  %v22516_v52 = vpack.c.bf16 %v13726_v63, %v13725_v9  ;;  %v13891_v63 = vld [vmem:[%s28815_s11] sm:$0xff] }
 0x6f5   : > { %20923 = vmatmul.mubr.f32.vlgmr.msra.gmra.mrb[22].mxu0 %v13445_v2  ;;  %v13728_v2 = vld [vmem:[%s28811_s7 + $0x68] sm:$0xff] }
 0x6f6   : > { %22478 = vmatpush3.bf16.msra.mxu0 %v22477_v27  ;;  %20958 = vmatmul.mubr.f32.vlgmr.msra.gmra.mrb[22].mxu1 %v13534_v41  ;;  %v22519_v27 = vpack.c.bf16 %v13728_v2, %v13727_v5  ;;  %v13894_v2 = vld [vmem:[%s28815_s11 + $0x18] sm:$0xff] }
 0x6f7   : > { %22479 = vmatprep.subr.bf16.mxu0 %v23530_v54  ;;  %20992 = vmatprep.mubr.msk.f32.mxu0 %vm23531_vm1, %v28954_v48 }
 0x6f8   : > { %21027 = vmatprep.mubr.msk.f32.mxu1 %vm23531_vm1, %v28954_v48  ;;  %22502 = vmatpush3.bf16.msra.mxu1 %v22501_v24 }
 0x6f9   : > { %22503 = vmatprep.subr.bf16.mxu1 %v23530_v54 }
 0x6fa   : > { %22481 = vmatpush3.bf16.msra.mxu0 %v22480_v15 }
 0x6fb   : > { %22482 = vmatprep.subr.bf16.mxu0 %v23530_v54 }
 0x6fc   : > { %22505 = vmatpush3.bf16.msra.mxu1 %v22504_v50 }
 0x6fd   : > { %22506 = vmatprep.subr.bf16.mxu1 %v23530_v54 }
 0x6fe   : > { %22484 = vmatpush3.bf16.msra.mxu0 %v22483_v38 }
 0x6ff   : > { %22485 = vmatprep.subr.bf16.mxu0 %v23530_v54 }
 0x700   : > { %22508 = vmatpush3.bf16.msra.mxu1 %v22507_v11  ;;  %v13712_v11 = vld [vmem:[%s28810_s6] sm:$0x1] }
 0x701   : > { %22509 = vmatprep.subr.bf16.mxu1 %v23530_v54 }
 0x702   : > { %22487 = vmatpush3.bf16.msra.mxu0 %v22486_v30  ;;  %v13803_v30 = vld [vmem:[%s28813_s9] sm:$0xff] }
 0x703   : > { %22488 = vmatprep.subr.bf16.mxu0 %v23530_v54 }
 0x706   : > { %22490 = vmatpush3.bf16.msra.mxu0 %v22489_v22  ;;  %v22525_v22 = vpack.c.bf16 %v13804_v16, %v13803_v30  ;;  %v13901_v30 = vld [vmem:[%s28815_s11 + $0x50] sm:$0xff]  ;;  %v13902_v16 = vld [vmem:[%s28815_s11 + $0x58] sm:$0xff] }
 0x707   : > { %22491 = vmatprep.subr.bf16.mxu0 %v23530_v54  ;;  %v22564_v20 = vpack.c.bf16 %v13902_v16, %v13901_v30 }
 0x708   : > { %v12461_v56 = vpop.f32.mrb[10].mxu0 }
 0x709   : > { %v12465_v6 = vadd.f32 %v12461_v56, %v12376_v53  ;;  %v20504_v17 = vpop.f32.mrb[11].mxu0  ;;  %v12550_v62 = vpop.f32.mrb[10].mxu1  ;;  %v13721_v53 = vld [vmem:[%s28811_s7 + $0x30] sm:$0xff] }
 0x70a   : > { %22493 = vmatpush3.bf16.msra.mxu0 %v22492_v60  ;;  %v20539_v7 = vpop.f32.mrb[11].mxu1  ;;  %v22510_v39 = vpack.c.bf16 %v13722_v49, %v13721_v53  ;;  %v13807_v60 = vld [vmem:[%s28813_s9 + $0x20] sm:$0xff]  ;;  %v13809_v56 = vld [vmem:[%s28813_s9 + $0x30] sm:$0xff] }
 0x70b   : > { %v12554_v14 = vadd.f32 %v12550_v62, %v12465_v6  ;;  %22494 = vmatprep.subr.bf16.mxu0 %v23530_v54  ;;  %v22531_v46 = vpack.c.bf16 %v13808_v58, %v13807_v60  ;;  %v13810_v6 = vld [vmem:[%s28813_s9 + $0x38] sm:$0xff]  ;;  %v13811_v62 = vld [vmem:[%s28813_s9 + $0x40] sm:$0xff] }
 0x70c   : > { %22511 = vmatpush3.bf16.msra.mxu1 %v22510_v39  ;;  %v22534_v17 = vpack.c.bf16 %v13810_v6, %v13809_v56  ;;  %v13731_v60 = vld [vmem:[%s28812_s8] sm:$0x1] }
 0x70d   : > { %22512 = vmatprep.subr.bf16.mxu1 %v23530_v54 }
 0x70e   : > { %22496 = vmatpush3.bf16.msra.mxu0 %v22495_v3  ;;  %v13812_v3 = vld [vmem:[%s28813_s9 + $0x48] sm:$0xff] }
 0x70f   : > { %22497 = vmatprep.subr.bf16.mxu0 %v23530_v54  ;;  %v22537_v7 = vpack.c.bf16 %v13812_v3, %v13811_v62  ;;  %v13906_v62 = vld [vmem:[%s28815_s11 + $0x78] sm:$0xff]  ;;  %v13819_v3 = vld [vmem:[%s28814_s10] sm:$0x1] }
 0x710   : > { %22514 = vmatpush3.bf16.msra.mxu1 %v22513_v29  ;;  %v13818_v29 = vld [vmem:[%s28813_s9 + $0x78] sm:$0xff] }
 0x711   : > { %22515 = vmatprep.subr.bf16.mxu1 %v23530_v54  ;;  %v22546_v9 = vpack.c.bf16 %v13818_v29, %v13817_v31 }
 0x712   : > { %22499 = vmatpush3.bf16.msra.mxu0 %v22498_v45  ;;  %v13815_v45 = vld [vmem:[%s28813_s9 + $0x60] sm:$0xff] }
 0x713   : > { %22524 = vmatprep.subr.bf16.mxu0 %v23530_v54 }
 0x714   : > { %22517 = vmatpush3.bf16.msra.mxu1 %v22516_v52  ;;  %v13892_v52 = vld [vmem:[%s28815_s11 + $0x8] sm:$0xff] }
 0x715   : > { %20993 = vmatmul.mubr.f32.vlgmr.msra.gmra.mrb[24].mxu0 %v13623_v10  ;;  %22518 = vmatprep.subr.bf16.mxu1 %v23530_v54  ;;  %v13816_v10 = vld [vmem:[%s28813_s9 + $0x68] sm:$0xff]  ;;  %v22549_v5 = vpack.c.bf16 %v13892_v52, %v13891_v63 }
 0x716   : > { %21062 = vmatprep.mubr.msk.f32.mxu0 %vm23531_vm1, %v28954_v48  ;;  %22526 = vmatpush3.bf16.msra.mxu0 %v22525_v22  ;;  %v13903_v22 = vld [vmem:[%s28815_s11 + $0x60] sm:$0xff] }
 0x717   : > { %22527 = vmatprep.subr.bf16.mxu0 %v23530_v54 }
 0x718   : > { %22520 = vmatpush3.bf16.msra.mxu1 %v22519_v27 }
 0x719   : > { %22521 = vmatprep.subr.bf16.mxu1 %v23530_v54 }
 0x71a   : > { %22529 = vmatpush3.bf16.msra.mxu0 %v22528_v19  ;;  %v22567_v19 = vpack.c.bf16 %v13904_v21, %v13903_v22 }
 0x71b   : > { %22530 = vmatprep.subr.bf16.mxu0 %v23530_v54 }
 0x71c   : > { %22523 = vmatpush3.bf16.msra.mxu1 %v22522_v8  ;;  %v13900_v8 = vld [vmem:[%s28815_s11 + $0x48] sm:$0xff] }
 0x71d   : > { %22548 = vmatprep.subr.bf16.mxu1 %v23530_v54 }
 0x71e   : > { %22532 = vmatpush3.bf16.msra.mxu0 %v22531_v46 }
 0x71f   : > { %22533 = vmatprep.subr.bf16.mxu0 %v23530_v54 }
 0x722   : > { %22535 = vmatpush3.bf16.msra.mxu0 %v22534_v17  ;;  %v13905_v17 = vld [vmem:[%s28815_s11 + $0x70] sm:$0xff] }
 0x723   : > { %22536 = vmatprep.subr.bf16.mxu0 %v23530_v54 }
 0x726   : > { %22538 = vmatpush3.bf16.msra.mxu0 %v22537_v7 }
 0x727   : > { %22539 = vmatprep.subr.bf16.mxu0 %v23530_v54 }
 0x728   : > { %v12639_v59 = vpop.f32.mrb[12].mxu0 }
 0x729   : > { %v12643_v32 = vadd.f32 %v12639_v59, %v12554_v14  ;;  %v20574_v33 = vpop.f32.mrb[13].mxu0  ;;  %v12728_v1 = vpop.f32.mrb[12].mxu1  ;;  %v13813_v14 = vld [vmem:[%s28813_s9 + $0x50] sm:$0xff]  ;;  %v22543_v59 = vpack.c.bf16 %v13816_v10, %v13815_v45  ;;  %v13907_v45 = vld [vmem:[%s28816_s12] sm:$0x1] }
 0x72a   : > { %v20609_v44 = vpop.f32.mrb[13].mxu1  ;;  %v22540_v34 = vpack.c.bf16 %v13814_v42, %v13813_v14 }
 0x72b   : > { %v12732_v23 = vadd.f32 %v12728_v1, %v12643_v32 }
 0x72c   : > { %22541 = vmatpush3.bf16.msra.mxu0 %v22540_v34 }
 0x72d   : > { %22542 = vmatprep.subr.bf16.mxu0 %v23530_v54 }
 0x730   : > { %22544 = vmatpush3.bf16.msra.mxu0 %v22543_v59 }
 0x731   : > { %22545 = vmatprep.subr.bf16.mxu0 %v23530_v54 }
 0x734   : > { %22547 = vmatpush3.bf16.msra.mxu0 %v22546_v9 }
 0x748   : > { %v12817_v35 = vpop.f32.mrb[14].mxu0 }
 0x749   : > { %v12821_v55 = vadd.f32 %v12817_v35, %v12732_v23  ;;  %v20644_v51 = vpop.f32.mrb[15].mxu0  ;;  %v12906_v18 = vpop.f32.mrb[14].mxu1 }
 0x74a   : > { %v20679_v61 = vpop.f32.mrb[15].mxu1 }
 0x74b   : > { %v12910_v25 = vadd.f32 %v12906_v18, %v12821_v55 }
 0x768   : > { %v12995_v41 = vpop.f32.mrb[16].mxu0 }
 0x769   : > { %v12999_v37 = vadd.f32 %v12995_v41, %v12910_v25  ;;  %v20714_v13 = vpop.f32.mrb[17].mxu0  ;;  %v13084_v15 = vpop.f32.mrb[16].mxu1  ;;  %v13895_v41 = vld [vmem:[%s28815_s11 + $0x20] sm:$0xff] }
 0x76a   : > { %v20749_v38 = vpop.f32.mrb[17].mxu1 }
 0x76b   : > { %v13088_v47 = vadd.f32 %v13084_v15, %v12999_v37  ;;  %v13896_v37 = vld [vmem:[%s28815_s11 + $0x28] sm:$0xff]  ;;  %v13897_v15 = vld [vmem:[%s28815_s11 + $0x30] sm:$0xff]  ;;  %v13899_v38 = vld [vmem:[%s28815_s11 + $0x40] sm:$0xff] }
 0x76c   : > { %v22555_v13 = vpack.c.bf16 %v13896_v37, %v13895_v41  ;;  %v22558_v26 = vpack.c.bf16 %v13898_v12, %v13897_v15 }
 0x788   : > { %v13173_v32 = vpop.f32.mrb[18].mxu0 }
 0x789   : > { %v13177_v33 = vadd.f32 %v13173_v32, %v13088_v47  ;;  %v20784_v1 = vpop.f32.mrb[19].mxu0  ;;  %v13262_v44 = vpop.f32.mrb[18].mxu1  ;;  %v22561_v47 = vpack.c.bf16 %v13900_v8, %v13899_v38 }
 0x78a   : > { %v20819_v23 = vpop.f32.mrb[19].mxu1 }
 0x78b   : > { %v13266_v35 = vadd.f32 %v13262_v44, %v13177_v33 }
 0x7a8   : > { %v13351_v55 = vpop.f32.mrb[20].mxu0 }
 0x7a9   : > { %v13355_v51 = vadd.f32 %v13351_v55, %v13266_v35  ;;  %v20854_v18 = vpop.f32.mrb[21].mxu0  ;;  %v13440_v61 = vpop.f32.mrb[20].mxu1 }
 0x7aa   : > { %v20889_v25 = vpop.f32.mrb[21].mxu1 }
 0x7ab   : > { %v13444_v36 = vadd.f32 %v13440_v61, %v13355_v51 }
 0x7c8   : > { %v13529_v40 = vpop.f32.mrb[22].mxu0 }
 0x7c9   : > { %v13533_v43 = vadd.f32 %v13529_v40, %v13444_v36  ;;  %v20924_v24 = vpop.f32.mrb[23].mxu0  ;;  %v13618_v0 = vpop.f32.mrb[22].mxu1 }
 0x7ca   : > { %v20959_v50 = vpop.f32.mrb[23].mxu1 }
 0x7cb   : > { %v13622_v28 = vadd.f32 %v13618_v0, %v13533_v43 }
 0x7e8   : > { %v13707_v4 = vpop.f32.mrb[24].mxu0 }
 0x7e9   : > { %v13711_v53 = vadd.f32 %v13707_v4, %v13622_v28  ;;  %v20994_v49 = vpop.f32.mrb[25].mxu0 }
 0x7eb   : > { %v13713_v39 = vadd.f32 %v13712_v11, %v13711_v53 }
 0x7ed   : > { %v13714_v57 = vmax.f32 %v13713_v39, 0.0 }
 0x7ef   : > { %21028 = vmatmul.mubr.f32.vlgmr.msra.gmra.mrb[24].mxu1 %v13714_v57 }
 0x7f0   : > { %21097 = vmatprep.mubr.msk.f32.mxu1 %vm23531_vm1, %v28954_v48  ;;  %v13893_v48 = vld [vmem:[%s28815_s11 + $0x10] sm:$0xff]  ;;  %22550 = vmatpush3.bf16.msra.mxu1 %v22549_v5 }
 0x7f1   : > { %v22552_v27 = vpack.c.bf16 %v13894_v2, %v13893_v48  ;;  %22551 = vmatprep.subr.bf16.mxu1 %v23530_v54 }
 0x7f4   : > { %22553 = vmatpush3.bf16.msra.mxu1 %v22552_v27 }
 0x7f5   : > { %22554 = vmatprep.subr.bf16.mxu1 %v23530_v54 }
 0x7f8   : > { %22556 = vmatpush3.bf16.msra.mxu1 %v22555_v13 }
 0x7f9   : > { %22557 = vmatprep.subr.bf16.mxu1 %v23530_v54 }
 0x7fc   : > { %22559 = vmatpush3.bf16.msra.mxu1 %v22558_v26 }
 0x7fd   : > { %22560 = vmatprep.subr.bf16.mxu1 %v23530_v54 }
 0x800   : > { %22562 = vmatpush3.bf16.msra.mxu1 %v22561_v47 }
 0x801   : > { %22563 = vmatprep.subr.bf16.mxu1 %v23530_v54 }
 0x804   : > { %22565 = vmatpush3.bf16.msra.mxu1 %v22564_v20 }
 0x805   : > { %22566 = vmatprep.subr.bf16.mxu1 %v23530_v54 }
 0x808   : > { %22568 = vmatpush3.bf16.msra.mxu1 %v22567_v19 }
 0x809   : > { %22569 = vmatprep.subr.bf16.mxu1 %v23530_v54  ;;  %v22570_v54 = vpack.c.bf16 %v13906_v62, %v13905_v17 }
 0x80c   : > { %22571 = vmatpush3.bf16.msra.mxu1 %v22570_v54 }
 0x8c2   : > { %v13798_v58 = vpop.f32.mrb[24].mxu1 }
 0x8c3   : > { %v13799_v46 = vadd.f32 %v13798_v58, %v13731_v60  ;;  %v21029_v56 = vpop.f32.mrb[25].mxu1 }
 0x8c5   : > { %v13802_v6 = vmax.f32 %v13799_v46, 0.0 }
 0x8c7   : > { %21063 = vmatmul.mubr.f32.vlgmr.msra.gmra.mrb[26].mxu0 %v13802_v6 }
 0x99a   : > { %v13886_v7 = vpop.f32.mrb[26].mxu0 }
 0x99b   : > { %v13887_v14 = vadd.f32 %v13886_v7, %v13819_v3  ;;  %v21064_v42 = vpop.f32.mrb[27].mxu0 }
 0x99d   : > { %v13890_v34 = vmax.f32 %v13887_v14, 0.0 }
 0x99f   : > { %21098 = vmatmul.mubr.f32.vlgmr.msra.gmra.mrb[26].mxu1 %v13890_v34 }
 0xa72   : > { %v13974_v10 = vpop.f32.mrb[26].mxu1 }
 0xa73   : > { %v13975_v59 = vadd.f32 %v13974_v10, %v13907_v45  ;;  %v21099_v32 = vpop.f32.mrb[27].mxu1 }
 0xa75   : > { %13978 = vst [vmem:[%s23754_s2] sm:$0x1] %v13975_v59 }
 0xa76   : > { %23446 = shalt.err (!%p23443_p9)
}
 0xa77   : > { %s23447_s2 = scalar_lea.hbm %s28759_s1, 16  ;;  %s23451_s22 = scalar_lea.hbm %s28817_s13, 32 }
 0xa78   : > { %p23448_p10 = scmp.ne.s32.totalorder %s28759_s1, %s23447_s2  ;;  %p23452_p13 = scmp.lt.u32.totalorder %s28759_s1, %s28817_s13 }
 0xa79   : > { %p23453_p0 = scmp.lt.u32.totalorder %s23451_s22, %s23447_s2  ;;  %p23455_p2 = scmp.lt.u32.totalorder %s23447_s2, %s28759_s1 }
 0xa7a   : > { %p23449_p11 = pnand %p23448_p10, %p23641_p5 }
 0xa7b   : > { %p23454_p1 = por %p23453_p0, %p23452_p13 }
 0xa7c   : > { %p23450_p12 = pneg %p23449_p11 }
 0xa7d   : > { %p23456_p3 = por %p23455_p2, %p23454_p1 }
 0xa7f   : > { %p23457_p4 = pnand %p23456_p3, %p23450_p12 }
 0xa81   : > { %23460 = shalt.err (!%p23457_p4)
}
 0xa82   : > { %23358 = dma.vmem_to_hbm [thread:$0]  (%p23641_p5), %s28761_s16, 16, %s28759_s1, %s13980_s20  }
 0xa83 PF: > { %p23364_p7 = scmp.ge.s32.totalorder %s23511_s28, 2  ;;  %s14004_s21 = sand.u32 1, %s23499_s25  }
 0xa84   : > { %s14005_s29 = scalar_lea.sflag [#allocation5], %s14004_s21 }
 0xa85   : > { %p23361_p8 = pnand %p23364_p7, %p23645_p6 }
 0xa87   : > { %23494 = dma.done.wait (!%p23361_p8), %s14005_s29, 16  }
 0xa88   : > { %23496 = vsyncadd (!%p23361_p8), %s14005_s29, 4294967280  ;;  %s28956_s23 = sld [smem:[#allocation7_spill]]  ;;  %p23_p9 = scmp.ge.s32.totalorder %s23628_s14, 4  }
 0xa89   : > { %s28957_s25 = smov %s23503_s26  ;;  %s28958_s26 = smov %s23507_s27 }
 0xa8a   : > { %s28960_s28 = smov %s23628_s14  ;;  %25 = sbr.rel (!%p23_p9) target bundleno = 7 (0x7), region = 313 }
 0xa8e   : > { %s28959_s27 = smov %s28956_s23 }
 0xa91   :  { %14009 = vsyncpa [#allocation5], 1 }
 0xa92   :  { %14011 = vsyncpa [#allocation5 + $0x1], 1 }

</bundles_post_ra>
